<compile_context>
chip_gen: v6e
topology: v6e:2x2x1
jax: 0.10.0
libtpu: 0.0.40
codegen_flags: <defaults>
</compile_context>

<pallas_src>
import numpy as np

import jax
import jax.numpy as jnp
from jax import lax
from jax.experimental import pallas as pl
from jax.experimental.pallas import tpu as pltpu

SOS_token = 1


# ----------------------------------------------------------------------------
# Pallas kernel: full seq2seq forward (teacher forcing) for one batch block
# ----------------------------------------------------------------------------
def _g2p_kernel(
    # blocked activations (time-major, batch block TB)
    enc_emb_ref,   # (S, TB, H)  f32   embedded input_seq
    dec_emb_ref,   # (T, TB, H)  f32   embedded [SOS, target[:, :-1]]
    # encoder LSTM, gates fused [i | f | g | o]
    lstm_wih_ref,  # (H, 4H)     bf16
    lstm_whh_ref,  # (H, 4H)     bf16
    lstm_b_ref,    # (1, 4H)     f32   (b_ih + b_hh)
    # Bahdanau attention
    wa_ref,        # (H, H)      bf16
    ba_ref,        # (1, H)      f32
    ua_ref,        # (H, H)      bf16
    bua_ref,       # (1, H)      f32
    va_ref,        # (1, H)      f32
    # decoder GRU (fused gate order [r | z | n])
    gru_wemb_ref,  # (H, 3H)     bf16  embedding part of W_ih
    gru_wctx_ref,  # (H, 3H)     bf16  context part of W_ih
    gru_whid_ref,  # (H, 3H)     bf16  W_hh
    gru_bpre_ref,  # (1, 3H)     f32   [bi_r+bh_r | bi_z+bh_z | bi_n]
    gru_bnh_ref,   # (1, H)      f32   bh_n
    # output projection (columns zero-padded to a multiple of 128)
    wo_ref,        # (H, Op)     bf16
    bo_ref,        # (1, Op)     f32
    # output
    out_ref,       # (T, TB, Op) f32   logits (time-major, lane-dense)
    # VMEM scratch
    xpre_ref,      # (S, TB, 4H) f32   hoisted encoder input projection
    enc_ref,       # (S, TB, H)  f32   encoder outputs
    keys_ref,      # (S, TB, H)  f32   attention keys  Ua @ enc_out + b
    dpre_ref,      # (T, TB, 3H) f32   hoisted decoder embedding projection
    hs_ref,        # (T, TB, H)  bf16/f32  decoder hidden states
):
    f32, bf16 = jnp.float32, jnp.bfloat16
    S, TB, H = enc_emb_ref.shape
    T = dec_emb_ref.shape[0]
    Op = out_ref.shape[-1]

    # fully unroll short static recurrences (LLO gets whole-loop visibility)
    unroll_s = True if S <= 16 else 4
    unroll_t = True if T <= 16 else 4

    def mm(a, b):  # bf16 MXU matmul, f32 accumulation
        return jnp.dot(a.astype(bf16), b.astype(bf16),
                       preferred_element_type=f32)

    # small hoisted bias broadcasts (loop bodies would re-broadcast per step)
    ba_b = jnp.broadcast_to(ba_ref[...], (TB, H))
    bnh_b = jnp.broadcast_to(gru_bnh_ref[...], (TB, H))
    va_b = va_ref[...].reshape(1, 1, H)

    # --- hoisted encoder input projection: x_t @ W_ih for all t at once -----
    xpre_ref[...] = (mm(enc_emb_ref[...].reshape(S * TB, H), lstm_wih_ref[...])
                     + lstm_b_ref[...]).reshape(S, TB, 4 * H)

    # --- encoder: single-layer LSTM over S steps (time-major) ---------------
    def enc_step(t, carry):
        h, c = carry
        gates = xpre_ref[t] + mm(h, lstm_whh_ref[...])           # (TB, 4H)
        i_g = jax.nn.sigmoid(gates[:, 0 * H:1 * H])
        f_g = jax.nn.sigmoid(gates[:, 1 * H:2 * H])
        g_g = jnp.tanh(gates[:, 2 * H:3 * H])
        o_g = jax.nn.sigmoid(gates[:, 3 * H:4 * H])
        c = f_g * c + i_g * g_g
        h = o_g * jnp.tanh(c)
        enc_ref[t] = h
        return h, c

    h, _ = lax.fori_loop(0, S, enc_step,
                         (jnp.zeros((TB, H), f32), jnp.zeros((TB, H), f32)),
                         unroll=unroll_s)

    # --- attention keys (Ua @ enc_out + b), hoisted, kept in scratch --------
    keys_ref[...] = (mm(enc_ref[...].reshape(S * TB, H), ua_ref[...])
                     + bua_ref[...]).reshape(S, TB, H)

    # --- hoisted decoder embedding projection (emb part of GRU W_ih) --------
    dpre_ref[...] = (mm(dec_emb_ref[...].reshape(T * TB, H), gru_wemb_ref[...])
                     + gru_bpre_ref[...]).reshape(T, TB, 3 * H)

    # --- decoder: Bahdanau attention + GRU over T steps ---------------------
    def dec_step(t, h):
        keys3 = keys_ref[...]                                    # (S, TB, H)
        enc3 = enc_ref[...]                                      # (S, TB, H)

        # additive attention: score = Va . tanh(Wa h + Ua enc_out)
        q = mm(h, wa_ref[...]) + ba_b                            # (TB, H)
        e = jnp.tanh(q[None, :, :] + keys3)                      # (S, TB, H)
        # VPU multiply + lane reduce (no N=1 MXU matvec); Va bias omitted:
        # adding a constant to all scores is a softmax no-op.
        s = jnp.sum(e * va_b, axis=-1, keepdims=True)            # (S, TB, 1)
        w = jnp.exp(s - jnp.max(s, axis=0, keepdims=True))       # (S, TB, 1)
        # softmax normalization deferred to the dense (TB, H) context
        ctx = jnp.sum(w * enc3, axis=0) / jnp.sum(w, axis=0)     # (TB, H)

        # fused GRU step: two MXU pushes instead of a per-step concat relayout
        g_c = mm(ctx, gru_wctx_ref[...])                         # (TB, 3H)
        g_h = mm(h, gru_whid_ref[...])                           # (TB, 3H)
        pre = dpre_ref[t]                                        # (TB, 3H)
        r = jax.nn.sigmoid(pre[:, 0 * H:1 * H] + g_c[:, 0 * H:1 * H]
                           + g_h[:, 0 * H:1 * H])
        z = jax.nn.sigmoid(pre[:, 1 * H:2 * H] + g_c[:, 1 * H:2 * H]
                           + g_h[:, 1 * H:2 * H])
        n = jnp.tanh(pre[:, 2 * H:3 * H] + g_c[:, 2 * H:3 * H]
                     + r * (g_h[:, 2 * H:3 * H] + bnh_b))
        h = (1.0 - z) * n + z * h
        hs_ref[t] = h.astype(hs_ref.dtype)
        return h

    lax.fori_loop(0, T, dec_step, h, unroll=unroll_t)

    # --- deferred, lane-dense output projection: ONE matmul + ONE store -----
    logits = mm(hs_ref[...].reshape(T * TB, H), wo_ref[...]) + bo_ref[...]
    out_ref[...] = logits.reshape(T, TB, Op)


# ----------------------------------------------------------------------------
# Parameter fusion (natural per-gate layout -> kernel layout)
# ----------------------------------------------------------------------------
def _round_up(x, m):
    return ((x + m - 1) // m) * m


def _fuse_params(p, o_pad):
    f32, bf16 = jnp.float32, jnp.bfloat16
    H = p["wa"].shape[0]

    lstm_wih = jnp.concatenate([p["lstm_wih"][g] for g in range(4)], axis=1)
    lstm_whh = jnp.concatenate([p["lstm_whh"][g] for g in range(4)], axis=1)
    lstm_b = jnp.concatenate([p["lstm_b"][g] for g in range(4)], axis=1)

    gwi, gwh = p["gru_wih"], p["gru_whh"]
    gbi, gbh = p["gru_bih"], p["gru_bhh"]
    w_emb = jnp.concatenate([gwi[g][:H] for g in range(3)], axis=1)      # (H,3H)
    w_ctx = jnp.concatenate([gwi[g][H:] for g in range(3)], axis=1)      # (H,3H)
    w_hid = jnp.concatenate([gwh[g] for g in range(3)], axis=1)          # (H,3H)
    b_pre = jnp.concatenate([gbi[0] + gbh[0], gbi[1] + gbh[1], gbi[2]], axis=1)

    wo, bo = p["wo"], p["bo"]
    O = wo.shape[1]
    if o_pad > O:   # lane-dense output projection / store
        wo = jnp.pad(wo, ((0, 0), (0, o_pad - O)))
        bo = jnp.pad(bo, ((0, 0), (0, o_pad - O)))

    return dict(
        lstm_wih=lstm_wih.astype(bf16), lstm_whh=lstm_whh.astype(bf16),
        lstm_b=lstm_b.astype(f32),
        wa=p["wa"].astype(bf16), ba=p["ba"].astype(f32),
        ua=p["ua"].astype(bf16), bua=p["bua"].astype(f32),
        va=p["va"].astype(f32),
        gru_wemb=w_emb.astype(bf16), gru_wctx=w_ctx.astype(bf16),
        gru_whid=w_hid.astype(bf16),
        gru_bpre=b_pre.astype(f32), gru_bnh=gbh[2].astype(f32),
        wo=wo.astype(bf16), bo=bo.astype(f32),
    )


# ----------------------------------------------------------------------------
# Wrapper: embedding glue, batch padding/blocking, pallas_call
# ----------------------------------------------------------------------------
def g2p_forward(input_seq, target, params, *, block_b=128):
    """Teacher-forcing forward. input_seq (B,S) int32, target (B,T) int32 -> (B,T,O)."""
    B, S = input_seq.shape
    T = int(target.shape[1])
    H = params["emb_enc"].shape[1]
    O = params["wo"].shape[1]
    Op = _round_up(O, 128)                      # lane-dense output columns

    # embedding gathers straight into time-major layout (no HBM transpose)
    enc_emb = jnp.take(params["emb_enc"], input_seq.T, axis=0)            # (S,B,H)
    dec_in = jnp.concatenate(
        [jnp.full((B, 1), SOS_token, dtype=jnp.int32), target[:, :-1]], axis=1)
    dec_emb = jnp.take(params["emb_dec"], dec_in.T, axis=0)               # (T,B,H)

    # batch block: as large as the (padded) batch allows, multiple of 8.
    # NOTE: on v7x, keep >= 2 batch blocks for large B so both TensorCores get
    # work ("parallel" grid axis is megacore-sharded).
    TB = max(8, min(_round_up(block_b, 8), _round_up(B, 8)))
    Bp = _round_up(B, TB)
    if Bp != B:
        pad = ((0, 0), (0, Bp - B), (0, 0))
        enc_emb = jnp.pad(enc_emb, pad)
        dec_emb = jnp.pad(dec_emb, pad)

    f = _fuse_params(params, Op)
    weights = (f["lstm_wih"], f["lstm_whh"], f["lstm_b"],
               f["wa"], f["ba"], f["ua"], f["bua"], f["va"],
               f["gru_wemb"], f["gru_wctx"], f["gru_whid"],
               f["gru_bpre"], f["gru_bnh"],
               f["wo"], f["bo"])

    def w_spec(w):
        n = w.ndim
        return pl.BlockSpec(w.shape, lambda i: (0,) * n)

    grid = (Bp // TB,)
    in_specs = ([pl.BlockSpec((S, TB, H), lambda i: (0, i, 0)),
                 pl.BlockSpec((T, TB, H), lambda i: (0, i, 0))]
                + [w_spec(w) for w in weights])
    out_specs = pl.BlockSpec((T, TB, Op), lambda i: (0, i, 0))

    # bf16 hidden-state scratch only when TB matches the bf16 sublane tile
    # (keeps the final (T,TB,H)->(T*TB,H) reshape a free, aligned merge).
    hs_dtype = jnp.bfloat16 if TB % 16 == 0 else jnp.float32
    hs_item = 2 if hs_dtype == jnp.bfloat16 else 4
    scratch_shapes = [
        pltpu.VMEM((S, TB, 4 * H), jnp.float32),   # hoisted LSTM input proj
        pltpu.VMEM((S, TB, H), jnp.float32),       # encoder outputs
        pltpu.VMEM((S, TB, H), jnp.float32),       # attention keys
        pltpu.VMEM((T, TB, 3 * H), jnp.float32),   # hoisted GRU emb proj
        pltpu.VMEM((T, TB, H), hs_dtype),          # decoder hidden states
    ]

    # exact VMEM budget: double-buffered activation blocks + double-buffered
    # weights + scratch + headroom, capped well under v7x's 64 MiB physical VMEM
    blk_bytes = 2 * 4 * (S * TB * H + T * TB * H + T * TB * Op)
    w_bytes = 2 * sum(int(np.prod(w.shape)) * w.dtype.itemsize for w in weights)
    scr_bytes = (4 * (S * TB * 4 * H) + 4 * 2 * (S * TB * H)
                 + 4 * (T * TB * 3 * H) + hs_item * (T * TB * H))
    vmem_limit = int(min(max(blk_bytes + w_bytes + scr_bytes + (4 << 20),
                             16 << 20), 48 << 20))

    out_tm = pl.pallas_call(
        _g2p_kernel,
        out_shape=jax.ShapeDtypeStruct((T, Bp, Op), jnp.float32),
        grid_spec=pltpu.PrefetchScalarGridSpec(
            num_scalar_prefetch=0,
            grid=grid,
            in_specs=in_specs,
            out_specs=out_specs,
            scratch_shapes=scratch_shapes),
        compiler_params=pltpu.CompilerParams(
            dimension_semantics=("parallel",),
            vmem_limit_bytes=vmem_limit),
    )(enc_emb, dec_emb, *weights)

    return jnp.transpose(out_tm, (1, 0, 2))[:B, :, :O]                    # (B,T,O)


# ----------------------------------------------------------------------------
# Pure-JAX reference (same math: bf16 matmul operands, f32 state)
# ----------------------------------------------------------------------------
def g2p_reference(input_seq, target, params):
    f32, bf16 = jnp.float32, jnp.bfloat16
    B, S = input_seq.shape
    T = target.shape[1]
    H = params["emb_enc"].shape[1]

    def mm(a, b):
        return jnp.dot(a.astype(bf16), b.astype(bf16), preferred_element_type=f32)

    enc_emb = jnp.take(params["emb_enc"], input_seq, axis=0)
    dec_in = jnp.concatenate(
        [jnp.full((B, 1), SOS_token, dtype=jnp.int32), target[:, :-1]], axis=1)
    dec_emb = jnp.take(params["emb_dec"], dec_in, axis=0)

    wih, whh, bb = params["lstm_wih"], params["lstm_whh"], params["lstm_b"]
    h = jnp.zeros((B, H), f32)
    c = jnp.zeros((B, H), f32)
    enc_outs = []
    for t in range(S):
        x_t = enc_emb[:, t, :]
        i_g = jax.nn.sigmoid(mm(x_t, wih[0]) + mm(h, whh[0]) + bb[0])
        f_g = jax.nn.sigmoid(mm(x_t, wih[1]) + mm(h, whh[1]) + bb[1])
        g_g = jnp.tanh(mm(x_t, wih[2]) + mm(h, whh[2]) + bb[2])
        o_g = jax.nn.sigmoid(mm(x_t, wih[3]) + mm(h, whh[3]) + bb[3])
        c = f_g * c + i_g * g_g
        h = o_g * jnp.tanh(c)
        enc_outs.append(h)
    enc_out = jnp.stack(enc_outs, axis=1)                                  # (B,S,H)

    keys = mm(enc_out.reshape(B * S, H), params["ua"]).reshape(B, S, H) + params["bua"]
    gwi, gwh = params["gru_wih"], params["gru_whh"]
    gbi, gbh = params["gru_bih"], params["gru_bhh"]
    outs = []
    for t in range(T):
        emb_t = dec_emb[:, t, :]
        q = mm(h, params["wa"]) + params["ba"]
        e = jnp.tanh(q[:, None, :] + keys)                                 # (B,S,H)
        scores = jnp.sum(e * params["va"][None, :, :], axis=-1) + params["bva"][0, 0]
        attn = jax.nn.softmax(scores, axis=-1)
        context = jnp.sum(attn[:, :, None] * enc_out, axis=1)
        x = jnp.concatenate([emb_t, context], axis=-1)
        r = jax.nn.sigmoid(mm(x, gwi[0]) + gbi[0] + mm(h, gwh[0]) + gbh[0])
        z = jax.nn.sigmoid(mm(x, gwi[1]) + gbi[1] + mm(h, gwh[1]) + gbh[1])
        n = jnp.tanh(mm(x, gwi[2]) + gbi[2] + r * (mm(h, gwh[2]) + gbh[2]))
        h = (1.0 - z) * n + z * h
        outs.append(mm(h, params["wo"]) + params["bo"])
    return jnp.stack(outs, axis=1)


# ----------------------------------------------------------------------------
def init_params(key, input_size, output_size, H):
    ks = jax.random.split(key, 17)
    s = 1.0 / np.sqrt(H)
    u = lambda k, shape: jax.random.uniform(k, shape, jnp.float32, -s, s)
    return {
        "emb_enc":  jax.random.normal(ks[0], (input_size, H), jnp.float32) * 0.1,
        "emb_dec":  jax.random.normal(ks[1], (output_size, H), jnp.float32) * 0.1,
        # encoder LSTM (gate order i, f, g, o), weights stored input-major
        "lstm_wih": u(ks[2], (4, H, H)),
        "lstm_whh": u(ks[3], (4, H, H)),
        "lstm_b":   u(ks[4], (4, 1, H)),
        # Bahdanau attention
        "wa":  u(ks[5], (H, H)),  "ba":  u(ks[6], (1, H)),
        "ua":  u(ks[7], (H, H)),  "bua": u(ks[8], (1, H)),
        "va":  u(ks[9], (1, H)),  "bva": u(ks[10], (1, 1)),
        # decoder GRU (gate order r, z, n), input = [emb ; context] -> 2H
        "gru_wih": u(ks[11], (3, 2 * H, H)),
        "gru_whh": u(ks[12], (3, H, H)),
        "gru_bih": u(ks[13], (3, 1, H)),
        "gru_bhh": u(ks[14], (3, 1, H)),
        # output projection
        "wo": u(ks[15], (H, output_size)),
        "bo": u(ks[16], (1, output_size)),
    }


if __name__ == "__main__":
    # TODO(synk): greedy (no-target) decode path with argmax feedback into an
    # in-kernel embedding gather is not implemented; only teacher forcing.
    B, S, T = 12, 8, 6
    input_size, output_size, H = 16, 16, 32

    key = jax.random.PRNGKey(0)
    k_par, k_in, k_tgt = jax.random.split(key, 3)
    params = init_params(k_par, input_size, output_size, H)
    input_seq = jax.random.randint(k_in, (B, S), 0, input_size, dtype=jnp.int32)
    target = jax.random.randint(k_tgt, (B, T), 0, output_size, dtype=jnp.int32)

    out = jax.block_until_ready(g2p_forward(input_seq, target, params))
    ref = jax.block_until_ready(g2p_reference(input_seq, target, params))

    assert out.shape == (B, T, output_size)
    # kernel and reference both use bf16 matmul operands with f32 accumulation;
    # remaining mismatch is accumulation-order noise well below the tolerance.
    np.testing.assert_allclose(np.asarray(out), np.asarray(ref),
                               atol=2e-3, rtol=2e-3)

    # multi-block path (grid > 1): exercises the batch-block index maps.
    out2 = jax.block_until_ready(g2p_forward(input_seq, target, params, block_b=8))
    np.testing.assert_allclose(np.asarray(out2), np.asarray(out),
                               atol=1e-5, rtol=1e-5)

    print("KERNEL_OK")
</pallas_src>

<mosaic_0001>
module attributes {stable_mosaic.version = 11 : i64} {
  func.func @_g2p_kernel(%arg0: i32, %arg1: memref<8x16x32xf32, #tpu.memory_space<vmem>>, %arg2: memref<6x16x32xf32, #tpu.memory_space<vmem>>, %arg3: memref<32x128xbf16, #tpu.memory_space<vmem>>, %arg4: memref<32x128xbf16, #tpu.memory_space<vmem>>, %arg5: memref<1x128xf32, #tpu.memory_space<vmem>>, %arg6: memref<32x32xbf16, #tpu.memory_space<vmem>>, %arg7: memref<1x32xf32, #tpu.memory_space<vmem>>, %arg8: memref<32x32xbf16, #tpu.memory_space<vmem>>, %arg9: memref<1x32xf32, #tpu.memory_space<vmem>>, %arg10: memref<1x32xf32, #tpu.memory_space<vmem>>, %arg11: memref<32x96xbf16, #tpu.memory_space<vmem>>, %arg12: memref<32x96xbf16, #tpu.memory_space<vmem>>, %arg13: memref<32x96xbf16, #tpu.memory_space<vmem>>, %arg14: memref<1x96xf32, #tpu.memory_space<vmem>>, %arg15: memref<1x32xf32, #tpu.memory_space<vmem>>, %arg16: memref<32x128xbf16, #tpu.memory_space<vmem>>, %arg17: memref<1x128xf32, #tpu.memory_space<vmem>>, %arg18: memref<6x16x128xf32, #tpu.memory_space<vmem>>, %arg19: memref<8x16x128xf32, #tpu.memory_space<vmem>>, %arg20: memref<8x16x32xf32, #tpu.memory_space<vmem>>, %arg21: memref<8x16x32xf32, #tpu.memory_space<vmem>>, %arg22: memref<6x16x96xf32, #tpu.memory_space<vmem>>, %arg23: memref<6x16x32xbf16, #tpu.memory_space<vmem>>) attributes {dimension_semantics = [#tpu.dimension_semantics<parallel>], iteration_bounds = array<i64: 1>, scalar_prefetch = 0 : i64, scratch_operands = 5 : i64, tpu.core_type = #tpu.core_type<tc>, window_params = [{transform_indices = @transform_0, window_bounds = array<i64: 8, 16, 32>}, {transform_indices = @transform_1, window_bounds = array<i64: 6, 16, 32>}, {pipeline_mode = #tpu.pipeline_mode<synchronous>, transform_indices = @transform_2, window_bounds = array<i64: 32, 128>}, {pipeline_mode = #tpu.pipeline_mode<synchronous>, transform_indices = @transform_3, window_bounds = array<i64: 32, 128>}, {pipeline_mode = #tpu.pipeline_mode<synchronous>, transform_indices = @transform_4, window_bounds = array<i64: 1, 128>}, {pipeline_mode = #tpu.pipeline_mode<synchronous>, transform_indices = @transform_5, window_bounds = array<i64: 32, 32>}, {pipeline_mode = #tpu.pipeline_mode<synchronous>, transform_indices = @transform_6, window_bounds = array<i64: 1, 32>}, {pipeline_mode = #tpu.pipeline_mode<synchronous>, transform_indices = @transform_7, window_bounds = array<i64: 32, 32>}, {pipeline_mode = #tpu.pipeline_mode<synchronous>, transform_indices = @transform_8, window_bounds = array<i64: 1, 32>}, {pipeline_mode = #tpu.pipeline_mode<synchronous>, transform_indices = @transform_9, window_bounds = array<i64: 1, 32>}, {pipeline_mode = #tpu.pipeline_mode<synchronous>, transform_indices = @transform_10, window_bounds = array<i64: 32, 96>}, {pipeline_mode = #tpu.pipeline_mode<synchronous>, transform_indices = @transform_11, window_bounds = array<i64: 32, 96>}, {pipeline_mode = #tpu.pipeline_mode<synchronous>, transform_indices = @transform_12, window_bounds = array<i64: 32, 96>}, {pipeline_mode = #tpu.pipeline_mode<synchronous>, transform_indices = @transform_13, window_bounds = array<i64: 1, 96>}, {pipeline_mode = #tpu.pipeline_mode<synchronous>, transform_indices = @transform_14, window_bounds = array<i64: 1, 32>}, {pipeline_mode = #tpu.pipeline_mode<synchronous>, transform_indices = @transform_15, window_bounds = array<i64: 32, 128>}, {pipeline_mode = #tpu.pipeline_mode<synchronous>, transform_indices = @transform_16, window_bounds = array<i64: 1, 128>}, {transform_indices = @transform_17, window_bounds = array<i64: 6, 16, 128>}]} {
    %c0 = arith.constant 0 : index
    %c0_0 = arith.constant 0 : index
    %0 = vector.load %arg7[%c0, %c0_0] : memref<1x32xf32, #tpu.memory_space<vmem>>, vector<1x32xf32>
    %1 = vector.shape_cast %0 : vector<1x32xf32> to vector<1x32xf32>
    %2 = vector.broadcast %1 : vector<1x32xf32> to vector<16x32xf32>
    %c0_1 = arith.constant 0 : index
    %c0_2 = arith.constant 0 : index
    %3 = vector.load %arg15[%c0_1, %c0_2] : memref<1x32xf32, #tpu.memory_space<vmem>>, vector<1x32xf32>
    %4 = vector.shape_cast %3 : vector<1x32xf32> to vector<1x32xf32>
    %5 = vector.broadcast %4 : vector<1x32xf32> to vector<16x32xf32>
    %c0_3 = arith.constant 0 : index
    %c0_4 = arith.constant 0 : index
    %6 = vector.load %arg10[%c0_3, %c0_4] : memref<1x32xf32, #tpu.memory_space<vmem>>, vector<1x32xf32>
    %7 = vector.shape_cast %6 : vector<1x32xf32> to vector<1x1x32xf32>
    %c0_5 = arith.constant 0 : index
    %c0_6 = arith.constant 0 : index
    %c0_7 = arith.constant 0 : index
    %8 = vector.load %arg1[%c0_5, %c0_6, %c0_7] : memref<8x16x32xf32, #tpu.memory_space<vmem>>, vector<8x16x32xf32>
    %9 = vector.shape_cast %8 : vector<8x16x32xf32> to vector<128x32xf32>
    %c0_8 = arith.constant 0 : index
    %c0_9 = arith.constant 0 : index
    %10 = vector.load %arg3[%c0_8, %c0_9] : memref<32x128xbf16, #tpu.memory_space<vmem>>, vector<32x128xbf16>
    %11 = arith.truncf %9 : vector<128x32xf32> to vector<128x32xbf16>
    %cst = arith.constant dense<0.000000e+00> : vector<128x128xf32>
    %12 = tpu.matmul %11, %10, %cst {dimension_numbers = #tpu.dot_dimension_numbers<[1], [0], [0], [1], [0, 0, 1, 1], [], []>} : vector<128x32xbf16>, vector<32x128xbf16>, vector<128x128xf32> -> vector<128x128xf32>
    %c0_10 = arith.constant 0 : index
    %c0_11 = arith.constant 0 : index
    %13 = vector.load %arg5[%c0_10, %c0_11] : memref<1x128xf32, #tpu.memory_space<vmem>>, vector<1x128xf32>
    %14 = vector.broadcast %13 : vector<1x128xf32> to vector<128x128xf32>
    %15 = arith.addf %12, %14 : vector<128x128xf32>
    %16 = vector.shape_cast %15 : vector<128x128xf32> to vector<8x16x128xf32>
    %c0_12 = arith.constant 0 : index
    %c0_13 = arith.constant 0 : index
    %c0_14 = arith.constant 0 : index
    %17 = vector.load %arg19[%c0_12, %c0_13, %c0_14] : memref<8x16x128xf32, #tpu.memory_space<vmem>>, vector<8x16x128xf32>
    tpu.vector_store %arg19[%c0_12, %c0_13, %c0_14], %16 {strides = array<i32>} : memref<8x16x128xf32, #tpu.memory_space<vmem>>, vector<8x16x128xf32>,
    %cst_15 = arith.constant 0.000000e+00 : f32
    %18 = vector.broadcast %cst_15 : f32 to vector<16x32xf32>
    %cst_16 = arith.constant 0.000000e+00 : f32
    %19 = vector.broadcast %cst_16 : f32 to vector<16x32xf32>
    %c0_i32 = arith.constant 0 : i32
    %20 = arith.index_cast %c0_i32 : i32 to index
    %c0_17 = arith.constant 0 : index
    %c0_18 = arith.constant 0 : index
    %21 = vector.load %arg19[%20, %c0_17, %c0_18] : memref<8x16x128xf32, #tpu.memory_space<vmem>>, vector<1x16x128xf32>
    %22 = vector.shape_cast %21 : vector<1x16x128xf32> to vector<16x128xf32>
    %c0_19 = arith.constant 0 : index
    %c0_20 = arith.constant 0 : index
    %23 = vector.load %arg4[%c0_19, %c0_20] : memref<32x128xbf16, #tpu.memory_space<vmem>>, vector<32x128xbf16>
    %24 = arith.truncf %18 : vector<16x32xf32> to vector<16x32xbf16>
    %cst_21 = arith.constant dense<0.000000e+00> : vector<16x128xf32>
    %25 = tpu.matmul %24, %23, %cst_21 {dimension_numbers = #tpu.dot_dimension_numbers<[1], [0], [0], [1], [0, 0, 1, 1], [], []>} : vector<16x32xbf16>, vector<32x128xbf16>, vector<16x128xf32> -> vector<16x128xf32>
    %26 = arith.addf %22, %25 : vector<16x128xf32>
    %27 = vector.extract_strided_slice %26 {offsets = [0, 0], sizes = [16, 32], strides = [1, 1]} : vector<16x128xf32> to vector<16x32xf32>
    %28 = arith.negf %27 : vector<16x32xf32>
    %29 = math.exp %28 : vector<16x32xf32>
    %cst_22 = arith.constant 1.000000e+00 : f32
    %30 = vector.broadcast %cst_22 : f32 to vector<16x32xf32>
    %31 = arith.addf %30, %29 : vector<16x32xf32>
    %32 = arith.divf %30, %31 : vector<16x32xf32>
    %33 = vector.extract_strided_slice %26 {offsets = [0, 32], sizes = [16, 32], strides = [1, 1]} : vector<16x128xf32> to vector<16x32xf32>
    %34 = arith.negf %33 : vector<16x32xf32>
    %35 = math.exp %34 : vector<16x32xf32>
    %cst_23 = arith.constant 1.000000e+00 : f32
    %36 = vector.broadcast %cst_23 : f32 to vector<16x32xf32>
    %37 = arith.addf %36, %35 : vector<16x32xf32>
    %38 = arith.divf %36, %37 : vector<16x32xf32>
    %39 = vector.extract_strided_slice %26 {offsets = [0, 64], sizes = [16, 32], strides = [1, 1]} : vector<16x128xf32> to vector<16x32xf32>
    %40 = math.tanh %39 : vector<16x32xf32>
    %41 = vector.extract_strided_slice %26 {offsets = [0, 96], sizes = [16, 32], strides = [1, 1]} : vector<16x128xf32> to vector<16x32xf32>
    %42 = arith.negf %41 : vector<16x32xf32>
    %43 = math.exp %42 : vector<16x32xf32>
    %cst_24 = arith.constant 1.000000e+00 : f32
    %44 = vector.broadcast %cst_24 : f32 to vector<16x32xf32>
    %45 = arith.addf %44, %43 : vector<16x32xf32>
    %46 = arith.divf %44, %45 : vector<16x32xf32>
    %47 = arith.mulf %38, %19 : vector<16x32xf32>
    %48 = arith.mulf %32, %40 : vector<16x32xf32>
    %49 = arith.addf %47, %48 : vector<16x32xf32>
    %50 = math.tanh %49 : vector<16x32xf32>
    %51 = arith.mulf %46, %50 : vector<16x32xf32>
    %52 = arith.index_cast %c0_i32 : i32 to index
    %c0_25 = arith.constant 0 : index
    %c0_26 = arith.constant 0 : index
    %53 = vector.load %arg20[%52, %c0_25, %c0_26] : memref<8x16x32xf32, #tpu.memory_space<vmem>>, vector<1x16x32xf32>
    %54 = vector.shape_cast %53 : vector<1x16x32xf32> to vector<16x32xf32>
    %55 = vector.shape_cast %51 : vector<16x32xf32> to vector<1x16x32xf32>
    tpu.vector_store %arg20[%52, %c0_25, %c0_26], %55 {strides = array<i32>} : memref<8x16x32xf32, #tpu.memory_space<vmem>>, vector<1x16x32xf32>,
    %c1_i32 = arith.constant 1 : i32
    %56 = arith.index_cast %c1_i32 : i32 to index
    %c0_27 = arith.constant 0 : index
    %c0_28 = arith.constant 0 : index
    %57 = vector.load %arg19[%56, %c0_27, %c0_28] : memref<8x16x128xf32, #tpu.memory_space<vmem>>, vector<1x16x128xf32>
    %58 = vector.shape_cast %57 : vector<1x16x128xf32> to vector<16x128xf32>
    %c0_29 = arith.constant 0 : index
    %c0_30 = arith.constant 0 : index
    %59 = vector.load %arg4[%c0_29, %c0_30] : memref<32x128xbf16, #tpu.memory_space<vmem>>, vector<32x128xbf16>
    %60 = arith.truncf %51 : vector<16x32xf32> to vector<16x32xbf16>
    %cst_31 = arith.constant dense<0.000000e+00> : vector<16x128xf32>
    %61 = tpu.matmul %60, %59, %cst_31 {dimension_numbers = #tpu.dot_dimension_numbers<[1], [0], [0], [1], [0, 0, 1, 1], [], []>} : vector<16x32xbf16>, vector<32x128xbf16>, vector<16x128xf32> -> vector<16x128xf32>
    %62 = arith.addf %58, %61 : vector<16x128xf32>
    %63 = vector.extract_strided_slice %62 {offsets = [0, 0], sizes = [16, 32], strides = [1, 1]} : vector<16x128xf32> to vector<16x32xf32>
    %64 = arith.negf %63 : vector<16x32xf32>
    %65 = math.exp %64 : vector<16x32xf32>
    %cst_32 = arith.constant 1.000000e+00 : f32
    %66 = vector.broadcast %cst_32 : f32 to vector<16x32xf32>
    %67 = arith.addf %66, %65 : vector<16x32xf32>
    %68 = arith.divf %66, %67 : vector<16x32xf32>
    %69 = vector.extract_strided_slice %62 {offsets = [0, 32], sizes = [16, 32], strides = [1, 1]} : vector<16x128xf32> to vector<16x32xf32>
    %70 = arith.negf %69 : vector<16x32xf32>
    %71 = math.exp %70 : vector<16x32xf32>
    %cst_33 = arith.constant 1.000000e+00 : f32
    %72 = vector.broadcast %cst_33 : f32 to vector<16x32xf32>
    %73 = arith.addf %72, %71 : vector<16x32xf32>
    %74 = arith.divf %72, %73 : vector<16x32xf32>
    %75 = vector.extract_strided_slice %62 {offsets = [0, 64], sizes = [16, 32], strides = [1, 1]} : vector<16x128xf32> to vector<16x32xf32>
    %76 = math.tanh %75 : vector<16x32xf32>
    %77 = vector.extract_strided_slice %62 {offsets = [0, 96], sizes = [16, 32], strides = [1, 1]} : vector<16x128xf32> to vector<16x32xf32>
    %78 = arith.negf %77 : vector<16x32xf32>
    %79 = math.exp %78 : vector<16x32xf32>
    %cst_34 = arith.constant 1.000000e+00 : f32
    %80 = vector.broadcast %cst_34 : f32 to vector<16x32xf32>
    %81 = arith.addf %80, %79 : vector<16x32xf32>
    %82 = arith.divf %80, %81 : vector<16x32xf32>
    %83 = arith.mulf %74, %49 : vector<16x32xf32>
    %84 = arith.mulf %68, %76 : vector<16x32xf32>
    %85 = arith.addf %83, %84 : vector<16x32xf32>
    %86 = math.tanh %85 : vector<16x32xf32>
    %87 = arith.mulf %82, %86 : vector<16x32xf32>
    %88 = arith.index_cast %c1_i32 : i32 to index
    %c0_35 = arith.constant 0 : index
    %c0_36 = arith.constant 0 : index
    %89 = vector.load %arg20[%88, %c0_35, %c0_36] : memref<8x16x32xf32, #tpu.memory_space<vmem>>, vector<1x16x32xf32>
    %90 = vector.shape_cast %89 : vector<1x16x32xf32> to vector<16x32xf32>
    %91 = vector.shape_cast %87 : vector<16x32xf32> to vector<1x16x32xf32>
    tpu.vector_store %arg20[%88, %c0_35, %c0_36], %91 {strides = array<i32>} : memref<8x16x32xf32, #tpu.memory_space<vmem>>, vector<1x16x32xf32>,
    %c2_i32 = arith.constant 2 : i32
    %92 = arith.index_cast %c2_i32 : i32 to index
    %c0_37 = arith.constant 0 : index
    %c0_38 = arith.constant 0 : index
    %93 = vector.load %arg19[%92, %c0_37, %c0_38] : memref<8x16x128xf32, #tpu.memory_space<vmem>>, vector<1x16x128xf32>
    %94 = vector.shape_cast %93 : vector<1x16x128xf32> to vector<16x128xf32>
    %c0_39 = arith.constant 0 : index
    %c0_40 = arith.constant 0 : index
    %95 = vector.load %arg4[%c0_39, %c0_40] : memref<32x128xbf16, #tpu.memory_space<vmem>>, vector<32x128xbf16>
    %96 = arith.truncf %87 : vector<16x32xf32> to vector<16x32xbf16>
    %cst_41 = arith.constant dense<0.000000e+00> : vector<16x128xf32>
    %97 = tpu.matmul %96, %95, %cst_41 {dimension_numbers = #tpu.dot_dimension_numbers<[1], [0], [0], [1], [0, 0, 1, 1], [], []>} : vector<16x32xbf16>, vector<32x128xbf16>, vector<16x128xf32> -> vector<16x128xf32>
    %98 = arith.addf %94, %97 : vector<16x128xf32>
    %99 = vector.extract_strided_slice %98 {offsets = [0, 0], sizes = [16, 32], strides = [1, 1]} : vector<16x128xf32> to vector<16x32xf32>
    %100 = arith.negf %99 : vector<16x32xf32>
    %101 = math.exp %100 : vector<16x32xf32>
    %cst_42 = arith.constant 1.000000e+00 : f32
    %102 = vector.broadcast %cst_42 : f32 to vector<16x32xf32>
    %103 = arith.addf %102, %101 : vector<16x32xf32>
    %104 = arith.divf %102, %103 : vector<16x32xf32>
    %105 = vector.extract_strided_slice %98 {offsets = [0, 32], sizes = [16, 32], strides = [1, 1]} : vector<16x128xf32> to vector<16x32xf32>
    %106 = arith.negf %105 : vector<16x32xf32>
    %107 = math.exp %106 : vector<16x32xf32>
    %cst_43 = arith.constant 1.000000e+00 : f32
    %108 = vector.broadcast %cst_43 : f32 to vector<16x32xf32>
    %109 = arith.addf %108, %107 : vector<16x32xf32>
    %110 = arith.divf %108, %109 : vector<16x32xf32>
    %111 = vector.extract_strided_slice %98 {offsets = [0, 64], sizes = [16, 32], strides = [1, 1]} : vector<16x128xf32> to vector<16x32xf32>
    %112 = math.tanh %111 : vector<16x32xf32>
    %113 = vector.extract_strided_slice %98 {offsets = [0, 96], sizes = [16, 32], strides = [1, 1]} : vector<16x128xf32> to vector<16x32xf32>
    %114 = arith.negf %113 : vector<16x32xf32>
    %115 = math.exp %114 : vector<16x32xf32>
    %cst_44 = arith.constant 1.000000e+00 : f32
    %116 = vector.broadcast %cst_44 : f32 to vector<16x32xf32>
    %117 = arith.addf %116, %115 : vector<16x32xf32>
    %118 = arith.divf %116, %117 : vector<16x32xf32>
    %119 = arith.mulf %110, %85 : vector<16x32xf32>
    %120 = arith.mulf %104, %112 : vector<16x32xf32>
    %121 = arith.addf %119, %120 : vector<16x32xf32>
    %122 = math.tanh %121 : vector<16x32xf32>
    %123 = arith.mulf %118, %122 : vector<16x32xf32>
    %124 = arith.index_cast %c2_i32 : i32 to index
    %c0_45 = arith.constant 0 : index
    %c0_46 = arith.constant 0 : index
    %125 = vector.load %arg20[%124, %c0_45, %c0_46] : memref<8x16x32xf32, #tpu.memory_space<vmem>>, vector<1x16x32xf32>
    %126 = vector.shape_cast %125 : vector<1x16x32xf32> to vector<16x32xf32>
    %127 = vector.shape_cast %123 : vector<16x32xf32> to vector<1x16x32xf32>
    tpu.vector_store %arg20[%124, %c0_45, %c0_46], %127 {strides = array<i32>} : memref<8x16x32xf32, #tpu.memory_space<vmem>>, vector<1x16x32xf32>,
    %c3_i32 = arith.constant 3 : i32
    %128 = arith.index_cast %c3_i32 : i32 to index
    %c0_47 = arith.constant 0 : index
    %c0_48 = arith.constant 0 : index
    %129 = vector.load %arg19[%128, %c0_47, %c0_48] : memref<8x16x128xf32, #tpu.memory_space<vmem>>, vector<1x16x128xf32>
    %130 = vector.shape_cast %129 : vector<1x16x128xf32> to vector<16x128xf32>
    %c0_49 = arith.constant 0 : index
    %c0_50 = arith.constant 0 : index
    %131 = vector.load %arg4[%c0_49, %c0_50] : memref<32x128xbf16, #tpu.memory_space<vmem>>, vector<32x128xbf16>
    %132 = arith.truncf %123 : vector<16x32xf32> to vector<16x32xbf16>
    %cst_51 = arith.constant dense<0.000000e+00> : vector<16x128xf32>
    %133 = tpu.matmul %132, %131, %cst_51 {dimension_numbers = #tpu.dot_dimension_numbers<[1], [0], [0], [1], [0, 0, 1, 1], [], []>} : vector<16x32xbf16>, vector<32x128xbf16>, vector<16x128xf32> -> vector<16x128xf32>
    %134 = arith.addf %130, %133 : vector<16x128xf32>
    %135 = vector.extract_strided_slice %134 {offsets = [0, 0], sizes = [16, 32], strides = [1, 1]} : vector<16x128xf32> to vector<16x32xf32>
    %136 = arith.negf %135 : vector<16x32xf32>
    %137 = math.exp %136 : vector<16x32xf32>
    %cst_52 = arith.constant 1.000000e+00 : f32
    %138 = vector.broadcast %cst_52 : f32 to vector<16x32xf32>
    %139 = arith.addf %138, %137 : vector<16x32xf32>
    %140 = arith.divf %138, %139 : vector<16x32xf32>
    %141 = vector.extract_strided_slice %134 {offsets = [0, 32], sizes = [16, 32], strides = [1, 1]} : vector<16x128xf32> to vector<16x32xf32>
    %142 = arith.negf %141 : vector<16x32xf32>
    %143 = math.exp %142 : vector<16x32xf32>
    %cst_53 = arith.constant 1.000000e+00 : f32
    %144 = vector.broadcast %cst_53 : f32 to vector<16x32xf32>
    %145 = arith.addf %144, %143 : vector<16x32xf32>
    %146 = arith.divf %144, %145 : vector<16x32xf32>
    %147 = vector.extract_strided_slice %134 {offsets = [0, 64], sizes = [16, 32], strides = [1, 1]} : vector<16x128xf32> to vector<16x32xf32>
    %148 = math.tanh %147 : vector<16x32xf32>
    %149 = vector.extract_strided_slice %134 {offsets = [0, 96], sizes = [16, 32], strides = [1, 1]} : vector<16x128xf32> to vector<16x32xf32>
    %150 = arith.negf %149 : vector<16x32xf32>
    %151 = math.exp %150 : vector<16x32xf32>
    %cst_54 = arith.constant 1.000000e+00 : f32
    %152 = vector.broadcast %cst_54 : f32 to vector<16x32xf32>
    %153 = arith.addf %152, %151 : vector<16x32xf32>
    %154 = arith.divf %152, %153 : vector<16x32xf32>
    %155 = arith.mulf %146, %121 : vector<16x32xf32>
    %156 = arith.mulf %140, %148 : vector<16x32xf32>
    %157 = arith.addf %155, %156 : vector<16x32xf32>
    %158 = math.tanh %157 : vector<16x32xf32>
    %159 = arith.mulf %154, %158 : vector<16x32xf32>
    %160 = arith.index_cast %c3_i32 : i32 to index
    %c0_55 = arith.constant 0 : index
    %c0_56 = arith.constant 0 : index
    %161 = vector.load %arg20[%160, %c0_55, %c0_56] : memref<8x16x32xf32, #tpu.memory_space<vmem>>, vector<1x16x32xf32>
    %162 = vector.shape_cast %161 : vector<1x16x32xf32> to vector<16x32xf32>
    %163 = vector.shape_cast %159 : vector<16x32xf32> to vector<1x16x32xf32>
    tpu.vector_store %arg20[%160, %c0_55, %c0_56], %163 {strides = array<i32>} : memref<8x16x32xf32, #tpu.memory_space<vmem>>, vector<1x16x32xf32>,
    %c4_i32 = arith.constant 4 : i32
    %164 = arith.index_cast %c4_i32 : i32 to index
    %c0_57 = arith.constant 0 : index
    %c0_58 = arith.constant 0 : index
    %165 = vector.load %arg19[%164, %c0_57, %c0_58] : memref<8x16x128xf32, #tpu.memory_space<vmem>>, vector<1x16x128xf32>
    %166 = vector.shape_cast %165 : vector<1x16x128xf32> to vector<16x128xf32>
    %c0_59 = arith.constant 0 : index
    %c0_60 = arith.constant 0 : index
    %167 = vector.load %arg4[%c0_59, %c0_60] : memref<32x128xbf16, #tpu.memory_space<vmem>>, vector<32x128xbf16>
    %168 = arith.truncf %159 : vector<16x32xf32> to vector<16x32xbf16>
    %cst_61 = arith.constant dense<0.000000e+00> : vector<16x128xf32>
    %169 = tpu.matmul %168, %167, %cst_61 {dimension_numbers = #tpu.dot_dimension_numbers<[1], [0], [0], [1], [0, 0, 1, 1], [], []>} : vector<16x32xbf16>, vector<32x128xbf16>, vector<16x128xf32> -> vector<16x128xf32>
    %170 = arith.addf %166, %169 : vector<16x128xf32>
    %171 = vector.extract_strided_slice %170 {offsets = [0, 0], sizes = [16, 32], strides = [1, 1]} : vector<16x128xf32> to vector<16x32xf32>
    %172 = arith.negf %171 : vector<16x32xf32>
    %173 = math.exp %172 : vector<16x32xf32>
    %cst_62 = arith.constant 1.000000e+00 : f32
    %174 = vector.broadcast %cst_62 : f32 to vector<16x32xf32>
    %175 = arith.addf %174, %173 : vector<16x32xf32>
    %176 = arith.divf %174, %175 : vector<16x32xf32>
    %177 = vector.extract_strided_slice %170 {offsets = [0, 32], sizes = [16, 32], strides = [1, 1]} : vector<16x128xf32> to vector<16x32xf32>
    %178 = arith.negf %177 : vector<16x32xf32>
    %179 = math.exp %178 : vector<16x32xf32>
    %cst_63 = arith.constant 1.000000e+00 : f32
    %180 = vector.broadcast %cst_63 : f32 to vector<16x32xf32>
    %181 = arith.addf %180, %179 : vector<16x32xf32>
    %182 = arith.divf %180, %181 : vector<16x32xf32>
    %183 = vector.extract_strided_slice %170 {offsets = [0, 64], sizes = [16, 32], strides = [1, 1]} : vector<16x128xf32> to vector<16x32xf32>
    %184 = math.tanh %183 : vector<16x32xf32>
    %185 = vector.extract_strided_slice %170 {offsets = [0, 96], sizes = [16, 32], strides = [1, 1]} : vector<16x128xf32> to vector<16x32xf32>
    %186 = arith.negf %185 : vector<16x32xf32>
    %187 = math.exp %186 : vector<16x32xf32>
    %cst_64 = arith.constant 1.000000e+00 : f32
    %188 = vector.broadcast %cst_64 : f32 to vector<16x32xf32>
    %189 = arith.addf %188, %187 : vector<16x32xf32>
    %190 = arith.divf %188, %189 : vector<16x32xf32>
    %191 = arith.mulf %182, %157 : vector<16x32xf32>
    %192 = arith.mulf %176, %184 : vector<16x32xf32>
    %193 = arith.addf %191, %192 : vector<16x32xf32>
    %194 = math.tanh %193 : vector<16x32xf32>
    %195 = arith.mulf %190, %194 : vector<16x32xf32>
    %196 = arith.index_cast %c4_i32 : i32 to index
    %c0_65 = arith.constant 0 : index
    %c0_66 = arith.constant 0 : index
    %197 = vector.load %arg20[%196, %c0_65, %c0_66] : memref<8x16x32xf32, #tpu.memory_space<vmem>>, vector<1x16x32xf32>
    %198 = vector.shape_cast %197 : vector<1x16x32xf32> to vector<16x32xf32>
    %199 = vector.shape_cast %195 : vector<16x32xf32> to vector<1x16x32xf32>
    tpu.vector_store %arg20[%196, %c0_65, %c0_66], %199 {strides = array<i32>} : memref<8x16x32xf32, #tpu.memory_space<vmem>>, vector<1x16x32xf32>,
    %c5_i32 = arith.constant 5 : i32
    %200 = arith.index_cast %c5_i32 : i32 to index
    %c0_67 = arith.constant 0 : index
    %c0_68 = arith.constant 0 : index
    %201 = vector.load %arg19[%200, %c0_67, %c0_68] : memref<8x16x128xf32, #tpu.memory_space<vmem>>, vector<1x16x128xf32>
    %202 = vector.shape_cast %201 : vector<1x16x128xf32> to vector<16x128xf32>
    %c0_69 = arith.constant 0 : index
    %c0_70 = arith.constant 0 : index
    %203 = vector.load %arg4[%c0_69, %c0_70] : memref<32x128xbf16, #tpu.memory_space<vmem>>, vector<32x128xbf16>
    %204 = arith.truncf %195 : vector<16x32xf32> to vector<16x32xbf16>
    %cst_71 = arith.constant dense<0.000000e+00> : vector<16x128xf32>
    %205 = tpu.matmul %204, %203, %cst_71 {dimension_numbers = #tpu.dot_dimension_numbers<[1], [0], [0], [1], [0, 0, 1, 1], [], []>} : vector<16x32xbf16>, vector<32x128xbf16>, vector<16x128xf32> -> vector<16x128xf32>
    %206 = arith.addf %202, %205 : vector<16x128xf32>
    %207 = vector.extract_strided_slice %206 {offsets = [0, 0], sizes = [16, 32], strides = [1, 1]} : vector<16x128xf32> to vector<16x32xf32>
    %208 = arith.negf %207 : vector<16x32xf32>
    %209 = math.exp %208 : vector<16x32xf32>
    %cst_72 = arith.constant 1.000000e+00 : f32
    %210 = vector.broadcast %cst_72 : f32 to vector<16x32xf32>
    %211 = arith.addf %210, %209 : vector<16x32xf32>
    %212 = arith.divf %210, %211 : vector<16x32xf32>
    %213 = vector.extract_strided_slice %206 {offsets = [0, 32], sizes = [16, 32], strides = [1, 1]} : vector<16x128xf32> to vector<16x32xf32>
    %214 = arith.negf %213 : vector<16x32xf32>
    %215 = math.exp %214 : vector<16x32xf32>
    %cst_73 = arith.constant 1.000000e+00 : f32
    %216 = vector.broadcast %cst_73 : f32 to vector<16x32xf32>
    %217 = arith.addf %216, %215 : vector<16x32xf32>
    %218 = arith.divf %216, %217 : vector<16x32xf32>
    %219 = vector.extract_strided_slice %206 {offsets = [0, 64], sizes = [16, 32], strides = [1, 1]} : vector<16x128xf32> to vector<16x32xf32>
    %220 = math.tanh %219 : vector<16x32xf32>
    %221 = vector.extract_strided_slice %206 {offsets = [0, 96], sizes = [16, 32], strides = [1, 1]} : vector<16x128xf32> to vector<16x32xf32>
    %222 = arith.negf %221 : vector<16x32xf32>
    %223 = math.exp %222 : vector<16x32xf32>
    %cst_74 = arith.constant 1.000000e+00 : f32
    %224 = vector.broadcast %cst_74 : f32 to vector<16x32xf32>
    %225 = arith.addf %224, %223 : vector<16x32xf32>
    %226 = arith.divf %224, %225 : vector<16x32xf32>
    %227 = arith.mulf %218, %193 : vector<16x32xf32>
    %228 = arith.mulf %212, %220 : vector<16x32xf32>
    %229 = arith.addf %227, %228 : vector<16x32xf32>
    %230 = math.tanh %229 : vector<16x32xf32>
    %231 = arith.mulf %226, %230 : vector<16x32xf32>
    %232 = arith.index_cast %c5_i32 : i32 to index
    %c0_75 = arith.constant 0 : index
    %c0_76 = arith.constant 0 : index
    %233 = vector.load %arg20[%232, %c0_75, %c0_76] : memref<8x16x32xf32, #tpu.memory_space<vmem>>, vector<1x16x32xf32>
    %234 = vector.shape_cast %233 : vector<1x16x32xf32> to vector<16x32xf32>
    %235 = vector.shape_cast %231 : vector<16x32xf32> to vector<1x16x32xf32>
    tpu.vector_store %arg20[%232, %c0_75, %c0_76], %235 {strides = array<i32>} : memref<8x16x32xf32, #tpu.memory_space<vmem>>, vector<1x16x32xf32>,
    %c6_i32 = arith.constant 6 : i32
    %236 = arith.index_cast %c6_i32 : i32 to index
    %c0_77 = arith.constant 0 : index
    %c0_78 = arith.constant 0 : index
    %237 = vector.load %arg19[%236, %c0_77, %c0_78] : memref<8x16x128xf32, #tpu.memory_space<vmem>>, vector<1x16x128xf32>
    %238 = vector.shape_cast %237 : vector<1x16x128xf32> to vector<16x128xf32>
    %c0_79 = arith.constant 0 : index
    %c0_80 = arith.constant 0 : index
    %239 = vector.load %arg4[%c0_79, %c0_80] : memref<32x128xbf16, #tpu.memory_space<vmem>>, vector<32x128xbf16>
    %240 = arith.truncf %231 : vector<16x32xf32> to vector<16x32xbf16>
    %cst_81 = arith.constant dense<0.000000e+00> : vector<16x128xf32>
    %241 = tpu.matmul %240, %239, %cst_81 {dimension_numbers = #tpu.dot_dimension_numbers<[1], [0], [0], [1], [0, 0, 1, 1], [], []>} : vector<16x32xbf16>, vector<32x128xbf16>, vector<16x128xf32> -> vector<16x128xf32>
    %242 = arith.addf %238, %241 : vector<16x128xf32>
    %243 = vector.extract_strided_slice %242 {offsets = [0, 0], sizes = [16, 32], strides = [1, 1]} : vector<16x128xf32> to vector<16x32xf32>
    %244 = arith.negf %243 : vector<16x32xf32>
    %245 = math.exp %244 : vector<16x32xf32>
    %cst_82 = arith.constant 1.000000e+00 : f32
    %246 = vector.broadcast %cst_82 : f32 to vector<16x32xf32>
    %247 = arith.addf %246, %245 : vector<16x32xf32>
    %248 = arith.divf %246, %247 : vector<16x32xf32>
    %249 = vector.extract_strided_slice %242 {offsets = [0, 32], sizes = [16, 32], strides = [1, 1]} : vector<16x128xf32> to vector<16x32xf32>
    %250 = arith.negf %249 : vector<16x32xf32>
    %251 = math.exp %250 : vector<16x32xf32>
    %cst_83 = arith.constant 1.000000e+00 : f32
    %252 = vector.broadcast %cst_83 : f32 to vector<16x32xf32>
    %253 = arith.addf %252, %251 : vector<16x32xf32>
    %254 = arith.divf %252, %253 : vector<16x32xf32>
    %255 = vector.extract_strided_slice %242 {offsets = [0, 64], sizes = [16, 32], strides = [1, 1]} : vector<16x128xf32> to vector<16x32xf32>
    %256 = math.tanh %255 : vector<16x32xf32>
    %257 = vector.extract_strided_slice %242 {offsets = [0, 96], sizes = [16, 32], strides = [1, 1]} : vector<16x128xf32> to vector<16x32xf32>
    %258 = arith.negf %257 : vector<16x32xf32>
    %259 = math.exp %258 : vector<16x32xf32>
    %cst_84 = arith.constant 1.000000e+00 : f32
    %260 = vector.broadcast %cst_84 : f32 to vector<16x32xf32>
    %261 = arith.addf %260, %259 : vector<16x32xf32>
    %262 = arith.divf %260, %261 : vector<16x32xf32>
    %263 = arith.mulf %254, %229 : vector<16x32xf32>
    %264 = arith.mulf %248, %256 : vector<16x32xf32>
    %265 = arith.addf %263, %264 : vector<16x32xf32>
    %266 = math.tanh %265 : vector<16x32xf32>
    %267 = arith.mulf %262, %266 : vector<16x32xf32>
    %268 = arith.index_cast %c6_i32 : i32 to index
    %c0_85 = arith.constant 0 : index
    %c0_86 = arith.constant 0 : index
    %269 = vector.load %arg20[%268, %c0_85, %c0_86] : memref<8x16x32xf32, #tpu.memory_space<vmem>>, vector<1x16x32xf32>
    %270 = vector.shape_cast %269 : vector<1x16x32xf32> to vector<16x32xf32>
    %271 = vector.shape_cast %267 : vector<16x32xf32> to vector<1x16x32xf32>
    tpu.vector_store %arg20[%268, %c0_85, %c0_86], %271 {strides = array<i32>} : memref<8x16x32xf32, #tpu.memory_space<vmem>>, vector<1x16x32xf32>,
    %c7_i32 = arith.constant 7 : i32
    %272 = arith.index_cast %c7_i32 : i32 to index
    %c0_87 = arith.constant 0 : index
    %c0_88 = arith.constant 0 : index
    %273 = vector.load %arg19[%272, %c0_87, %c0_88] : memref<8x16x128xf32, #tpu.memory_space<vmem>>, vector<1x16x128xf32>
    %274 = vector.shape_cast %273 : vector<1x16x128xf32> to vector<16x128xf32>
    %c0_89 = arith.constant 0 : index
    %c0_90 = arith.constant 0 : index
    %275 = vector.load %arg4[%c0_89, %c0_90] : memref<32x128xbf16, #tpu.memory_space<vmem>>, vector<32x128xbf16>
    %276 = arith.truncf %267 : vector<16x32xf32> to vector<16x32xbf16>
    %cst_91 = arith.constant dense<0.000000e+00> : vector<16x128xf32>
    %277 = tpu.matmul %276, %275, %cst_91 {dimension_numbers = #tpu.dot_dimension_numbers<[1], [0], [0], [1], [0, 0, 1, 1], [], []>} : vector<16x32xbf16>, vector<32x128xbf16>, vector<16x128xf32> -> vector<16x128xf32>
    %278 = arith.addf %274, %277 : vector<16x128xf32>
    %279 = vector.extract_strided_slice %278 {offsets = [0, 0], sizes = [16, 32], strides = [1, 1]} : vector<16x128xf32> to vector<16x32xf32>
    %280 = arith.negf %279 : vector<16x32xf32>
    %281 = math.exp %280 : vector<16x32xf32>
    %cst_92 = arith.constant 1.000000e+00 : f32
    %282 = vector.broadcast %cst_92 : f32 to vector<16x32xf32>
    %283 = arith.addf %282, %281 : vector<16x32xf32>
    %284 = arith.divf %282, %283 : vector<16x32xf32>
    %285 = vector.extract_strided_slice %278 {offsets = [0, 32], sizes = [16, 32], strides = [1, 1]} : vector<16x128xf32> to vector<16x32xf32>
    %286 = arith.negf %285 : vector<16x32xf32>
    %287 = math.exp %286 : vector<16x32xf32>
    %cst_93 = arith.constant 1.000000e+00 : f32
    %288 = vector.broadcast %cst_93 : f32 to vector<16x32xf32>
    %289 = arith.addf %288, %287 : vector<16x32xf32>
    %290 = arith.divf %288, %289 : vector<16x32xf32>
    %291 = vector.extract_strided_slice %278 {offsets = [0, 64], sizes = [16, 32], strides = [1, 1]} : vector<16x128xf32> to vector<16x32xf32>
    %292 = math.tanh %291 : vector<16x32xf32>
    %293 = vector.extract_strided_slice %278 {offsets = [0, 96], sizes = [16, 32], strides = [1, 1]} : vector<16x128xf32> to vector<16x32xf32>
    %294 = arith.negf %293 : vector<16x32xf32>
    %295 = math.exp %294 : vector<16x32xf32>
    %cst_94 = arith.constant 1.000000e+00 : f32
    %296 = vector.broadcast %cst_94 : f32 to vector<16x32xf32>
    %297 = arith.addf %296, %295 : vector<16x32xf32>
    %298 = arith.divf %296, %297 : vector<16x32xf32>
    %299 = arith.mulf %290, %265 : vector<16x32xf32>
    %300 = arith.mulf %284, %292 : vector<16x32xf32>
    %301 = arith.addf %299, %300 : vector<16x32xf32>
    %302 = math.tanh %301 : vector<16x32xf32>
    %303 = arith.mulf %298, %302 : vector<16x32xf32>
    %304 = arith.index_cast %c7_i32 : i32 to index
    %c0_95 = arith.constant 0 : index
    %c0_96 = arith.constant 0 : index
    %305 = vector.load %arg20[%304, %c0_95, %c0_96] : memref<8x16x32xf32, #tpu.memory_space<vmem>>, vector<1x16x32xf32>
    %306 = vector.shape_cast %305 : vector<1x16x32xf32> to vector<16x32xf32>
    %307 = vector.shape_cast %303 : vector<16x32xf32> to vector<1x16x32xf32>
    tpu.vector_store %arg20[%304, %c0_95, %c0_96], %307 {strides = array<i32>} : memref<8x16x32xf32, #tpu.memory_space<vmem>>, vector<1x16x32xf32>,
    %c8_i32 = arith.constant 8 : i32
    %c0_97 = arith.constant 0 : index
    %c0_98 = arith.constant 0 : index
    %c0_99 = arith.constant 0 : index
    %308 = vector.load %arg20[%c0_97, %c0_98, %c0_99] : memref<8x16x32xf32, #tpu.memory_space<vmem>>, vector<8x16x32xf32>
    %309 = vector.shape_cast %308 : vector<8x16x32xf32> to vector<128x32xf32>
    %c0_100 = arith.constant 0 : index
    %c0_101 = arith.constant 0 : index
    %310 = vector.load %arg8[%c0_100, %c0_101] : memref<32x32xbf16, #tpu.memory_space<vmem>>, vector<32x32xbf16>
    %311 = arith.truncf %309 : vector<128x32xf32> to vector<128x32xbf16>
    %cst_102 = arith.constant dense<0.000000e+00> : vector<128x32xf32>
    %312 = tpu.matmul %311, %310, %cst_102 {dimension_numbers = #tpu.dot_dimension_numbers<[1], [0], [0], [1], [0, 0, 1, 1], [], []>} : vector<128x32xbf16>, vector<32x32xbf16>, vector<128x32xf32> -> vector<128x32xf32>
    %c0_103 = arith.constant 0 : index
    %c0_104 = arith.constant 0 : index
    %313 = vector.load %arg9[%c0_103, %c0_104] : memref<1x32xf32, #tpu.memory_space<vmem>>, vector<1x32xf32>
    %314 = vector.broadcast %313 : vector<1x32xf32> to vector<128x32xf32>
    %315 = arith.addf %312, %314 : vector<128x32xf32>
    %316 = vector.shape_cast %315 : vector<128x32xf32> to vector<8x16x32xf32>
    %c0_105 = arith.constant 0 : index
    %c0_106 = arith.constant 0 : index
    %c0_107 = arith.constant 0 : index
    %317 = vector.load %arg21[%c0_105, %c0_106, %c0_107] : memref<8x16x32xf32, #tpu.memory_space<vmem>>, vector<8x16x32xf32>
    tpu.vector_store %arg21[%c0_105, %c0_106, %c0_107], %316 {strides = array<i32>} : memref<8x16x32xf32, #tpu.memory_space<vmem>>, vector<8x16x32xf32>,
    %c0_108 = arith.constant 0 : index
    %c0_109 = arith.constant 0 : index
    %c0_110 = arith.constant 0 : index
    %318 = vector.load %arg2[%c0_108, %c0_109, %c0_110] : memref<6x16x32xf32, #tpu.memory_space<vmem>>, vector<6x16x32xf32>
    %319 = vector.shape_cast %318 : vector<6x16x32xf32> to vector<96x32xf32>
    %c0_111 = arith.constant 0 : index
    %c0_112 = arith.constant 0 : index
    %320 = vector.load %arg11[%c0_111, %c0_112] : memref<32x96xbf16, #tpu.memory_space<vmem>>, vector<32x96xbf16>
    %321 = arith.truncf %319 : vector<96x32xf32> to vector<96x32xbf16>
    %cst_113 = arith.constant dense<0.000000e+00> : vector<96x96xf32>
    %322 = tpu.matmul %321, %320, %cst_113 {dimension_numbers = #tpu.dot_dimension_numbers<[1], [0], [0], [1], [0, 0, 1, 1], [], []>} : vector<96x32xbf16>, vector<32x96xbf16>, vector<96x96xf32> -> vector<96x96xf32>
    %c0_114 = arith.constant 0 : index
    %c0_115 = arith.constant 0 : index
    %323 = vector.load %arg14[%c0_114, %c0_115] : memref<1x96xf32, #tpu.memory_space<vmem>>, vector<1x96xf32>
    %324 = vector.broadcast %323 : vector<1x96xf32> to vector<96x96xf32>
    %325 = arith.addf %322, %324 : vector<96x96xf32>
    %326 = vector.shape_cast %325 : vector<96x96xf32> to vector<6x16x96xf32>
    %c0_116 = arith.constant 0 : index
    %c0_117 = arith.constant 0 : index
    %c0_118 = arith.constant 0 : index
    %327 = vector.load %arg22[%c0_116, %c0_117, %c0_118] : memref<6x16x96xf32, #tpu.memory_space<vmem>>, vector<6x16x96xf32>
    tpu.vector_store %arg22[%c0_116, %c0_117, %c0_118], %326 {strides = array<i32>} : memref<6x16x96xf32, #tpu.memory_space<vmem>>, vector<6x16x96xf32>,
    %c0_i32_119 = arith.constant 0 : i32
    %c0_120 = arith.constant 0 : index
    %c0_121 = arith.constant 0 : index
    %c0_122 = arith.constant 0 : index
    %328 = vector.load %arg21[%c0_120, %c0_121, %c0_122] : memref<8x16x32xf32, #tpu.memory_space<vmem>>, vector<8x16x32xf32>
    %c0_123 = arith.constant 0 : index
    %c0_124 = arith.constant 0 : index
    %c0_125 = arith.constant 0 : index
    %329 = vector.load %arg20[%c0_123, %c0_124, %c0_125] : memref<8x16x32xf32, #tpu.memory_space<vmem>>, vector<8x16x32xf32>
    %c0_126 = arith.constant 0 : index
    %c0_127 = arith.constant 0 : index
    %330 = vector.load %arg6[%c0_126, %c0_127] : memref<32x32xbf16, #tpu.memory_space<vmem>>, vector<32x32xbf16>
    %331 = arith.truncf %303 : vector<16x32xf32> to vector<16x32xbf16>
    %cst_128 = arith.constant dense<0.000000e+00> : vector<16x32xf32>
    %332 = tpu.matmul %331, %330, %cst_128 {dimension_numbers = #tpu.dot_dimension_numbers<[1], [0], [0], [1], [0, 0, 1, 1], [], []>} : vector<16x32xbf16>, vector<32x32xbf16>, vector<16x32xf32> -> vector<16x32xf32>
    %333 = arith.addf %332, %2 : vector<16x32xf32>
    %334 = vector.shape_cast %333 : vector<16x32xf32> to vector<1x16x32xf32>
    %335 = vector.broadcast %334 : vector<1x16x32xf32> to vector<8x16x32xf32>
    %336 = arith.addf %335, %328 : vector<8x16x32xf32>
    %337 = math.tanh %336 : vector<8x16x32xf32>
    %338 = vector.broadcast %7 : vector<1x1x32xf32> to vector<8x16x32xf32>
    %339 = arith.mulf %337, %338 : vector<8x16x32xf32>
    %cst_129 = arith.constant dense<0.000000e+00> : vector<8x16xf32>
    %340 = vector.multi_reduction <add>, %339, %cst_129 [2] : vector<8x16x32xf32> to vector<8x16xf32>
    %341 = vector.shape_cast %340 : vector<8x16xf32> to vector<8x16x1xf32>
    %cst_130 = arith.constant dense<0xFF800000> : vector<16x1xf32>
    %342 = vector.multi_reduction <maximumf>, %341, %cst_130 [0] : vector<8x16x1xf32> to vector<16x1xf32>
    %343 = vector.shape_cast %342 : vector<16x1xf32> to vector<1x16x1xf32>
    %344 = vector.broadcast %343 : vector<1x16x1xf32> to vector<8x16x1xf32>
    %345 = arith.subf %341, %344 : vector<8x16x1xf32>
    %346 = math.exp %345 : vector<8x16x1xf32>
    %347 = vector.broadcast %346 : vector<8x16x1xf32> to vector<8x16x32xf32>
    %348 = arith.mulf %347, %329 : vector<8x16x32xf32>
    %cst_131 = arith.constant dense<0.000000e+00> : vector<16x32xf32>
    %349 = vector.multi_reduction <add>, %348, %cst_131 [0] : vector<8x16x32xf32> to vector<16x32xf32>
    %cst_132 = arith.constant dense<0.000000e+00> : vector<16x1xf32>
    %350 = vector.multi_reduction <add>, %346, %cst_132 [0] : vector<8x16x1xf32> to vector<16x1xf32>
    %351 = vector.broadcast %350 : vector<16x1xf32> to vector<16x32xf32>
    %352 = arith.divf %349, %351 : vector<16x32xf32>
    %c0_133 = arith.constant 0 : index
    %c0_134 = arith.constant 0 : index
    %353 = vector.load %arg12[%c0_133, %c0_134] : memref<32x96xbf16, #tpu.memory_space<vmem>>, vector<32x96xbf16>
    %354 = arith.truncf %352 : vector<16x32xf32> to vector<16x32xbf16>
    %cst_135 = arith.constant dense<0.000000e+00> : vector<16x96xf32>
    %355 = tpu.matmul %354, %353, %cst_135 {dimension_numbers = #tpu.dot_dimension_numbers<[1], [0], [0], [1], [0, 0, 1, 1], [], []>} : vector<16x32xbf16>, vector<32x96xbf16>, vector<16x96xf32> -> vector<16x96xf32>
    %c0_136 = arith.constant 0 : index
    %c0_137 = arith.constant 0 : index
    %356 = vector.load %arg13[%c0_136, %c0_137] : memref<32x96xbf16, #tpu.memory_space<vmem>>, vector<32x96xbf16>
    %357 = arith.truncf %303 : vector<16x32xf32> to vector<16x32xbf16>
    %cst_138 = arith.constant dense<0.000000e+00> : vector<16x96xf32>
    %358 = tpu.matmul %357, %356, %cst_138 {dimension_numbers = #tpu.dot_dimension_numbers<[1], [0], [0], [1], [0, 0, 1, 1], [], []>} : vector<16x32xbf16>, vector<32x96xbf16>, vector<16x96xf32> -> vector<16x96xf32>
    %359 = arith.index_cast %c0_i32_119 : i32 to index
    %c0_139 = arith.constant 0 : index
    %c0_140 = arith.constant 0 : index
    %360 = vector.load %arg22[%359, %c0_139, %c0_140] : memref<6x16x96xf32, #tpu.memory_space<vmem>>, vector<1x16x96xf32>
    %361 = vector.shape_cast %360 : vector<1x16x96xf32> to vector<16x96xf32>
    %362 = vector.extract_strided_slice %361 {offsets = [0, 0], sizes = [16, 32], strides = [1, 1]} : vector<16x96xf32> to vector<16x32xf32>
    %363 = vector.extract_strided_slice %355 {offsets = [0, 0], sizes = [16, 32], strides = [1, 1]} : vector<16x96xf32> to vector<16x32xf32>
    %364 = arith.addf %362, %363 : vector<16x32xf32>
    %365 = vector.extract_strided_slice %358 {offsets = [0, 0], sizes = [16, 32], strides = [1, 1]} : vector<16x96xf32> to vector<16x32xf32>
    %366 = arith.addf %364, %365 : vector<16x32xf32>
    %367 = arith.negf %366 : vector<16x32xf32>
    %368 = math.exp %367 : vector<16x32xf32>
    %cst_141 = arith.constant 1.000000e+00 : f32
    %369 = vector.broadcast %cst_141 : f32 to vector<16x32xf32>
    %370 = arith.addf %369, %368 : vector<16x32xf32>
    %371 = arith.divf %369, %370 : vector<16x32xf32>
    %372 = vector.extract_strided_slice %361 {offsets = [0, 32], sizes = [16, 32], strides = [1, 1]} : vector<16x96xf32> to vector<16x32xf32>
    %373 = vector.extract_strided_slice %355 {offsets = [0, 32], sizes = [16, 32], strides = [1, 1]} : vector<16x96xf32> to vector<16x32xf32>
    %374 = arith.addf %372, %373 : vector<16x32xf32>
    %375 = vector.extract_strided_slice %358 {offsets = [0, 32], sizes = [16, 32], strides = [1, 1]} : vector<16x96xf32> to vector<16x32xf32>
    %376 = arith.addf %374, %375 : vector<16x32xf32>
    %377 = arith.negf %376 : vector<16x32xf32>
    %378 = math.exp %377 : vector<16x32xf32>
    %cst_142 = arith.constant 1.000000e+00 : f32
    %379 = vector.broadcast %cst_142 : f32 to vector<16x32xf32>
    %380 = arith.addf %379, %378 : vector<16x32xf32>
    %381 = arith.divf %379, %380 : vector<16x32xf32>
    %382 = vector.extract_strided_slice %361 {offsets = [0, 64], sizes = [16, 32], strides = [1, 1]} : vector<16x96xf32> to vector<16x32xf32>
    %383 = vector.extract_strided_slice %355 {offsets = [0, 64], sizes = [16, 32], strides = [1, 1]} : vector<16x96xf32> to vector<16x32xf32>
    %384 = arith.addf %382, %383 : vector<16x32xf32>
    %385 = vector.extract_strided_slice %358 {offsets = [0, 64], sizes = [16, 32], strides = [1, 1]} : vector<16x96xf32> to vector<16x32xf32>
    %386 = arith.addf %385, %5 : vector<16x32xf32>
    %387 = arith.mulf %371, %386 : vector<16x32xf32>
    %388 = arith.addf %384, %387 : vector<16x32xf32>
    %389 = math.tanh %388 : vector<16x32xf32>
    %cst_143 = arith.constant 1.000000e+00 : f32
    %390 = vector.broadcast %cst_143 : f32 to vector<16x32xf32>
    %391 = arith.subf %390, %381 : vector<16x32xf32>
    %392 = arith.mulf %391, %389 : vector<16x32xf32>
    %393 = arith.mulf %381, %303 : vector<16x32xf32>
    %394 = arith.addf %392, %393 : vector<16x32xf32>
    %395 = arith.truncf %394 : vector<16x32xf32> to vector<16x32xbf16>
    %396 = arith.index_cast %c0_i32_119 : i32 to index
    %c0_144 = arith.constant 0 : index
    %c0_145 = arith.constant 0 : index
    %397 = vector.load %arg23[%396, %c0_144, %c0_145] : memref<6x16x32xbf16, #tpu.memory_space<vmem>>, vector<1x16x32xbf16>
    %398 = vector.shape_cast %397 : vector<1x16x32xbf16> to vector<16x32xbf16>
    %399 = vector.shape_cast %395 : vector<16x32xbf16> to vector<1x16x32xbf16>
    tpu.vector_store %arg23[%396, %c0_144, %c0_145], %399 {strides = array<i32>} : memref<6x16x32xbf16, #tpu.memory_space<vmem>>, vector<1x16x32xbf16>,
    %c1_i32_146 = arith.constant 1 : i32
    %c0_147 = arith.constant 0 : index
    %c0_148 = arith.constant 0 : index
    %c0_149 = arith.constant 0 : index
    %400 = vector.load %arg21[%c0_147, %c0_148, %c0_149] : memref<8x16x32xf32, #tpu.memory_space<vmem>>, vector<8x16x32xf32>
    %c0_150 = arith.constant 0 : index
    %c0_151 = arith.constant 0 : index
    %c0_152 = arith.constant 0 : index
    %401 = vector.load %arg20[%c0_150, %c0_151, %c0_152] : memref<8x16x32xf32, #tpu.memory_space<vmem>>, vector<8x16x32xf32>
    %c0_153 = arith.constant 0 : index
    %c0_154 = arith.constant 0 : index
    %402 = vector.load %arg6[%c0_153, %c0_154] : memref<32x32xbf16, #tpu.memory_space<vmem>>, vector<32x32xbf16>
    %403 = arith.truncf %394 : vector<16x32xf32> to vector<16x32xbf16>
    %cst_155 = arith.constant dense<0.000000e+00> : vector<16x32xf32>
    %404 = tpu.matmul %403, %402, %cst_155 {dimension_numbers = #tpu.dot_dimension_numbers<[1], [0], [0], [1], [0, 0, 1, 1], [], []>} : vector<16x32xbf16>, vector<32x32xbf16>, vector<16x32xf32> -> vector<16x32xf32>
    %405 = arith.addf %404, %2 : vector<16x32xf32>
    %406 = vector.shape_cast %405 : vector<16x32xf32> to vector<1x16x32xf32>
    %407 = vector.broadcast %406 : vector<1x16x32xf32> to vector<8x16x32xf32>
    %408 = arith.addf %407, %400 : vector<8x16x32xf32>
    %409 = math.tanh %408 : vector<8x16x32xf32>
    %410 = vector.broadcast %7 : vector<1x1x32xf32> to vector<8x16x32xf32>
    %411 = arith.mulf %409, %410 : vector<8x16x32xf32>
    %cst_156 = arith.constant dense<0.000000e+00> : vector<8x16xf32>
    %412 = vector.multi_reduction <add>, %411, %cst_156 [2] : vector<8x16x32xf32> to vector<8x16xf32>
    %413 = vector.shape_cast %412 : vector<8x16xf32> to vector<8x16x1xf32>
    %cst_157 = arith.constant dense<0xFF800000> : vector<16x1xf32>
    %414 = vector.multi_reduction <maximumf>, %413, %cst_157 [0] : vector<8x16x1xf32> to vector<16x1xf32>
    %415 = vector.shape_cast %414 : vector<16x1xf32> to vector<1x16x1xf32>
    %416 = vector.broadcast %415 : vector<1x16x1xf32> to vector<8x16x1xf32>
    %417 = arith.subf %413, %416 : vector<8x16x1xf32>
    %418 = math.exp %417 : vector<8x16x1xf32>
    %419 = vector.broadcast %418 : vector<8x16x1xf32> to vector<8x16x32xf32>
    %420 = arith.mulf %419, %401 : vector<8x16x32xf32>
    %cst_158 = arith.constant dense<0.000000e+00> : vector<16x32xf32>
    %421 = vector.multi_reduction <add>, %420, %cst_158 [0] : vector<8x16x32xf32> to vector<16x32xf32>
    %cst_159 = arith.constant dense<0.000000e+00> : vector<16x1xf32>
    %422 = vector.multi_reduction <add>, %418, %cst_159 [0] : vector<8x16x1xf32> to vector<16x1xf32>
    %423 = vector.broadcast %422 : vector<16x1xf32> to vector<16x32xf32>
    %424 = arith.divf %421, %423 : vector<16x32xf32>
    %c0_160 = arith.constant 0 : index
    %c0_161 = arith.constant 0 : index
    %425 = vector.load %arg12[%c0_160, %c0_161] : memref<32x96xbf16, #tpu.memory_space<vmem>>, vector<32x96xbf16>
    %426 = arith.truncf %424 : vector<16x32xf32> to vector<16x32xbf16>
    %cst_162 = arith.constant dense<0.000000e+00> : vector<16x96xf32>
    %427 = tpu.matmul %426, %425, %cst_162 {dimension_numbers = #tpu.dot_dimension_numbers<[1], [0], [0], [1], [0, 0, 1, 1], [], []>} : vector<16x32xbf16>, vector<32x96xbf16>, vector<16x96xf32> -> vector<16x96xf32>
    %c0_163 = arith.constant 0 : index
    %c0_164 = arith.constant 0 : index
    %428 = vector.load %arg13[%c0_163, %c0_164] : memref<32x96xbf16, #tpu.memory_space<vmem>>, vector<32x96xbf16>
    %429 = arith.truncf %394 : vector<16x32xf32> to vector<16x32xbf16>
    %cst_165 = arith.constant dense<0.000000e+00> : vector<16x96xf32>
    %430 = tpu.matmul %429, %428, %cst_165 {dimension_numbers = #tpu.dot_dimension_numbers<[1], [0], [0], [1], [0, 0, 1, 1], [], []>} : vector<16x32xbf16>, vector<32x96xbf16>, vector<16x96xf32> -> vector<16x96xf32>
    %431 = arith.index_cast %c1_i32_146 : i32 to index
    %c0_166 = arith.constant 0 : index
    %c0_167 = arith.constant 0 : index
    %432 = vector.load %arg22[%431, %c0_166, %c0_167] : memref<6x16x96xf32, #tpu.memory_space<vmem>>, vector<1x16x96xf32>
    %433 = vector.shape_cast %432 : vector<1x16x96xf32> to vector<16x96xf32>
    %434 = vector.extract_strided_slice %433 {offsets = [0, 0], sizes = [16, 32], strides = [1, 1]} : vector<16x96xf32> to vector<16x32xf32>
    %435 = vector.extract_strided_slice %427 {offsets = [0, 0], sizes = [16, 32], strides = [1, 1]} : vector<16x96xf32> to vector<16x32xf32>
    %436 = arith.addf %434, %435 : vector<16x32xf32>
    %437 = vector.extract_strided_slice %430 {offsets = [0, 0], sizes = [16, 32], strides = [1, 1]} : vector<16x96xf32> to vector<16x32xf32>
    %438 = arith.addf %436, %437 : vector<16x32xf32>
    %439 = arith.negf %438 : vector<16x32xf32>
    %440 = math.exp %439 : vector<16x32xf32>
    %cst_168 = arith.constant 1.000000e+00 : f32
    %441 = vector.broadcast %cst_168 : f32 to vector<16x32xf32>
    %442 = arith.addf %441, %440 : vector<16x32xf32>
    %443 = arith.divf %441, %442 : vector<16x32xf32>
    %444 = vector.extract_strided_slice %433 {offsets = [0, 32], sizes = [16, 32], strides = [1, 1]} : vector<16x96xf32> to vector<16x32xf32>
    %445 = vector.extract_strided_slice %427 {offsets = [0, 32], sizes = [16, 32], strides = [1, 1]} : vector<16x96xf32> to vector<16x32xf32>
    %446 = arith.addf %444, %445 : vector<16x32xf32>
    %447 = vector.extract_strided_slice %430 {offsets = [0, 32], sizes = [16, 32], strides = [1, 1]} : vector<16x96xf32> to vector<16x32xf32>
    %448 = arith.addf %446, %447 : vector<16x32xf32>
    %449 = arith.negf %448 : vector<16x32xf32>
    %450 = math.exp %449 : vector<16x32xf32>
    %cst_169 = arith.constant 1.000000e+00 : f32
    %451 = vector.broadcast %cst_169 : f32 to vector<16x32xf32>
    %452 = arith.addf %451, %450 : vector<16x32xf32>
    %453 = arith.divf %451, %452 : vector<16x32xf32>
    %454 = vector.extract_strided_slice %433 {offsets = [0, 64], sizes = [16, 32], strides = [1, 1]} : vector<16x96xf32> to vector<16x32xf32>
    %455 = vector.extract_strided_slice %427 {offsets = [0, 64], sizes = [16, 32], strides = [1, 1]} : vector<16x96xf32> to vector<16x32xf32>
    %456 = arith.addf %454, %455 : vector<16x32xf32>
    %457 = vector.extract_strided_slice %430 {offsets = [0, 64], sizes = [16, 32], strides = [1, 1]} : vector<16x96xf32> to vector<16x32xf32>
    %458 = arith.addf %457, %5 : vector<16x32xf32>
    %459 = arith.mulf %443, %458 : vector<16x32xf32>
    %460 = arith.addf %456, %459 : vector<16x32xf32>
    %461 = math.tanh %460 : vector<16x32xf32>
    %cst_170 = arith.constant 1.000000e+00 : f32
    %462 = vector.broadcast %cst_170 : f32 to vector<16x32xf32>
    %463 = arith.subf %462, %453 : vector<16x32xf32>
    %464 = arith.mulf %463, %461 : vector<16x32xf32>
    %465 = arith.mulf %453, %394 : vector<16x32xf32>
    %466 = arith.addf %464, %465 : vector<16x32xf32>
    %467 = arith.truncf %466 : vector<16x32xf32> to vector<16x32xbf16>
    %468 = arith.index_cast %c1_i32_146 : i32 to index
    %c0_171 = arith.constant 0 : index
    %c0_172 = arith.constant 0 : index
    %469 = vector.load %arg23[%468, %c0_171, %c0_172] : memref<6x16x32xbf16, #tpu.memory_space<vmem>>, vector<1x16x32xbf16>
    %470 = vector.shape_cast %469 : vector<1x16x32xbf16> to vector<16x32xbf16>
    %471 = vector.shape_cast %467 : vector<16x32xbf16> to vector<1x16x32xbf16>
    tpu.vector_store %arg23[%468, %c0_171, %c0_172], %471 {strides = array<i32>} : memref<6x16x32xbf16, #tpu.memory_space<vmem>>, vector<1x16x32xbf16>,
    %c2_i32_173 = arith.constant 2 : i32
    %c0_174 = arith.constant 0 : index
    %c0_175 = arith.constant 0 : index
    %c0_176 = arith.constant 0 : index
    %472 = vector.load %arg21[%c0_174, %c0_175, %c0_176] : memref<8x16x32xf32, #tpu.memory_space<vmem>>, vector<8x16x32xf32>
    %c0_177 = arith.constant 0 : index
    %c0_178 = arith.constant 0 : index
    %c0_179 = arith.constant 0 : index
    %473 = vector.load %arg20[%c0_177, %c0_178, %c0_179] : memref<8x16x32xf32, #tpu.memory_space<vmem>>, vector<8x16x32xf32>
    %c0_180 = arith.constant 0 : index
    %c0_181 = arith.constant 0 : index
    %474 = vector.load %arg6[%c0_180, %c0_181] : memref<32x32xbf16, #tpu.memory_space<vmem>>, vector<32x32xbf16>
    %475 = arith.truncf %466 : vector<16x32xf32> to vector<16x32xbf16>
    %cst_182 = arith.constant dense<0.000000e+00> : vector<16x32xf32>
    %476 = tpu.matmul %475, %474, %cst_182 {dimension_numbers = #tpu.dot_dimension_numbers<[1], [0], [0], [1], [0, 0, 1, 1], [], []>} : vector<16x32xbf16>, vector<32x32xbf16>, vector<16x32xf32> -> vector<16x32xf32>
    %477 = arith.addf %476, %2 : vector<16x32xf32>
    %478 = vector.shape_cast %477 : vector<16x32xf32> to vector<1x16x32xf32>
    %479 = vector.broadcast %478 : vector<1x16x32xf32> to vector<8x16x32xf32>
    %480 = arith.addf %479, %472 : vector<8x16x32xf32>
    %481 = math.tanh %480 : vector<8x16x32xf32>
    %482 = vector.broadcast %7 : vector<1x1x32xf32> to vector<8x16x32xf32>
    %483 = arith.mulf %481, %482 : vector<8x16x32xf32>
    %cst_183 = arith.constant dense<0.000000e+00> : vector<8x16xf32>
    %484 = vector.multi_reduction <add>, %483, %cst_183 [2] : vector<8x16x32xf32> to vector<8x16xf32>
    %485 = vector.shape_cast %484 : vector<8x16xf32> to vector<8x16x1xf32>
    %cst_184 = arith.constant dense<0xFF800000> : vector<16x1xf32>
    %486 = vector.multi_reduction <maximumf>, %485, %cst_184 [0] : vector<8x16x1xf32> to vector<16x1xf32>
    %487 = vector.shape_cast %486 : vector<16x1xf32> to vector<1x16x1xf32>
    %488 = vector.broadcast %487 : vector<1x16x1xf32> to vector<8x16x1xf32>
    %489 = arith.subf %485, %488 : vector<8x16x1xf32>
    %490 = math.exp %489 : vector<8x16x1xf32>
    %491 = vector.broadcast %490 : vector<8x16x1xf32> to vector<8x16x32xf32>
    %492 = arith.mulf %491, %473 : vector<8x16x32xf32>
    %cst_185 = arith.constant dense<0.000000e+00> : vector<16x32xf32>
    %493 = vector.multi_reduction <add>, %492, %cst_185 [0] : vector<8x16x32xf32> to vector<16x32xf32>
    %cst_186 = arith.constant dense<0.000000e+00> : vector<16x1xf32>
    %494 = vector.multi_reduction <add>, %490, %cst_186 [0] : vector<8x16x1xf32> to vector<16x1xf32>
    %495 = vector.broadcast %494 : vector<16x1xf32> to vector<16x32xf32>
    %496 = arith.divf %493, %495 : vector<16x32xf32>
    %c0_187 = arith.constant 0 : index
    %c0_188 = arith.constant 0 : index
    %497 = vector.load %arg12[%c0_187, %c0_188] : memref<32x96xbf16, #tpu.memory_space<vmem>>, vector<32x96xbf16>
    %498 = arith.truncf %496 : vector<16x32xf32> to vector<16x32xbf16>
    %cst_189 = arith.constant dense<0.000000e+00> : vector<16x96xf32>
    %499 = tpu.matmul %498, %497, %cst_189 {dimension_numbers = #tpu.dot_dimension_numbers<[1], [0], [0], [1], [0, 0, 1, 1], [], []>} : vector<16x32xbf16>, vector<32x96xbf16>, vector<16x96xf32> -> vector<16x96xf32>
    %c0_190 = arith.constant 0 : index
    %c0_191 = arith.constant 0 : index
    %500 = vector.load %arg13[%c0_190, %c0_191] : memref<32x96xbf16, #tpu.memory_space<vmem>>, vector<32x96xbf16>
    %501 = arith.truncf %466 : vector<16x32xf32> to vector<16x32xbf16>
    %cst_192 = arith.constant dense<0.000000e+00> : vector<16x96xf32>
    %502 = tpu.matmul %501, %500, %cst_192 {dimension_numbers = #tpu.dot_dimension_numbers<[1], [0], [0], [1], [0, 0, 1, 1], [], []>} : vector<16x32xbf16>, vector<32x96xbf16>, vector<16x96xf32> -> vector<16x96xf32>
    %503 = arith.index_cast %c2_i32_173 : i32 to index
    %c0_193 = arith.constant 0 : index
    %c0_194 = arith.constant 0 : index
    %504 = vector.load %arg22[%503, %c0_193, %c0_194] : memref<6x16x96xf32, #tpu.memory_space<vmem>>, vector<1x16x96xf32>
    %505 = vector.shape_cast %504 : vector<1x16x96xf32> to vector<16x96xf32>
    %506 = vector.extract_strided_slice %505 {offsets = [0, 0], sizes = [16, 32], strides = [1, 1]} : vector<16x96xf32> to vector<16x32xf32>
    %507 = vector.extract_strided_slice %499 {offsets = [0, 0], sizes = [16, 32], strides = [1, 1]} : vector<16x96xf32> to vector<16x32xf32>
    %508 = arith.addf %506, %507 : vector<16x32xf32>
    %509 = vector.extract_strided_slice %502 {offsets = [0, 0], sizes = [16, 32], strides = [1, 1]} : vector<16x96xf32> to vector<16x32xf32>
    %510 = arith.addf %508, %509 : vector<16x32xf32>
    %511 = arith.negf %510 : vector<16x32xf32>
    %512 = math.exp %511 : vector<16x32xf32>
    %cst_195 = arith.constant 1.000000e+00 : f32
    %513 = vector.broadcast %cst_195 : f32 to vector<16x32xf32>
    %514 = arith.addf %513, %512 : vector<16x32xf32>
    %515 = arith.divf %513, %514 : vector<16x32xf32>
    %516 = vector.extract_strided_slice %505 {offsets = [0, 32], sizes = [16, 32], strides = [1, 1]} : vector<16x96xf32> to vector<16x32xf32>
    %517 = vector.extract_strided_slice %499 {offsets = [0, 32], sizes = [16, 32], strides = [1, 1]} : vector<16x96xf32> to vector<16x32xf32>
    %518 = arith.addf %516, %517 : vector<16x32xf32>
    %519 = vector.extract_strided_slice %502 {offsets = [0, 32], sizes = [16, 32], strides = [1, 1]} : vector<16x96xf32> to vector<16x32xf32>
    %520 = arith.addf %518, %519 : vector<16x32xf32>
    %521 = arith.negf %520 : vector<16x32xf32>
    %522 = math.exp %521 : vector<16x32xf32>
    %cst_196 = arith.constant 1.000000e+00 : f32
    %523 = vector.broadcast %cst_196 : f32 to vector<16x32xf32>
    %524 = arith.addf %523, %522 : vector<16x32xf32>
    %525 = arith.divf %523, %524 : vector<16x32xf32>
    %526 = vector.extract_strided_slice %505 {offsets = [0, 64], sizes = [16, 32], strides = [1, 1]} : vector<16x96xf32> to vector<16x32xf32>
    %527 = vector.extract_strided_slice %499 {offsets = [0, 64], sizes = [16, 32], strides = [1, 1]} : vector<16x96xf32> to vector<16x32xf32>
    %528 = arith.addf %526, %527 : vector<16x32xf32>
    %529 = vector.extract_strided_slice %502 {offsets = [0, 64], sizes = [16, 32], strides = [1, 1]} : vector<16x96xf32> to vector<16x32xf32>
    %530 = arith.addf %529, %5 : vector<16x32xf32>
    %531 = arith.mulf %515, %530 : vector<16x32xf32>
    %532 = arith.addf %528, %531 : vector<16x32xf32>
    %533 = math.tanh %532 : vector<16x32xf32>
    %cst_197 = arith.constant 1.000000e+00 : f32
    %534 = vector.broadcast %cst_197 : f32 to vector<16x32xf32>
    %535 = arith.subf %534, %525 : vector<16x32xf32>
    %536 = arith.mulf %535, %533 : vector<16x32xf32>
    %537 = arith.mulf %525, %466 : vector<16x32xf32>
    %538 = arith.addf %536, %537 : vector<16x32xf32>
    %539 = arith.truncf %538 : vector<16x32xf32> to vector<16x32xbf16>
    %540 = arith.index_cast %c2_i32_173 : i32 to index
    %c0_198 = arith.constant 0 : index
    %c0_199 = arith.constant 0 : index
    %541 = vector.load %arg23[%540, %c0_198, %c0_199] : memref<6x16x32xbf16, #tpu.memory_space<vmem>>, vector<1x16x32xbf16>
    %542 = vector.shape_cast %541 : vector<1x16x32xbf16> to vector<16x32xbf16>
    %543 = vector.shape_cast %539 : vector<16x32xbf16> to vector<1x16x32xbf16>
    tpu.vector_store %arg23[%540, %c0_198, %c0_199], %543 {strides = array<i32>} : memref<6x16x32xbf16, #tpu.memory_space<vmem>>, vector<1x16x32xbf16>,
    %c3_i32_200 = arith.constant 3 : i32
    %c0_201 = arith.constant 0 : index
    %c0_202 = arith.constant 0 : index
    %c0_203 = arith.constant 0 : index
    %544 = vector.load %arg21[%c0_201, %c0_202, %c0_203] : memref<8x16x32xf32, #tpu.memory_space<vmem>>, vector<8x16x32xf32>
    %c0_204 = arith.constant 0 : index
    %c0_205 = arith.constant 0 : index
    %c0_206 = arith.constant 0 : index
    %545 = vector.load %arg20[%c0_204, %c0_205, %c0_206] : memref<8x16x32xf32, #tpu.memory_space<vmem>>, vector<8x16x32xf32>
    %c0_207 = arith.constant 0 : index
    %c0_208 = arith.constant 0 : index
    %546 = vector.load %arg6[%c0_207, %c0_208] : memref<32x32xbf16, #tpu.memory_space<vmem>>, vector<32x32xbf16>
    %547 = arith.truncf %538 : vector<16x32xf32> to vector<16x32xbf16>
    %cst_209 = arith.constant dense<0.000000e+00> : vector<16x32xf32>
    %548 = tpu.matmul %547, %546, %cst_209 {dimension_numbers = #tpu.dot_dimension_numbers<[1], [0], [0], [1], [0, 0, 1, 1], [], []>} : vector<16x32xbf16>, vector<32x32xbf16>, vector<16x32xf32> -> vector<16x32xf32>
    %549 = arith.addf %548, %2 : vector<16x32xf32>
    %550 = vector.shape_cast %549 : vector<16x32xf32> to vector<1x16x32xf32>
    %551 = vector.broadcast %550 : vector<1x16x32xf32> to vector<8x16x32xf32>
    %552 = arith.addf %551, %544 : vector<8x16x32xf32>
    %553 = math.tanh %552 : vector<8x16x32xf32>
    %554 = vector.broadcast %7 : vector<1x1x32xf32> to vector<8x16x32xf32>
    %555 = arith.mulf %553, %554 : vector<8x16x32xf32>
    %cst_210 = arith.constant dense<0.000000e+00> : vector<8x16xf32>
    %556 = vector.multi_reduction <add>, %555, %cst_210 [2] : vector<8x16x32xf32> to vector<8x16xf32>
    %557 = vector.shape_cast %556 : vector<8x16xf32> to vector<8x16x1xf32>
    %cst_211 = arith.constant dense<0xFF800000> : vector<16x1xf32>
    %558 = vector.multi_reduction <maximumf>, %557, %cst_211 [0] : vector<8x16x1xf32> to vector<16x1xf32>
    %559 = vector.shape_cast %558 : vector<16x1xf32> to vector<1x16x1xf32>
    %560 = vector.broadcast %559 : vector<1x16x1xf32> to vector<8x16x1xf32>
    %561 = arith.subf %557, %560 : vector<8x16x1xf32>
    %562 = math.exp %561 : vector<8x16x1xf32>
    %563 = vector.broadcast %562 : vector<8x16x1xf32> to vector<8x16x32xf32>
    %564 = arith.mulf %563, %545 : vector<8x16x32xf32>
    %cst_212 = arith.constant dense<0.000000e+00> : vector<16x32xf32>
    %565 = vector.multi_reduction <add>, %564, %cst_212 [0] : vector<8x16x32xf32> to vector<16x32xf32>
    %cst_213 = arith.constant dense<0.000000e+00> : vector<16x1xf32>
    %566 = vector.multi_reduction <add>, %562, %cst_213 [0] : vector<8x16x1xf32> to vector<16x1xf32>
    %567 = vector.broadcast %566 : vector<16x1xf32> to vector<16x32xf32>
    %568 = arith.divf %565, %567 : vector<16x32xf32>
    %c0_214 = arith.constant 0 : index
    %c0_215 = arith.constant 0 : index
    %569 = vector.load %arg12[%c0_214, %c0_215] : memref<32x96xbf16, #tpu.memory_space<vmem>>, vector<32x96xbf16>
    %570 = arith.truncf %568 : vector<16x32xf32> to vector<16x32xbf16>
    %cst_216 = arith.constant dense<0.000000e+00> : vector<16x96xf32>
    %571 = tpu.matmul %570, %569, %cst_216 {dimension_numbers = #tpu.dot_dimension_numbers<[1], [0], [0], [1], [0, 0, 1, 1], [], []>} : vector<16x32xbf16>, vector<32x96xbf16>, vector<16x96xf32> -> vector<16x96xf32>
    %c0_217 = arith.constant 0 : index
    %c0_218 = arith.constant 0 : index
    %572 = vector.load %arg13[%c0_217, %c0_218] : memref<32x96xbf16, #tpu.memory_space<vmem>>, vector<32x96xbf16>
    %573 = arith.truncf %538 : vector<16x32xf32> to vector<16x32xbf16>
    %cst_219 = arith.constant dense<0.000000e+00> : vector<16x96xf32>
    %574 = tpu.matmul %573, %572, %cst_219 {dimension_numbers = #tpu.dot_dimension_numbers<[1], [0], [0], [1], [0, 0, 1, 1], [], []>} : vector<16x32xbf16>, vector<32x96xbf16>, vector<16x96xf32> -> vector<16x96xf32>
    %575 = arith.index_cast %c3_i32_200 : i32 to index
    %c0_220 = arith.constant 0 : index
    %c0_221 = arith.constant 0 : index
    %576 = vector.load %arg22[%575, %c0_220, %c0_221] : memref<6x16x96xf32, #tpu.memory_space<vmem>>, vector<1x16x96xf32>
    %577 = vector.shape_cast %576 : vector<1x16x96xf32> to vector<16x96xf32>
    %578 = vector.extract_strided_slice %577 {offsets = [0, 0], sizes = [16, 32], strides = [1, 1]} : vector<16x96xf32> to vector<16x32xf32>
    %579 = vector.extract_strided_slice %571 {offsets = [0, 0], sizes = [16, 32], strides = [1, 1]} : vector<16x96xf32> to vector<16x32xf32>
    %580 = arith.addf %578, %579 : vector<16x32xf32>
    %581 = vector.extract_strided_slice %574 {offsets = [0, 0], sizes = [16, 32], strides = [1, 1]} : vector<16x96xf32> to vector<16x32xf32>
    %582 = arith.addf %580, %581 : vector<16x32xf32>
    %583 = arith.negf %582 : vector<16x32xf32>
    %584 = math.exp %583 : vector<16x32xf32>
    %cst_222 = arith.constant 1.000000e+00 : f32
    %585 = vector.broadcast %cst_222 : f32 to vector<16x32xf32>
    %586 = arith.addf %585, %584 : vector<16x32xf32>
    %587 = arith.divf %585, %586 : vector<16x32xf32>
    %588 = vector.extract_strided_slice %577 {offsets = [0, 32], sizes = [16, 32], strides = [1, 1]} : vector<16x96xf32> to vector<16x32xf32>
    %589 = vector.extract_strided_slice %571 {offsets = [0, 32], sizes = [16, 32], strides = [1, 1]} : vector<16x96xf32> to vector<16x32xf32>
    %590 = arith.addf %588, %589 : vector<16x32xf32>
    %591 = vector.extract_strided_slice %574 {offsets = [0, 32], sizes = [16, 32], strides = [1, 1]} : vector<16x96xf32> to vector<16x32xf32>
    %592 = arith.addf %590, %591 : vector<16x32xf32>
    %593 = arith.negf %592 : vector<16x32xf32>
    %594 = math.exp %593 : vector<16x32xf32>
    %cst_223 = arith.constant 1.000000e+00 : f32
    %595 = vector.broadcast %cst_223 : f32 to vector<16x32xf32>
    %596 = arith.addf %595, %594 : vector<16x32xf32>
    %597 = arith.divf %595, %596 : vector<16x32xf32>
    %598 = vector.extract_strided_slice %577 {offsets = [0, 64], sizes = [16, 32], strides = [1, 1]} : vector<16x96xf32> to vector<16x32xf32>
    %599 = vector.extract_strided_slice %571 {offsets = [0, 64], sizes = [16, 32], strides = [1, 1]} : vector<16x96xf32> to vector<16x32xf32>
    %600 = arith.addf %598, %599 : vector<16x32xf32>
    %601 = vector.extract_strided_slice %574 {offsets = [0, 64], sizes = [16, 32], strides = [1, 1]} : vector<16x96xf32> to vector<16x32xf32>
    %602 = arith.addf %601, %5 : vector<16x32xf32>
    %603 = arith.mulf %587, %602 : vector<16x32xf32>
    %604 = arith.addf %600, %603 : vector<16x32xf32>
    %605 = math.tanh %604 : vector<16x32xf32>
    %cst_224 = arith.constant 1.000000e+00 : f32
    %606 = vector.broadcast %cst_224 : f32 to vector<16x32xf32>
    %607 = arith.subf %606, %597 : vector<16x32xf32>
    %608 = arith.mulf %607, %605 : vector<16x32xf32>
    %609 = arith.mulf %597, %538 : vector<16x32xf32>
    %610 = arith.addf %608, %609 : vector<16x32xf32>
    %611 = arith.truncf %610 : vector<16x32xf32> to vector<16x32xbf16>
    %612 = arith.index_cast %c3_i32_200 : i32 to index
    %c0_225 = arith.constant 0 : index
    %c0_226 = arith.constant 0 : index
    %613 = vector.load %arg23[%612, %c0_225, %c0_226] : memref<6x16x32xbf16, #tpu.memory_space<vmem>>, vector<1x16x32xbf16>
    %614 = vector.shape_cast %613 : vector<1x16x32xbf16> to vector<16x32xbf16>
    %615 = vector.shape_cast %611 : vector<16x32xbf16> to vector<1x16x32xbf16>
    tpu.vector_store %arg23[%612, %c0_225, %c0_226], %615 {strides = array<i32>} : memref<6x16x32xbf16, #tpu.memory_space<vmem>>, vector<1x16x32xbf16>,
    %c4_i32_227 = arith.constant 4 : i32
    %c0_228 = arith.constant 0 : index
    %c0_229 = arith.constant 0 : index
    %c0_230 = arith.constant 0 : index
    %616 = vector.load %arg21[%c0_228, %c0_229, %c0_230] : memref<8x16x32xf32, #tpu.memory_space<vmem>>, vector<8x16x32xf32>
    %c0_231 = arith.constant 0 : index
    %c0_232 = arith.constant 0 : index
    %c0_233 = arith.constant 0 : index
    %617 = vector.load %arg20[%c0_231, %c0_232, %c0_233] : memref<8x16x32xf32, #tpu.memory_space<vmem>>, vector<8x16x32xf32>
    %c0_234 = arith.constant 0 : index
    %c0_235 = arith.constant 0 : index
    %618 = vector.load %arg6[%c0_234, %c0_235] : memref<32x32xbf16, #tpu.memory_space<vmem>>, vector<32x32xbf16>
    %619 = arith.truncf %610 : vector<16x32xf32> to vector<16x32xbf16>
    %cst_236 = arith.constant dense<0.000000e+00> : vector<16x32xf32>
    %620 = tpu.matmul %619, %618, %cst_236 {dimension_numbers = #tpu.dot_dimension_numbers<[1], [0], [0], [1], [0, 0, 1, 1], [], []>} : vector<16x32xbf16>, vector<32x32xbf16>, vector<16x32xf32> -> vector<16x32xf32>
    %621 = arith.addf %620, %2 : vector<16x32xf32>
    %622 = vector.shape_cast %621 : vector<16x32xf32> to vector<1x16x32xf32>
    %623 = vector.broadcast %622 : vector<1x16x32xf32> to vector<8x16x32xf32>
    %624 = arith.addf %623, %616 : vector<8x16x32xf32>
    %625 = math.tanh %624 : vector<8x16x32xf32>
    %626 = vector.broadcast %7 : vector<1x1x32xf32> to vector<8x16x32xf32>
    %627 = arith.mulf %625, %626 : vector<8x16x32xf32>
    %cst_237 = arith.constant dense<0.000000e+00> : vector<8x16xf32>
    %628 = vector.multi_reduction <add>, %627, %cst_237 [2] : vector<8x16x32xf32> to vector<8x16xf32>
    %629 = vector.shape_cast %628 : vector<8x16xf32> to vector<8x16x1xf32>
    %cst_238 = arith.constant dense<0xFF800000> : vector<16x1xf32>
    %630 = vector.multi_reduction <maximumf>, %629, %cst_238 [0] : vector<8x16x1xf32> to vector<16x1xf32>
    %631 = vector.shape_cast %630 : vector<16x1xf32> to vector<1x16x1xf32>
    %632 = vector.broadcast %631 : vector<1x16x1xf32> to vector<8x16x1xf32>
    %633 = arith.subf %629, %632 : vector<8x16x1xf32>
    %634 = math.exp %633 : vector<8x16x1xf32>
    %635 = vector.broadcast %634 : vector<8x16x1xf32> to vector<8x16x32xf32>
    %636 = arith.mulf %635, %617 : vector<8x16x32xf32>
    %cst_239 = arith.constant dense<0.000000e+00> : vector<16x32xf32>
    %637 = vector.multi_reduction <add>, %636, %cst_239 [0] : vector<8x16x32xf32> to vector<16x32xf32>
    %cst_240 = arith.constant dense<0.000000e+00> : vector<16x1xf32>
    %638 = vector.multi_reduction <add>, %634, %cst_240 [0] : vector<8x16x1xf32> to vector<16x1xf32>
    %639 = vector.broadcast %638 : vector<16x1xf32> to vector<16x32xf32>
    %640 = arith.divf %637, %639 : vector<16x32xf32>
    %c0_241 = arith.constant 0 : index
    %c0_242 = arith.constant 0 : index
    %641 = vector.load %arg12[%c0_241, %c0_242] : memref<32x96xbf16, #tpu.memory_space<vmem>>, vector<32x96xbf16>
    %642 = arith.truncf %640 : vector<16x32xf32> to vector<16x32xbf16>
    %cst_243 = arith.constant dense<0.000000e+00> : vector<16x96xf32>
    %643 = tpu.matmul %642, %641, %cst_243 {dimension_numbers = #tpu.dot_dimension_numbers<[1], [0], [0], [1], [0, 0, 1, 1], [], []>} : vector<16x32xbf16>, vector<32x96xbf16>, vector<16x96xf32> -> vector<16x96xf32>
    %c0_244 = arith.constant 0 : index
    %c0_245 = arith.constant 0 : index
    %644 = vector.load %arg13[%c0_244, %c0_245] : memref<32x96xbf16, #tpu.memory_space<vmem>>, vector<32x96xbf16>
    %645 = arith.truncf %610 : vector<16x32xf32> to vector<16x32xbf16>
    %cst_246 = arith.constant dense<0.000000e+00> : vector<16x96xf32>
    %646 = tpu.matmul %645, %644, %cst_246 {dimension_numbers = #tpu.dot_dimension_numbers<[1], [0], [0], [1], [0, 0, 1, 1], [], []>} : vector<16x32xbf16>, vector<32x96xbf16>, vector<16x96xf32> -> vector<16x96xf32>
    %647 = arith.index_cast %c4_i32_227 : i32 to index
    %c0_247 = arith.constant 0 : index
    %c0_248 = arith.constant 0 : index
    %648 = vector.load %arg22[%647, %c0_247, %c0_248] : memref<6x16x96xf32, #tpu.memory_space<vmem>>, vector<1x16x96xf32>
    %649 = vector.shape_cast %648 : vector<1x16x96xf32> to vector<16x96xf32>
    %650 = vector.extract_strided_slice %649 {offsets = [0, 0], sizes = [16, 32], strides = [1, 1]} : vector<16x96xf32> to vector<16x32xf32>
    %651 = vector.extract_strided_slice %643 {offsets = [0, 0], sizes = [16, 32], strides = [1, 1]} : vector<16x96xf32> to vector<16x32xf32>
    %652 = arith.addf %650, %651 : vector<16x32xf32>
    %653 = vector.extract_strided_slice %646 {offsets = [0, 0], sizes = [16, 32], strides = [1, 1]} : vector<16x96xf32> to vector<16x32xf32>
    %654 = arith.addf %652, %653 : vector<16x32xf32>
    %655 = arith.negf %654 : vector<16x32xf32>
    %656 = math.exp %655 : vector<16x32xf32>
    %cst_249 = arith.constant 1.000000e+00 : f32
    %657 = vector.broadcast %cst_249 : f32 to vector<16x32xf32>
    %658 = arith.addf %657, %656 : vector<16x32xf32>
    %659 = arith.divf %657, %658 : vector<16x32xf32>
    %660 = vector.extract_strided_slice %649 {offsets = [0, 32], sizes = [16, 32], strides = [1, 1]} : vector<16x96xf32> to vector<16x32xf32>
    %661 = vector.extract_strided_slice %643 {offsets = [0, 32], sizes = [16, 32], strides = [1, 1]} : vector<16x96xf32> to vector<16x32xf32>
    %662 = arith.addf %660, %661 : vector<16x32xf32>
    %663 = vector.extract_strided_slice %646 {offsets = [0, 32], sizes = [16, 32], strides = [1, 1]} : vector<16x96xf32> to vector<16x32xf32>
    %664 = arith.addf %662, %663 : vector<16x32xf32>
    %665 = arith.negf %664 : vector<16x32xf32>
    %666 = math.exp %665 : vector<16x32xf32>
    %cst_250 = arith.constant 1.000000e+00 : f32
    %667 = vector.broadcast %cst_250 : f32 to vector<16x32xf32>
    %668 = arith.addf %667, %666 : vector<16x32xf32>
    %669 = arith.divf %667, %668 : vector<16x32xf32>
    %670 = vector.extract_strided_slice %649 {offsets = [0, 64], sizes = [16, 32], strides = [1, 1]} : vector<16x96xf32> to vector<16x32xf32>
    %671 = vector.extract_strided_slice %643 {offsets = [0, 64], sizes = [16, 32], strides = [1, 1]} : vector<16x96xf32> to vector<16x32xf32>
    %672 = arith.addf %670, %671 : vector<16x32xf32>
    %673 = vector.extract_strided_slice %646 {offsets = [0, 64], sizes = [16, 32], strides = [1, 1]} : vector<16x96xf32> to vector<16x32xf32>
    %674 = arith.addf %673, %5 : vector<16x32xf32>
    %675 = arith.mulf %659, %674 : vector<16x32xf32>
    %676 = arith.addf %672, %675 : vector<16x32xf32>
    %677 = math.tanh %676 : vector<16x32xf32>
    %cst_251 = arith.constant 1.000000e+00 : f32
    %678 = vector.broadcast %cst_251 : f32 to vector<16x32xf32>
    %679 = arith.subf %678, %669 : vector<16x32xf32>
    %680 = arith.mulf %679, %677 : vector<16x32xf32>
    %681 = arith.mulf %669, %610 : vector<16x32xf32>
    %682 = arith.addf %680, %681 : vector<16x32xf32>
    %683 = arith.truncf %682 : vector<16x32xf32> to vector<16x32xbf16>
    %684 = arith.index_cast %c4_i32_227 : i32 to index
    %c0_252 = arith.constant 0 : index
    %c0_253 = arith.constant 0 : index
    %685 = vector.load %arg23[%684, %c0_252, %c0_253] : memref<6x16x32xbf16, #tpu.memory_space<vmem>>, vector<1x16x32xbf16>
    %686 = vector.shape_cast %685 : vector<1x16x32xbf16> to vector<16x32xbf16>
    %687 = vector.shape_cast %683 : vector<16x32xbf16> to vector<1x16x32xbf16>
    tpu.vector_store %arg23[%684, %c0_252, %c0_253], %687 {strides = array<i32>} : memref<6x16x32xbf16, #tpu.memory_space<vmem>>, vector<1x16x32xbf16>,
    %c5_i32_254 = arith.constant 5 : i32
    %c0_255 = arith.constant 0 : index
    %c0_256 = arith.constant 0 : index
    %c0_257 = arith.constant 0 : index
    %688 = vector.load %arg21[%c0_255, %c0_256, %c0_257] : memref<8x16x32xf32, #tpu.memory_space<vmem>>, vector<8x16x32xf32>
    %c0_258 = arith.constant 0 : index
    %c0_259 = arith.constant 0 : index
    %c0_260 = arith.constant 0 : index
    %689 = vector.load %arg20[%c0_258, %c0_259, %c0_260] : memref<8x16x32xf32, #tpu.memory_space<vmem>>, vector<8x16x32xf32>
    %c0_261 = arith.constant 0 : index
    %c0_262 = arith.constant 0 : index
    %690 = vector.load %arg6[%c0_261, %c0_262] : memref<32x32xbf16, #tpu.memory_space<vmem>>, vector<32x32xbf16>
    %691 = arith.truncf %682 : vector<16x32xf32> to vector<16x32xbf16>
    %cst_263 = arith.constant dense<0.000000e+00> : vector<16x32xf32>
    %692 = tpu.matmul %691, %690, %cst_263 {dimension_numbers = #tpu.dot_dimension_numbers<[1], [0], [0], [1], [0, 0, 1, 1], [], []>} : vector<16x32xbf16>, vector<32x32xbf16>, vector<16x32xf32> -> vector<16x32xf32>
    %693 = arith.addf %692, %2 : vector<16x32xf32>
    %694 = vector.shape_cast %693 : vector<16x32xf32> to vector<1x16x32xf32>
    %695 = vector.broadcast %694 : vector<1x16x32xf32> to vector<8x16x32xf32>
    %696 = arith.addf %695, %688 : vector<8x16x32xf32>
    %697 = math.tanh %696 : vector<8x16x32xf32>
    %698 = vector.broadcast %7 : vector<1x1x32xf32> to vector<8x16x32xf32>
    %699 = arith.mulf %697, %698 : vector<8x16x32xf32>
    %cst_264 = arith.constant dense<0.000000e+00> : vector<8x16xf32>
    %700 = vector.multi_reduction <add>, %699, %cst_264 [2] : vector<8x16x32xf32> to vector<8x16xf32>
    %701 = vector.shape_cast %700 : vector<8x16xf32> to vector<8x16x1xf32>
    %cst_265 = arith.constant dense<0xFF800000> : vector<16x1xf32>
    %702 = vector.multi_reduction <maximumf>, %701, %cst_265 [0] : vector<8x16x1xf32> to vector<16x1xf32>
    %703 = vector.shape_cast %702 : vector<16x1xf32> to vector<1x16x1xf32>
    %704 = vector.broadcast %703 : vector<1x16x1xf32> to vector<8x16x1xf32>
    %705 = arith.subf %701, %704 : vector<8x16x1xf32>
    %706 = math.exp %705 : vector<8x16x1xf32>
    %707 = vector.broadcast %706 : vector<8x16x1xf32> to vector<8x16x32xf32>
    %708 = arith.mulf %707, %689 : vector<8x16x32xf32>
    %cst_266 = arith.constant dense<0.000000e+00> : vector<16x32xf32>
    %709 = vector.multi_reduction <add>, %708, %cst_266 [0] : vector<8x16x32xf32> to vector<16x32xf32>
    %cst_267 = arith.constant dense<0.000000e+00> : vector<16x1xf32>
    %710 = vector.multi_reduction <add>, %706, %cst_267 [0] : vector<8x16x1xf32> to vector<16x1xf32>
    %711 = vector.broadcast %710 : vector<16x1xf32> to vector<16x32xf32>
    %712 = arith.divf %709, %711 : vector<16x32xf32>
    %c0_268 = arith.constant 0 : index
    %c0_269 = arith.constant 0 : index
    %713 = vector.load %arg12[%c0_268, %c0_269] : memref<32x96xbf16, #tpu.memory_space<vmem>>, vector<32x96xbf16>
    %714 = arith.truncf %712 : vector<16x32xf32> to vector<16x32xbf16>
    %cst_270 = arith.constant dense<0.000000e+00> : vector<16x96xf32>
    %715 = tpu.matmul %714, %713, %cst_270 {dimension_numbers = #tpu.dot_dimension_numbers<[1], [0], [0], [1], [0, 0, 1, 1], [], []>} : vector<16x32xbf16>, vector<32x96xbf16>, vector<16x96xf32> -> vector<16x96xf32>
    %c0_271 = arith.constant 0 : index
    %c0_272 = arith.constant 0 : index
    %716 = vector.load %arg13[%c0_271, %c0_272] : memref<32x96xbf16, #tpu.memory_space<vmem>>, vector<32x96xbf16>
    %717 = arith.truncf %682 : vector<16x32xf32> to vector<16x32xbf16>
    %cst_273 = arith.constant dense<0.000000e+00> : vector<16x96xf32>
    %718 = tpu.matmul %717, %716, %cst_273 {dimension_numbers = #tpu.dot_dimension_numbers<[1], [0], [0], [1], [0, 0, 1, 1], [], []>} : vector<16x32xbf16>, vector<32x96xbf16>, vector<16x96xf32> -> vector<16x96xf32>
    %719 = arith.index_cast %c5_i32_254 : i32 to index
    %c0_274 = arith.constant 0 : index
    %c0_275 = arith.constant 0 : index
    %720 = vector.load %arg22[%719, %c0_274, %c0_275] : memref<6x16x96xf32, #tpu.memory_space<vmem>>, vector<1x16x96xf32>
    %721 = vector.shape_cast %720 : vector<1x16x96xf32> to vector<16x96xf32>
    %722 = vector.extract_strided_slice %721 {offsets = [0, 0], sizes = [16, 32], strides = [1, 1]} : vector<16x96xf32> to vector<16x32xf32>
    %723 = vector.extract_strided_slice %715 {offsets = [0, 0], sizes = [16, 32], strides = [1, 1]} : vector<16x96xf32> to vector<16x32xf32>
    %724 = arith.addf %722, %723 : vector<16x32xf32>
    %725 = vector.extract_strided_slice %718 {offsets = [0, 0], sizes = [16, 32], strides = [1, 1]} : vector<16x96xf32> to vector<16x32xf32>
    %726 = arith.addf %724, %725 : vector<16x32xf32>
    %727 = arith.negf %726 : vector<16x32xf32>
    %728 = math.exp %727 : vector<16x32xf32>
    %cst_276 = arith.constant 1.000000e+00 : f32
    %729 = vector.broadcast %cst_276 : f32 to vector<16x32xf32>
    %730 = arith.addf %729, %728 : vector<16x32xf32>
    %731 = arith.divf %729, %730 : vector<16x32xf32>
    %732 = vector.extract_strided_slice %721 {offsets = [0, 32], sizes = [16, 32], strides = [1, 1]} : vector<16x96xf32> to vector<16x32xf32>
    %733 = vector.extract_strided_slice %715 {offsets = [0, 32], sizes = [16, 32], strides = [1, 1]} : vector<16x96xf32> to vector<16x32xf32>
    %734 = arith.addf %732, %733 : vector<16x32xf32>
    %735 = vector.extract_strided_slice %718 {offsets = [0, 32], sizes = [16, 32], strides = [1, 1]} : vector<16x96xf32> to vector<16x32xf32>
    %736 = arith.addf %734, %735 : vector<16x32xf32>
    %737 = arith.negf %736 : vector<16x32xf32>
    %738 = math.exp %737 : vector<16x32xf32>
    %cst_277 = arith.constant 1.000000e+00 : f32
    %739 = vector.broadcast %cst_277 : f32 to vector<16x32xf32>
    %740 = arith.addf %739, %738 : vector<16x32xf32>
    %741 = arith.divf %739, %740 : vector<16x32xf32>
    %742 = vector.extract_strided_slice %721 {offsets = [0, 64], sizes = [16, 32], strides = [1, 1]} : vector<16x96xf32> to vector<16x32xf32>
    %743 = vector.extract_strided_slice %715 {offsets = [0, 64], sizes = [16, 32], strides = [1, 1]} : vector<16x96xf32> to vector<16x32xf32>
    %744 = arith.addf %742, %743 : vector<16x32xf32>
    %745 = vector.extract_strided_slice %718 {offsets = [0, 64], sizes = [16, 32], strides = [1, 1]} : vector<16x96xf32> to vector<16x32xf32>
    %746 = arith.addf %745, %5 : vector<16x32xf32>
    %747 = arith.mulf %731, %746 : vector<16x32xf32>
    %748 = arith.addf %744, %747 : vector<16x32xf32>
    %749 = math.tanh %748 : vector<16x32xf32>
    %cst_278 = arith.constant 1.000000e+00 : f32
    %750 = vector.broadcast %cst_278 : f32 to vector<16x32xf32>
    %751 = arith.subf %750, %741 : vector<16x32xf32>
    %752 = arith.mulf %751, %749 : vector<16x32xf32>
    %753 = arith.mulf %741, %682 : vector<16x32xf32>
    %754 = arith.addf %752, %753 : vector<16x32xf32>
    %755 = arith.truncf %754 : vector<16x32xf32> to vector<16x32xbf16>
    %756 = arith.index_cast %c5_i32_254 : i32 to index
    %c0_279 = arith.constant 0 : index
    %c0_280 = arith.constant 0 : index
    %757 = vector.load %arg23[%756, %c0_279, %c0_280] : memref<6x16x32xbf16, #tpu.memory_space<vmem>>, vector<1x16x32xbf16>
    %758 = vector.shape_cast %757 : vector<1x16x32xbf16> to vector<16x32xbf16>
    %759 = vector.shape_cast %755 : vector<16x32xbf16> to vector<1x16x32xbf16>
    tpu.vector_store %arg23[%756, %c0_279, %c0_280], %759 {strides = array<i32>} : memref<6x16x32xbf16, #tpu.memory_space<vmem>>, vector<1x16x32xbf16>,
    %c6_i32_281 = arith.constant 6 : i32
    %c0_282 = arith.constant 0 : index
    %c0_283 = arith.constant 0 : index
    %c0_284 = arith.constant 0 : index
    %760 = vector.load %arg23[%c0_282, %c0_283, %c0_284] : memref<6x16x32xbf16, #tpu.memory_space<vmem>>, vector<6x16x32xbf16>
    %761 = vector.shape_cast %760 : vector<6x16x32xbf16> to vector<96x32xbf16>
    %c0_285 = arith.constant 0 : index
    %c0_286 = arith.constant 0 : index
    %762 = vector.load %arg16[%c0_285, %c0_286] : memref<32x128xbf16, #tpu.memory_space<vmem>>, vector<32x128xbf16>
    %cst_287 = arith.constant dense<0.000000e+00> : vector<96x128xf32>
    %763 = tpu.matmul %761, %762, %cst_287 {dimension_numbers = #tpu.dot_dimension_numbers<[1], [0], [0], [1], [0, 0, 1, 1], [], []>} : vector<96x32xbf16>, vector<32x128xbf16>, vector<96x128xf32> -> vector<96x128xf32>
    %c0_288 = arith.constant 0 : index
    %c0_289 = arith.constant 0 : index
    %764 = vector.load %arg17[%c0_288, %c0_289] : memref<1x128xf32, #tpu.memory_space<vmem>>, vector<1x128xf32>
    %765 = vector.broadcast %764 : vector<1x128xf32> to vector<96x128xf32>
    %766 = arith.addf %763, %765 : vector<96x128xf32>
    %767 = vector.shape_cast %766 : vector<96x128xf32> to vector<6x16x128xf32>
    %c0_290 = arith.constant 0 : index
    %c0_291 = arith.constant 0 : index
    %c0_292 = arith.constant 0 : index
    %768 = vector.load %arg18[%c0_290, %c0_291, %c0_292] : memref<6x16x128xf32, #tpu.memory_space<vmem>>, vector<6x16x128xf32>
    tpu.vector_store %arg18[%c0_290, %c0_291, %c0_292], %767 {strides = array<i32>} : memref<6x16x128xf32, #tpu.memory_space<vmem>>, vector<6x16x128xf32>,
    return
  }
  func.func @transform_0(%arg0: i32) -> (i32, i32, i32) {
    %c0_i32 = arith.constant 0 : i32
    %c0_i32_0 = arith.constant 0 : i32
    %c0_i32_1 = arith.constant 0 : i32
    return %c0_i32, %arg0, %c0_i32_0 : i32, i32, i32
  }
  func.func @transform_1(%arg0: i32) -> (i32, i32, i32) {
    %c0_i32 = arith.constant 0 : i32
    %c0_i32_0 = arith.constant 0 : i32
    %c0_i32_1 = arith.constant 0 : i32
    return %c0_i32, %arg0, %c0_i32_0 : i32, i32, i32
  }
  func.func @transform_2(%arg0: i32) -> (i32, i32) {
    %c0_i32 = arith.constant 0 : i32
    %c0_i32_0 = arith.constant 0 : i32
    %c0_i32_1 = arith.constant 0 : i32
    return %c0_i32, %c0_i32_0 : i32, i32
  }
  func.func @transform_3(%arg0: i32) -> (i32, i32) {
    %c0_i32 = arith.constant 0 : i32
    %c0_i32_0 = arith.constant 0 : i32
    %c0_i32_1 = arith.constant 0 : i32
    return %c0_i32, %c0_i32_0 : i32, i32
  }
  func.func @transform_4(%arg0: i32) -> (i32, i32) {
    %c0_i32 = arith.constant 0 : i32
    %c0_i32_0 = arith.constant 0 : i32
    %c0_i32_1 = arith.constant 0 : i32
    return %c0_i32, %c0_i32_0 : i32, i32
  }
  func.func @transform_5(%arg0: i32) -> (i32, i32) {
    %c0_i32 = arith.constant 0 : i32
    %c0_i32_0 = arith.constant 0 : i32
    %c0_i32_1 = arith.constant 0 : i32
    return %c0_i32, %c0_i32_0 : i32, i32
  }
  func.func @transform_6(%arg0: i32) -> (i32, i32) {
    %c0_i32 = arith.constant 0 : i32
    %c0_i32_0 = arith.constant 0 : i32
    %c0_i32_1 = arith.constant 0 : i32
    return %c0_i32, %c0_i32_0 : i32, i32
  }
  func.func @transform_7(%arg0: i32) -> (i32, i32) {
    %c0_i32 = arith.constant 0 : i32
    %c0_i32_0 = arith.constant 0 : i32
    %c0_i32_1 = arith.constant 0 : i32
    return %c0_i32, %c0_i32_0 : i32, i32
  }
  func.func @transform_8(%arg0: i32) -> (i32, i32) {
    %c0_i32 = arith.constant 0 : i32
    %c0_i32_0 = arith.constant 0 : i32
    %c0_i32_1 = arith.constant 0 : i32
    return %c0_i32, %c0_i32_0 : i32, i32
  }
  func.func @transform_9(%arg0: i32) -> (i32, i32) {
    %c0_i32 = arith.constant 0 : i32
    %c0_i32_0 = arith.constant 0 : i32
    %c0_i32_1 = arith.constant 0 : i32
    return %c0_i32, %c0_i32_0 : i32, i32
  }
  func.func @transform_10(%arg0: i32) -> (i32, i32) {
    %c0_i32 = arith.constant 0 : i32
    %c0_i32_0 = arith.constant 0 : i32
    %c0_i32_1 = arith.constant 0 : i32
    return %c0_i32, %c0_i32_0 : i32, i32
  }
  func.func @transform_11(%arg0: i32) -> (i32, i32) {
    %c0_i32 = arith.constant 0 : i32
    %c0_i32_0 = arith.constant 0 : i32
    %c0_i32_1 = arith.constant 0 : i32
    return %c0_i32, %c0_i32_0 : i32, i32
  }
  func.func @transform_12(%arg0: i32) -> (i32, i32) {
    %c0_i32 = arith.constant 0 : i32
    %c0_i32_0 = arith.constant 0 : i32
    %c0_i32_1 = arith.constant 0 : i32
    return %c0_i32, %c0_i32_0 : i32, i32
  }
  func.func @transform_13(%arg0: i32) -> (i32, i32) {
    %c0_i32 = arith.constant 0 : i32
    %c0_i32_0 = arith.constant 0 : i32
    %c0_i32_1 = arith.constant 0 : i32
    return %c0_i32, %c0_i32_0 : i32, i32
  }
  func.func @transform_14(%arg0: i32) -> (i32, i32) {
    %c0_i32 = arith.constant 0 : i32
    %c0_i32_0 = arith.constant 0 : i32
    %c0_i32_1 = arith.constant 0 : i32
    return %c0_i32, %c0_i32_0 : i32, i32
  }
  func.func @transform_15(%arg0: i32) -> (i32, i32) {
    %c0_i32 = arith.constant 0 : i32
    %c0_i32_0 = arith.constant 0 : i32
    %c0_i32_1 = arith.constant 0 : i32
    return %c0_i32, %c0_i32_0 : i32, i32
  }
  func.func @transform_16(%arg0: i32) -> (i32, i32) {
    %c0_i32 = arith.constant 0 : i32
    %c0_i32_0 = arith.constant 0 : i32
    %c0_i32_1 = arith.constant 0 : i32
    return %c0_i32, %c0_i32_0 : i32, i32
  }
  func.func @transform_17(%arg0: i32) -> (i32, i32, i32) {
    %c0_i32 = arith.constant 0 : i32
    %c0_i32_0 = arith.constant 0 : i32
    %c0_i32_1 = arith.constant 0 : i32
    return %c0_i32, %arg0, %c0_i32_0 : i32, i32, i32
  }
}

</mosaic_0001>

<bundles_post_ra>
// kernel: tpu_custom_call.1
= control target key start
LH: loop header
LB: loop body
LE: loop exit
PB: predicated region body
PF: predicated region fallthrough
CT: control target
= control target key end

     0   :  { %s8119_s0 = inlined_call_operand.hbm [shape: f32[8,16,32], index: 0, kind: input, shape index: {}]   ;;  %s8120_s1 = inlined_call_operand.hbm [shape: f32[6,16,32], index: 1, kind: input, shape index: {}]   ;;  %s8121_s2 = inlined_call_operand.hbm [shape: bf16[32,128], index: 2, kind: input, shape index: {}]   ;;  %s8122_s3 = inlined_call_operand.hbm [shape: bf16[32,128], index: 3, kind: input, shape index: {}]   ;;  %s8123_s4 = inlined_call_operand.vmem [shape: f32[1,128], index: 4, kind: input, shape index: {}]   ;;  %s8124_s5 = inlined_call_operand.hbm [shape: bf16[32,32], index: 5, kind: input, shape index: {}]   ;;  %s8125_s6 = inlined_call_operand.vmem [shape: f32[1,32], index: 6, kind: input, shape index: {}]   ;;  %s8126_s7 = inlined_call_operand.hbm [shape: bf16[32,32], index: 7, kind: input, shape index: {}]   ;;  %s8127_s8 = inlined_call_operand.hbm [shape: f32[1,32], index: 8, kind: input, shape index: {}]   ;;  %s8128_s9 = inlined_call_operand.hbm [shape: f32[1,32], index: 9, kind: input, shape index: {}]   ;;  %s8129_s10 = inlined_call_operand.vmem [shape: bf16[32,96], index: 10, kind: input, shape index: {}]   ;;  %s8130_s11 = inlined_call_operand.hbm [shape: bf16[32,96], index: 11, kind: input, shape index: {}]   ;;  %s8131_s12 = inlined_call_operand.hbm [shape: bf16[32,96], index: 12, kind: input, shape index: {}]   ;;  %s8132_s13 = inlined_call_operand.vmem [shape: f32[1,96], index: 13, kind: input, shape index: {}]   ;;  %s8133_s14 = inlined_call_operand.vmem [shape: f32[1,32], index: 14, kind: input, shape index: {}]   ;;  %s8134_s15 = inlined_call_operand.hbm [shape: bf16[32,128], index: 15, kind: input, shape index: {}]   ;;  %s8135_s16 = inlined_call_operand.vmem [shape: f32[1,128], index: 16, kind: input, shape index: {}]   ;;  %s8136_s17 = inlined_call_operand.hbm [shape: f32[6,16,128], index: 17, kind: output, shape index: {}]  }
   0x1   :  { %8184 = sst [smem:[#allocation53_spill]] %s8119_s0 }
   0x2   :  { %8185 = sst [smem:[#allocation54_spill]] %s8120_s1 }
   0x3   :  { %22 = vsyncpa [#allocation8], 0 }
   0x4   :  { %23 = vsyncpa [#allocation11], 0 }
   0x5   :  { %24 = vsyncpa [#allocation14], 0 }
   0x6   :  { %25 = vsyncpa [#allocation17], 0 }
   0x7   :  { %26 = vsyncpa [#allocation20], 0 }
   0x8   :  { %27 = vsyncpa [#allocation23], 0 }
   0x9   :  { %28 = vsyncpa [#allocation9], 0  ;;  %s6544_s24 = smov [#allocation10]  }
   0xa   :  { %s46_s25 = sshll.u32 %s6544_s24, 4  ;;  %s47_s25 = int_to_ptr.vmem [resolvable:$true] %s46_s25 }
   0xb   :  { %s6298_s26 = scalar_lea.vmem %s47_s25, 1536  ;;  %p6303_p1 = scmp.lt.s32.totalorder %s47_s25, %s47_s25 }
   0xc   :  { %p6299_p0 = scmp.ne.s32.totalorder %s47_s25, %s6298_s26  ;;  %p6304_p2 = scmp.lt.s32.totalorder %s6298_s26, %s6298_s26 }
   0xe   :  { %p6305_p3 = por %p6304_p2, %p6303_p1 }
  0x10   :  { %p6306_p4 = pnand %p6305_p3, %p6299_p0 }
  0x12   :  { %6309 = shalt.err (!%p6306_p4)
}
  0x13   :  { %s6545_s27 = smov 128   ;;  %s6546_s28 = smov 8  }
  0x14   :  { %s8186_s30 = sld [smem:[#allocation54_spill]]  ;;  %s6547_s18 = smov [#allocation13]  }
  0x15   :  { %s70_s19 = sshll.u32 %s6547_s18, 4  ;;  %s6548_s1 = smov [#allocation16]   ;;  %s71_s19 = int_to_ptr.vmem [resolvable:$true] %s70_s19 }
  0x16   :  { %s98_s20 = sshll.u32 %s6548_s1, 4  ;;  %s6318_s21 = scalar_lea.vmem %s71_s19, 256  ;;  %s99_s20 = int_to_ptr.vmem [resolvable:$true] %s98_s20 }
  0x17   :  { %p6319_p5 = scmp.ne.s32.totalorder %s71_s19, %s6318_s21  ;;  %p6323_p6 = scmp.lt.s32.totalorder %s71_s19, %s71_s19 }
  0x18   :  { %p6324_p7 = scmp.lt.s32.totalorder %s6318_s21, %s6318_s21 }
  0x1a   :  { %52 = dma.hbm_to_vmem [thread:$0]  %s8186_s30, 1536, %s47_s25, [#allocation11], %s6545_s27, %s6545_s27, %s6546_s28  }
  0x1b   :  { %p6325_p8 = por %p6324_p7, %p6323_p6 }
  0x1d   :  { %p6326_p9 = pnand %p6325_p8, %p6319_p5 }
  0x1f   :  { %6329 = shalt.err (!%p6326_p9)
}
  0x20   :  { %s6549_s22 = smov 64   ;;  %s6550_s23 = smov 4  }
  0x21   :  { %76 = dma.hbm_to_vmem [thread:$0]  %s8122_s3, 256, %s71_s19, [#allocation14], %s6549_s22, %s6549_s22, %s6550_s23  }
  0x22   :  { %s6338_s25 = scalar_lea.vmem %s99_s20, 256  ;;  %p6343_p11 = scmp.lt.s32.totalorder %s99_s20, %s99_s20 }
  0x23   :  { %p6339_p10 = scmp.ne.s32.totalorder %s99_s20, %s6338_s25  ;;  %p6344_p12 = scmp.lt.s32.totalorder %s6338_s25, %s6338_s25 }
  0x25   :  { %p6345_p13 = por %p6344_p12, %p6343_p11 }
  0x27   :  { %p6346_p0 = pnand %p6345_p13, %p6339_p10 }
  0x29   :  { %6349 = shalt.err (!%p6346_p0)
}
  0x2a   :  { %104 = dma.hbm_to_vmem [thread:$0]  %s8126_s7, 256, %s99_s20, [#allocation17], %s6549_s22, %s6549_s22, %s6550_s23  }
  0x2b   :  { %s6551_s30 = smov [#allocation19]   ;;  %s6552_s1 = smov [#allocation22]  }
  0x2c   :  { %s121_s18 = sshll.u32 %s6551_s30, 4  ;;  %s144_s3 = sshll.u32 %s6552_s1, 4  ;;  %s122_s18 = int_to_ptr.vmem [resolvable:$true] %s121_s18  ;;  %s145_s3 = int_to_ptr.vmem [resolvable:$true] %s144_s3 }
  0x2d   :  { %s6358_s19 = scalar_lea.vmem %s122_s18, 16  ;;  %s6362_s21 = scalar_lea.vmem %s122_s18, 32 }
  0x2e   :  { %p6359_p1 = scmp.ne.s32.totalorder %s122_s18, %s6358_s19  ;;  %p6363_p2 = scmp.lt.s32.totalorder %s122_s18, %s122_s18 }
  0x2f   :  { %p6364_p3 = scmp.lt.s32.totalorder %s6362_s21, %s6358_s19 }
  0x31   :  { %p6365_p4 = por %p6364_p3, %p6363_p2 }
  0x33   :  { %p6366_p5 = pnand %p6365_p4, %p6359_p1 }
  0x35   :  { %6369 = shalt.err (!%p6366_p5)
}
  0x36   :  { %124 = dma.hbm_to_vmem [thread:$0]  %s8128_s9, 16, %s122_s18, [#allocation20]  }
  0x37   :  { %s6378_s25 = scalar_lea.vmem %s145_s3, 256  ;;  %p6383_p7 = scmp.lt.s32.totalorder %s145_s3, %s145_s3 }
  0x38   :  { %p6379_p6 = scmp.ne.s32.totalorder %s145_s3, %s6378_s25  ;;  %p6384_p8 = scmp.lt.s32.totalorder %s6378_s25, %s6378_s25 }
  0x3a   :  { %p6385_p9 = por %p6384_p8, %p6383_p7 }
  0x3c   :  { %p6386_p10 = pnand %p6385_p9, %p6379_p6 }
  0x3e   :  { %6389 = shalt.err (!%p6386_p10)
}
  0x3f   :  { %150 = dma.hbm_to_vmem [thread:$0]  %s8131_s12, 256, %s145_s3, [#allocation23], %s6549_s22, %s6549_s22, %s6550_s23  }
  0x40   :  { %s6553_s29 = smov [#allocation7]   ;;  %s6554_s30 = smov [#allocation12]  }
  0x41   :  { %s34_s0 = sshll.u32 %s6553_s29, 4  ;;  %s58_s9 = sshll.u32 %s6554_s30, 4  ;;  %s35_s0 = int_to_ptr.vmem [resolvable:$true] %s34_s0  ;;  %s59_s9 = int_to_ptr.vmem [resolvable:$true] %s58_s9 }
  0x42   :  { %s6398_s18 = scalar_lea.vmem %s35_s0, 2048  ;;  %p6403_p12 = scmp.lt.s32.totalorder %s35_s0, %s35_s0 }
  0x43   :  { %p6399_p11 = scmp.ne.s32.totalorder %s35_s0, %s6398_s18  ;;  %p6404_p13 = scmp.lt.s32.totalorder %s6398_s18, %s6398_s18 }
  0x45   :  { %p6405_p0 = por %p6404_p13, %p6403_p12 }
  0x47   :  { %p6406_p1 = pnand %p6405_p0, %p6399_p11 }
  0x49   :  { %6409 = shalt.err (!%p6406_p1)
}
  0x4a   :  { %s8187_s21 = sld [smem:[#allocation53_spill]]  ;;  %s6418_s12 = scalar_lea.vmem %s59_s9, 256 }
  0x4b   :  { %p6419_p2 = scmp.ne.s32.totalorder %s59_s9, %s6418_s12  ;;  %p6423_p3 = scmp.lt.s32.totalorder %s59_s9, %s59_s9 }
  0x4c   :  { %p6424_p4 = scmp.lt.s32.totalorder %s6418_s12, %s6418_s12 }
  0x4e   :  { %p6425_p5 = por %p6424_p4, %p6423_p3 }
  0x50   :  { %40 = dma.hbm_to_vmem [thread:$0]  %s8187_s21, 2048, %s35_s0, [#allocation8], %s6545_s27, %s6545_s27, %s6546_s28  }
  0x51   :  { %p6426_p6 = pnand %p6425_p5, %p6419_p2 }
  0x53   :  { %6429 = shalt.err (!%p6426_p6)
}
  0x54   :  { %64 = dma.hbm_to_vmem [thread:$0]  %s8121_s2, 256, %s59_s9, [#allocation11], %s6549_s22, %s6549_s22, %s6550_s23  }
  0x55   :  { %s6555_s26 = smov [#allocation15]   ;;  %s6556_s7 = smov [#allocation18]  }
  0x56   :  { %s84_s25 = sshll.u32 %s6555_s26, 4  ;;  %s111_s20 = sshll.u32 %s6556_s7, 4  ;;  %s85_s25 = int_to_ptr.vmem [resolvable:$true] %s84_s25  ;;  %s112_s20 = int_to_ptr.vmem [resolvable:$true] %s111_s20 }
  0x57   :  { %s6438_s29 = scalar_lea.vmem %s85_s25, 256  ;;  %p6443_p8 = scmp.lt.s32.totalorder %s85_s25, %s85_s25 }
  0x58   :  { %p6439_p7 = scmp.ne.s32.totalorder %s85_s25, %s6438_s29  ;;  %p6444_p9 = scmp.lt.s32.totalorder %s6438_s29, %s6438_s29 }
  0x5a   :  { %p6445_p10 = por %p6444_p9, %p6443_p8 }
  0x5c   :  { %p6446_p11 = pnand %p6445_p10, %p6439_p7 }
  0x5e   :  { %6449 = shalt.err (!%p6446_p11)
}
  0x5f   :  { %90 = dma.hbm_to_vmem [thread:$0]  %s8124_s5, 256, %s85_s25, [#allocation14], %s6549_s22, %s6549_s22, %s6550_s23  }
  0x60   :  { %s6458_s2 = scalar_lea.vmem %s112_s20, 16  ;;  %s6462_s9 = scalar_lea.vmem %s112_s20, 32 }
  0x61   :  { %p6459_p12 = scmp.ne.s32.totalorder %s112_s20, %s6458_s2  ;;  %p6463_p13 = scmp.lt.s32.totalorder %s112_s20, %s112_s20 }
  0x62   :  { %p6464_p0 = scmp.lt.s32.totalorder %s6462_s9, %s6458_s2 }
  0x64   :  { %p6465_p1 = por %p6464_p0, %p6463_p13 }
  0x66   :  { %p6466_p2 = pnand %p6465_p1, %p6459_p12 }
  0x68   :  { %6469 = shalt.err (!%p6466_p2)
}
  0x69   :  { %114 = dma.hbm_to_vmem [thread:$0]  %s8127_s8, 16, %s112_s20, [#allocation17]  }
  0x6a   :  { %s6557_s19 = smov [#allocation21]   ;;  %s6558_s12 = smov [#allocation24]  }
  0x6b   :  { %s132_s21 = sshll.u32 %s6557_s19, 4  ;;  %s160_s3 = sshll.u32 %s6558_s12, 4  ;;  %s133_s21 = int_to_ptr.vmem [resolvable:$true] %s132_s21  ;;  %s161_s3 = int_to_ptr.vmem [resolvable:$true] %s160_s3 }
  0x6c   :  { %s6478_s24 = scalar_lea.vmem %s133_s21, 256  ;;  %p6483_p4 = scmp.lt.s32.totalorder %s133_s21, %s133_s21 }
  0x6d   :  { %p6479_p3 = scmp.ne.s32.totalorder %s133_s21, %s6478_s24  ;;  %p6484_p5 = scmp.lt.s32.totalorder %s6478_s24, %s6478_s24 }
  0x6f   :  { %p6485_p6 = por %p6484_p5, %p6483_p4 }
  0x71   :  { %p6486_p7 = pnand %p6485_p6, %p6479_p3 }
  0x73   :  { %6489 = shalt.err (!%p6486_p7)
}
  0x74   :  { %138 = dma.hbm_to_vmem [thread:$0]  %s8130_s11, 256, %s133_s21, [#allocation20], %s6549_s22, %s6549_s22, %s6550_s23  }
  0x75   :  { %s6498_s8 = scalar_lea.vmem %s161_s3, 256  ;;  %p6503_p9 = scmp.lt.s32.totalorder %s161_s3, %s161_s3 }
  0x76   :  { %p6499_p8 = scmp.ne.s32.totalorder %s161_s3, %s6498_s8  ;;  %p6504_p10 = scmp.lt.s32.totalorder %s6498_s8, %s6498_s8 }
  0x78   :  { %p6505_p11 = por %p6504_p10, %p6503_p9 }
  0x7a   :  { %p6506_p12 = pnand %p6505_p11, %p6499_p8 }
  0x7c   :  { %6509 = shalt.err (!%p6506_p12)
}
  0x7d   :  { %166 = dma.hbm_to_vmem [thread:$0]  %s8134_s15, 256, %s161_s3, [#allocation23], %s6549_s22, %s6549_s22, %s6550_s23  }
  0x7e   :  { %6530 = dma.done.wait [#allocation8], 2048  }
  0x7f   :  { %6531 = vsyncadd [#allocation8], 4294965248 }
  0x80   :  { %6532 = dma.done.wait [#allocation11], 1792  }
  0x81   :  { %6533 = vsyncadd [#allocation11], 4294965504 }
  0x82   :  { %6534 = dma.done.wait [#allocation14], 512  }
  0x83   :  { %6535 = vsyncadd [#allocation14], 4294966784 }
  0x84   :  { %6536 = dma.done.wait [#allocation17], 272  }
  0x85   :  { %6537 = vsyncadd [#allocation17], 4294967024 }
  0x86   :  { %6538 = dma.done.wait [#allocation20], 272  }
  0x87   :  { %6539 = vsyncadd [#allocation20], 4294967024 }
  0x88   :  { %6540 = dma.done.wait [#allocation23], 512  }
  0x89   :  { %6541 = vsyncadd [#allocation23], 4294966784  ;;  %v8137_v0 = vmov 0.0   ;;  %vm6560_vm0 = vmmov 0   ;;  %v5612_v1 = vld [vmem:[#allocation12 + $0x8] sm:$0xff]   ;;  %v5613_v2 = vld [vmem:[#allocation12] sm:$0xff]  }
  0x8a   :  { %5339 = vmatprep.subr.bf16.mxu1 %v8137_v0  ;;  %5343 = vmatprep.mubr.msk.bf16.mxu1 %vm6560_vm0, %v8137_v0  ;;  %v217_v3 = vld [vmem:[#allocation7] sm:$0xff]  ;;  %v218_v4 = vld [vmem:[#allocation7 + $0x8] sm:$0xff]  ;;  %vm264_vm1 = vcmask 261120   ;;  %v219_v5 = vld [vmem:[#allocation7 + $0x10] sm:$0xff]  ;;  %v6561_v29 = vmov 0   ;;  %vm1744_vm2 = vcmask 785408  }
  0x8b   :  { %5311 = vmatprep.subr.bf16.mxu0 %v5612_v1  ;;  %v237_v6 = vpack.c.bf16 %v218_v4, %v217_v3  ;;  %v220_v7 = vld [vmem:[#allocation7 + $0x18] sm:$0xff]  ;;  %v221_v8 = vld [vmem:[#allocation7 + $0x20] sm:$0xff]  ;;  %v222_v9 = vld [vmem:[#allocation7 + $0x28] sm:$0xff]  ;;  %vm2278_vm3 = vcmask 257024  }
  0x8c   :  { %5312 = vmatpush3.bf16.msra.mxu0 %v5612_v1  ;;  %v238_v10 = vpack.c.bf16 %v220_v7, %v219_v5  ;;  %v5614_v11 = vld [vmem:[#allocation13 + $0x8] sm:$0xff]   ;;  %v239_v12 = vpack.c.bf16 %v222_v9, %v221_v8  ;;  %v223_v13 = vld [vmem:[#allocation7 + $0x30] sm:$0xff]  ;;  %v225_v16 = vld [vmem:[#allocation7 + $0x40] sm:$0xff] }
  0x8d   :  { %5313 = vmatprep.subr.bf16.mxu0 %v5613_v2  ;;  %5315 = vmatprep.mubr.msk.bf16.mxu0 %vm264_vm1, %v237_v6  ;;  %v224_v14 = vld [vmem:[#allocation7 + $0x38] sm:$0xff]  ;;  %v5615_v15 = vld [vmem:[#allocation13] sm:$0xff]   ;;  %v226_v17 = vld [vmem:[#allocation7 + $0x48] sm:$0xff] }
  0x8e   :  { %v240_v18 = vpack.c.bf16 %v224_v14, %v223_v13  ;;  %v241_v19 = vpack.c.bf16 %v226_v17, %v225_v16  ;;  %v227_v20 = vld [vmem:[#allocation7 + $0x50] sm:$0xff]  ;;  %v228_v21 = vld [vmem:[#allocation7 + $0x58] sm:$0xff]  ;;  %v229_v22 = vld [vmem:[#allocation7 + $0x60] sm:$0xff] }
  0x8f   :  { %v230_v23 = vld [vmem:[#allocation7 + $0x68] sm:$0xff]  ;;  %v242_v24 = vpack.c.bf16 %v228_v21, %v227_v20  ;;  %v231_v26 = vld [vmem:[#allocation7 + $0x70] sm:$0xff]  ;;  %v232_v27 = vld [vmem:[#allocation7 + $0x78] sm:$0xff] }
  0x90   :  { %5314 = vmatpush3.bf16.msra.mxu0 %v5613_v2  ;;  %v243_v25 = vpack.c.bf16 %v230_v23, %v229_v22  ;;  %v244_v28 = vpack.c.bf16 %v232_v27, %v231_v26  ;;  %v5021_v30 = vld [vmem:[%s8123_s4] ss:$0 sm:$0xff]  ;;  %s6562_s4 = smov 32   ;;  %v5616_v26 = vld [vmem:[#allocation13 + $0x8] sm:$0xff]  }
  0x91   :  { %5331 = vmatprep.subr.bf16.mxu0 %v8137_v0  ;;  %5340 = vmatpush3.bf16.msra.mxu1 %v5616_v26  ;;  %v5617_v27 = vld [vmem:[#allocation13] sm:$0xff]  }
  0x92   :  { %5341 = vmatprep.subr.bf16.mxu1 %v8137_v0 }
  0x93   :  { %5316 = vmatmul.mubr.msk.bf16.vlgmr.msra.gmra.mxu0 %vm264_vm1, %v238_v10 }
  0x94   :  { %5332 = vmatpush3.bf16.msra.mxu0 %v5614_v11  ;;  %5319 = vmatprep.mubr.msk.bf16.mxu0 %vm264_vm1, %v239_v12 }
  0x95   :  { %5333 = vmatprep.subr.bf16.mxu0 %v8137_v0  ;;  %5342 = vmatpush3.bf16.msra.mxu1 %v5617_v27 }
  0x96   :  { %5347 = vmatprep.subr.bf16.mxu1 %v8137_v0 }
  0x98   :  { %5334 = vmatpush3.bf16.msra.mxu0 %v5615_v15 }
  0x99   :  { %5363 = vmatprep.subr.bf16.mxu0 %v8137_v0 }
  0x9b   :  { %5320 = vmatmul.mubr.msk.bf16.gmra.mxu0 %vm264_vm1, %v240_v18 }
  0x9c   :  { %5323 = vmatprep.mubr.msk.bf16.mxu0 %vm264_vm1, %v241_v19 }
  0xa3   :  { %5324 = vmatmul.mubr.msk.bf16.gmra.mxu0 %vm264_vm1, %v242_v24 }
  0xa4   :  { %5327 = vmatprep.mubr.msk.bf16.mxu0 %vm264_vm1, %v243_v25 }
  0xab   :  { %5328 = vmatmul.mubr.msk.bf16.gmra.mxu0 %vm264_vm1, %v244_v28 }
  0xac   :  { %5335 = vmatprep.mubr.msk.bf16.mxu0 %vm6560_vm0, %v8137_v0 }
  0xb3   :  { %5336 = vmatmul.mubr.bf16.vlgmr.msra.gmra.mxu0 %v6561_v29 }
  0xb4   :  { %5367 = vmatprep.mubr.msk.bf16.mxu0 %vm6560_vm0, %v8137_v0 }
 0x153   :  { %v5317_v31 = vpop.f32.mrf.mxu0 }
 0x154   :  { %v6736_v32 = vadd.f32 %v5317_v31, %v5021_v30 }
 0x155   :  { %v323_v33 = vpop.f32.mrf.mxu0 }
 0x156   :  { %v324_v60 = vadd.f32 %v5021_v30, %v323_v33 }
 0x157   :  { %v5318_v34 = vpop.f32.mrf.mxu0 }
 0x158   :  { %v6738_v35 = vadd.f32 %v5318_v34, %v5021_v30 }
 0x159   :  { %v326_v36 = vpop.f32.mrf.mxu0 }
 0x15a   :  { %v327_v2 = vadd.f32 %v5021_v30, %v326_v36 }
 0x15b   :  { %v5321_v37 = vpop.f32.mrf.mxu0 }
 0x15c   :  { %v6740_v38 = vadd.f32 %v5321_v37, %v5021_v30 }
 0x15d   :  { %v339_v39 = vpop.f32.mrf.mxu0 }
 0x15e   :  { %v6742_v40 = vadd.f32 %v5021_v30, %v339_v39 }
 0x15f   :  { %v5322_v41 = vpop.f32.mrf.mxu0 }
 0x160   :  { %v6744_v42 = vadd.f32 %v5322_v41, %v5021_v30 }
 0x161   :  { %v342_v43 = vpop.f32.mrf.mxu0 }
 0x162   :  { %v6746_v44 = vadd.f32 %v5021_v30, %v342_v43 }
 0x163   :  { %v5325_v45 = vpop.f32.mrf.mxu0 }
 0x164   :  { %v6748_v46 = vadd.f32 %v5325_v45, %v5021_v30 }
 0x165   :  { %v355_v47 = vpop.f32.mrf.mxu0 }
 0x166   :  { %v6750_v48 = vadd.f32 %v5021_v30, %v355_v47 }
 0x167   :  { %v5326_v49 = vpop.f32.mrf.mxu0 }
 0x168   :  { %v6752_v50 = vadd.f32 %v5326_v49, %v5021_v30 }
 0x169   :  { %v358_v51 = vpop.f32.mrf.mxu0 }
 0x16a   :  { %v6754_v52 = vadd.f32 %v5021_v30, %v358_v51 }
 0x16b   :  { %v5329_v53 = vpop.f32.mrf.mxu0 }
 0x16c   :  { %v6756_v54 = vadd.f32 %v5329_v53, %v5021_v30 }
 0x16d   :  { %v371_v55 = vpop.f32.mrf.mxu0 }
 0x16e   :  { %v6758_v56 = vadd.f32 %v5021_v30, %v371_v55 }
 0x16f   :  { %v5330_v57 = vpop.f32.mrf.mxu0 }
 0x170   :  { %v6760_v58 = vadd.f32 %v5330_v57, %v5021_v30 }
 0x171   :  { %v374_v59 = vpop.f32.mrf.mxu0 }
 0x172   :  { %v6762_v61 = vadd.f32 %v5021_v30, %v374_v59 }
 0x173   :  { %v457_v62 = vpop.f32.mrf.mxu0 }
 0x174   :  { %v464_v63 = vadd.f32 %v457_v62, %v324_v60 }
 0x175   :  { %v5337_v1 = vpop.f32.mrf.mxu0 }
 0x176   :  { %5678 = vtanh.f32 %v464_v63  ;;  %v5034_v8 = vmul.f32 -1.442695, %v464_v63 }
 0x177   :  { %v460_v3 = vpop.f32.mrf.mxu0 }
 0x178   :  { %v465_v4 = vadd.f32 %v460_v3, %v327_v2 }
 0x179   :  { %v5338_v5 = vpop.f32.mrf.mxu0 }
 0x17a   :  { %5680 = vtanh.f32 %v465_v4  ;;  %v5035_v9 = vmul.f32 -1.442695, %v465_v4 }
 0x17b   :  { %5682 = vpow2.f32 %v5034_v8 }
 0x17c   :  { %5684 = vpow2.f32 %v5035_v9 }
 0x183   :  { %v5679_v6 = vpop.eup %5678 }
 0x184   :  { %484 = vrot.lane.b32.xlu0 %v5679_v6, %s6549_s22 }
 0x187   :  { %v5681_v7 = vpop.eup %5680 }
 0x188   :  { %486 = vrot.lane.b32.xlu0 %v5681_v7, %s6549_s22  ;;  %v5683_v10 = vpop.eup %5682 }
 0x189   :  { %v472_v11 = vadd.f32 1.0, %v5683_v10  ;;  %v5685_v12 = vpop.eup %5684 }
 0x18a   :  { %v473_v13 = vadd.f32 1.0, %v5685_v12  ;;  %v5619_v12 = vld [vmem:[#allocation13] sm:$0xff]  }
 0x18b   :  { %5686 = vrcp.f32 %v472_v11  ;;  %v5618_v11 = vld [vmem:[#allocation13 + $0x8] sm:$0xff]  }
 0x18c   :  { %5688 = vrcp.f32 %v473_v13 }
 0x198   :  { %v5687_v14 = vpop.eup %5686 }
 0x199   :  { %v5689_v17 = vpop.eup %5688  ;;  %v480_v20 = vmul.f32 0.0, %v5687_v14 }
 0x19a   :  { %v481_v23 = vmul.f32 0.0, %v5689_v17 }
 0x1f6   :  { %v485_v15 = vpop.permute.xlu0 %484 }
 0x1f7   :  { %v490_v16 = vmul.f32 %v5687_v14, %v485_v15 }
 0x1f9   :  { %494 = vrot.lane.b32.xlu1 %v490_v16, %s6562_s4 }
 0x1fa   :  { %v487_v18 = vpop.permute.xlu0 %486 }
 0x1fb   :  { %v491_v19 = vmul.f32 %v5689_v17, %v487_v18 }
 0x1fd   :  { %496 = vrot.lane.b32.xlu1 %v491_v19, %s6562_s4 }
 0x26b   :  { %v495_v21 = vpop.permute.xlu1 %494 }
 0x26c   :  { %v500_v22 = vadd.f32 %v495_v21, %v480_v20 }
 0x26e   :  { %5690 = vtanh.f32 %v500_v22 }
 0x26f   :  { %v497_v24 = vpop.permute.xlu1 %496 }
 0x270   :  { %v501_v25 = vadd.f32 %v497_v24, %v481_v23 }
 0x272   :  { %5692 = vtanh.f32 %v501_v25 }
 0x27b   :  { %v5691_v28 = vpop.eup %5690 }
 0x27c   :  { %506 = vrot.lane.b32.xlu0 %v5691_v28, %s6549_s22 }
 0x27f   :  { %v5693_v29 = vpop.eup %5692 }
 0x280   :  { %508 = vrot.lane.b32.xlu1 %v5693_v29, %s6549_s22 }
 0x2ee   :  { %v507_v30 = vpop.permute.xlu0 %506 }
 0x2ef   :  { %v6772_v33 = vmul.f32 %v5687_v14, %v507_v30 }
 0x2f2   :  { %v509_v31 = vpop.permute.xlu1 %508 }
 0x2f3   :  { %v6774_v34 = vmul.f32 %v5689_v17, %v509_v31 }
 0x2f5   :  { %v531_v36 = vpack.c.bf16 %v6774_v34, %v6772_v33 }
 0x2f7   :  { %533 = vrot.lane.b32.xlu0 %v531_v36, %s6562_s4 }
 0x369   :  { %v534_v37 = vpop.permute.xlu0 %533 }
 0x36a   :  { %5344 = vmatmul.mubr.msk.bf16.vlgmr.msra.gmra.mxu1 %vm264_vm1, %v534_v37 }
 0x36b   :  { %5351 = vmatprep.mubr.msk.bf16.mxu1 %vm6560_vm0, %v8137_v0  ;;  %5348 = vmatpush3.bf16.msra.mxu1 %v5618_v11 }
 0x36c   :  { %5349 = vmatprep.subr.bf16.mxu1 %v8137_v0 }
 0x36f   :  { %5350 = vmatpush3.bf16.msra.mxu1 %v5619_v12 }
 0x370   :  { %5355 = vmatprep.subr.bf16.mxu1 %v8137_v0 }
 0x42a   :  { %v584_v39 = vpop.f32.mrf.mxu1 }
 0x42b   :  { %v591_v41 = vadd.f32 %v584_v39, %v6736_v32 }
 0x42c   :  { %v5345_v43 = vpop.f32.mrf.mxu1 }
 0x42d   :  { %5694 = vtanh.f32 %v591_v41  ;;  %v5039_v55 = vmul.f32 -1.442695, %v591_v41 }
 0x42e   :  { %v587_v45 = vpop.f32.mrf.mxu1 }
 0x42f   :  { %v592_v47 = vadd.f32 %v587_v45, %v6738_v35 }
 0x430   :  { %v5346_v49 = vpop.f32.mrf.mxu1 }
 0x431   :  { %5696 = vtanh.f32 %v592_v47  ;;  %v5040_v57 = vmul.f32 -1.442695, %v592_v47 }
 0x432   :  { %5698 = vpow2.f32 %v5039_v55 }
 0x433   :  { %5700 = vpow2.f32 %v5040_v57 }
 0x43a   :  { %v5695_v51 = vpop.eup %5694 }
 0x43b   :  { %611 = vrot.lane.b32.xlu1 %v5695_v51, %s6549_s22 }
 0x43e   :  { %v5697_v53 = vpop.eup %5696 }
 0x43f   :  { %613 = vrot.lane.b32.xlu0 %v5697_v53, %s6549_s22  ;;  %v5699_v59 = vpop.eup %5698 }
 0x440   :  { %v599_v60 = vadd.f32 1.0, %v5699_v59  ;;  %v5701_v32 = vpop.eup %5700 }
 0x441   :  { %v600_v62 = vadd.f32 1.0, %v5701_v32  ;;  %v5621_v32 = vld [vmem:[#allocation13] sm:$0xff]  }
 0x442   :  { %5702 = vrcp.f32 %v599_v60  ;;  %v5620_v60 = vld [vmem:[#allocation13 + $0x8] sm:$0xff]  }
 0x443   :  { %5704 = vrcp.f32 %v600_v62 }
 0x44f   :  { %v5703_v63 = vpop.eup %5702 }
 0x450   :  { %v5705_v2 = vpop.eup %5704  ;;  %v607_v5 = vmul.f32 %v5703_v63, %v500_v22 }
 0x451   :  { %v608_v8 = vmul.f32 %v5705_v2, %v501_v25 }
 0x4ad   :  { %v612_v35 = vpop.permute.xlu1 %611 }
 0x4ae   :  { %v617_v1 = vmul.f32 %v5703_v63, %v612_v35 }
 0x4b0   :  { %621 = vrot.lane.b32.xlu1 %v617_v1, %s6562_s4 }
 0x4b1   :  { %v614_v3 = vpop.permute.xlu0 %613 }
 0x4b2   :  { %v618_v4 = vmul.f32 %v5705_v2, %v614_v3 }
 0x4b4   :  { %623 = vrot.lane.b32.xlu0 %v618_v4, %s6562_s4 }
 0x522   :  { %v622_v6 = vpop.permute.xlu1 %621 }
 0x523   :  { %v627_v7 = vadd.f32 %v622_v6, %v607_v5 }
 0x525   :  { %5706 = vtanh.f32 %v627_v7 }
 0x526   :  { %v624_v9 = vpop.permute.xlu0 %623 }
 0x527   :  { %v628_v10 = vadd.f32 %v624_v9, %v608_v8 }
 0x529   :  { %5708 = vtanh.f32 %v628_v10 }
 0x532   :  { %v5707_v13 = vpop.eup %5706 }
 0x533   :  { %633 = vrot.lane.b32.xlu1 %v5707_v13, %s6549_s22 }
 0x536   :  { %v5709_v14 = vpop.eup %5708 }
 0x537   :  { %635 = vrot.lane.b32.xlu0 %v5709_v14, %s6549_s22 }
 0x5a5   :  { %v634_v15 = vpop.permute.xlu1 %633 }
 0x5a6   :  { %v6792_v17 = vmul.f32 %v5703_v63, %v634_v15 }
 0x5a9   :  { %v636_v16 = vpop.permute.xlu0 %635 }
 0x5aa   :  { %v6794_v18 = vmul.f32 %v5705_v2, %v636_v16 }
 0x5ac   :  { %v659_v19 = vpack.c.bf16 %v6794_v18, %v6792_v17 }
 0x5ae   :  { %661 = vrot.lane.b32.xlu1 %v659_v19, %s6562_s4 }
 0x620   :  { %v662_v20 = vpop.permute.xlu1 %661 }
 0x621   :  { %5352 = vmatmul.mubr.msk.bf16.vlgmr.msra.gmra.mxu1 %vm264_vm1, %v662_v20 }
 0x622   :  { %5359 = vmatprep.mubr.msk.bf16.mxu1 %vm6560_vm0, %v8137_v0  ;;  %5356 = vmatpush3.bf16.msra.mxu1 %v5620_v60 }
 0x623   :  { %5357 = vmatprep.subr.bf16.mxu1 %v8137_v0 }
 0x626   :  { %5358 = vmatpush3.bf16.msra.mxu1 %v5621_v32 }
 0x627   :  { %5371 = vmatprep.subr.bf16.mxu1 %v8137_v0 }
 0x6e1   :  { %v712_v21 = vpop.f32.mrf.mxu1 }
 0x6e2   :  { %v719_v22 = vadd.f32 %v712_v21, %v6742_v40 }
 0x6e3   :  { %v5353_v23 = vpop.f32.mrf.mxu1 }
 0x6e4   :  { %5710 = vtanh.f32 %v719_v22  ;;  %v5044_v29 = vmul.f32 -1.442695, %v719_v22 }
 0x6e5   :  { %v715_v24 = vpop.f32.mrf.mxu1 }
 0x6e6   :  { %v720_v25 = vadd.f32 %v715_v24, %v6746_v44 }
 0x6e7   :  { %v5354_v26 = vpop.f32.mrf.mxu1 }
 0x6e8   :  { %5712 = vtanh.f32 %v720_v25  ;;  %v5045_v30 = vmul.f32 -1.442695, %v720_v25 }
 0x6e9   :  { %5714 = vpow2.f32 %v5044_v29 }
 0x6ea   :  { %5716 = vpow2.f32 %v5045_v30 }
 0x6f1   :  { %v5711_v27 = vpop.eup %5710 }
 0x6f2   :  { %739 = vrot.lane.b32.xlu0 %v5711_v27, %s6549_s22 }
 0x6f5   :  { %v5713_v28 = vpop.eup %5712 }
 0x6f6   :  { %741 = vrot.lane.b32.xlu1 %v5713_v28, %s6549_s22  ;;  %v5715_v31 = vpop.eup %5714 }
 0x6f7   :  { %v727_v36 = vadd.f32 1.0, %v5715_v31  ;;  %v5717_v40 = vpop.eup %5716 }
 0x6f8   :  { %v728_v37 = vadd.f32 1.0, %v5717_v40  ;;  %v5623_v40 = vld [vmem:[#allocation13] sm:$0xff]  }
 0x6f9   :  { %5718 = vrcp.f32 %v727_v36  ;;  %v5622_v36 = vld [vmem:[#allocation13 + $0x8] sm:$0xff]  }
 0x6fa   :  { %5720 = vrcp.f32 %v728_v37  ;;  %5364 = vmatpush3.bf16.msra.mxu0 %v5622_v36 }
 0x6fb   :  { %5365 = vmatprep.subr.bf16.mxu0 %v8137_v0 }
 0x6fe   :  { %5366 = vmatpush3.bf16.msra.mxu0 %v5623_v40 }
 0x6ff   :  { %5379 = vmatprep.subr.bf16.mxu0 %v8137_v0 }
 0x706   :  { %v5719_v39 = vpop.eup %5718 }
 0x707   :  { %v5721_v43 = vpop.eup %5720  ;;  %v735_v49 = vmul.f32 %v5719_v39, %v627_v7 }
 0x708   :  { %v736_v55 = vmul.f32 %v5721_v43, %v628_v10 }
 0x764   :  { %v740_v44 = vpop.permute.xlu0 %739 }
 0x765   :  { %v745_v41 = vmul.f32 %v5719_v39, %v740_v44 }
 0x767   :  { %749 = vrot.lane.b32.xlu0 %v745_v41, %s6562_s4 }
 0x768   :  { %v742_v45 = vpop.permute.xlu1 %741 }
 0x769   :  { %v746_v47 = vmul.f32 %v5721_v43, %v742_v45 }
 0x76b   :  { %751 = vrot.lane.b32.xlu1 %v746_v47, %s6562_s4 }
 0x7d9   :  { %v750_v51 = vpop.permute.xlu0 %749 }
 0x7da   :  { %v755_v53 = vadd.f32 %v750_v51, %v735_v49 }
 0x7dc   :  { %5722 = vtanh.f32 %v755_v53 }
 0x7dd   :  { %v752_v57 = vpop.permute.xlu1 %751 }
 0x7de   :  { %v756_v59 = vadd.f32 %v752_v57, %v736_v55 }
 0x7e0   :  { %5724 = vtanh.f32 %v756_v59 }
 0x7e9   :  { %v5723_v62 = vpop.eup %5722 }
 0x7ea   :  { %761 = vrot.lane.b32.xlu0 %v5723_v62, %s6549_s22 }
 0x7ed   :  { %v5725_v63 = vpop.eup %5724 }
 0x7ee   :  { %763 = vrot.lane.b32.xlu1 %v5725_v63, %s6549_s22 }
 0x85c   :  { %v762_v35 = vpop.permute.xlu0 %761 }
 0x85d   :  { %v6812_v2 = vmul.f32 %v5719_v39, %v762_v35 }
 0x860   :  { %v764_v1 = vpop.permute.xlu1 %763 }
 0x861   :  { %v6814_v3 = vmul.f32 %v5721_v43, %v764_v1 }
 0x863   :  { %v787_v4 = vpack.c.bf16 %v6814_v3, %v6812_v2 }
 0x865   :  { %789 = vrot.lane.b32.xlu0 %v787_v4, %s6562_s4 }
 0x8d7   :  { %v790_v5 = vpop.permute.xlu0 %789 }
 0x8d8   :  { %5360 = vmatmul.mubr.msk.bf16.vlgmr.msra.gmra.mxu1 %vm264_vm1, %v790_v5 }
 0x8d9   :  { %5375 = vmatprep.mubr.msk.bf16.mxu1 %vm6560_vm0, %v8137_v0 }
 0x998   :  { %v840_v6 = vpop.f32.mrf.mxu1 }
 0x999   :  { %v847_v7 = vadd.f32 %v840_v6, %v6740_v38 }
 0x99a   :  { %v5361_v8 = vpop.f32.mrf.mxu1 }
 0x99b   :  { %5726 = vtanh.f32 %v847_v7  ;;  %v5049_v14 = vmul.f32 -1.442695, %v847_v7 }
 0x99c   :  { %v843_v9 = vpop.f32.mrf.mxu1 }
 0x99d   :  { %v848_v10 = vadd.f32 %v843_v9, %v6744_v42 }
 0x99e   :  { %v5362_v11 = vpop.f32.mrf.mxu1 }
 0x99f   :  { %5728 = vtanh.f32 %v848_v10  ;;  %v5050_v15 = vmul.f32 -1.442695, %v848_v10 }
 0x9a0   :  { %5730 = vpow2.f32 %v5049_v14 }
 0x9a1   :  { %5732 = vpow2.f32 %v5050_v15 }
 0x9a8   :  { %v5727_v12 = vpop.eup %5726 }
 0x9a9   :  { %867 = vrot.lane.b32.xlu1 %v5727_v12, %s6549_s22 }
 0x9ac   :  { %v5729_v13 = vpop.eup %5728 }
 0x9ad   :  { %869 = vrot.lane.b32.xlu0 %v5729_v13, %s6549_s22  ;;  %v5731_v16 = vpop.eup %5730 }
 0x9ae   :  { %v855_v19 = vadd.f32 1.0, %v5731_v16  ;;  %v5733_v38 = vpop.eup %5732 }
 0x9af   :  { %v856_v20 = vadd.f32 1.0, %v5733_v38  ;;  %v5625_v38 = vld [vmem:[#allocation13] sm:$0xff]  }
 0x9b0   :  { %5734 = vrcp.f32 %v855_v19  ;;  %v5624_v19 = vld [vmem:[#allocation13 + $0x8] sm:$0xff]  }
 0x9b1   :  { %5736 = vrcp.f32 %v856_v20  ;;  %5372 = vmatpush3.bf16.msra.mxu1 %v5624_v19 }
 0x9b2   :  { %5373 = vmatprep.subr.bf16.mxu1 %v8137_v0 }
 0x9b5   :  { %5374 = vmatpush3.bf16.msra.mxu1 %v5625_v38 }
 0x9b6   :  { %5387 = vmatprep.subr.bf16.mxu1 %v8137_v0 }
 0x9bd   :  { %v5735_v21 = vpop.eup %5734 }
 0x9be   :  { %v5737_v23 = vpop.eup %5736  ;;  %v863_v26 = vmul.f32 %v5735_v21, %v755_v53 }
 0x9bf   :  { %v864_v29 = vmul.f32 %v5737_v23, %v756_v59 }
 0xa1b   :  { %v868_v42 = vpop.permute.xlu1 %867 }
 0xa1c   :  { %v873_v22 = vmul.f32 %v5735_v21, %v868_v42 }
 0xa1e   :  { %877 = vrot.lane.b32.xlu1 %v873_v22, %s6562_s4 }
 0xa1f   :  { %v870_v24 = vpop.permute.xlu0 %869 }
 0xa20   :  { %v874_v25 = vmul.f32 %v5737_v23, %v870_v24 }
 0xa22   :  { %879 = vrot.lane.b32.xlu0 %v874_v25, %s6562_s4 }
 0xa90   :  { %v878_v27 = vpop.permute.xlu1 %877 }
 0xa91   :  { %v883_v28 = vadd.f32 %v878_v27, %v863_v26 }
 0xa93   :  { %5738 = vtanh.f32 %v883_v28 }
 0xa94   :  { %v880_v30 = vpop.permute.xlu0 %879 }
 0xa95   :  { %v884_v31 = vadd.f32 %v880_v30, %v864_v29 }
 0xa97   :  { %5740 = vtanh.f32 %v884_v31 }
 0xaa0   :  { %v5739_v37 = vpop.eup %5738 }
 0xaa1   :  { %889 = vrot.lane.b32.xlu1 %v5739_v37, %s6549_s22 }
 0xaa4   :  { %v5741_v39 = vpop.eup %5740 }
 0xaa5   :  { %891 = vrot.lane.b32.xlu0 %v5741_v39, %s6549_s22 }
 0xb13   :  { %v890_v44 = vpop.permute.xlu1 %889 }
 0xb14   :  { %v6832_v43 = vmul.f32 %v5735_v21, %v890_v44 }
 0xb17   :  { %v892_v41 = vpop.permute.xlu0 %891 }
 0xb18   :  { %v6834_v45 = vmul.f32 %v5737_v23, %v892_v41 }
 0xb1a   :  { %v915_v47 = vpack.c.bf16 %v6834_v45, %v6832_v43 }
 0xb1c   :  { %917 = vrot.lane.b32.xlu1 %v915_v47, %s6562_s4 }
 0xb8e   :  { %v918_v49 = vpop.permute.xlu1 %917 }
 0xb8f   :  { %5368 = vmatmul.mubr.msk.bf16.vlgmr.msra.gmra.mxu0 %vm264_vm1, %v918_v49 }
 0xb90   :  { %5383 = vmatprep.mubr.msk.bf16.mxu0 %vm6560_vm0, %v8137_v0 }
 0xc4f   :  { %v968_v51 = vpop.f32.mrf.mxu0 }
 0xc50   :  { %v975_v53 = vadd.f32 %v968_v51, %v6750_v48 }
 0xc51   :  { %v5369_v55 = vpop.f32.mrf.mxu0 }
 0xc52   :  { %5742 = vtanh.f32 %v975_v53  ;;  %v5054_v63 = vmul.f32 -1.442695, %v975_v53 }
 0xc53   :  { %v971_v57 = vpop.f32.mrf.mxu0 }
 0xc54   :  { %v976_v59 = vadd.f32 %v971_v57, %v6754_v52 }
 0xc55   :  { %v5370_v60 = vpop.f32.mrf.mxu0 }
 0xc56   :  { %5744 = vtanh.f32 %v976_v59  ;;  %v5055_v35 = vmul.f32 -1.442695, %v976_v59 }
 0xc57   :  { %5746 = vpow2.f32 %v5054_v63 }
 0xc58   :  { %5748 = vpow2.f32 %v5055_v35 }
 0xc5f   :  { %v5743_v32 = vpop.eup %5742 }
 0xc60   :  { %995 = vrot.lane.b32.xlu0 %v5743_v32, %s6549_s22 }
 0xc63   :  { %v5745_v62 = vpop.eup %5744 }
 0xc64   :  { %997 = vrot.lane.b32.xlu1 %v5745_v62, %s6549_s22  ;;  %v5747_v1 = vpop.eup %5746 }
 0xc65   :  { %v983_v4 = vadd.f32 1.0, %v5747_v1  ;;  %v5749_v48 = vpop.eup %5748 }
 0xc66   :  { %v984_v5 = vadd.f32 1.0, %v5749_v48  ;;  %v5627_v48 = vld [vmem:[#allocation13] sm:$0xff]  }
 0xc67   :  { %5750 = vrcp.f32 %v983_v4  ;;  %v5626_v4 = vld [vmem:[#allocation13 + $0x8] sm:$0xff]  }
 0xc68   :  { %5752 = vrcp.f32 %v984_v5  ;;  %5380 = vmatpush3.bf16.msra.mxu0 %v5626_v4 }
 0xc69   :  { %5381 = vmatprep.subr.bf16.mxu0 %v8137_v0 }
 0xc6c   :  { %5382 = vmatpush3.bf16.msra.mxu0 %v5627_v48 }
 0xc74   :  { %v5751_v6 = vpop.eup %5750 }
 0xc75   :  { %v5753_v8 = vpop.eup %5752  ;;  %v991_v11 = vmul.f32 %v5751_v6, %v883_v28 }
 0xc76   :  { %v992_v14 = vmul.f32 %v5753_v8, %v884_v31 }
 0xcd2   :  { %v996_v52 = vpop.permute.xlu0 %995 }
 0xcd3   :  { %v1001_v7 = vmul.f32 %v5751_v6, %v996_v52 }
 0xcd5   :  { %1005 = vrot.lane.b32.xlu0 %v1001_v7, %s6562_s4 }
 0xcd6   :  { %v998_v9 = vpop.permute.xlu1 %997 }
 0xcd7   :  { %v1002_v10 = vmul.f32 %v5753_v8, %v998_v9 }
 0xcd9   :  { %1007 = vrot.lane.b32.xlu1 %v1002_v10, %s6562_s4 }
 0xd47   :  { %v1006_v12 = vpop.permute.xlu0 %1005 }
 0xd48   :  { %v1011_v13 = vadd.f32 %v1006_v12, %v991_v11 }
 0xd4a   :  { %5754 = vtanh.f32 %v1011_v13 }
 0xd4b   :  { %v1008_v15 = vpop.permute.xlu1 %1007 }
 0xd4c   :  { %v1012_v16 = vadd.f32 %v1008_v15, %v992_v14 }
 0xd4e   :  { %5756 = vtanh.f32 %v1012_v16 }
 0xd57   :  { %v5755_v20 = vpop.eup %5754 }
 0xd58   :  { %1017 = vrot.lane.b32.xlu0 %v5755_v20, %s6549_s22 }
 0xd5b   :  { %v5757_v21 = vpop.eup %5756 }
 0xd5c   :  { %1019 = vrot.lane.b32.xlu1 %v5757_v21, %s6549_s22 }
 0xdca   :  { %v1018_v42 = vpop.permute.xlu0 %1017 }
 0xdcb   :  { %v6852_v23 = vmul.f32 %v5751_v6, %v1018_v42 }
 0xdce   :  { %v1020_v22 = vpop.permute.xlu1 %1019 }
 0xdcf   :  { %v6854_v24 = vmul.f32 %v5753_v8, %v1020_v22 }
 0xdd1   :  { %v1043_v25 = vpack.c.bf16 %v6854_v24, %v6852_v23 }
 0xdd3   :  { %1045 = vrot.lane.b32.xlu0 %v1043_v25, %s6562_s4 }
 0xe45   :  { %v1046_v26 = vpop.permute.xlu0 %1045 }
 0xe46   :  { %5376 = vmatmul.mubr.msk.bf16.vlgmr.msra.gmra.mxu1 %vm264_vm1, %v1046_v26 }
 0xe47   :  { %5391 = vmatprep.mubr.msk.bf16.mxu1 %vm6560_vm0, %v8137_v0 }
 0xf06   :  { %v1096_v27 = vpop.f32.mrf.mxu1 }
 0xf07   :  { %v1103_v28 = vadd.f32 %v1096_v27, %v6748_v46 }
 0xf08   :  { %v5377_v29 = vpop.f32.mrf.mxu1 }
 0xf09   :  { %5758 = vtanh.f32 %v1103_v28  ;;  %v5059_v39 = vmul.f32 -1.442695, %v1103_v28 }
 0xf0a   :  { %v1099_v30 = vpop.f32.mrf.mxu1 }
 0xf0b   :  { %v1104_v31 = vadd.f32 %v1099_v30, %v6752_v50 }
 0xf0c   :  { %v5378_v36 = vpop.f32.mrf.mxu1 }
 0xf0d   :  { %5760 = vtanh.f32 %v1104_v31  ;;  %v5060_v44 = vmul.f32 -1.442695, %v1104_v31 }
 0xf0e   :  { %5762 = vpow2.f32 %v5059_v39 }
 0xf0f   :  { %5764 = vpow2.f32 %v5060_v44 }
 0xf16   :  { %v5759_v40 = vpop.eup %5758 }
 0xf17   :  { %1123 = vrot.lane.b32.xlu1 %v5759_v40, %s6549_s22 }
 0xf1a   :  { %v5761_v37 = vpop.eup %5760 }
 0xf1b   :  { %1125 = vrot.lane.b32.xlu0 %v5761_v37, %s6549_s22  ;;  %v5763_v41 = vpop.eup %5762 }
 0xf1c   :  { %v1111_v47 = vadd.f32 1.0, %v5763_v41  ;;  %v5765_v46 = vpop.eup %5764 }
 0xf1d   :  { %v1112_v49 = vadd.f32 1.0, %v5765_v46  ;;  %v5629_v46 = vld [vmem:[#allocation13] sm:$0xff]  }
 0xf1e   :  { %5766 = vrcp.f32 %v1111_v47  ;;  %v5628_v47 = vld [vmem:[#allocation13 + $0x8] sm:$0xff]  }
 0xf1f   :  { %5768 = vrcp.f32 %v1112_v49  ;;  %5388 = vmatpush3.bf16.msra.mxu1 %v5628_v47 }
 0xf20   :  { %5389 = vmatprep.subr.bf16.mxu1 %v8137_v0 }
 0xf23   :  { %5390 = vmatpush3.bf16.msra.mxu1 %v5629_v46 }
 0xf2b   :  { %v5767_v51 = vpop.eup %5766 }
 0xf2c   :  { %v5769_v55 = vpop.eup %5768  ;;  %v1119_v60 = vmul.f32 %v5767_v51, %v1011_v13 }
 0xf2d   :  { %v1120_v63 = vmul.f32 %v5769_v55, %v1012_v16 }
 0xf89   :  { %v1124_v50 = vpop.permute.xlu1 %1123 }
 0xf8a   :  { %v1129_v53 = vmul.f32 %v5767_v51, %v1124_v50 }
 0xf8c   :  { %1133 = vrot.lane.b32.xlu1 %v1129_v53, %s6562_s4 }
 0xf8d   :  { %v1126_v57 = vpop.permute.xlu0 %1125 }
 0xf8e   :  { %v1130_v59 = vmul.f32 %v5769_v55, %v1126_v57 }
 0xf90   :  { %1135 = vrot.lane.b32.xlu0 %v1130_v59, %s6562_s4 }
 0xffe   :  { %v1134_v32 = vpop.permute.xlu1 %1133 }
 0xfff   :  { %v1139_v62 = vadd.f32 %v1134_v32, %v1119_v60 }
0x1001   :  { %5770 = vtanh.f32 %v1139_v62 }
0x1002   :  { %v1136_v35 = vpop.permute.xlu0 %1135 }
0x1003   :  { %v1140_v1 = vadd.f32 %v1136_v35, %v1120_v63 }
0x1005   :  { %5772 = vtanh.f32 %v1140_v1 }
0x100e   :  { %v5771_v5 = vpop.eup %5770 }
0x100f   :  { %1145 = vrot.lane.b32.xlu1 %v5771_v5, %s6549_s22 }
0x1012   :  { %v5773_v6 = vpop.eup %5772 }
0x1013   :  { %1147 = vrot.lane.b32.xlu0 %v5773_v6, %s6549_s22 }
0x1081   :  { %v1146_v52 = vpop.permute.xlu1 %1145 }
0x1082   :  { %v6871_v8 = vmul.f32 %v5767_v51, %v1146_v52 }
0x1085   :  { %v1148_v7 = vpop.permute.xlu0 %1147 }
0x1086   :  { %v6873_v9 = vmul.f32 %v5769_v55, %v1148_v7 }
0x1088   :  { %v1171_v10 = vpack.c.bf16 %v6873_v9, %v6871_v8 }
0x108a   :  { %1173 = vrot.lane.b32.xlu1 %v1171_v10, %s6562_s4 }
0x10fc   :  { %v1174_v11 = vpop.permute.xlu1 %1173 }
0x10fd   :  { %5384 = vmatmul.mubr.msk.bf16.vlgmr.msra.gmra.mxu0 %vm264_vm1, %v1174_v11 }
0x11bd   :  { %v1224_v12 = vpop.f32.mrf.mxu0 }
0x11be   :  { %v1231_v13 = vadd.f32 %v1224_v12, %v6758_v56 }
0x11bf   :  { %v5385_v14 = vpop.f32.mrf.mxu0 }
0x11c0   :  { %5774 = vtanh.f32 %v1231_v13  ;;  %v5064_v21 = vmul.f32 -1.442695, %v1231_v13 }
0x11c1   :  { %v1227_v15 = vpop.f32.mrf.mxu0 }
0x11c2   :  { %v1232_v16 = vadd.f32 %v1227_v15, %v6762_v61 }
0x11c3   :  { %v5386_v19 = vpop.f32.mrf.mxu0 }
0x11c4   :  { %5776 = vtanh.f32 %v1232_v16  ;;  %v5065_v42 = vmul.f32 -1.442695, %v1232_v16 }
0x11c5   :  { %5778 = vpow2.f32 %v5064_v21 }
0x11c6   :  { %5780 = vpow2.f32 %v5065_v42 }
0x11cd   :  { %v5775_v38 = vpop.eup %5774 }
0x11ce   :  { %1251 = vrot.lane.b32.xlu0 %v5775_v38, %s6549_s22 }
0x11d1   :  { %v5777_v20 = vpop.eup %5776 }
0x11d2   :  { %1253 = vrot.lane.b32.xlu1 %v5777_v20, %s6549_s22  ;;  %v5779_v22 = vpop.eup %5778 }
0x11d3   :  { %v1239_v25 = vadd.f32 1.0, %v5779_v22  ;;  %v5781_v56 = vpop.eup %5780 }
0x11d4   :  { %v1240_v26 = vadd.f32 1.0, %v5781_v56  ;;  %v5630_v56 = vld [vmem:[#allocation16 + $0x8] sm:$0xff]  }
0x11d5   :  { %5782 = vrcp.f32 %v1239_v25  ;;  %5395 = vmatprep.subr.bf16.mxu0 %v5630_v56 }
0x11d6   :  { %5784 = vrcp.f32 %v1240_v26  ;;  %5396 = vmatpush3.bf16.msra.mxu0 %v5630_v56 }
0x11e2   :  { %v5783_v27 = vpop.eup %5782 }
0x11e3   :  { %v5785_v29 = vpop.eup %5784  ;;  %v1247_v36 = vmul.f32 %v5783_v27, %v1139_v62 }
0x11e4   :  { %v1248_v39 = vmul.f32 %v5785_v29, %v1140_v1 }
0x1240   :  { %v1252_v61 = vpop.permute.xlu0 %1251 }
0x1241   :  { %v1257_v28 = vmul.f32 %v5783_v27, %v1252_v61  ;;  %v1610_v61 = vld [vmem:[#allocation10 + $0x30] sm:$0xff] }
0x1243   :  { %1261 = vrot.lane.b32.xlu0 %v1257_v28, %s6562_s4  ;;  %v1611_v28 = vld [vmem:[#allocation10 + $0x38] sm:$0xff] }
0x1244   :  { %v1254_v30 = vpop.permute.xlu1 %1253 }
0x1245   :  { %v1258_v31 = vmul.f32 %v5785_v29, %v1254_v30  ;;  %v1612_v30 = vld [vmem:[#allocation10 + $0x40] sm:$0xff] }
0x1247   :  { %1263 = vrot.lane.b32.xlu1 %v1258_v31, %s6562_s4  ;;  %v1613_v31 = vld [vmem:[#allocation10 + $0x48] sm:$0xff] }
0x12b5   :  { %v1262_v40 = vpop.permute.xlu0 %1261 }
0x12b6   :  { %v1267_v37 = vadd.f32 %v1262_v40, %v1247_v36  ;;  %v1623_v36 = vpack.c.bf16 %v1611_v28, %v1610_v61  ;;  %v1624_v40 = vpack.c.bf16 %v1613_v31, %v1612_v30  ;;  %v5637_v61 = vld [vmem:[#allocation22] sm:$0xff]  }
0x12b8   :  { %5786 = vtanh.f32 %v1267_v37 }
0x12b9   :  { %v1264_v44 = vpop.permute.xlu1 %1263 }
0x12ba   :  { %v1268_v41 = vadd.f32 %v1264_v44, %v1248_v39  ;;  %v1615_v39 = vld [vmem:[#allocation10 + $0x58] sm:$0xff] }
0x12bc   :  { %5788 = vtanh.f32 %v1268_v41 }
0x12c5   :  { %v5787_v49 = vpop.eup %5786 }
0x12c6   :  { %1273 = vrot.lane.b32.xlu0 %v5787_v49, %s6549_s22 }
0x12c9   :  { %v5789_v51 = vpop.eup %5788 }
0x12ca   :  { %1275 = vrot.lane.b32.xlu1 %v5789_v51, %s6549_s22 }
0x1338   :  { %v1274_v50 = vpop.permute.xlu0 %1273 }
0x1339   :  { %v6888_v55 = vmul.f32 %v5783_v27, %v1274_v50  ;;  %v5631_v27 = vld [vmem:[#allocation16] sm:$0xff]  }
0x133a   :  { %5397 = vmatprep.subr.bf16.mxu0 %v5631_v27 }
0x133b   :  { %5398 = vmatpush3.bf16.msra.mxu0 %v5631_v27  ;;  %v5082_v27 = vld [vmem:[%s8132_s13] ss:$0 sm:$0xff] }
0x133c   :  { %v1276_v53 = vpop.permute.xlu1 %1275  ;;  %5439 = vmatprep.subr.bf16.mxu0 %v8137_v0 }
0x133d   :  { %v6890_v57 = vmul.f32 %v5785_v29, %v1276_v53  ;;  %v5635_v29 = vld [vmem:[#allocation15] sm:$0xff]  }
0x133f   :  { %v1299_v59 = vpack.c.bf16 %v6890_v57, %v6888_v55 }
0x1341   :  { %1301 = vrot.lane.b32.xlu0 %v1299_v59, %s6562_s4 }
0x13b3   :  { %v1302_v60 = vpop.permute.xlu0 %1301 }
0x13b4   :  { %5392 = vmatmul.mubr.msk.bf16.vlgmr.msra.gmra.mxu1 %vm264_vm1, %v1302_v60 }
0x1474   :  { %v1352_v32 = vpop.f32.mrf.mxu1 }
0x1475   :  { %v1359_v62 = vadd.f32 %v1352_v32, %v6756_v54 }
0x1476   :  { %v5393_v63 = vpop.f32.mrf.mxu1 }
0x1477   :  { %5790 = vtanh.f32 %v1359_v62  ;;  %v5069_v6 = vmul.f32 -1.442695, %v1359_v62 }
0x1478   :  { %v1355_v35 = vpop.f32.mrf.mxu1 }
0x1479   :  { %v1360_v1 = vadd.f32 %v1355_v35, %v6760_v58 }
0x147a   :  { %v5394_v4 = vpop.f32.mrf.mxu1 }
0x147b   :  { %5792 = vtanh.f32 %v1360_v1  ;;  %v5070_v52 = vmul.f32 -1.442695, %v1360_v1 }
0x147c   :  { %5794 = vpow2.f32 %v5069_v6 }
0x147d   :  { %5796 = vpow2.f32 %v5070_v52 }
0x1484   :  { %v5791_v48 = vpop.eup %5790 }
0x1485   :  { %1379 = vrot.lane.b32.xlu1 %v5791_v48, %s6549_s22 }
0x1488   :  { %v5793_v5 = vpop.eup %5792 }
0x1489   :  { %1381 = vrot.lane.b32.xlu0 %v5793_v5, %s6549_s22  ;;  %v5795_v7 = vpop.eup %5794 }
0x148a   :  { %v1367_v10 = vadd.f32 1.0, %v5795_v7  ;;  %v5797_v54 = vpop.eup %5796 }
0x148b   :  { %v1368_v11 = vadd.f32 1.0, %v5797_v54 }
0x148c   :  { %5798 = vrcp.f32 %v1367_v10 }
0x148d   :  { %5800 = vrcp.f32 %v1368_v11 }
0x1499   :  { %v6900_v12 = vpop.eup %5798 }
0x149a   :  { %v6904_v14 = vpop.eup %5800  ;;  %v1375_v19 = vmul.f32 %v6900_v12, %v1267_v37  ;;  %v1614_v37 = vld [vmem:[#allocation10 + $0x50] sm:$0xff] }
0x149b   :  { %v1376_v21 = vmul.f32 %v6904_v14, %v1268_v41  ;;  %v1625_v44 = vpack.c.bf16 %v1615_v39, %v1614_v37 }
0x14f7   :  { %v1380_v58 = vpop.permute.xlu1 %1379 }
0x14f8   :  { %v1385_v13 = vmul.f32 %v6900_v12, %v1380_v58 }
0x14fa   :  { %1389 = vrot.lane.b32.xlu1 %v1385_v13, %s6562_s4 }
0x14fb   :  { %v1382_v15 = vpop.permute.xlu0 %1381 }
0x14fc   :  { %v1386_v16 = vmul.f32 %v6904_v14, %v1382_v15 }
0x14fe   :  { %1391 = vrot.lane.b32.xlu0 %v1386_v16, %s6562_s4 }
0x156c   :  { %v1390_v38 = vpop.permute.xlu1 %1389 }
0x156d   :  { %v1395_v20 = vadd.f32 %v1390_v38, %v1375_v19 }
0x156f   :  { %5802 = vtanh.f32 %v1395_v20 }
0x1570   :  { %v1392_v42 = vpop.permute.xlu0 %1391 }
0x1571   :  { %v1396_v22 = vadd.f32 %v1392_v42, %v1376_v21 }
0x1573   :  { %5804 = vtanh.f32 %v1396_v22 }
0x157c   :  { %v5803_v25 = vpop.eup %5802 }
0x157d   :  { %1401 = vrot.lane.b32.xlu1 %v5803_v25, %s6549_s22 }
0x1580   :  { %v5805_v26 = vpop.eup %5804 }
0x1581   :  { %516 = vrot.lane.b32.xlu1 %v6772_v33, %s6562_s4  ;;  %1403 = vrot.lane.b32.xlu0 %v5805_v26, %s6549_s22  ;;  %v5632_v33 = vld [vmem:[%s8129_s10 + $0x8] sm:$0xff]  }
0x1582   :  { %5415 = vmatprep.subr.bf16.mxu1 %v5632_v33 }
0x1583   :  { %5416 = vmatpush3.bf16.msra.mxu1 %v5632_v33 }
0x1585   :  { %643 = vrot.lane.b32.xlu1 %v6792_v17, %s6562_s4  ;;  %518 = vrot.lane.b32.xlu0 %v6774_v34, %s6562_s4  ;;  %v5633_v34 = vld [vmem:[%s8129_s10] sm:$0xff]   ;;  %v1604_v17 = vld [vmem:[#allocation10] sm:$0xff] }
0x1586   :  { %5417 = vmatprep.subr.bf16.mxu1 %v5633_v34 }
0x1587   :  { %5418 = vmatpush3.bf16.msra.mxu1 %v5633_v34 }
0x1588   :  { %5431 = vmatprep.subr.bf16.mxu1 %v8137_v0 }
0x1589   :  { %771 = vrot.lane.b32.xlu1 %v6812_v2, %s6562_s4  ;;  %645 = vrot.lane.b32.xlu0 %v6794_v18, %s6562_s4  ;;  %v1605_v18 = vld [vmem:[#allocation10 + $0x8] sm:$0xff] }
0x158a   :  { %v1620_v2 = vpack.c.bf16 %v1605_v18, %v1604_v17 }
0x158c   :  { %5419 = vmatprep.mubr.msk.bf16.mxu1 %vm264_vm1, %v1620_v2 }
0x158d   :  { %899 = vrot.lane.b32.xlu1 %v6832_v43, %s6562_s4  ;;  %773 = vrot.lane.b32.xlu0 %v6814_v3, %s6562_s4  ;;  %v1606_v3 = vld [vmem:[#allocation10 + $0x10] sm:$0xff]  ;;  %v1607_v43 = vld [vmem:[#allocation10 + $0x18] sm:$0xff] }
0x1591   :  { %1027 = vrot.lane.b32.xlu1 %v6852_v23, %s6562_s4  ;;  %901 = vrot.lane.b32.xlu0 %v6834_v45, %s6562_s4  ;;  %v1608_v45 = vld [vmem:[#allocation10 + $0x20] sm:$0xff]  ;;  %v1609_v23 = vld [vmem:[#allocation10 + $0x28] sm:$0xff] }
0x1595   :  { %1155 = vrot.lane.b32.xlu1 %v6871_v8, %s6562_s4  ;;  %1029 = vrot.lane.b32.xlu0 %v6854_v24, %s6562_s4  ;;  %v1621_v24 = vpack.c.bf16 %v1607_v43, %v1606_v3  ;;  %v5634_v8 = vld [vmem:[#allocation15 + $0x8] sm:$0xff]   ;;  %v5636_v43 = vld [vmem:[#allocation22 + $0x8] sm:$0xff]  }
0x1597   :  { %5420 = vmatmul.mubr.msk.bf16.vlgmr.msra.gmra.mxu1 %vm264_vm1, %v1621_v24 }
0x1598   :  { %5432 = vmatpush3.bf16.msra.mxu1 %v5634_v8 }
0x1599   :  { %1283 = vrot.lane.b32.xlu1 %v6888_v55, %s6562_s4  ;;  %1157 = vrot.lane.b32.xlu0 %v6873_v9, %s6562_s4  ;;  %v1622_v9 = vpack.c.bf16 %v1609_v23, %v1608_v45 }
0x159a   :  { %5433 = vmatprep.subr.bf16.mxu1 %v8137_v0 }
0x159b   :  { %5423 = vmatprep.mubr.msk.bf16.mxu1 %vm264_vm1, %v1622_v9 }
0x159c   :  { %5434 = vmatpush3.bf16.msra.mxu1 %v5635_v29 }
0x159d   :  { %1285 = vrot.lane.b32.xlu0 %v6890_v57, %s6562_s4  ;;  %5447 = vmatprep.subr.bf16.mxu1 %v8137_v0 }
0x159f   :  { %5424 = vmatmul.mubr.msk.bf16.gmra.mxu1 %vm264_vm1, %v1623_v36 }
0x15a0   :  { %5427 = vmatprep.mubr.msk.bf16.mxu1 %vm264_vm1, %v1624_v40 }
0x15a7   :  { %5428 = vmatmul.mubr.msk.bf16.gmra.mxu1 %vm264_vm1, %v1625_v44 }
0x15a8   :  { %5435 = vmatprep.mubr.msk.bf16.mxu1 %vm6560_vm0, %v8137_v0 }
0x15ef   :  { %v1402_v41 = vpop.permute.xlu1 %1401 }
0x15f0   :  { %v6959_v47 = vmul.f32 %v6900_v12, %v1402_v41 }
0x15f2   :  { %1411 = vrot.lane.b32.xlu1 %v6959_v47, %s6562_s4 }
0x15f3   :  { %v517_v46 = vpop.permute.xlu1 %516  ;;  %v1404_v49 = vpop.permute.xlu0 %1403 }
0x15f4   :  { %522 = vst.msk [vmem:[#allocation3] sm:$0xff] %vm264_vm1, %v517_v46  ;;  %v6965_v51 = vmul.f32 %v6904_v14, %v1404_v49 }
0x15f6   :  { %1413 = vrot.lane.b32.xlu0 %v6965_v51, %s6562_s4  ;;  %v1793_v50 = vpack.c.bf16 %v6965_v51, %v6959_v47 }
0x15f7   :  { %v644_v53 = vpop.permute.xlu1 %643  ;;  %v519_v55 = vpop.permute.xlu0 %518 }
0x15f8   :  { %650 = vst.msk [vmem:[#allocation3 + $0x10] sm:$0xff] %vm264_vm1, %v644_v53  ;;  %523 = vst.msk [vmem:[#allocation3 + $0x8] sm:$0xff] %vm264_vm1, %v519_v55  ;;  %1795 = vrot.lane.b32.xlu1 %v1793_v50, %s6562_s4 }
0x15fb   :  { %v772_v57 = vpop.permute.xlu1 %771  ;;  %v646_v59 = vpop.permute.xlu0 %645  ;;  %v6976_v60 = vld [vmem:[#allocation3] sm:$0xff] }
0x15fc   :  { %778 = vst.msk [vmem:[#allocation3 + $0x20] sm:$0xff] %vm264_vm1, %v772_v57  ;;  %651 = vst.msk [vmem:[#allocation3 + $0x18] sm:$0xff] %vm264_vm1, %v646_v59 }
0x15ff   :  { %v6978_v32 = vld [vmem:[#allocation3 + $0x8] sm:$0xff]  ;;  %v900_v62 = vpop.permute.xlu1 %899  ;;  %v774_v63 = vpop.permute.xlu0 %773  ;;  %v6985_v1 = vld [vmem:[#allocation3 + $0x10] sm:$0xff] }
0x1600   :  { %906 = vst.msk [vmem:[#allocation3 + $0x30] sm:$0xff] %vm264_vm1, %v900_v62  ;;  %779 = vst.msk [vmem:[#allocation3 + $0x28] sm:$0xff] %vm264_vm1, %v774_v63  ;;  %v1440_v35 = vpack.c.bf16 %v6978_v32, %v6976_v60 }
0x1602   :  { %5399 = vmatprep.mubr.msk.bf16.mxu0 %vm264_vm1, %v1440_v35  ;;  %v7068_v35 = vld [vmem:[#allocation18] ss:$0 sm:$0xff] }
0x1603   :  { %v6987_v4 = vld [vmem:[#allocation3 + $0x18] sm:$0xff]  ;;  %v1028_v48 = vpop.permute.xlu1 %1027  ;;  %v902_v5 = vpop.permute.xlu0 %901  ;;  %v6994_v52 = vld [vmem:[#allocation3 + $0x20] sm:$0xff] }
0x1604   :  { %1034 = vst.msk [vmem:[#allocation3 + $0x40] sm:$0xff] %vm264_vm1, %v1028_v48  ;;  %907 = vst.msk [vmem:[#allocation3 + $0x38] sm:$0xff] %vm264_vm1, %v902_v5  ;;  %v1441_v6 = vpack.c.bf16 %v6987_v4, %v6985_v1 }
0x1606   :  { %5400 = vmatmul.mubr.msk.bf16.vlgmr.msra.gmra.mxu0 %vm264_vm1, %v1441_v6 }
0x1607   :  { %v6996_v7 = vld [vmem:[#allocation3 + $0x28] sm:$0xff]  ;;  %v1156_v10 = vpop.permute.xlu1 %1155  ;;  %v1030_v54 = vpop.permute.xlu0 %1029  ;;  %v7003_v13 = vld [vmem:[#allocation3 + $0x30] sm:$0xff] }
0x1608   :  { %1162 = vst.msk [vmem:[#allocation3 + $0x50] sm:$0xff] %vm264_vm1, %v1156_v10  ;;  %1035 = vst.msk [vmem:[#allocation3 + $0x48] sm:$0xff] %vm264_vm1, %v1030_v54  ;;  %v1442_v11 = vpack.c.bf16 %v6996_v7, %v6994_v52 }
0x160a   :  { %5403 = vmatprep.mubr.msk.bf16.mxu0 %vm264_vm1, %v1442_v11 }
0x160b   :  { %v1284_v12 = vpop.permute.xlu1 %1283  ;;  %v1158_v58 = vpop.permute.xlu0 %1157  ;;  %v7005_v14 = vld [vmem:[#allocation3 + $0x38] sm:$0xff]  ;;  %v7012_v19 = vld [vmem:[#allocation3 + $0x40] sm:$0xff] }
0x160c   :  { %1290 = vst.msk [vmem:[#allocation3 + $0x60] sm:$0xff] %vm264_vm1, %v1284_v12  ;;  %1163 = vst.msk [vmem:[#allocation3 + $0x58] sm:$0xff] %vm264_vm1, %v1158_v58  ;;  %v1443_v15 = vpack.c.bf16 %v7005_v14, %v7003_v13 }
0x160e   :  { %5404 = vmatmul.mubr.msk.bf16.gmra.mxu0 %vm264_vm1, %v1443_v15 }
0x160f   :  { %v1286_v16 = vpop.permute.xlu0 %1285  ;;  %v7014_v38 = vld [vmem:[#allocation3 + $0x48] sm:$0xff]  ;;  %v7020_v21 = vld [vmem:[#allocation3 + $0x50] sm:$0xff] }
0x1610   :  { %1291 = vst.msk [vmem:[#allocation3 + $0x68] sm:$0xff] %vm264_vm1, %v1286_v16  ;;  %v1444_v20 = vpack.c.bf16 %v7014_v38, %v7012_v19 }
0x1612   :  { %5407 = vmatprep.mubr.msk.bf16.mxu0 %vm264_vm1, %v1444_v20 }
0x1613   :  { %v7022_v42 = vld [vmem:[#allocation3 + $0x58] sm:$0xff]  ;;  %v7027_v25 = vld [vmem:[#allocation3 + $0x60] sm:$0xff] }
0x1614   :  { %v1445_v22 = vpack.c.bf16 %v7022_v42, %v7020_v21 }
0x1616   :  { %5408 = vmatmul.mubr.msk.bf16.gmra.mxu0 %vm264_vm1, %v1445_v22 }
0x1617   :  { %v7029_v56 = vld [vmem:[#allocation3 + $0x68] sm:$0xff] }
0x1618   :  { %v1446_v26 = vpack.c.bf16 %v7029_v56, %v7027_v25 }
0x161a   :  { %5411 = vmatprep.mubr.msk.bf16.mxu0 %vm264_vm1, %v1446_v26 }
0x1657   :  { %v5421_v34 = vpop.f32.mrf.mxu1 }
0x1658   :  { %v1706_v17 = vadd.f32 %v5421_v34, %v5082_v27 }
0x1659   :  { %v1697_v18 = vpop.f32.mrf.mxu1 }
0x165a   :  { %1747 = vst.msk [vmem:[#allocation5 + $0x10] sm:$0xff] %vm1744_vm2, %v1706_v17  ;;  %v1698_v2 = vadd.f32 %v5082_v27, %v1697_v18 }
0x165b   :  { %v5422_v45 = vpop.f32.mrf.mxu1 }
0x165c   :  { %1745 = vst.msk [vmem:[#allocation5] sm:$0xff] %vm1744_vm2, %v1698_v2  ;;  %v1709_v23 = vadd.f32 %v5422_v45, %v5082_v27 }
0x165d   :  { %v1700_v8 = vpop.f32.mrf.mxu1 }
0x165e   :  { %1748 = vst.msk [vmem:[#allocation5 + $0x18] sm:$0xff] %vm1744_vm2, %v1709_v23  ;;  %v1701_v9 = vadd.f32 %v5082_v27, %v1700_v8  ;;  %v7097_v8 = vld [vmem:[%s8125_s6] ss:$0 sm:$0xff] }
0x165f   :  { %v5425_v28 = vpop.f32.mrf.mxu1 }
0x1660   :  { %1746 = vst.msk [vmem:[#allocation5 + $0x8] sm:$0xff] %vm1744_vm2, %v1701_v9  ;;  %v1722_v29 = vadd.f32 %v5425_v28, %v5082_v27 }
0x1661   :  { %v1713_v30 = vpop.f32.mrf.mxu1 }
0x1662   :  { %1751 = vst.msk [vmem:[#allocation5 + $0x30] sm:$0xff] %vm1744_vm2, %v1722_v29  ;;  %v1714_v31 = vadd.f32 %v5082_v27, %v1713_v30 }
0x1663   :  { %v5426_v37 = vpop.f32.mrf.mxu1 }
0x1664   :  { %v1412_v33 = vpop.permute.xlu1 %1411  ;;  %1749 = vst.msk [vmem:[#allocation5 + $0x20] sm:$0xff] %vm1744_vm2, %v1714_v31  ;;  %v1725_v44 = vadd.f32 %v5426_v37, %v5082_v27 }
0x1665   :  { %1418 = vst.msk [vmem:[#allocation3 + $0x70] sm:$0xff] %vm264_vm1, %v1412_v33  ;;  %v1716_v41 = vpop.f32.mrf.mxu1 }
0x1666   :  { %1752 = vst.msk [vmem:[#allocation5 + $0x38] sm:$0xff] %vm1744_vm2, %v1725_v44  ;;  %v1717_v46 = vadd.f32 %v5082_v27, %v1716_v41 }
0x1667   :  { %v5429_v49 = vpop.f32.mrf.mxu1 }
0x1668   :  { %v1414_v3 = vpop.permute.xlu0 %1413  ;;  %1750 = vst.msk [vmem:[#allocation5 + $0x28] sm:$0xff] %vm1744_vm2, %v1717_v46  ;;  %v1738_v50 = vadd.f32 %v5429_v49, %v5082_v27 }
0x1669   :  { %1419 = vst.msk [vmem:[#allocation3 + $0x78] sm:$0xff] %vm264_vm1, %v1414_v3  ;;  %v1729_v53 = vpop.f32.mrf.mxu1 }
0x166a   :  { %v1796_v24 = vpop.permute.xlu1 %1795  ;;  %1755 = vst.msk [vmem:[#allocation5 + $0x50] sm:$0xff] %vm1744_vm2, %v1738_v50  ;;  %v1730_v55 = vadd.f32 %v5082_v27, %v1729_v53 }
0x166b   :  { %5436 = vmatmul.mubr.msk.bf16.vlgmr.msra.gmra.mxu1 %vm264_vm1, %v1796_v24  ;;  %v5430_v57 = vpop.f32.mrf.mxu1 }
0x166c   :  { %5448 = vmatpush3.bf16.msra.mxu1 %v5636_v43  ;;  %5451 = vmatprep.mubr.msk.bf16.mxu1 %vm6560_vm0, %v8137_v0  ;;  %v7048_v36 = vld [vmem:[#allocation3 + $0x70] sm:$0xff]  ;;  %1753 = vst.msk [vmem:[#allocation5 + $0x40] sm:$0xff] %vm1744_vm2, %v1730_v55  ;;  %v1741_v59 = vadd.f32 %v5430_v57, %v5082_v27 }
0x166d   :  { %5449 = vmatprep.subr.bf16.mxu1 %v8137_v0  ;;  %v1732_v62 = vpop.f32.mrf.mxu1 }
0x166e   :  { %1756 = vst.msk [vmem:[#allocation5 + $0x58] sm:$0xff] %vm1744_vm2, %v1741_v59  ;;  %v1733_v63 = vadd.f32 %v5082_v27, %v1732_v62 }
0x1670   :  { %5450 = vmatpush3.bf16.msra.mxu1 %v5637_v61  ;;  %v7050_v40 = vld [vmem:[#allocation3 + $0x78] sm:$0xff]  ;;  %1754 = vst.msk [vmem:[#allocation5 + $0x48] sm:$0xff] %vm1744_vm2, %v1733_v63 }
0x1671   :  { %v1447_v39 = vpack.c.bf16 %v7050_v40, %v7048_v36  ;;  %5463 = vmatprep.subr.bf16.mxu1 %v8137_v0 }
0x1673   :  { %5412 = vmatmul.mubr.msk.bf16.gmra.mxu0 %vm264_vm1, %v1447_v39  ;;  %5452 = vmatmul.mubr.msk.bf16.vlgmr.msra.gmra.mxu1 %vm264_vm1, %v1796_v24 }
0x1674   :  { %5443 = vmatprep.mubr.msk.bf16.mxu0 %vm6560_vm0, %v8137_v0  ;;  %5467 = vmatprep.mubr.msk.bf16.mxu1 %vm6560_vm0, %v8137_v0 }
0x16c6   :  { %v5401_v48 = vpop.f32.mrf.mxu0 }
0x16c7   :  { %v1534_v5 = vadd.f32 %v5401_v48, %v7068_v35 }
0x16c8   :  { %v1525_v6 = vpop.f32.mrf.mxu0 }
0x16c9   :  { %1590 = vst.msk [vmem:[#allocation4 + $0x10] sm:$0xff] %vm264_vm1, %v1534_v5  ;;  %v1526_v10 = vadd.f32 %v7068_v35, %v1525_v6 }
0x16ca   :  { %v5402_v54 = vpop.f32.mrf.mxu0 }
0x16cb   :  { %1588 = vst.msk [vmem:[#allocation4] sm:$0xff] %vm264_vm1, %v1526_v10  ;;  %v1537_v11 = vadd.f32 %v5402_v54, %v7068_v35 }
0x16cc   :  { %v1528_v12 = vpop.f32.mrf.mxu0 }
0x16cd   :  { %1591 = vst.msk [vmem:[#allocation4 + $0x18] sm:$0xff] %vm264_vm1, %v1537_v11  ;;  %v1529_v58 = vadd.f32 %v7068_v35, %v1528_v12 }
0x16ce   :  { %v5405_v15 = vpop.f32.mrf.mxu0 }
0x16cf   :  { %1589 = vst.msk [vmem:[#allocation4 + $0x8] sm:$0xff] %vm264_vm1, %v1529_v58  ;;  %v1550_v16 = vadd.f32 %v5405_v15, %v7068_v35 }
0x16d0   :  { %v1541_v20 = vpop.f32.mrf.mxu0  ;;  %v7114_v41 = vld [vmem:[#allocation4 + $0x10] sm:$0xff] }
0x16d1   :  { %1594 = vst.msk [vmem:[#allocation4 + $0x30] sm:$0xff] %vm264_vm1, %v1550_v16  ;;  %v1542_v22 = vadd.f32 %v7068_v35, %v1541_v20 }
0x16d2   :  { %v5406_v26 = vpop.f32.mrf.mxu0  ;;  %v7104_v30 = vld [vmem:[#allocation4] sm:$0xff] }
0x16d3   :  { %1592 = vst.msk [vmem:[#allocation4 + $0x20] sm:$0xff] %vm264_vm1, %v1542_v22  ;;  %v1553_v27 = vadd.f32 %v5406_v26, %v7068_v35 }
0x16d4   :  { %v1544_v33 = vpop.f32.mrf.mxu0  ;;  %v7125_v59 = vld [vmem:[#allocation4 + $0x18] sm:$0xff] }
0x16d5   :  { %1595 = vst.msk [vmem:[#allocation4 + $0x38] sm:$0xff] %vm264_vm1, %v1553_v27  ;;  %v1545_v34 = vadd.f32 %v7068_v35, %v1544_v33 }
0x16d6   :  { %v5409_v17 = vpop.f32.mrf.mxu0  ;;  %v7144_v22 = vld [vmem:[#allocation4 + $0x8] sm:$0xff] }
0x16d7   :  { %1593 = vst.msk [vmem:[#allocation4 + $0x28] sm:$0xff] %vm264_vm1, %v1545_v34  ;;  %v1566_v18 = vadd.f32 %v5409_v17, %v7068_v35  ;;  %8188 = vst [vmem:[#allocation33_spill] sm:$0xff] %v7144_v22 }
0x16d8   :  { %v1557_v2 = vpop.f32.mrf.mxu0  ;;  %v7106_v31 = vld [vmem:[#allocation4 + $0x30] sm:$0xff] }
0x16d9   :  { %1598 = vst.msk [vmem:[#allocation4 + $0x50] sm:$0xff] %vm264_vm1, %v1566_v18  ;;  %v1558_v3 = vadd.f32 %v7068_v35, %v1557_v2 }
0x16da   :  { %v5410_v43 = vpop.f32.mrf.mxu0  ;;  %v7102_v29 = vld [vmem:[#allocation4 + $0x20] sm:$0xff] }
0x16db   :  { %1596 = vst.msk [vmem:[#allocation4 + $0x40] sm:$0xff] %vm264_vm1, %v1558_v3  ;;  %v1569_v45 = vadd.f32 %v5410_v43, %v7068_v35  ;;  %v7156_v3 = vld [vmem:[#allocation19] ss:$0 sm:$0xff] }
0x16dc   :  { %v1560_v23 = vpop.f32.mrf.mxu0  ;;  %v7150_v33 = vld [vmem:[#allocation4 + $0x38] sm:$0xff]  ;;  %8189 = vst [vmem:[#allocation34_spill] sm:$0xff] %v7156_v3 }
0x16dd   :  { %1599 = vst.msk [vmem:[#allocation4 + $0x58] sm:$0xff] %vm264_vm1, %v1569_v45  ;;  %v1561_v24 = vadd.f32 %v7068_v35, %v1560_v23 }
0x16de   :  { %v7136_v54 = vld [vmem:[#allocation4 + $0x28] sm:$0xff] }
0x16df   :  { %1597 = vst.msk [vmem:[#allocation4 + $0x48] sm:$0xff] %vm264_vm1, %v1561_v24 }
0x16e0   :  { %v7131_v5 = vld [vmem:[#allocation4 + $0x50] sm:$0xff] }
0x16e2   :  { %v7118_v50 = vld [vmem:[#allocation4 + $0x40] sm:$0xff] }
0x16e6   :  { %v7159_v43 = vld [vmem:[#allocation4 + $0x48] sm:$0xff] }
0x16e7   :  { %8190 = vst [vmem:[#allocation35_spill] sm:$0xff] %v7159_v43 }
0x172b   :  { %v1846_v9 = vpop.f32.mrf.mxu1 }
0x172c   :  { %v7100_v61 = vadd.f32 %v7097_v8, %v1846_v9 }
0x172d   :  { %v5437_v28 = vpop.f32.mrf.mxu1 }
0x172e   :  { %v1857_v37 = vadd.f32 %v7100_v61, %v7102_v29  ;;  %v1853_v39 = vadd.f32 %v7100_v61, %v7104_v30  ;;  %v1859_v44 = vadd.f32 %v7100_v61, %v7106_v31  ;;  %v1855_v49 = vadd.f32 %v7100_v61, %v7114_v41 }
0x172f   :  { %v1849_v46 = vpop.f32.mrf.mxu1  ;;  %v1861_v55 = vadd.f32 %v7100_v61, %v7118_v50  ;;  %v1863_v10 = vadd.f32 %v7100_v61, %v7131_v5 }
0x1730   :  { %v7121_v53 = vadd.f32 %v7097_v8, %v1849_v46  ;;  %5806 = vtanh.f32 %v1857_v37 }
0x1731   :  { %v5438_v57 = vpop.f32.mrf.mxu1  ;;  %5808 = vtanh.f32 %v1853_v39 }
0x1732   :  { %5810 = vtanh.f32 %v1859_v44  ;;  %v1856_v62 = vadd.f32 %v7121_v53, %v7125_v59  ;;  %v1858_v58 = vadd.f32 %v7121_v53, %v7136_v54  ;;  %v1854_v27 = vadd.f32 %v7121_v53, %v7144_v22 }
0x1733   :  { %v5413_v63 = vpop.f32.mrf.mxu0  ;;  %v7129_v48 = vpop.f32.mrf.mxu1  ;;  %5812 = vtanh.f32 %v1855_v49  ;;  %v1860_v18 = vadd.f32 %v7121_v53, %v7150_v33  ;;  %v1862_v23 = vadd.f32 %v7121_v53, %v7159_v43 }
0x1734   :  { %v1582_v6 = vadd.f32 %v5413_v63, %v7068_v35  ;;  %5814 = vtanh.f32 %v1861_v55 }
0x1735   :  { %v1573_v11 = vpop.f32.mrf.mxu0  ;;  %v5453_v12 = vpop.f32.mrf.mxu1  ;;  %5816 = vtanh.f32 %v1856_v62  ;;  %v7175_v62 = vld [vmem:[#allocation4 + $0x58] sm:$0xff] }
0x1736   :  { %1602 = vst.msk [vmem:[#allocation4 + $0x70] sm:$0xff] %vm264_vm1, %v1582_v6  ;;  %v1574_v15 = vadd.f32 %v7068_v35, %v1573_v11  ;;  %5818 = vtanh.f32 %v1863_v10  ;;  %8192 = vst [vmem:[#allocation37_spill] sm:$0xff] %v7175_v62  ;;  %v1864_v11 = vadd.f32 %v7121_v53, %v7175_v62 }
0x1737   :  { %v5414_v16 = vpop.f32.mrf.mxu0  ;;  %v7142_v20 = vpop.f32.mrf.mxu1  ;;  %5820 = vtanh.f32 %v1858_v58 }
0x1738   :  { %1600 = vst.msk [vmem:[#allocation4 + $0x60] sm:$0xff] %vm264_vm1, %v1574_v15  ;;  %v1585_v26 = vadd.f32 %v5414_v16, %v7068_v35  ;;  %5822 = vtanh.f32 %v1854_v27 }
0x1739   :  { %v1576_v34 = vpop.f32.mrf.mxu0  ;;  %v5454_v17 = vpop.f32.mrf.mxu1  ;;  %5824 = vtanh.f32 %v1860_v18 }
0x173a   :  { %1603 = vst.msk [vmem:[#allocation4 + $0x78] sm:$0xff] %vm264_vm1, %v1585_v26  ;;  %v1577_v2 = vadd.f32 %v7068_v35, %v1576_v34  ;;  %5826 = vtanh.f32 %v1862_v23 }
0x173c   :  { %1601 = vst.msk [vmem:[#allocation4 + $0x68] sm:$0xff] %vm264_vm1, %v1577_v2 }
0x173d   :  { %v5807_v45 = vpop.eup %5806  ;;  %v7163_v24 = vld [vmem:[#allocation4 + $0x70] sm:$0xff] }
0x173e   :  { %8191 = vst [vmem:[#allocation36_spill] sm:$0xff] %v7163_v24  ;;  %v5809_v9 = vpop.eup %5808  ;;  %v1895_v28 = vmul.f32 %v5807_v45, %v7156_v3  ;;  %v1867_v57 = vadd.f32 %v7100_v61, %v7163_v24 }
0x173f   :  { %v5811_v37 = vpop.eup %5810  ;;  %v1891_v35 = vmul.f32 %v5809_v9, %v7156_v3  ;;  %v7167_v39 = vld [vmem:[#allocation4 + $0x60] sm:$0xff] }
0x1740   :  { %v5813_v44 = vpop.eup %5812  ;;  %v1919_v46 = vsel %vm264_vm1, %v1895_v28, 0.0  ;;  %v1897_v49 = vmul.f32 %v5811_v37, %v7156_v3  ;;  %v1865_v55 = vadd.f32 %v7100_v61, %v7167_v39 }
0x1741   :  { %v5815_v63 = vpop.eup %5814  ;;  %1920 = vadd.xlane.f32.xlu1 %v1919_v46  ;;  %v1907_v6 = vsel %vm264_vm1, %v1891_v35, 0.0  ;;  %v1893_v10 = vmul.f32 %v5813_v44, %v7156_v3  ;;  %v7189_v18 = vld [vmem:[#allocation4 + $0x78] sm:$0xff] }
0x1742   :  { %v5817_v12 = vpop.eup %5816  ;;  %1908 = vadd.xlane.f32.xlu0 %v1907_v6  ;;  %5828 = vtanh.f32 %v1865_v55  ;;  %v1925_v15 = vsel %vm264_vm1, %v1897_v49, 0.0  ;;  %v1899_v61 = vmul.f32 %v5815_v63, %v7156_v3  ;;  %8194 = vst [vmem:[#allocation39_spill] sm:$0xff] %v7189_v18  ;;  %v1868_v37 = vadd.f32 %v7121_v53, %v7189_v18 }
0x1743   :  { %v7181_v58 = vld [vmem:[#allocation4 + $0x68] sm:$0xff]  ;;  %5830 = vtanh.f32 %v1867_v57  ;;  %v5819_v16 = vpop.eup %5818  ;;  %v1913_v26 = vsel %vm264_vm1, %v1893_v10, 0.0  ;;  %v1894_v27 = vmul.f32 %v5817_v12, %v7156_v3 }
0x1744   :  { %8193 = vst [vmem:[#allocation38_spill] sm:$0xff] %v7181_v58  ;;  %5832 = vtanh.f32 %v1864_v11  ;;  %v1866_v34 = vadd.f32 %v7121_v53, %v7181_v58  ;;  %v5821_v17 = vpop.eup %5820  ;;  %v1931_v2 = vsel %vm264_vm1, %v1899_v61, 0.0  ;;  %v1901_v45 = vmul.f32 %v5819_v16, %v7156_v3 }
0x1745   :  { %1926 = vadd.xlane.f32.xlu1 %v1925_v15  ;;  %v5823_v23 = vpop.eup %5822  ;;  %v1916_v9 = vsel %vm264_vm1, %v1894_v27, 0.0  ;;  %v1896_v28 = vmul.f32 %v5821_v17, %v7156_v3 }
0x1746   :  { %1914 = vadd.xlane.f32.xlu0 %v1913_v26  ;;  %5834 = vtanh.f32 %v1866_v34  ;;  %v5825_v35 = vpop.eup %5824  ;;  %v1937_v44 = vsel %vm264_vm1, %v1901_v45, 0.0  ;;  %v1892_v46 = vmul.f32 %v5823_v23, %v7156_v3 }
0x1747   :  { %v1922_v49 = vsel %vm264_vm1, %v1896_v28, 0.0  ;;  %v1898_v55 = vmul.f32 %v5825_v35, %v7156_v3  ;;  %5836 = vtanh.f32 %v1868_v37  ;;  %v5827_v57 = vpop.eup %5826  ;;  %v5020_v35 = vld [vmem:[%s8133_s14] ss:$0 sm:$0xff]  ;;  %s6563_s14 = smov 96  }
0x1748   :  { %v1910_v6 = vsel %vm264_vm1, %v1892_v46, 0.0  ;;  %v1900_v12 = vmul.f32 %v5827_v57, %v7156_v3  ;;  %v5639_v46 = vld [vmem:[#allocation21] sm:$0xff]  }
0x1749   :  { %1932 = vadd.xlane.f32.xlu1 %v1931_v2  ;;  %v1928_v11 = vsel %vm264_vm1, %v1898_v55, 0.0 }
0x174a   :  { %1917 = vadd.xlane.f32.xlu0 %v1916_v9  ;;  %v1934_v26 = vsel %vm264_vm1, %v1900_v12, 0.0 }
0x174d   :  { %1938 = vadd.xlane.f32.xlu1 %v1937_v44  ;;  %v5638_v44 = vld [vmem:[#allocation21 + $0x8] sm:$0xff]  }
0x174e   :  { %1923 = vadd.xlane.f32.xlu0 %v1922_v49  ;;  %5440 = vmatpush3.bf16.msra.mxu0 %v5638_v44 }
0x174f   :  { %v5829_v63 = vpop.eup %5828  ;;  %5441 = vmatprep.subr.bf16.mxu0 %v8137_v0 }
0x1750   :  { %v1903_v10 = vmul.f32 %v5829_v63, %v7156_v3  ;;  %v5831_v53 = vpop.eup %5830 }
0x1751   :  { %1911 = vadd.xlane.f32.xlu1 %v1910_v6  ;;  %v5833_v15 = vpop.eup %5832  ;;  %v1905_v16 = vmul.f32 %v5831_v53, %v7156_v3 }
0x1752   :  { %1929 = vadd.xlane.f32.xlu0 %v1928_v11  ;;  %v1943_v61 = vsel %vm264_vm1, %v1903_v10, 0.0  ;;  %v1902_v27 = vmul.f32 %v5833_v15, %v7156_v3  ;;  %5442 = vmatpush3.bf16.msra.mxu0 %v5639_v46 }
0x1753   :  { %v5835_v34 = vpop.eup %5834  ;;  %v1949_v17 = vsel %vm264_vm1, %v1905_v16, 0.0  ;;  %5455 = vmatprep.subr.bf16.mxu0 %v8137_v0 }
0x1754   :  { %v1940_v2 = vsel %vm264_vm1, %v1902_v27, 0.0  ;;  %v1904_v45 = vmul.f32 %v5835_v34, %v7156_v3  ;;  %v5837_v23 = vpop.eup %5836 }
0x1755   :  { %1944 = vadd.xlane.f32.xlu1 %v1943_v61  ;;  %v1906_v28 = vmul.f32 %v5837_v23, %v7156_v3 }
0x1756   :  { %1935 = vadd.xlane.f32.xlu0 %v1934_v26  ;;  %v1946_v9 = vsel %vm264_vm1, %v1904_v45, 0.0 }
0x1757   :  { %v1952_v37 = vsel %vm264_vm1, %v1906_v28, 0.0 }
0x1759   :  { %1950 = vadd.xlane.f32.xlu1 %v1949_v17 }
0x175a   :  { %1941 = vadd.xlane.f32.xlu0 %v1940_v2 }
0x175e   :  { %1947 = vadd.xlane.f32.xlu0 %v1946_v9 }
0x1762   :  { %1953 = vadd.xlane.f32.xlu0 %v1952_v37 }
0x176a   :  { %2217 = vrot.lane.b32.xlu1 %v5020_v35, %s6549_s22 }
0x17ca   :  { %v1921_v49 = vpop.xlane.xlu1 %1920 }
0x17cb   :  { %v1909_v55 = vpop.xlane.xlu0 %1908 }
0x17cc   :  { %v1955_v16 = vmax.f32 %v1909_v55, %v1921_v49 }
0x17ce   :  { %v1927_v57 = vpop.xlane.xlu1 %1926 }
0x17cf   :  { %v1915_v63 = vpop.xlane.xlu0 %1914 }
0x17d0   :  { %v1956_v26 = vmax.f32 %v1915_v63, %v1927_v57 }
0x17d2   :  { %v1933_v6 = vpop.xlane.xlu1 %1932 }
0x17d3   :  { %v1918_v10 = vpop.xlane.xlu0 %1917  ;;  %v1957_v34 = vmax.f32 %v1955_v16, %v1933_v6 }
0x17d6   :  { %v1939_v53 = vpop.xlane.xlu1 %1938 }
0x17d7   :  { %v1924_v11 = vpop.xlane.xlu0 %1923  ;;  %v1958_v17 = vmax.f32 %v1956_v26, %v1939_v53 }
0x17da   :  { %v1912_v12 = vpop.xlane.xlu1 %1911 }
0x17db   :  { %v1930_v15 = vpop.xlane.xlu0 %1929  ;;  %v1962_v37 = vmax.f32 %v1912_v12, %v1924_v11 }
0x17dc   :  { %v1963_v58 = vmax.f32 %v1918_v10, %v1930_v15 }
0x17de   :  { %v1945_v61 = vpop.xlane.xlu1 %1944 }
0x17df   :  { %v1936_v27 = vpop.xlane.xlu0 %1935  ;;  %v1959_v45 = vmax.f32 %v1957_v34, %v1945_v61 }
0x17e0   :  { %v1964_v24 = vmax.f32 %v1962_v37, %v1936_v27 }
0x17e2   :  { %v1951_v2 = vpop.xlane.xlu1 %1950 }
0x17e3   :  { %v1960_v23 = vmax.f32 %v1958_v17, %v1951_v2  ;;  %v1942_v9 = vpop.xlane.xlu0 %1941 }
0x17e4   :  { %v1965_v26 = vmax.f32 %v1963_v58, %v1942_v9 }
0x17e5   :  { %v1961_v28 = vmax.f32 %v1959_v45, %v1960_v23 }
0x17e6   :  { %v7221_v0 = vpop.permute.xlu1 %2217 }
0x17e7   :  { %v1969_v35 = vsub.f32 %v1909_v55, %v1961_v28  ;;  %v1971_v44 = vsub.f32 %v1915_v63, %v1961_v28  ;;  %v1973_v46 = vsub.f32 %v1921_v49, %v1961_v28  ;;  %8195 = vst [vmem:[#allocation40_spill] sm:$0xff] %v7221_v0  ;;  %v1948_v18 = vpop.xlane.xlu0 %1947  ;;  %v1975_v62 = vsub.f32 %v1927_v57, %v1961_v28 }
0x17e8   :  { %v1977_v22 = vsub.f32 %v1933_v6, %v1961_v28  ;;  %v2221_v34 = vadd.f32 %v7221_v0, %v7142_v20  ;;  %v1979_v17 = vsub.f32 %v1939_v53, %v1961_v28  ;;  %v2220_v55 = vadd.f32 %v7221_v0, %v7129_v48 }
0x17e9   :  { %v1985_v3 = vmul.f32 1.442695, %v1969_v35  ;;  %v1989_v43 = vmul.f32 1.442695, %v1971_v44  ;;  %v1993_v16 = vmul.f32 1.442695, %v1973_v46  ;;  %v1966_v45 = vmax.f32 %v1964_v24, %v1948_v18 }
0x17ea   :  { %v1997_v63 = vmul.f32 1.442695, %v1975_v62  ;;  %2226 = vrot.lane.b32.xlu1 %v2221_v34, %s6549_s22  ;;  %2224 = vrot.lane.b32.xlu0 %v2220_v55, %s6549_s22  ;;  %v2001_v6 = vmul.f32 1.442695, %v1977_v22  ;;  %v2005_v23 = vmul.f32 1.442695, %v1979_v17  ;;  %v1981_v35 = vsub.f32 %v1945_v61, %v1961_v28 }
0x17eb   :  { %5838 = vpow2.f32 %v1985_v3  ;;  %v1954_v49 = vpop.xlane.xlu0 %1953  ;;  %v1983_v34 = vsub.f32 %v1951_v2, %v1961_v28 }
0x17ec   :  { %5840 = vpow2.f32 %v1989_v43  ;;  %v1967_v57 = vmax.f32 %v1965_v26, %v1954_v49  ;;  %v2009_v55 = vmul.f32 1.442695, %v1981_v35 }
0x17ed   :  { %5842 = vpow2.f32 %v1993_v16 }
0x17ee   :  { %v1968_v58 = vmax.f32 %v1966_v45, %v1967_v57  ;;  %5844 = vpow2.f32 %v1997_v63 }
0x17ef   :  { %5846 = vpow2.f32 %v2001_v6 }
0x17f0   :  { %v1970_v37 = vsub.f32 %v1912_v12, %v1968_v58  ;;  %v1972_v53 = vsub.f32 %v1918_v10, %v1968_v58  ;;  %v1974_v3 = vsub.f32 %v1924_v11, %v1968_v58  ;;  %v1976_v44 = vsub.f32 %v1930_v15, %v1968_v58 }
0x17f1   :  { %5848 = vpow2.f32 %v2005_v23  ;;  %v1978_v43 = vsub.f32 %v1936_v27, %v1968_v58  ;;  %v1980_v16 = vsub.f32 %v1942_v9, %v1968_v58  ;;  %v1982_v22 = vsub.f32 %v1948_v18, %v1968_v58 }
0x17f2   :  { %v1987_v46 = vmul.f32 1.442695, %v1970_v37  ;;  %v1991_v24 = vmul.f32 1.442695, %v1972_v53  ;;  %v1995_v62 = vmul.f32 1.442695, %v1974_v3  ;;  %v1984_v15 = vsub.f32 %v1954_v49, %v1968_v58 }
0x17f3   :  { %v1999_v26 = vmul.f32 1.442695, %v1976_v44  ;;  %v2003_v17 = vmul.f32 1.442695, %v1978_v43  ;;  %v2013_v10 = vmul.f32 1.442695, %v1983_v34 }
0x17f4   :  { %5850 = vpow2.f32 %v1987_v46  ;;  %v2007_v61 = vmul.f32 1.442695, %v1980_v16  ;;  %v2011_v45 = vmul.f32 1.442695, %v1982_v22  ;;  %v2015_v9 = vmul.f32 1.442695, %v1984_v15 }
0x17f5   :  { %5852 = vpow2.f32 %v1991_v24 }
0x17f6   :  { %5854 = vpow2.f32 %v1995_v62 }
0x17f7   :  { %5856 = vpow2.f32 %v1999_v26 }
0x17f8   :  { %v5839_v12 = vpop.eup %5838  ;;  %5858 = vpow2.f32 %v2009_v55 }
0x17f9   :  { %v5841_v11 = vpop.eup %5840  ;;  %5860 = vpow2.f32 %v2003_v17  ;;  %v2017_v18 = vmul.f32 %v5839_v12, %v6976_v60 }
0x17fa   :  { %v2063_v63 = vadd.f32 %v5841_v11, %v5839_v12  ;;  %v5843_v27 = vpop.eup %5842  ;;  %5862 = vpow2.f32 %v2013_v10  ;;  %v2019_v6 = vmul.f32 %v5841_v11, %v6985_v1 }
0x17fb   :  { %v5845_v28 = vpop.eup %5844  ;;  %5864 = vpow2.f32 %v2007_v61  ;;  %v2033_v35 = vsel %vm264_vm1, %v2017_v18, 0.0  ;;  %v2021_v1 = vmul.f32 %v5843_v27, %v6994_v52 }
0x17fc   :  { %v2064_v2 = vadd.f32 %v5843_v27, %v2063_v63  ;;  %v5847_v23 = vpop.eup %5846  ;;  %5866 = vpow2.f32 %v2011_v45  ;;  %v2034_v44 = vsel %vm264_vm1, %v2019_v6, 0.0  ;;  %v2023_v15 = vmul.f32 %v5845_v28, %v7003_v13 }
0x17fd   :  { %5868 = vpow2.f32 %v2015_v9  ;;  %v2035_v16 = vadd.f32 %v2034_v44, %v2033_v35  ;;  %v2036_v52 = vsel %vm264_vm1, %v2021_v1, 0.0  ;;  %v2025_v6 = vmul.f32 %v5847_v23, %v7012_v19 }
0x17fe   :  { %v2065_v57 = vadd.f32 %v5845_v28, %v2064_v2  ;;  %v5849_v37 = vpop.eup %5848  ;;  %v2038_v13 = vsel %vm264_vm1, %v2023_v15, 0.0 }
0x17ff   :  { %v2037_v27 = vadd.f32 %v2036_v52, %v2035_v16  ;;  %v2027_v44 = vmul.f32 %v5849_v37, %v7020_v21  ;;  %v2199_v52 = vld [vmem:[#allocation5] sm:$0xff] }
0x1800   :  { %v2066_v53 = vadd.f32 %v5847_v23, %v2065_v57 }
0x1801   :  { %v5851_v49 = vpop.eup %5850  ;;  %v2042_v1 = vsel %vm264_vm1, %v2027_v44, 0.0 }
0x1802   :  { %v5853_v58 = vpop.eup %5852  ;;  %v2018_v3 = vmul.f32 %v5851_v49, %v6978_v32  ;;  %v2067_v43 = vadd.f32 %v5849_v37, %v2066_v53 }
0x1803   :  { %v5855_v46 = vpop.eup %5854  ;;  %v2070_v24 = vadd.f32 %v5853_v58, %v5851_v49  ;;  %v2020_v60 = vmul.f32 %v5853_v58, %v6987_v4  ;;  %v2039_v49 = vadd.f32 %v2038_v13, %v2037_v27 }
0x1804   :  { %v2022_v62 = vmul.f32 %v5855_v46, %v6996_v7  ;;  %v2048_v34 = vsel %vm264_vm1, %v2018_v3, 0.0  ;;  %v5857_v26 = vpop.eup %5856 }
0x1805   :  { %v2071_v55 = vadd.f32 %v5855_v46, %v2070_v24  ;;  %v2049_v32 = vsel %vm264_vm1, %v2020_v60, 0.0  ;;  %v5859_v22 = vpop.eup %5858  ;;  %v2024_v4 = vmul.f32 %v5857_v26, %v7005_v14 }
0x1806   :  { %v2050_v17 = vadd.f32 %v2049_v32, %v2048_v34  ;;  %v2068_v12 = vadd.f32 %v5859_v22, %v2067_v43  ;;  %v5861_v11 = vpop.eup %5860  ;;  %v2051_v7 = vsel %vm264_vm1, %v2022_v62, 0.0  ;;  %v2040_v43 = vsel %vm264_vm1, %v2025_v6, 0.0 }
0x1807   :  { %v2072_v10 = vadd.f32 %v5857_v26, %v2071_v55  ;;  %v5863_v61 = vpop.eup %5862  ;;  %v2026_v53 = vmul.f32 %v5861_v11, %v7014_v38  ;;  %v2053_v14 = vsel %vm264_vm1, %v2024_v4, 0.0  ;;  %v2041_v38 = vadd.f32 %v2040_v43, %v2039_v49 }
0x1808   :  { %v2052_v45 = vadd.f32 %v2051_v7, %v2050_v17  ;;  %v5865_v2 = vpop.eup %5864  ;;  %v2069_v9 = vadd.f32 %v5863_v61, %v2068_v12  ;;  %v2029_v24 = vmul.f32 %v5859_v22, %v7027_v25  ;;  %v2031_v21 = vmul.f32 %v5863_v61, %v7048_v36 }
0x1809   :  { %v2073_v63 = vadd.f32 %v5861_v11, %v2072_v10  ;;  %v5867_v18 = vpop.eup %5866  ;;  %v2028_v46 = vmul.f32 %v5865_v2, %v7022_v42  ;;  %v2055_v19 = vsel %vm264_vm1, %v2026_v53, 0.0  ;;  %v2043_v34 = vadd.f32 %v2042_v1, %v2041_v38 }
0x180a   :  { %v2054_v58 = vadd.f32 %v2053_v14, %v2052_v45  ;;  %v5869_v3 = vpop.eup %5868  ;;  %5870 = vrcp.f32 %v2069_v9  ;;  %v2030_v60 = vmul.f32 %v5867_v18, %v7029_v56  ;;  %v2044_v37 = vsel %vm264_vm1, %v2029_v24, 0.0  ;;  %v2200_v45 = vld [vmem:[#allocation5 + $0x8] sm:$0xff] }
0x180b   :  { %v2074_v57 = vadd.f32 %v5865_v2, %v2073_v63  ;;  %v2057_v62 = vsel %vm264_vm1, %v2028_v46, 0.0  ;;  %v2032_v42 = vmul.f32 %v5869_v3, %v7050_v40  ;;  %v2045_v16 = vadd.f32 %v2044_v37, %v2043_v34 }
0x180c   :  { %v2056_v23 = vadd.f32 %v2055_v19, %v2054_v58  ;;  %v2059_v55 = vsel %vm264_vm1, %v2030_v60, 0.0  ;;  %v2046_v25 = vsel %vm264_vm1, %v2031_v21, 0.0  ;;  %v8196_v36 = vmov 0.0   ;;  %v5641_v60 = vld [vmem:[#allocation15] sm:$0xff]  }
0x180d   :  { %v2075_v28 = vadd.f32 %v5867_v18, %v2074_v57  ;;  %v2061_v56 = vsel %vm264_vm1, %v2032_v42, 0.0  ;;  %v2047_v22 = vadd.f32 %v2046_v25, %v2045_v16 }
0x180e   :  { %v2058_v26 = vadd.f32 %v2057_v62, %v2056_v23  ;;  %v5640_v23 = vld [vmem:[#allocation15 + $0x8] sm:$0xff]  }
0x180f   :  { %v2076_v35 = vadd.f32 %v5869_v3, %v2075_v28 }
0x1810   :  { %v2060_v32 = vadd.f32 %v2059_v55, %v2058_v26 }
0x1811   :  { %5872 = vrcp.f32 %v2076_v35 }
0x1812   :  { %v2062_v12 = vadd.f32 %v2061_v56, %v2060_v32 }
0x1817   :  { %v5871_v17 = vpop.eup %5870 }
0x1818   :  { %v2078_v11 = vmul.f32 %v5871_v17, %v2047_v22  ;;  %v5643_v22 = vld [vmem:[#allocation22] sm:$0xff]  }
0x181e   :  { %v5873_v10 = vpop.eup %5872 }
0x181f   :  { %v2080_v15 = vmul.f32 %v5873_v10, %v2062_v12 }
0x1821   :  { %v2085_v4 = vpack.c.bf16 %v2080_v15, %v2078_v11 }
0x1823   :  { %5444 = vmatmul.mubr.msk.bf16.vlgmr.msra.gmra.mxu0 %vm264_vm1, %v2085_v4 }
0x1824   :  { %5459 = vmatprep.mubr.msk.bf16.mxu0 %vm6560_vm0, %v8196_v36  ;;  %5456 = vmatpush3.bf16.msra.mxu0 %v5640_v23 }
0x1825   :  { %5457 = vmatprep.subr.bf16.mxu0 %v8196_v36 }
0x1828   :  { %5458 = vmatpush3.bf16.msra.mxu0 %v5641_v60 }
0x1829   :  { %5471 = vmatprep.subr.bf16.mxu0 %v8196_v36 }
0x185c   :  { %v2225_v58 = vpop.permute.xlu0 %2224  ;;  %v2227_v35 = vpop.permute.xlu1 %2226 }
0x18e3   :  { %v2135_v40 = vpop.f32.mrf.mxu0 }
0x18e4   :  { %v2201_v7 = vadd.f32 %v2199_v52, %v2135_v40 }
0x18e5   :  { %v5445_v61 = vpop.f32.mrf.mxu0 }
0x18e6   :  { %v2203_v63 = vadd.f32 %v2201_v7, %v7129_v48 }
0x18e7   :  { %v2138_v27 = vpop.f32.mrf.mxu0 }
0x18e8   :  { %v5101_v2 = vmul.f32 -1.442695, %v2203_v63  ;;  %v2202_v9 = vadd.f32 %v2200_v45, %v2138_v27 }
0x18e9   :  { %v5446_v57 = vpop.f32.mrf.mxu0 }
0x18ea   :  { %5874 = vpow2.f32 %v5101_v2  ;;  %v2204_v18 = vadd.f32 %v2202_v9, %v7142_v20 }
0x18ec   :  { %v5102_v6 = vmul.f32 -1.442695, %v2204_v18 }
0x18ee   :  { %5876 = vpow2.f32 %v5102_v6  ;;  %v8200_v6 = vld [vmem:[#allocation35_spill] sm:$0xff] }
0x18f7   :  { %v5875_v53 = vpop.eup %5874 }
0x18f8   :  { %v2211_v13 = vadd.f32 1.0, %v5875_v53 }
0x18fa   :  { %5878 = vrcp.f32 %v2211_v13  ;;  %v8201_v13 = vld [vmem:[#allocation34_spill] sm:$0xff] }
0x18fb   :  { %v5877_v14 = vpop.eup %5876 }
0x18fc   :  { %v2212_v28 = vadd.f32 1.0, %v5877_v14 }
0x18fe   :  { %5880 = vrcp.f32 %v2212_v28 }
0x1907   :  { %v5879_v49 = vpop.eup %5878 }
0x1908   :  { %v2230_v3 = vmul.f32 %v5879_v49, %v2225_v58  ;;  %v2244_v26 = vsub.f32 1.0, %v5879_v49 }
0x190a   :  { %2234 = vrot.lane.b32.xlu1 %v2230_v3, %s6549_s22 }
0x190b   :  { %v5881_v48 = vpop.eup %5880 }
0x190c   :  { %v2231_v44 = vmul.f32 %v5881_v48, %v2227_v35  ;;  %v2245_v42 = vsub.f32 1.0, %v5881_v48 }
0x190e   :  { %2236 = vrot.lane.b32.xlu0 %v2231_v44, %s6549_s22 }
0x197c   :  { %v2235_v46 = vpop.permute.xlu1 %2234 }
0x197d   :  { %v2240_v20 = vadd.f32 %v2235_v46, %v2201_v7  ;;  %v8203_v46 = vld [vmem:[#allocation37_spill] sm:$0xff] }
0x197f   :  { %5882 = vtanh.f32 %v2240_v20 }
0x1980   :  { %v2237_v43 = vpop.permute.xlu0 %2236 }
0x1981   :  { %v2241_v19 = vadd.f32 %v2237_v43, %v2202_v9 }
0x1983   :  { %5884 = vtanh.f32 %v2241_v19 }
0x198c   :  { %v5883_v38 = vpop.eup %5882 }
0x198d   :  { %2248 = vrot.lane.b32.xlu1 %v5883_v38, %s6563_s14 }
0x1990   :  { %v5885_v24 = vpop.eup %5884 }
0x1991   :  { %2256 = vrot.lane.b32.xlu1 %v6959_v47, %s6549_s22  ;;  %2250 = vrot.lane.b32.xlu0 %v5885_v24, %s6563_s14 }
0x1995   :  { %2258 = vrot.lane.b32.xlu0 %v6965_v51, %s6549_s22  ;;  %v5642_v51 = vld [vmem:[#allocation22 + $0x8] sm:$0xff]  }
0x19ff   :  { %v2249_v1 = vpop.permute.xlu1 %2248 }
0x1a00   :  { %v2254_v55 = vmul.f32 %v2249_v1, %v2244_v26  ;;  %v8204_v1 = vld [vmem:[#allocation38_spill] sm:$0xff] }
0x1a03   :  { %v2257_v62 = vpop.permute.xlu1 %2256  ;;  %v2251_v34 = vpop.permute.xlu0 %2250 }
0x1a04   :  { %v2262_v21 = vmul.f32 %v5879_v49, %v2257_v62  ;;  %v2255_v16 = vmul.f32 %v2251_v34, %v2245_v42 }
0x1a06   :  { %v7276_v32 = vadd.f32 %v2262_v21, %v2254_v55 }
0x1a07   :  { %v2259_v37 = vpop.permute.xlu0 %2258 }
0x1a08   :  { %v2263_v47 = vmul.f32 %v5881_v48, %v2259_v37  ;;  %8197 = vst [vmem:[#allocation41_spill] sm:$0xff] %v7276_v32 }
0x1a0a   :  { %v7278_v17 = vadd.f32 %v2263_v47, %v2255_v16  ;;  %v8205_v16 = vld [vmem:[#allocation39_spill] sm:$0xff] }
0x1a0c   :  { %8198 = vst [vmem:[#allocation42_spill] sm:$0xff] %v7278_v17  ;;  %v2266_v25 = vpack.c.bf16 %v7278_v17, %v7276_v32 }
0x1a0e   :  { %2317 = vrot.lane.b32.xlu1 %v2266_v25, %s6563_s14 }
0x1a80   :  { %v2318_v56 = vpop.permute.xlu1 %2317 }
0x1a81   :  { %5460 = vmatmul.mubr.msk.bf16.vlgmr.msra.gmra.mxu0 %vm264_vm1, %v2318_v56 }
0x1a82   :  { %5472 = vmatpush3.bf16.msra.mxu0 %v5642_v51  ;;  %5475 = vmatprep.mubr.msk.bf16.mxu0 %vm6560_vm0, %v8196_v36 }
0x1a83   :  { %5473 = vmatprep.subr.bf16.mxu0 %v8196_v36 }
0x1a86   :  { %5474 = vmatpush3.bf16.msra.mxu0 %v5643_v22 }
0x1a87   :  { %5487 = vmatprep.subr.bf16.mxu0 %v8196_v36 }
0x1a89   :  { %5476 = vmatmul.mubr.msk.bf16.vlgmr.msra.gmra.mxu0 %vm264_vm1, %v2318_v56 }
0x1a8a   :  { %5491 = vmatprep.mubr.msk.bf16.mxu0 %vm6560_vm0, %v8196_v36 }
0x1b41   :  { %v2368_v12 = vpop.f32.mrf.mxu0 }
0x1b42   :  { %v2369_v10 = vadd.f32 %v7097_v8, %v2368_v12 }
0x1b43   :  { %v5461_v11 = vpop.f32.mrf.mxu0 }
0x1b44   :  { %v2379_v15 = vadd.f32 %v2369_v10, %v7102_v29  ;;  %v2375_v4 = vadd.f32 %v2369_v10, %v7104_v30  ;;  %v2381_v40 = vadd.f32 %v2369_v10, %v7106_v31  ;;  %v2377_v7 = vadd.f32 %v2369_v10, %v7114_v41 }
0x1b45   :  { %v2371_v52 = vpop.f32.mrf.mxu0  ;;  %v2383_v63 = vadd.f32 %v2369_v10, %v7118_v50  ;;  %v2385_v29 = vadd.f32 %v2369_v10, %v7131_v5 }
0x1b46   :  { %v2372_v61 = vadd.f32 %v7097_v8, %v2371_v52  ;;  %5886 = vtanh.f32 %v2379_v15  ;;  %v2387_v8 = vadd.f32 %v2369_v10, %v7167_v39 }
0x1b47   :  { %v5462_v27 = vpop.f32.mrf.mxu0  ;;  %5888 = vtanh.f32 %v2375_v4 }
0x1b48   :  { %5890 = vtanh.f32 %v2381_v40  ;;  %v2378_v45 = vadd.f32 %v2372_v61, %v7125_v59  ;;  %v2380_v31 = vadd.f32 %v2372_v61, %v7136_v54  ;;  %v2382_v9 = vadd.f32 %v2372_v61, %v7150_v33  ;;  %v8199_v59 = vld [vmem:[#allocation33_spill] sm:$0xff]  ;;  %v8202_v33 = vld [vmem:[#allocation36_spill] sm:$0xff] }
0x1b49   :  { %v7299_v2 = vpop.f32.mrf.mxu0  ;;  %5892 = vtanh.f32 %v2377_v7  ;;  %v2376_v57 = vadd.f32 %v2372_v61, %v8199_v59  ;;  %v2384_v5 = vadd.f32 %v2372_v61, %v8200_v6  ;;  %v2389_v3 = vadd.f32 %v2369_v10, %v8202_v33 }
0x1b4a   :  { %5894 = vtanh.f32 %v2383_v63  ;;  %v2386_v20 = vadd.f32 %v2372_v61, %v8203_v46  ;;  %v2388_v62 = vadd.f32 %v2372_v61, %v8204_v1  ;;  %v2390_v47 = vadd.f32 %v2372_v61, %v8205_v16 }
0x1b4b   :  { %v5477_v30 = vpop.f32.mrf.mxu0  ;;  %5896 = vtanh.f32 %v2378_v45  ;;  %v2734_v6 = vadd.f32 %v7299_v2, %v7221_v0 }
0x1b4c   :  { %5898 = vtanh.f32 %v2385_v29 }
0x1b4d   :  { %v7303_v41 = vpop.f32.mrf.mxu0  ;;  %5900 = vtanh.f32 %v2380_v31 }
0x1b4e   :  { %5902 = vtanh.f32 %v2387_v8 }
0x1b4f   :  { %v5478_v50 = vpop.f32.mrf.mxu0  ;;  %5904 = vtanh.f32 %v2382_v9 }
0x1b50   :  { %5906 = vtanh.f32 %v2376_v57 }
0x1b51   :  { %5908 = vtanh.f32 %v2384_v5  ;;  %v2735_v5 = vadd.f32 %v7303_v41, %v7221_v0 }
0x1b52   :  { %5910 = vtanh.f32 %v2389_v3 }
0x1b53   :  { %v5887_v18 = vpop.eup %5886  ;;  %5912 = vtanh.f32 %v2386_v20 }
0x1b54   :  { %v5889_v53 = vpop.eup %5888  ;;  %v2411_v14 = vmul.f32 %v5887_v18, %v8201_v13  ;;  %5914 = vtanh.f32 %v2388_v62 }
0x1b55   :  { %v5891_v54 = vpop.eup %5890  ;;  %v2407_v28 = vmul.f32 %v5889_v53, %v8201_v13  ;;  %5916 = vtanh.f32 %v2390_v47  ;;  %v5644_v53 = vld [vmem:[#allocation21 + $0x8] sm:$0xff]  }
0x1b56   :  { %v5893_v49 = vpop.eup %5892  ;;  %v2435_v39 = vsel %vm264_vm1, %v2411_v14, 0.0  ;;  %v2413_v58 = vmul.f32 %v5891_v54, %v8201_v13  ;;  %5464 = vmatpush3.bf16.msra.mxu1 %v5644_v53  ;;  %v5645_v14 = vld [vmem:[#allocation21] sm:$0xff]  }
0x1b57   :  { %v5895_v48 = vpop.eup %5894  ;;  %2436 = vadd.xlane.f32.xlu1 %v2435_v39  ;;  %v2423_v35 = vsel %vm264_vm1, %v2407_v28, 0.0  ;;  %v2409_v44 = vmul.f32 %v5893_v49, %v8201_v13  ;;  %5465 = vmatprep.subr.bf16.mxu1 %v8196_v36 }
0x1b58   :  { %v5897_v43 = vpop.eup %5896  ;;  %2424 = vadd.xlane.f32.xlu0 %v2423_v35  ;;  %v2441_v19 = vsel %vm264_vm1, %v2413_v58, 0.0  ;;  %v2415_v38 = vmul.f32 %v5895_v48, %v8201_v13 }
0x1b59   :  { %v5899_v23 = vpop.eup %5898  ;;  %v2429_v24 = vsel %vm264_vm1, %v2409_v44, 0.0  ;;  %v2410_v60 = vmul.f32 %v5897_v43, %v8201_v13 }
0x1b5a   :  { %v5901_v34 = vpop.eup %5900  ;;  %v2447_v26 = vsel %vm264_vm1, %v2415_v38, 0.0  ;;  %v2417_v21 = vmul.f32 %v5899_v23, %v8201_v13  ;;  %5466 = vmatpush3.bf16.msra.mxu1 %v5645_v14 }
0x1b5b   :  { %2442 = vadd.xlane.f32.xlu1 %v2441_v19  ;;  %v5903_v42 = vpop.eup %5902  ;;  %v2432_v37 = vsel %vm264_vm1, %v2410_v60, 0.0  ;;  %v2412_v55 = vmul.f32 %v5901_v34, %v8201_v13  ;;  %5479 = vmatprep.subr.bf16.mxu1 %v8196_v36 }
0x1b5c   :  { %2430 = vadd.xlane.f32.xlu0 %v2429_v24  ;;  %v5905_v25 = vpop.eup %5904  ;;  %v2453_v51 = vsel %vm264_vm1, %v2417_v21, 0.0  ;;  %v2419_v56 = vmul.f32 %v5903_v42, %v8201_v13 }
0x1b5d   :  { %v5907_v22 = vpop.eup %5906  ;;  %v2438_v12 = vsel %vm264_vm1, %v2412_v55, 0.0  ;;  %v2414_v10 = vmul.f32 %v5905_v25, %v8201_v13 }
0x1b5e   :  { %v5909_v11 = vpop.eup %5908  ;;  %v2459_v15 = vsel %vm264_vm1, %v2419_v56, 0.0  ;;  %v2408_v4 = vmul.f32 %v5907_v22, %v8201_v13 }
0x1b5f   :  { %2448 = vadd.xlane.f32.xlu1 %v2447_v26  ;;  %v5911_v40 = vpop.eup %5910  ;;  %v2444_v52 = vsel %vm264_vm1, %v2414_v10, 0.0  ;;  %v2416_v7 = vmul.f32 %v5909_v11, %v8201_v13 }
0x1b60   :  { %2433 = vadd.xlane.f32.xlu0 %v2432_v37  ;;  %v5913_v61 = vpop.eup %5912  ;;  %v2426_v63 = vsel %vm264_vm1, %v2408_v4, 0.0  ;;  %v2421_v27 = vmul.f32 %v5911_v40, %v8201_v13 }
0x1b61   :  { %v2450_v45 = vsel %vm264_vm1, %v2416_v7, 0.0  ;;  %v2418_v29 = vmul.f32 %v5913_v61, %v8201_v13  ;;  %v5915_v30 = vpop.eup %5914 }
0x1b62   :  { %v2465_v31 = vsel %vm264_vm1, %v2421_v27, 0.0  ;;  %v2420_v50 = vmul.f32 %v5915_v30, %v8201_v13  ;;  %v5917_v9 = vpop.eup %5916 }
0x1b63   :  { %2454 = vadd.xlane.f32.xlu1 %v2453_v51  ;;  %v2456_v8 = vsel %vm264_vm1, %v2418_v29, 0.0  ;;  %v2422_v57 = vmul.f32 %v5917_v9, %v8201_v13 }
0x1b64   :  { %2439 = vadd.xlane.f32.xlu0 %v2438_v12  ;;  %v2462_v59 = vsel %vm264_vm1, %v2420_v50, 0.0 }
0x1b65   :  { %v2468_v18 = vsel %vm264_vm1, %v2422_v57, 0.0 }
0x1b67   :  { %2460 = vadd.xlane.f32.xlu1 %v2459_v15 }
0x1b68   :  { %2445 = vadd.xlane.f32.xlu0 %v2444_v52 }
0x1b6b   :  { %2427 = vadd.xlane.f32.xlu1 %v2426_v63 }
0x1b6c   :  { %2451 = vadd.xlane.f32.xlu0 %v2450_v45 }
0x1b6f   :  { %2466 = vadd.xlane.f32.xlu1 %v2465_v31 }
0x1b70   :  { %2457 = vadd.xlane.f32.xlu0 %v2456_v8 }
0x1b74   :  { %2463 = vadd.xlane.f32.xlu0 %v2462_v59 }
0x1b78   :  { %2469 = vadd.xlane.f32.xlu0 %v2468_v18 }
0x1b80   :  { %2738 = vrot.lane.b32.xlu1 %v2734_v6, %s6549_s22 }
0x1b8e   :  { %2740 = vrot.lane.b32.xlu0 %v2735_v5, %s6549_s22 }
0x1be0   :  { %v2437_v13 = vpop.xlane.xlu1 %2436 }
0x1be1   :  { %v2425_v54 = vpop.xlane.xlu0 %2424 }
0x1be2   :  { %v2471_v46 = vmax.f32 %v2425_v54, %v2437_v13 }
0x1be4   :  { %v2443_v28 = vpop.xlane.xlu1 %2442 }
0x1be5   :  { %v2431_v49 = vpop.xlane.xlu0 %2430 }
0x1be6   :  { %v2472_v20 = vmax.f32 %v2431_v49, %v2443_v28 }
0x1be8   :  { %v2449_v39 = vpop.xlane.xlu1 %2448 }
0x1be9   :  { %v2434_v58 = vpop.xlane.xlu0 %2433  ;;  %v2473_v19 = vmax.f32 %v2471_v46, %v2449_v39  ;;  %v7355_v46 = vld [vmem:[#allocation3 + $0x10] sm:$0xff] }
0x1bec   :  { %v2455_v33 = vpop.xlane.xlu1 %2454 }
0x1bed   :  { %v2440_v3 = vpop.xlane.xlu0 %2439  ;;  %v2474_v38 = vmax.f32 %v2472_v20, %v2455_v33 }
0x1bf0   :  { %v2461_v48 = vpop.xlane.xlu1 %2460 }
0x1bf1   :  { %v2446_v35 = vpop.xlane.xlu0 %2445  ;;  %v2475_v24 = vmax.f32 %v2473_v19, %v2461_v48 }
0x1bf2   :  { %v2479_v55 = vmax.f32 %v2434_v58, %v2446_v35 }
0x1bf4   :  { %v2428_v44 = vpop.xlane.xlu1 %2427 }
0x1bf5   :  { %v2452_v43 = vpop.xlane.xlu0 %2451  ;;  %v2478_v34 = vmax.f32 %v2428_v44, %v2440_v3 }
0x1bf7   :  { %v2480_v12 = vmax.f32 %v2478_v34, %v2452_v43  ;;  %v7361_v34 = vld [vmem:[#allocation3 + $0x18] sm:$0xff] }
0x1bf8   :  { %v2467_v23 = vpop.xlane.xlu1 %2466 }
0x1bf9   :  { %v2458_v60 = vpop.xlane.xlu0 %2457  ;;  %v2476_v1 = vmax.f32 %v2474_v38, %v2467_v23 }
0x1bfa   :  { %v2481_v51 = vmax.f32 %v2479_v55, %v2458_v60 }
0x1bfb   :  { %v2477_v62 = vmax.f32 %v2475_v24, %v2476_v1  ;;  %v7359_v1 = vld [vmem:[#allocation3 + $0x8] sm:$0xff] }
0x1bfd   :  { %v2485_v26 = vsub.f32 %v2425_v54, %v2477_v62  ;;  %v2487_v21 = vsub.f32 %v2431_v49, %v2477_v62  ;;  %v2489_v42 = vsub.f32 %v2437_v13, %v2477_v62  ;;  %v2464_v37 = vpop.xlane.xlu0 %2463  ;;  %v2491_v16 = vsub.f32 %v2443_v28, %v2477_v62 }
0x1bfe   :  { %v2493_v56 = vsub.f32 %v2449_v39, %v2477_v62  ;;  %v2495_v10 = vsub.f32 %v2455_v33, %v2477_v62  ;;  %v2482_v4 = vmax.f32 %v2480_v12, %v2464_v37  ;;  %v2497_v29 = vsub.f32 %v2461_v48, %v2477_v62 }
0x1bff   :  { %v2501_v47 = vmul.f32 1.442695, %v2485_v26  ;;  %v2505_v25 = vmul.f32 1.442695, %v2487_v21  ;;  %v2509_v22 = vmul.f32 1.442695, %v2489_v42  ;;  %v2499_v59 = vsub.f32 %v2467_v23, %v2477_v62 }
0x1c00   :  { %v2513_v15 = vmul.f32 1.442695, %v2491_v16  ;;  %v2517_v52 = vmul.f32 1.442695, %v2493_v56  ;;  %v2521_v61 = vmul.f32 1.442695, %v2495_v10 }
0x1c01   :  { %5918 = vpow2.f32 %v2501_v47  ;;  %v2470_v11 = vpop.xlane.xlu0 %2469  ;;  %v2525_v18 = vmul.f32 1.442695, %v2497_v29  ;;  %v2529_v13 = vmul.f32 1.442695, %v2499_v59  ;;  %v7366_v47 = vld [vmem:[#allocation3 + $0x20] sm:$0xff] }
0x1c02   :  { %5920 = vpow2.f32 %v2505_v25  ;;  %v2483_v40 = vmax.f32 %v2481_v51, %v2470_v11  ;;  %v7368_v25 = vld [vmem:[#allocation3 + $0x28] sm:$0xff] }
0x1c03   :  { %5922 = vpow2.f32 %v2509_v22 }
0x1c04   :  { %v2484_v7 = vmax.f32 %v2482_v4, %v2483_v40  ;;  %5924 = vpow2.f32 %v2513_v15 }
0x1c05   :  { %5926 = vpow2.f32 %v2517_v52 }
0x1c06   :  { %v2486_v63 = vsub.f32 %v2428_v44, %v2484_v7  ;;  %v2488_v27 = vsub.f32 %v2434_v58, %v2484_v7  ;;  %v2490_v45 = vsub.f32 %v2440_v3, %v2484_v7  ;;  %v2492_v30 = vsub.f32 %v2446_v35, %v2484_v7  ;;  %v7353_v44 = vld [vmem:[#allocation3] sm:$0xff] }
0x1c07   :  { %5928 = vpow2.f32 %v2521_v61  ;;  %v2494_v8 = vsub.f32 %v2452_v43, %v2484_v7  ;;  %v2496_v6 = vsub.f32 %v2458_v60, %v2484_v7  ;;  %v2498_v5 = vsub.f32 %v2464_v37, %v2484_v7 }
0x1c08   :  { %v2503_v31 = vmul.f32 1.442695, %v2486_v63  ;;  %v2507_v50 = vmul.f32 1.442695, %v2488_v27  ;;  %v2511_v9 = vmul.f32 1.442695, %v2490_v45  ;;  %v2500_v28 = vsub.f32 %v2470_v11, %v2484_v7 }
0x1c09   :  { %v2515_v57 = vmul.f32 1.442695, %v2492_v30  ;;  %v2519_v53 = vmul.f32 1.442695, %v2494_v8  ;;  %v2523_v49 = vmul.f32 1.442695, %v2496_v6 }
0x1c0a   :  { %5930 = vpow2.f32 %v2503_v31  ;;  %v2527_v33 = vmul.f32 1.442695, %v2498_v5  ;;  %v2531_v35 = vmul.f32 1.442695, %v2500_v28  ;;  %v7375_v63 = vld [vmem:[#allocation3 + $0x30] sm:$0xff]  ;;  %v7377_v27 = vld [vmem:[#allocation3 + $0x38] sm:$0xff] }
0x1c0b   :  { %5932 = vpow2.f32 %v2507_v50 }
0x1c0c   :  { %5934 = vpow2.f32 %v2511_v9 }
0x1c0d   :  { %5936 = vpow2.f32 %v2515_v57 }
0x1c0e   :  { %v5919_v14 = vpop.eup %5918  ;;  %5938 = vpow2.f32 %v2525_v18 }
0x1c0f   :  { %v5921_v54 = vpop.eup %5920  ;;  %5940 = vpow2.f32 %v2519_v53  ;;  %v2533_v43 = vmul.f32 %v5919_v14, %v7353_v44  ;;  %v7383_v53 = vld [vmem:[#allocation3 + $0x40] sm:$0xff] }
0x1c10   :  { %v2579_v39 = vadd.f32 %v5921_v54, %v5919_v14  ;;  %v5923_v58 = vpop.eup %5922  ;;  %5942 = vpow2.f32 %v2529_v13  ;;  %v2535_v19 = vmul.f32 %v5921_v54, %v7355_v46  ;;  %v7385_v14 = vld [vmem:[#allocation3 + $0x48] sm:$0xff] }
0x1c11   :  { %v5925_v48 = vpop.eup %5924  ;;  %5944 = vpow2.f32 %v2523_v49  ;;  %v2549_v21 = vsel %vm264_vm1, %v2533_v43, 0.0  ;;  %v2537_v56 = vmul.f32 %v5923_v58, %v7366_v47  ;;  %v7393_v43 = vld [vmem:[#allocation3 + $0x58] sm:$0xff] }
0x1c12   :  { %v2580_v3 = vadd.f32 %v5923_v58, %v2579_v39  ;;  %v5927_v38 = vpop.eup %5926  ;;  %5946 = vpow2.f32 %v2527_v33  ;;  %v2550_v42 = vsel %vm264_vm1, %v2535_v19, 0.0  ;;  %v2539_v29 = vmul.f32 %v5925_v48, %v7375_v63 }
0x1c13   :  { %5948 = vpow2.f32 %v2531_v35  ;;  %v2551_v15 = vadd.f32 %v2550_v42, %v2549_v21  ;;  %v2552_v31 = vsel %vm264_vm1, %v2537_v56, 0.0  ;;  %v2541_v54 = vmul.f32 %v5927_v38, %v7383_v53  ;;  %v7399_v21 = vld [vmem:[#allocation3 + $0x60] sm:$0xff]  ;;  %v7401_v42 = vld [vmem:[#allocation3 + $0x68] sm:$0xff] }
0x1c14   :  { %v2581_v20 = vadd.f32 %v5925_v48, %v2580_v3  ;;  %v5929_v23 = vpop.eup %5928  ;;  %v2554_v49 = vsel %vm264_vm1, %v2539_v29, 0.0 }
0x1c15   :  { %v2553_v59 = vadd.f32 %v2552_v31, %v2551_v15 }
0x1c16   :  { %v2582_v24 = vadd.f32 %v5927_v38, %v2581_v20  ;;  %v7391_v20 = vld [vmem:[#allocation3 + $0x50] sm:$0xff] }
0x1c17   :  { %v5931_v60 = vpop.eup %5930  ;;  %v2555_v33 = vadd.f32 %v2554_v49, %v2553_v59  ;;  %v2543_v19 = vmul.f32 %v5929_v23, %v7391_v20 }
0x1c18   :  { %v5933_v62 = vpop.eup %5932  ;;  %v2534_v26 = vmul.f32 %v5931_v60, %v7359_v1  ;;  %v2583_v55 = vadd.f32 %v5929_v23, %v2582_v24  ;;  %v2556_v24 = vsel %vm264_vm1, %v2541_v54, 0.0  ;;  %v2717_v54 = vld [vmem:[#allocation5 + $0x18] sm:$0xff] }
0x1c19   :  { %v5935_v37 = vpop.eup %5934  ;;  %v2586_v16 = vadd.f32 %v5933_v62, %v5931_v60  ;;  %v2536_v51 = vmul.f32 %v5933_v62, %v7361_v34  ;;  %v2557_v62 = vadd.f32 %v2556_v24, %v2555_v33  ;;  %v2739_v24 = vpop.permute.xlu1 %2738 }
0x1c1a   :  { %v2538_v22 = vmul.f32 %v5935_v37, %v7368_v25  ;;  %v2564_v12 = vsel %vm264_vm1, %v2534_v26, 0.0  ;;  %v5937_v10 = vpop.eup %5936 }
0x1c1b   :  { %v2587_v11 = vadd.f32 %v5935_v37, %v2586_v16  ;;  %v2565_v4 = vsel %vm264_vm1, %v2536_v51, 0.0  ;;  %v5939_v40 = vpop.eup %5938  ;;  %v2540_v30 = vmul.f32 %v5937_v10, %v7377_v27  ;;  %v2558_v16 = vsel %vm264_vm1, %v2543_v19, 0.0 }
0x1c1c   :  { %v2566_v52 = vadd.f32 %v2565_v4, %v2564_v12  ;;  %v2584_v7 = vadd.f32 %v5939_v40, %v2583_v55  ;;  %v5941_v45 = vpop.eup %5940  ;;  %v2567_v8 = vsel %vm264_vm1, %v2538_v22, 0.0  ;;  %v2545_v37 = vmul.f32 %v5939_v40, %v7399_v21  ;;  %v7407_v22 = vld [vmem:[#allocation3 + $0x70] sm:$0xff]  ;;  %v7409_v12 = vld [vmem:[#allocation3 + $0x78] sm:$0xff] }
0x1c1d   :  { %v2588_v61 = vadd.f32 %v5937_v10, %v2587_v11  ;;  %v5943_v50 = vpop.eup %5942  ;;  %v2542_v28 = vmul.f32 %v5941_v45, %v7385_v14  ;;  %v2569_v39 = vsel %vm264_vm1, %v2540_v30, 0.0  ;;  %v2559_v51 = vadd.f32 %v2558_v16, %v2557_v62  ;;  %v2741_v62 = vpop.permute.xlu0 %2740 }
0x1c1e   :  { %v2568_v57 = vadd.f32 %v2567_v8, %v2566_v52  ;;  %v5945_v18 = vpop.eup %5944  ;;  %v2585_v6 = vadd.f32 %v5943_v50, %v2584_v7  ;;  %v2547_v10 = vmul.f32 %v5943_v50, %v7407_v22  ;;  %v2560_v15 = vsel %vm264_vm1, %v2545_v37, 0.0 }
0x1c1f   :  { %v2589_v9 = vadd.f32 %v5941_v45, %v2588_v61  ;;  %v5947_v13 = vpop.eup %5946  ;;  %v2544_v38 = vmul.f32 %v5945_v18, %v7393_v43  ;;  %v2571_v60 = vsel %vm264_vm1, %v2542_v28, 0.0  ;;  %v2561_v40 = vadd.f32 %v2560_v15, %v2559_v51 }
0x1c20   :  { %v2570_v3 = vadd.f32 %v2569_v39, %v2568_v57  ;;  %v5949_v48 = vpop.eup %5948  ;;  %5950 = vrcp.f32 %v2585_v6  ;;  %v2546_v55 = vmul.f32 %v5947_v13, %v7401_v42  ;;  %v2562_v61 = vsel %vm264_vm1, %v2547_v10, 0.0  ;;  %v2716_v57 = vld [vmem:[#allocation5 + $0x10] sm:$0xff] }
0x1c21   :  { %v2590_v5 = vadd.f32 %v5945_v18, %v2589_v9  ;;  %v2573_v23 = vsel %vm264_vm1, %v2544_v38, 0.0  ;;  %v2548_v11 = vmul.f32 %v5949_v48, %v7409_v12  ;;  %v2563_v29 = vadd.f32 %v2562_v61, %v2561_v40 }
0x1c22   :  { %v2572_v26 = vadd.f32 %v2571_v60, %v2570_v3  ;;  %v2575_v4 = vsel %vm264_vm1, %v2546_v55, 0.0 }
0x1c23   :  { %v2591_v58 = vadd.f32 %v5947_v13, %v2590_v5  ;;  %v2577_v45 = vsel %vm264_vm1, %v2548_v11, 0.0 }
0x1c24   :  { %v2574_v56 = vadd.f32 %v2573_v23, %v2572_v26  ;;  %v5646_v23 = vld [vmem:[#allocation15 + $0x8] sm:$0xff]  }
0x1c25   :  { %v2592_v35 = vadd.f32 %v5949_v48, %v2591_v58 }
0x1c26   :  { %v2576_v52 = vadd.f32 %v2575_v4, %v2574_v56  ;;  %v5647_v56 = vld [vmem:[#allocation15] sm:$0xff]  }
0x1c27   :  { %5952 = vrcp.f32 %v2592_v35 }
0x1c28   :  { %v2578_v30 = vadd.f32 %v2577_v45, %v2576_v52 }
0x1c2d   :  { %v5951_v7 = vpop.eup %5950 }
0x1c2e   :  { %v2594_v8 = vmul.f32 %v5951_v7, %v2563_v29 }
0x1c34   :  { %v5953_v31 = vpop.eup %5952 }
0x1c35   :  { %v2596_v9 = vmul.f32 %v5953_v31, %v2578_v30 }
0x1c37   :  { %v2601_v59 = vpack.c.bf16 %v2596_v9, %v2594_v8  ;;  %v5648_v8 = vld [vmem:[#allocation22 + $0x8] sm:$0xff]  }
0x1c39   :  { %5468 = vmatmul.mubr.msk.bf16.vlgmr.msra.gmra.mxu1 %vm264_vm1, %v2601_v59  ;;  %v5649_v59 = vld [vmem:[#allocation22] sm:$0xff]  }
0x1c3a   :  { %5483 = vmatprep.mubr.msk.bf16.mxu1 %vm6560_vm0, %v8196_v36  ;;  %5480 = vmatpush3.bf16.msra.mxu1 %v5646_v23  ;;  %v7492_v23 = vld [vmem:[#allocation4 + $0x50] sm:$0xff] }
0x1c3b   :  { %5481 = vmatprep.subr.bf16.mxu1 %v8196_v36  ;;  %8212 = vst [vmem:[#allocation39_spill] sm:$0xff] %v7492_v23 }
0x1c3e   :  { %5482 = vmatpush3.bf16.msra.mxu1 %v5647_v56  ;;  %v7496_v56 = vld [vmem:[#allocation4 + $0x48] sm:$0xff] }
0x1c3f   :  { %5495 = vmatprep.subr.bf16.mxu1 %v8196_v36  ;;  %8213 = vst [vmem:[#allocation43_spill] sm:$0xff] %v7496_v56 }
0x1cf9   :  { %v2651_v50 = vpop.f32.mrf.mxu1 }
0x1cfa   :  { %v2718_v18 = vadd.f32 %v2716_v57, %v2651_v50  ;;  %v7448_v57 = vld [vmem:[%s8125_s6] ss:$0 sm:$0xff] }
0x1cfb   :  { %v5469_v6 = vpop.f32.mrf.mxu1 }
0x1cfc   :  { %v2720_v5 = vadd.f32 %v2718_v18, %v7299_v2 }
0x1cfd   :  { %v2654_v13 = vpop.f32.mrf.mxu1 }
0x1cfe   :  { %v5114_v28 = vmul.f32 -1.442695, %v2720_v5  ;;  %v2719_v49 = vadd.f32 %v2717_v54, %v2654_v13  ;;  %v7453_v5 = vld [vmem:[#allocation4 + $0x10] sm:$0xff]  ;;  %v7455_v13 = vld [vmem:[#allocation4] sm:$0xff] }
0x1cff   :  { %v5470_v39 = vpop.f32.mrf.mxu1  ;;  %v7457_v54 = vld [vmem:[#allocation4 + $0x20] sm:$0xff] }
0x1d00   :  { %5954 = vpow2.f32 %v5114_v28  ;;  %v2721_v58 = vadd.f32 %v2719_v49, %v7303_v41 }
0x1d02   :  { %v5115_v33 = vmul.f32 -1.442695, %v2721_v58  ;;  %v7465_v58 = vld [vmem:[#allocation4 + $0x30] sm:$0xff] }
0x1d04   :  { %5956 = vpow2.f32 %v5115_v33 }
0x1d0d   :  { %v5955_v3 = vpop.eup %5954 }
0x1d0e   :  { %v2728_v48 = vadd.f32 1.0, %v5955_v3 }
0x1d10   :  { %5958 = vrcp.f32 %v2728_v48 }
0x1d11   :  { %v5957_v35 = vpop.eup %5956 }
0x1d12   :  { %v2729_v19 = vadd.f32 1.0, %v5957_v35 }
0x1d14   :  { %5960 = vrcp.f32 %v2729_v19  ;;  %v7472_v19 = vld [vmem:[#allocation4 + $0x18] sm:$0xff] }
0x1d15   :  { %8208 = vst [vmem:[#allocation34_spill] sm:$0xff] %v7472_v19 }
0x1d1d   :  { %v5959_v38 = vpop.eup %5958 }
0x1d1e   :  { %v2744_v60 = vmul.f32 %v5959_v38, %v2739_v24  ;;  %v2758_v15 = vsub.f32 1.0, %v5959_v38  ;;  %v2770_v7 = vmul.f32 %v5959_v38, %v7276_v32  ;;  %v7474_v38 = vld [vmem:[#allocation4 + $0x28] sm:$0xff] }
0x1d1f   :  { %8209 = vst [vmem:[#allocation36_spill] sm:$0xff] %v7474_v38 }
0x1d20   :  { %2748 = vrot.lane.b32.xlu1 %v2744_v60, %s6549_s22 }
0x1d21   :  { %v5961_v2 = vpop.eup %5960 }
0x1d22   :  { %v2745_v26 = vmul.f32 %v5961_v2, %v2741_v62  ;;  %v2759_v40 = vsub.f32 1.0, %v5961_v2  ;;  %v2771_v61 = vmul.f32 %v5961_v2, %v7278_v17  ;;  %v7482_v62 = vld [vmem:[#allocation4 + $0x40] sm:$0xff] }
0x1d23   :  { %8210 = vst [vmem:[#allocation37_spill] sm:$0xff] %v7482_v62 }
0x1d24   :  { %2750 = vrot.lane.b32.xlu1 %v2745_v26, %s6549_s22 }
0x1d92   :  { %v2749_v37 = vpop.permute.xlu1 %2748 }
0x1d93   :  { %v2754_v41 = vadd.f32 %v2749_v37, %v2718_v18  ;;  %v7486_v37 = vld [vmem:[#allocation4 + $0x38] sm:$0xff] }
0x1d94   :  { %8211 = vst [vmem:[#allocation38_spill] sm:$0xff] %v7486_v37 }
0x1d95   :  { %5962 = vtanh.f32 %v2754_v41 }
0x1d96   :  { %v2751_v55 = vpop.permute.xlu1 %2750 }
0x1d97   :  { %v2755_v16 = vadd.f32 %v2751_v55, %v2719_v49 }
0x1d99   :  { %5964 = vtanh.f32 %v2755_v16 }
0x1da2   :  { %v5963_v51 = vpop.eup %5962 }
0x1da3   :  { %2762 = vrot.lane.b32.xlu0 %v5963_v51, %s6563_s14 }
0x1da6   :  { %v5965_v10 = vpop.eup %5964 }
0x1da7   :  { %2764 = vrot.lane.b32.xlu1 %v5965_v10, %s6563_s14 }
0x1e15   :  { %v2763_v11 = vpop.permute.xlu0 %2762 }
0x1e16   :  { %v2768_v4 = vmul.f32 %v2763_v11, %v2758_v15  ;;  %v7500_v15 = vld [vmem:[#allocation4 + $0x60] sm:$0xff] }
0x1e17   :  { %8214 = vst [vmem:[#allocation44_spill] sm:$0xff] %v7500_v15 }
0x1e18   :  { %v7430_v29 = vadd.f32 %v2770_v7, %v2768_v4 }
0x1e19   :  { %v2765_v52 = vpop.permute.xlu1 %2764 }
0x1e1a   :  { %v2769_v45 = vmul.f32 %v2765_v52, %v2759_v40  ;;  %8206 = vst [vmem:[#allocation33_spill] sm:$0xff] %v7430_v29  ;;  %v7504_v40 = vld [vmem:[#allocation4 + $0x58] sm:$0xff] }
0x1e1b   :  { %8215 = vst [vmem:[#allocation45_spill] sm:$0xff] %v7504_v40 }
0x1e1c   :  { %v7432_v30 = vadd.f32 %v2771_v61, %v2769_v45  ;;  %v7508_v45 = vld [vmem:[#allocation19] ss:$0 sm:$0xff] }
0x1e1d   :  { %8216 = vst [vmem:[#allocation46_spill] sm:$0xff] %v7508_v45 }
0x1e1e   :  { %8207 = vst [vmem:[#allocation35_spill] sm:$0xff] %v7432_v30  ;;  %v2774_v31 = vpack.c.bf16 %v7432_v30, %v7430_v29 }
0x1e20   :  { %2825 = vrot.lane.b32.xlu0 %v2774_v31, %s6563_s14 }
0x1e92   :  { %v2826_v9 = vpop.permute.xlu0 %2825 }
0x1e93   :  { %5484 = vmatmul.mubr.msk.bf16.vlgmr.msra.gmra.mxu1 %vm264_vm1, %v2826_v9 }
0x1e94   :  { %5496 = vmatpush3.bf16.msra.mxu1 %v5648_v8  ;;  %5499 = vmatprep.mubr.msk.bf16.mxu1 %vm6560_vm0, %v8196_v36 }
0x1e95   :  { %5497 = vmatprep.subr.bf16.mxu1 %v8196_v36 }
0x1e98   :  { %5498 = vmatpush3.bf16.msra.mxu1 %v5649_v59  ;;  %v7512_v59 = vld [vmem:[#allocation4 + $0x8] sm:$0xff] }
0x1e99   :  { %5511 = vmatprep.subr.bf16.mxu1 %v8196_v36  ;;  %8217 = vst [vmem:[#allocation47_spill] sm:$0xff] %v7512_v59 }
0x1e9b   :  { %5500 = vmatmul.mubr.msk.bf16.vlgmr.msra.gmra.mxu1 %vm264_vm1, %v2826_v9 }
0x1e9c   :  { %5515 = vmatprep.mubr.msk.bf16.mxu1 %vm6560_vm0, %v8196_v36 }
0x1f53   :  { %v2876_v50 = vpop.f32.mrf.mxu1 }
0x1f54   :  { %v7451_v18 = vadd.f32 %v7448_v57, %v2876_v50 }
0x1f55   :  { %v5485_v6 = vpop.f32.mrf.mxu1 }
0x1f56   :  { %v2885_v28 = vadd.f32 %v7451_v18, %v7453_v5  ;;  %v2883_v49 = vadd.f32 %v7451_v18, %v7455_v13  ;;  %v2887_v39 = vadd.f32 %v7451_v18, %v7457_v54  ;;  %v2889_v3 = vadd.f32 %v7451_v18, %v7465_v58 }
0x1f57   :  { %v2879_v33 = vpop.f32.mrf.mxu1  ;;  %v2891_v26 = vadd.f32 %v7451_v18, %v7482_v62  ;;  %v2893_v51 = vadd.f32 %v7451_v18, %v7492_v23  ;;  %v2895_v4 = vadd.f32 %v7451_v18, %v7500_v15 }
0x1f58   :  { %v7470_v48 = vadd.f32 %v7448_v57, %v2879_v33  ;;  %5966 = vtanh.f32 %v2885_v28 }
0x1f59   :  { %v5486_v35 = vpop.f32.mrf.mxu1  ;;  %5968 = vtanh.f32 %v2883_v49  ;;  %v7516_v49 = vld [vmem:[#allocation4 + $0x68] sm:$0xff] }
0x1f5a   :  { %5970 = vtanh.f32 %v2887_v39  ;;  %v2886_v24 = vadd.f32 %v7470_v48, %v7472_v19  ;;  %v2888_v60 = vadd.f32 %v7470_v48, %v7474_v38  ;;  %v2890_v55 = vadd.f32 %v7470_v48, %v7486_v37  ;;  %8218 = vst [vmem:[#allocation48_spill] sm:$0xff] %v7516_v49 }
0x1f5b   :  { %v7480_v2 = vpop.f32.mrf.mxu1  ;;  %5972 = vtanh.f32 %v2889_v3  ;;  %v2892_v11 = vadd.f32 %v7470_v48, %v7496_v56  ;;  %v2894_v7 = vadd.f32 %v7470_v48, %v7504_v40  ;;  %v2884_v39 = vadd.f32 %v7470_v48, %v7512_v59 }
0x1f5c   :  { %5974 = vtanh.f32 %v2886_v24  ;;  %v2896_v35 = vadd.f32 %v7470_v48, %v7516_v49 }
0x1f5d   :  { %v5501_v41 = vpop.f32.mrf.mxu1  ;;  %5976 = vtanh.f32 %v2888_v60 }
0x1f5e   :  { %5978 = vtanh.f32 %v2891_v26  ;;  %v7524_v26 = vld [vmem:[#allocation4 + $0x70] sm:$0xff] }
0x1f5f   :  { %v7490_v16 = vpop.f32.mrf.mxu1  ;;  %5980 = vtanh.f32 %v2890_v55  ;;  %8219 = vst [vmem:[#allocation49_spill] sm:$0xff] %v7524_v26  ;;  %v2897_v41 = vadd.f32 %v7451_v18, %v7524_v26 }
0x1f60   :  { %5982 = vtanh.f32 %v2893_v51 }
0x1f61   :  { %v5502_v10 = vpop.f32.mrf.mxu1  ;;  %5984 = vtanh.f32 %v2892_v11  ;;  %v7531_v11 = vld [vmem:[#allocation4 + $0x78] sm:$0xff] }
0x1f62   :  { %5986 = vtanh.f32 %v2895_v4  ;;  %8220 = vst [vmem:[#allocation50_spill] sm:$0xff] %v7531_v11 }
0x1f63   :  { %5988 = vtanh.f32 %v2894_v7  ;;  %v2898_v7 = vadd.f32 %v7470_v48, %v7531_v11 }
0x1f64   :  { %5990 = vtanh.f32 %v2884_v39 }
0x1f65   :  { %v5967_v52 = vpop.eup %5966  ;;  %5992 = vtanh.f32 %v2896_v35 }
0x1f66   :  { %v5969_v61 = vpop.eup %5968  ;;  %v2917_v31 = vmul.f32 %v7508_v45, %v5967_v52  ;;  %5994 = vtanh.f32 %v2897_v41 }
0x1f67   :  { %v5971_v8 = vpop.eup %5970  ;;  %v2915_v9 = vmul.f32 %v7508_v45, %v5969_v61  ;;  %5996 = vtanh.f32 %v2898_v7 }
0x1f68   :  { %v5973_v50 = vpop.eup %5972  ;;  %v2937_v6 = vsel %vm264_vm1, %v2917_v31, 0.0  ;;  %v2919_v28 = vmul.f32 %v7508_v45, %v5971_v8 }
0x1f69   :  { %v5975_v33 = vpop.eup %5974  ;;  %2938 = vadd.xlane.f32.xlu0 %v2937_v6  ;;  %v2931_v3 = vsel %vm264_vm1, %v2915_v9, 0.0  ;;  %v2921_v10 = vmul.f32 %v7508_v45, %v5973_v50 }
0x1f6a   :  { %v5977_v24 = vpop.eup %5976  ;;  %2932 = vadd.xlane.f32.xlu1 %v2931_v3  ;;  %v2918_v60 = vmul.f32 %v7508_v45, %v5975_v33  ;;  %v2943_v55 = vsel %vm264_vm1, %v2919_v28, 0.0 }
0x1f6b   :  { %v5979_v4 = vpop.eup %5978  ;;  %v2920_v52 = vmul.f32 %v7508_v45, %v5977_v24  ;;  %v2949_v18 = vsel %vm264_vm1, %v2921_v10, 0.0 }
0x1f6c   :  { %v2940_v51 = vsel %vm264_vm1, %v2918_v60, 0.0  ;;  %v5981_v61 = vpop.eup %5980  ;;  %v2923_v31 = vmul.f32 %v7508_v45, %v5979_v4 }
0x1f6d   :  { %2944 = vadd.xlane.f32.xlu0 %v2943_v55  ;;  %v5983_v8 = vpop.eup %5982  ;;  %v2946_v9 = vsel %vm264_vm1, %v2920_v52, 0.0  ;;  %v2922_v50 = vmul.f32 %v7508_v45, %v5981_v61 }
0x1f6e   :  { %2941 = vadd.xlane.f32.xlu1 %v2940_v51  ;;  %v5985_v6 = vpop.eup %5984  ;;  %v2955_v28 = vsel %vm264_vm1, %v2923_v31, 0.0  ;;  %v2925_v48 = vmul.f32 %v7508_v45, %v5983_v8 }
0x1f6f   :  { %v5987_v39 = vpop.eup %5986  ;;  %v2952_v33 = vsel %vm264_vm1, %v2922_v50, 0.0  ;;  %v2924_v3 = vmul.f32 %v7508_v45, %v5985_v6 }
0x1f70   :  { %v5989_v35 = vpop.eup %5988  ;;  %v2961_v24 = vsel %vm264_vm1, %v2925_v48, 0.0  ;;  %v2927_v60 = vmul.f32 %v7508_v45, %v5987_v39  ;;  %v3243_v39 = vadd.f32 %v7490_v16, %v7221_v0 }
0x1f71   :  { %2950 = vadd.xlane.f32.xlu0 %v2949_v18  ;;  %v5991_v41 = vpop.eup %5990  ;;  %v2958_v55 = vsel %vm264_vm1, %v2924_v3, 0.0  ;;  %v2926_v51 = vmul.f32 %v7508_v45, %v5989_v35  ;;  %v5650_v3 = vld [vmem:[#allocation21 + $0x8] sm:$0xff]   ;;  %v5651_v35 = vld [vmem:[#allocation21] sm:$0xff]  }
0x1f72   :  { %2947 = vadd.xlane.f32.xlu1 %v2946_v9  ;;  %v5993_v10 = vpop.eup %5992  ;;  %v2967_v4 = vsel %vm264_vm1, %v2927_v60, 0.0  ;;  %v2916_v52 = vmul.f32 %v7508_v45, %v5991_v41  ;;  %5488 = vmatpush3.bf16.msra.mxu0 %v5650_v3 }
0x1f73   :  { %v5995_v7 = vpop.eup %5994  ;;  %v2964_v61 = vsel %vm264_vm1, %v2926_v51, 0.0  ;;  %v2928_v18 = vmul.f32 %v7508_v45, %v5993_v10  ;;  %5489 = vmatprep.subr.bf16.mxu0 %v8196_v36 }
0x1f74   :  { %v5997_v31 = vpop.eup %5996  ;;  %v2934_v8 = vsel %vm264_vm1, %v2916_v52, 0.0  ;;  %v2929_v9 = vmul.f32 %v7508_v45, %v5995_v7 }
0x1f75   :  { %2956 = vadd.xlane.f32.xlu0 %v2955_v28  ;;  %v2970_v50 = vsel %vm264_vm1, %v2928_v18, 0.0  ;;  %v2930_v6 = vmul.f32 %v7508_v45, %v5997_v31 }
0x1f76   :  { %2953 = vadd.xlane.f32.xlu1 %v2952_v33  ;;  %v2973_v28 = vsel %vm264_vm1, %v2929_v9, 0.0  ;;  %v3242_v33 = vadd.f32 %v7480_v2, %v7221_v0  ;;  %5490 = vmatpush3.bf16.msra.mxu0 %v5651_v35 }
0x1f77   :  { %v2976_v48 = vsel %vm264_vm1, %v2930_v6, 0.0  ;;  %5503 = vmatprep.subr.bf16.mxu0 %v8196_v36 }
0x1f79   :  { %2962 = vadd.xlane.f32.xlu0 %v2961_v24 }
0x1f7a   :  { %2959 = vadd.xlane.f32.xlu1 %v2958_v55 }
0x1f7d   :  { %2968 = vadd.xlane.f32.xlu0 %v2967_v4 }
0x1f7e   :  { %2965 = vadd.xlane.f32.xlu1 %v2964_v61 }
0x1f81   :  { %2935 = vadd.xlane.f32.xlu0 %v2934_v8 }
0x1f82   :  { %2971 = vadd.xlane.f32.xlu1 %v2970_v50 }
0x1f85   :  { %2974 = vadd.xlane.f32.xlu0 %v2973_v28 }
0x1f86   :  { %2977 = vadd.xlane.f32.xlu1 %v2976_v48 }
0x1f97   :  { %3248 = vrot.lane.b32.xlu1 %v3243_v39, %s6549_s22 }
0x1f9b   :  { %3246 = vrot.lane.b32.xlu0 %v3242_v33, %s6549_s22 }
0x1ff2   :  { %v2939_v24 = vpop.xlane.xlu0 %2938 }
0x1ff3   :  { %v2933_v60 = vpop.xlane.xlu1 %2932 }
0x1ff6   :  { %v2945_v41 = vpop.xlane.xlu0 %2944 }
0x1ff7   :  { %v2942_v55 = vpop.xlane.xlu1 %2941  ;;  %v2979_v39 = vmax.f32 %v2933_v60, %v2945_v41 }
0x1ffa   :  { %v2951_v51 = vpop.xlane.xlu0 %2950 }
0x1ffb   :  { %v2948_v10 = vpop.xlane.xlu1 %2947  ;;  %v2980_v6 = vmax.f32 %v2939_v24, %v2951_v51 }
0x1ffe   :  { %v2957_v4 = vpop.xlane.xlu0 %2956 }
0x1fff   :  { %v2954_v52 = vpop.xlane.xlu1 %2953  ;;  %v2981_v0 = vmax.f32 %v2979_v39, %v2957_v4 }
0x2000   :  { %v2987_v28 = vmax.f32 %v2942_v55, %v2954_v52 }
0x2002   :  { %v7566_v7 = vpop.xlane.xlu0 %2962 }
0x2003   :  { %v2960_v61 = vpop.xlane.xlu1 %2959  ;;  %v2982_v33 = vmax.f32 %v2980_v6, %v7566_v7 }
0x2006   :  { %v7568_v18 = vpop.xlane.xlu0 %2968 }
0x2007   :  { %v2966_v31 = vpop.xlane.xlu1 %2965  ;;  %v2983_v40 = vmax.f32 %v2981_v0, %v7568_v18 }
0x2008   :  { %v2989_v3 = vmax.f32 %v2987_v28, %v2966_v31 }
0x200a   :  { %v2936_v8 = vpop.xlane.xlu0 %2935 }
0x200b   :  { %v2972_v9 = vpop.xlane.xlu1 %2971  ;;  %v2986_v50 = vmax.f32 %v2936_v8, %v2948_v10 }
0x200d   :  { %v2988_v48 = vmax.f32 %v2986_v50, %v2960_v61 }
0x200e   :  { %v2975_v35 = vpop.xlane.xlu0 %2974 }
0x200f   :  { %v2978_v17 = vpop.xlane.xlu1 %2977  ;;  %v2990_v32 = vmax.f32 %v2988_v48, %v2972_v9  ;;  %v2984_v49 = vmax.f32 %v2982_v33, %v2975_v35 }
0x2010   :  { %v2991_v11 = vmax.f32 %v2989_v3, %v2978_v17 }
0x2011   :  { %v2985_v37 = vmax.f32 %v2983_v40, %v2984_v49 }
0x2012   :  { %v2992_v26 = vmax.f32 %v2990_v32, %v2991_v11 }
0x2013   :  { %v2993_v28 = vsub.f32 %v2933_v60, %v2985_v37  ;;  %v2995_v39 = vsub.f32 %v2939_v24, %v2985_v37  ;;  %v2997_v33 = vsub.f32 %v2945_v41, %v2985_v37  ;;  %v2999_v32 = vsub.f32 %v2951_v51, %v2985_v37 }
0x2014   :  { %v2994_v45 = vsub.f32 %v2936_v8, %v2992_v26  ;;  %v2996_v56 = vsub.f32 %v2942_v55, %v2992_v26  ;;  %v2998_v59 = vsub.f32 %v2948_v10, %v2992_v26  ;;  %v3000_v15 = vsub.f32 %v2954_v52, %v2992_v26 }
0x2015   :  { %v3002_v38 = vsub.f32 %v2960_v61, %v2992_v26  ;;  %v3004_v19 = vsub.f32 %v2966_v31, %v2992_v26  ;;  %v3006_v62 = vsub.f32 %v2972_v9, %v2992_v26  ;;  %v3009_v11 = vmul.f32 1.442695, %v2993_v28 }
0x2016   :  { %v3011_v50 = vmul.f32 1.442695, %v2994_v45  ;;  %v3015_v23 = vmul.f32 1.442695, %v2996_v56  ;;  %v3019_v6 = vmul.f32 1.442695, %v2998_v59  ;;  %v3008_v49 = vsub.f32 %v2978_v17, %v2992_v26 }
0x2017   :  { %v3023_v48 = vmul.f32 1.442695, %v3000_v15  ;;  %v3027_v3 = vmul.f32 1.442695, %v3002_v38  ;;  %v3031_v0 = vmul.f32 1.442695, %v3004_v19  ;;  %v3001_v59 = vsub.f32 %v2957_v4, %v2985_v37 }
0x2018   :  { %5998 = vpow2.f32 %v3011_v50  ;;  %v3013_v40 = vmul.f32 1.442695, %v2995_v39  ;;  %v3017_v45 = vmul.f32 1.442695, %v2997_v33  ;;  %v3035_v56 = vmul.f32 1.442695, %v3006_v62 }
0x2019   :  { %6000 = vpow2.f32 %v3015_v23  ;;  %v3021_v60 = vmul.f32 1.442695, %v2999_v32  ;;  %v3003_v23 = vsub.f32 %v7566_v7, %v2985_v37  ;;  %v3039_v38 = vmul.f32 1.442695, %v3008_v49 }
0x201a   :  { %6002 = vpow2.f32 %v3019_v6  ;;  %v3005_v19 = vsub.f32 %v7568_v18, %v2985_v37  ;;  %v3025_v15 = vmul.f32 1.442695, %v3001_v59  ;;  %v3007_v41 = vsub.f32 %v2975_v35, %v2985_v37 }
0x201b   :  { %6004 = vpow2.f32 %v3023_v48  ;;  %v3029_v17 = vmul.f32 1.442695, %v3003_v23 }
0x201c   :  { %6006 = vpow2.f32 %v3027_v3  ;;  %v3033_v62 = vmul.f32 1.442695, %v3005_v19  ;;  %v3037_v7 = vmul.f32 1.442695, %v3007_v41 }
0x201d   :  { %6008 = vpow2.f32 %v3031_v0 }
0x201e   :  { %6010 = vpow2.f32 %v3009_v11 }
0x201f   :  { %6012 = vpow2.f32 %v3013_v40 }
0x2020   :  { %6014 = vpow2.f32 %v3017_v45 }
0x2021   :  { %6016 = vpow2.f32 %v3035_v56 }
0x2022   :  { %6018 = vpow2.f32 %v3021_v60 }
0x2023   :  { %6020 = vpow2.f32 %v3039_v38 }
0x2024   :  { %6022 = vpow2.f32 %v3025_v15 }
0x2025   :  { %v5999_v24 = vpop.eup %5998  ;;  %6024 = vpow2.f32 %v3029_v17 }
0x2026   :  { %v6001_v26 = vpop.eup %6000  ;;  %v3042_v10 = vmul.f32 %v5999_v24, %v7359_v1  ;;  %6026 = vpow2.f32 %v3033_v62 }
0x2027   :  { %v3094_v55 = vadd.f32 %v6001_v26, %v5999_v24  ;;  %v6003_v51 = vpop.eup %6002  ;;  %v3044_v4 = vmul.f32 %v6001_v26, %v7361_v34  ;;  %6028 = vpow2.f32 %v3037_v7 }
0x2028   :  { %v6005_v61 = vpop.eup %6004  ;;  %v3072_v37 = vsel %vm264_vm1, %v3042_v10, 0.0  ;;  %v3046_v34 = vmul.f32 %v6003_v51, %v7368_v25 }
0x2029   :  { %v3095_v52 = vadd.f32 %v6003_v51, %v3094_v55  ;;  %v6007_v18 = vpop.eup %6006  ;;  %v3073_v9 = vsel %vm264_vm1, %v3044_v4, 0.0 }
0x202a   :  { %v6009_v8 = vpop.eup %6008  ;;  %v3074_v33 = vadd.f32 %v3073_v9, %v3072_v37  ;;  %v3075_v25 = vsel %vm264_vm1, %v3046_v34, 0.0  ;;  %v3050_v26 = vmul.f32 %v6007_v18, %v7385_v14 }
0x202b   :  { %v3096_v31 = vadd.f32 %v6005_v61, %v3095_v52  ;;  %v6011_v35 = vpop.eup %6010 }
0x202c   :  { %v6013_v6 = vpop.eup %6012  ;;  %v3041_v1 = vmul.f32 %v6011_v35, %v7353_v44  ;;  %v3048_v44 = vmul.f32 %v6005_v61, %v7377_v27  ;;  %v3076_v38 = vadd.f32 %v3075_v25, %v3074_v33  ;;  %v3052_v61 = vmul.f32 %v6009_v8, %v7393_v43 }
0x202d   :  { %v3097_v50 = vadd.f32 %v6007_v18, %v3096_v31  ;;  %v6015_v28 = vpop.eup %6014  ;;  %v3087_v39 = vadd.f32 %v6013_v6, %v6011_v35  ;;  %v3043_v3 = vmul.f32 %v6013_v6, %v7355_v46  ;;  %v3079_v31 = vsel %vm264_vm1, %v3050_v26, 0.0 }
0x202e   :  { %v6017_v0 = vpop.eup %6016  ;;  %v3045_v32 = vmul.f32 %v6015_v28, %v7366_v47  ;;  %v3057_v11 = vsel %vm264_vm1, %v3041_v1, 0.0  ;;  %v3077_v55 = vsel %vm264_vm1, %v3048_v44, 0.0 }
0x202f   :  { %v3098_v48 = vadd.f32 %v6009_v8, %v3097_v50  ;;  %v6019_v40 = vpop.eup %6018  ;;  %v3088_v45 = vadd.f32 %v6015_v28, %v3087_v39  ;;  %v3058_v56 = vsel %vm264_vm1, %v3043_v3, 0.0  ;;  %v3078_v62 = vadd.f32 %v3077_v55, %v3076_v38  ;;  %v3247_v55 = vpop.permute.xlu0 %3246 }
0x2030   :  { %v3059_v59 = vadd.f32 %v3058_v56, %v3057_v11  ;;  %v6021_v60 = vpop.eup %6020  ;;  %v3047_v19 = vmul.f32 %v6019_v40, %v7375_v63  ;;  %v3060_v47 = vsel %vm264_vm1, %v3045_v32, 0.0  ;;  %v3081_v50 = vsel %vm264_vm1, %v3052_v61, 0.0  ;;  %v5653_v61 = vld [vmem:[#allocation15] sm:$0xff]  }
0x2031   :  { %v3099_v49 = vadd.f32 %v6017_v0, %v3098_v48  ;;  %v3089_v23 = vadd.f32 %v6019_v40, %v3088_v45  ;;  %v6023_v46 = vpop.eup %6022  ;;  %v3080_v9 = vadd.f32 %v3079_v31, %v3078_v62  ;;  %v3056_v8 = vmul.f32 %v6021_v60, %v7409_v12  ;;  %v3224_v12 = vld [vmem:[#allocation5 + $0x20] sm:$0xff]  ;;  %v3249_v62 = vpop.permute.xlu1 %3248 }
0x2032   :  { %v3061_v41 = vadd.f32 %v3060_v47, %v3059_v59  ;;  %v6025_v17 = vpop.eup %6024  ;;  %v3049_v10 = vmul.f32 %v6023_v46, %v7383_v53  ;;  %v3062_v4 = vsel %vm264_vm1, %v3047_v19, 0.0  ;;  %v3054_v53 = vmul.f32 %v6017_v0, %v7401_v42 }
0x2033   :  { %v3100_v15 = vadd.f32 %v6021_v60, %v3099_v49  ;;  %v3090_v24 = vadd.f32 %v6023_v46, %v3089_v23  ;;  %v6027_v51 = vpop.eup %6026  ;;  %v3051_v14 = vmul.f32 %v6025_v17, %v7391_v20  ;;  %v3082_v6 = vadd.f32 %v3081_v50, %v3080_v9  ;;  %v3225_v60 = vld [vmem:[#allocation5 + $0x28] sm:$0xff] }
0x2034   :  { %v3063_v63 = vadd.f32 %v3062_v4, %v3061_v41  ;;  %v6029_v7 = vpop.eup %6028  ;;  %v3064_v18 = vsel %vm264_vm1, %v3049_v10, 0.0  ;;  %v3053_v1 = vmul.f32 %v6027_v51, %v7399_v21  ;;  %v3083_v28 = vsel %vm264_vm1, %v3054_v53, 0.0 }
0x2035   :  { %v3091_v27 = vadd.f32 %v6025_v17, %v3090_v24  ;;  %6030 = vrcp.f32 %v3100_v15  ;;  %v3066_v34 = vsel %vm264_vm1, %v3051_v14, 0.0  ;;  %v3084_v48 = vadd.f32 %v3083_v28, %v3082_v6 }
0x2036   :  { %v3065_v35 = vadd.f32 %v3064_v18, %v3063_v63  ;;  %v3055_v20 = vmul.f32 %v6029_v7, %v7407_v22  ;;  %v3068_v39 = vsel %vm264_vm1, %v3053_v1, 0.0  ;;  %v3085_v42 = vsel %vm264_vm1, %v3056_v8, 0.0  ;;  %v5652_v63 = vld [vmem:[#allocation15 + $0x8] sm:$0xff]   ;;  %v5654_v8 = vld [vmem:[#allocation22 + $0x8] sm:$0xff]  }
0x2037   :  { %v3092_v52 = vadd.f32 %v6027_v51, %v3091_v27  ;;  %v3086_v0 = vadd.f32 %v3085_v42, %v3084_v48  ;;  %v5655_v48 = vld [vmem:[#allocation22] sm:$0xff]  }
0x2038   :  { %v3067_v43 = vadd.f32 %v3066_v34, %v3065_v35  ;;  %v3070_v32 = vsel %vm264_vm1, %v3055_v20, 0.0 }
0x2039   :  { %v3093_v37 = vadd.f32 %v6029_v7, %v3092_v52 }
0x203a   :  { %v3069_v3 = vadd.f32 %v3068_v39, %v3067_v43 }
0x203b   :  { %6032 = vrcp.f32 %v3093_v37 }
0x203c   :  { %v3071_v21 = vadd.f32 %v3070_v32, %v3069_v3 }
0x2042   :  { %v6031_v33 = vpop.eup %6030 }
0x2043   :  { %v3104_v11 = vmul.f32 %v6031_v33, %v3086_v0 }
0x2048   :  { %v6033_v40 = vpop.eup %6032 }
0x2049   :  { %v3102_v49 = vmul.f32 %v6033_v40, %v3071_v21  ;;  %v8223_v40 = vld [vmem:[#allocation37_spill] sm:$0xff] }
0x204b   :  { %v3109_v45 = vpack.c.bf16 %v3104_v11, %v3102_v49 }
0x204d   :  { %5492 = vmatmul.mubr.msk.bf16.vlgmr.msra.gmra.mxu0 %vm264_vm1, %v3109_v45 }
0x204e   :  { %5507 = vmatprep.mubr.msk.bf16.mxu0 %vm6560_vm0, %v8196_v36  ;;  %5504 = vmatpush3.bf16.msra.mxu0 %v5652_v63 }
0x204f   :  { %5505 = vmatprep.subr.bf16.mxu0 %v8196_v36 }
0x2052   :  { %5506 = vmatpush3.bf16.msra.mxu0 %v5653_v61 }
0x2053   :  { %5519 = vmatprep.subr.bf16.mxu0 %v8196_v36 }
0x210d   :  { %v3159_v22 = vpop.f32.mrf.mxu0 }
0x210e   :  { %v3226_v56 = vadd.f32 %v3224_v12, %v3159_v22  ;;  %v8224_v22 = vld [vmem:[#allocation34_spill] sm:$0xff] }
0x210f   :  { %v5493_v44 = vpop.f32.mrf.mxu0 }
0x2110   :  { %v3228_v59 = vadd.f32 %v3226_v56, %v7480_v2  ;;  %v8226_v44 = vld [vmem:[#allocation36_spill] sm:$0xff] }
0x2111   :  { %v3162_v25 = vpop.f32.mrf.mxu0 }
0x2112   :  { %v5127_v23 = vmul.f32 -1.442695, %v3228_v59  ;;  %v3227_v38 = vadd.f32 %v3225_v60, %v3162_v25 }
0x2113   :  { %v5494_v46 = vpop.f32.mrf.mxu0 }
0x2114   :  { %6034 = vpow2.f32 %v5127_v23  ;;  %v3229_v19 = vadd.f32 %v3227_v38, %v7490_v16  ;;  %v8228_v23 = vld [vmem:[#allocation38_spill] sm:$0xff]  ;;  %v8229_v46 = vld [vmem:[#allocation47_spill] sm:$0xff] }
0x2116   :  { %v5128_v47 = vmul.f32 -1.442695, %v3229_v19 }
0x2118   :  { %6036 = vpow2.f32 %v5128_v47 }
0x2121   :  { %v6035_v15 = vpop.eup %6034 }
0x2122   :  { %v3236_v24 = vadd.f32 1.0, %v6035_v15  ;;  %v8230_v15 = vld [vmem:[#allocation43_spill] sm:$0xff] }
0x2124   :  { %6038 = vrcp.f32 %v3236_v24 }
0x2125   :  { %v6037_v41 = vpop.eup %6036 }
0x2126   :  { %v3237_v17 = vadd.f32 1.0, %v6037_v41 }
0x2128   :  { %6040 = vrcp.f32 %v3237_v17  ;;  %v8231_v17 = vld [vmem:[#allocation46_spill] sm:$0xff] }
0x2131   :  { %v6039_v26 = vpop.eup %6038 }
0x2132   :  { %v3252_v27 = vmul.f32 %v6039_v26, %v3247_v55  ;;  %v3266_v9 = vsub.f32 1.0, %v6039_v26  ;;  %v3278_v53 = vmul.f32 %v6039_v26, %v7430_v29 }
0x2134   :  { %3256 = vrot.lane.b32.xlu1 %v3252_v27, %s6549_s22 }
0x2135   :  { %v6041_v2 = vpop.eup %6040 }
0x2136   :  { %v3253_v51 = vmul.f32 %v6041_v2, %v3249_v62  ;;  %v3267_v18 = vsub.f32 1.0, %v6041_v2  ;;  %v3279_v50 = vmul.f32 %v6041_v2, %v7432_v30 }
0x2138   :  { %3258 = vrot.lane.b32.xlu0 %v3253_v51, %s6549_s22 }
0x21a6   :  { %v3257_v10 = vpop.permute.xlu1 %3256 }
0x21a7   :  { %v3262_v16 = vadd.f32 %v3257_v10, %v3226_v56  ;;  %v8232_v10 = vld [vmem:[#allocation49_spill] sm:$0xff] }
0x21a9   :  { %6042 = vtanh.f32 %v3262_v16 }
0x21aa   :  { %v3259_v4 = vpop.permute.xlu0 %3258 }
0x21ab   :  { %v3263_v52 = vadd.f32 %v3259_v4, %v3227_v38 }
0x21ad   :  { %6044 = vtanh.f32 %v3263_v52 }
0x21b6   :  { %v6043_v7 = vpop.eup %6042 }
0x21b7   :  { %3270 = vrot.lane.b32.xlu1 %v6043_v7, %s6563_s14  ;;  %v8233_v7 = vld [vmem:[#allocation45_spill] sm:$0xff] }
0x21ba   :  { %v6045_v31 = vpop.eup %6044 }
0x21bb   :  { %3272 = vrot.lane.b32.xlu0 %v6045_v31, %s6563_s14 }
0x2229   :  { %v3271_v37 = vpop.permute.xlu1 %3270 }
0x222a   :  { %v3276_v14 = vmul.f32 %v3271_v37, %v3266_v9 }
0x222c   :  { %v7619_v1 = vadd.f32 %v3278_v53, %v3276_v14  ;;  %v8234_v53 = vld [vmem:[#allocation48_spill] sm:$0xff] }
0x222d   :  { %v3273_v35 = vpop.permute.xlu0 %3272 }
0x222e   :  { %v3277_v6 = vmul.f32 %v3273_v35, %v3267_v18  ;;  %8221 = vst [vmem:[#allocation51_spill] sm:$0xff] %v7619_v1 }
0x2230   :  { %v7621_v34 = vadd.f32 %v3279_v50, %v3277_v6 }
0x2232   :  { %8222 = vst [vmem:[#allocation52_spill] sm:$0xff] %v7621_v34  ;;  %v3282_v43 = vpack.c.bf16 %v7621_v34, %v7619_v1 }
0x2234   :  { %3333 = vrot.lane.b32.xlu1 %v3282_v43, %s6563_s14 }
0x22a6   :  { %v3334_v28 = vpop.permute.xlu1 %3333 }
0x22a7   :  { %5508 = vmatmul.mubr.msk.bf16.vlgmr.msra.gmra.mxu0 %vm264_vm1, %v3334_v28 }
0x22a8   :  { %5520 = vmatpush3.bf16.msra.mxu0 %v5654_v8  ;;  %5523 = vmatprep.mubr.msk.bf16.mxu0 %vm6560_vm0, %v8196_v36 }
0x22a9   :  { %5521 = vmatprep.subr.bf16.mxu0 %v8196_v36 }
0x22ac   :  { %5522 = vmatpush3.bf16.msra.mxu0 %v5655_v48 }
0x22ad   :  { %5535 = vmatprep.subr.bf16.mxu0 %v8196_v36 }
0x22af   :  { %5524 = vmatmul.mubr.msk.bf16.vlgmr.msra.gmra.mxu0 %vm264_vm1, %v3334_v28 }
0x22b0   :  { %5539 = vmatprep.mubr.msk.bf16.mxu0 %vm6560_vm0, %v8196_v36 }
0x2367   :  { %v3384_v20 = vpop.f32.mrf.mxu0 }
0x2368   :  { %v3385_v39 = vadd.f32 %v7448_v57, %v3384_v20 }
0x2369   :  { %v5509_v3 = vpop.f32.mrf.mxu0 }
0x236a   :  { %v3395_v33 = vadd.f32 %v3385_v39, %v7457_v54  ;;  %v3391_v42 = vadd.f32 %v3385_v39, %v7455_v13  ;;  %v3397_v0 = vadd.f32 %v3385_v39, %v7465_v58  ;;  %v3393_v21 = vadd.f32 %v3385_v39, %v7453_v5  ;;  %v8225_v13 = vld [vmem:[#allocation39_spill] sm:$0xff] }
0x236b   :  { %v3387_v32 = vpop.f32.mrf.mxu0  ;;  %v3399_v49 = vadd.f32 %v3385_v39, %v8223_v40  ;;  %v3401_v54 = vadd.f32 %v3385_v39, %v8225_v13  ;;  %v3405_v16 = vadd.f32 %v3385_v39, %v8232_v10 }
0x236c   :  { %v3388_v11 = vadd.f32 %v7448_v57, %v3387_v32  ;;  %6046 = vtanh.f32 %v3395_v33  ;;  %v8227_v57 = vld [vmem:[#allocation44_spill] sm:$0xff] }
0x236d   :  { %v5510_v45 = vpop.f32.mrf.mxu0  ;;  %6048 = vtanh.f32 %v3391_v42  ;;  %v3403_v25 = vadd.f32 %v3385_v39, %v8227_v57  ;;  %v8235_v39 = vld [vmem:[#allocation50_spill] sm:$0xff] }
0x236e   :  { %6050 = vtanh.f32 %v3397_v0  ;;  %v3394_v12 = vadd.f32 %v3388_v11, %v8224_v22  ;;  %v3396_v5 = vadd.f32 %v3388_v11, %v8226_v44  ;;  %v3398_v38 = vadd.f32 %v3388_v11, %v8228_v23 }
0x236f   :  { %v7642_v56 = vpop.f32.mrf.mxu0  ;;  %6052 = vtanh.f32 %v3393_v21  ;;  %v3392_v19 = vadd.f32 %v3388_v11, %v8229_v46  ;;  %v3400_v24 = vadd.f32 %v3388_v11, %v8230_v15  ;;  %v3402_v61 = vadd.f32 %v3388_v11, %v8233_v7 }
0x2370   :  { %6054 = vtanh.f32 %v3399_v49  ;;  %v3404_v50 = vadd.f32 %v3388_v11, %v8234_v53  ;;  %v3406_v3 = vadd.f32 %v3388_v11, %v8235_v39 }
0x2371   :  { %v5525_v58 = vpop.f32.mrf.mxu0  ;;  %6056 = vtanh.f32 %v3394_v12 }
0x2372   :  { %6058 = vtanh.f32 %v3401_v54 }
0x2373   :  { %v7646_v59 = vpop.f32.mrf.mxu0  ;;  %6060 = vtanh.f32 %v3396_v5 }
0x2374   :  { %6062 = vtanh.f32 %v3403_v25 }
0x2375   :  { %v5526_v60 = vpop.f32.mrf.mxu0  ;;  %6064 = vtanh.f32 %v3398_v38 }
0x2376   :  { %6066 = vtanh.f32 %v3392_v19 }
0x2377   :  { %6068 = vtanh.f32 %v3400_v24  ;;  %v8236_v24 = vld [vmem:[#allocation40_spill] sm:$0xff] }
0x2378   :  { %6070 = vtanh.f32 %v3405_v16 }
0x2379   :  { %v6047_v47 = vpop.eup %6046  ;;  %6072 = vtanh.f32 %v3402_v61 }
0x237a   :  { %v6049_v41 = vpop.eup %6048  ;;  %v3427_v26 = vmul.f32 %v8231_v17, %v6047_v47  ;;  %6074 = vtanh.f32 %v3404_v50 }
0x237b   :  { %v6051_v55 = vpop.eup %6050  ;;  %v3423_v27 = vmul.f32 %v8231_v17, %v6049_v41  ;;  %6076 = vtanh.f32 %v3406_v3  ;;  %v3750_v41 = vadd.f32 %v7642_v56, %v8236_v24 }
0x237c   :  { %v6053_v2 = vpop.eup %6052  ;;  %v3451_v62 = vsel %vm264_vm1, %v3427_v26, 0.0  ;;  %v3429_v51 = vmul.f32 %v8231_v17, %v6051_v55  ;;  %v3751_v26 = vadd.f32 %v7646_v59, %v8236_v24  ;;  %v5656_v55 = vld [vmem:[#allocation21 + $0x8] sm:$0xff]  }
0x237d   :  { %v6055_v4 = vpop.eup %6054  ;;  %3452 = vadd.xlane.f32.xlu1 %v3451_v62  ;;  %v3439_v52 = vsel %vm264_vm1, %v3423_v27, 0.0  ;;  %v3425_v63 = vmul.f32 %v8231_v17, %v6053_v2  ;;  %5512 = vmatpush3.bf16.msra.mxu1 %v5656_v55  ;;  %v5657_v27 = vld [vmem:[#allocation21] sm:$0xff]  }
0x237e   :  { %v6057_v31 = vpop.eup %6056  ;;  %3440 = vadd.xlane.f32.xlu0 %v3439_v52  ;;  %v3457_v37 = vsel %vm264_vm1, %v3429_v51, 0.0  ;;  %v3431_v9 = vmul.f32 %v8231_v17, %v6055_v4  ;;  %5513 = vmatprep.subr.bf16.mxu1 %v8196_v36 }
0x237f   :  { %v6059_v14 = vpop.eup %6058  ;;  %v3445_v18 = vsel %vm264_vm1, %v3425_v63, 0.0  ;;  %v3426_v35 = vmul.f32 %v8231_v17, %v6057_v31 }
0x2380   :  { %v6061_v6 = vpop.eup %6060  ;;  %v3463_v43 = vsel %vm264_vm1, %v3431_v9, 0.0  ;;  %v3433_v8 = vmul.f32 %v8231_v17, %v6059_v14 }
0x2381   :  { %3458 = vadd.xlane.f32.xlu1 %v3457_v37  ;;  %v6063_v28 = vpop.eup %6062  ;;  %v3448_v48 = vsel %vm264_vm1, %v3426_v35, 0.0  ;;  %v3428_v20 = vmul.f32 %v8231_v17, %v6061_v6  ;;  %5514 = vmatpush3.bf16.msra.mxu1 %v5657_v27 }
0x2382   :  { %3446 = vadd.xlane.f32.xlu0 %v3445_v18  ;;  %v6065_v33 = vpop.eup %6064  ;;  %v3469_v42 = vsel %vm264_vm1, %v3433_v8, 0.0  ;;  %v3435_v0 = vmul.f32 %v8231_v17, %v6063_v28  ;;  %5527 = vmatprep.subr.bf16.mxu1 %v8196_v36 }
0x2383   :  { %v6067_v32 = vpop.eup %6066  ;;  %v3454_v21 = vsel %vm264_vm1, %v3428_v20, 0.0  ;;  %v3430_v40 = vmul.f32 %v8231_v17, %v6065_v33 }
0x2384   :  { %v6069_v49 = vpop.eup %6068  ;;  %v3475_v45 = vsel %vm264_vm1, %v3435_v0, 0.0  ;;  %v3424_v22 = vmul.f32 %v8231_v17, %v6067_v32 }
0x2385   :  { %3464 = vadd.xlane.f32.xlu1 %v3463_v43  ;;  %v6071_v11 = vpop.eup %6070  ;;  %v3460_v12 = vsel %vm264_vm1, %v3430_v40, 0.0  ;;  %v3432_v13 = vmul.f32 %v8231_v17, %v6069_v49 }
0x2386   :  { %3449 = vadd.xlane.f32.xlu0 %v3448_v48  ;;  %v6073_v54 = vpop.eup %6072  ;;  %v3442_v58 = vsel %vm264_vm1, %v3424_v22, 0.0  ;;  %v3437_v44 = vmul.f32 %v8231_v17, %v6071_v11 }
0x2387   :  { %v3466_v5 = vsel %vm264_vm1, %v3432_v13, 0.0  ;;  %v3434_v57 = vmul.f32 %v8231_v17, %v6073_v54  ;;  %v6075_v25 = vpop.eup %6074 }
0x2388   :  { %v3481_v60 = vsel %vm264_vm1, %v3437_v44, 0.0  ;;  %v3436_v38 = vmul.f32 %v8231_v17, %v6075_v25  ;;  %v6077_v46 = vpop.eup %6076 }
0x2389   :  { %3470 = vadd.xlane.f32.xlu1 %v3469_v42  ;;  %v3472_v23 = vsel %vm264_vm1, %v3434_v57, 0.0  ;;  %v3438_v47 = vmul.f32 %v8231_v17, %v6077_v46 }
0x238a   :  { %3455 = vadd.xlane.f32.xlu0 %v3454_v21  ;;  %v3478_v19 = vsel %vm264_vm1, %v3436_v38, 0.0 }
0x238b   :  { %v3484_v15 = vsel %vm264_vm1, %v3438_v47, 0.0 }
0x238d   :  { %3476 = vadd.xlane.f32.xlu1 %v3475_v45 }
0x238e   :  { %3461 = vadd.xlane.f32.xlu0 %v3460_v12 }
0x2391   :  { %3443 = vadd.xlane.f32.xlu1 %v3442_v58 }
0x2392   :  { %3467 = vadd.xlane.f32.xlu0 %v3466_v5 }
0x2395   :  { %3482 = vadd.xlane.f32.xlu1 %v3481_v60 }
0x2396   :  { %3473 = vadd.xlane.f32.xlu0 %v3472_v23 }
0x239a   :  { %3479 = vadd.xlane.f32.xlu0 %v3478_v19 }
0x239e   :  { %3485 = vadd.xlane.f32.xlu0 %v3484_v15 }
0x23a6   :  { %3754 = vrot.lane.b32.xlu1 %v3750_v41, %s6549_s22 }
0x23b4   :  { %3756 = vrot.lane.b32.xlu0 %v3751_v26, %s6549_s22 }
0x2406   :  { %v3453_v17 = vpop.xlane.xlu1 %3452 }
0x2407   :  { %v3441_v2 = vpop.xlane.xlu0 %3440 }
0x2408   :  { %v3487_v31 = vmax.f32 %v3441_v2, %v3453_v17 }
0x240a   :  { %v3459_v62 = vpop.xlane.xlu1 %3458 }
0x240b   :  { %v3447_v51 = vpop.xlane.xlu0 %3446 }
0x240c   :  { %v3488_v37 = vmax.f32 %v3447_v51, %v3459_v62 }
0x240e   :  { %v3465_v10 = vpop.xlane.xlu1 %3464 }
0x240f   :  { %v3450_v16 = vpop.xlane.xlu0 %3449  ;;  %v3489_v14 = vmax.f32 %v3487_v31, %v3465_v10 }
0x2412   :  { %v3471_v4 = vpop.xlane.xlu1 %3470 }
0x2413   :  { %v3456_v52 = vpop.xlane.xlu0 %3455  ;;  %v3490_v18 = vmax.f32 %v3488_v37, %v3471_v4  ;;  %v7696_v37 = vld [vmem:[#allocation3] sm:$0xff] }
0x2416   :  { %v3477_v63 = vpop.xlane.xlu1 %3476 }
0x2417   :  { %v3462_v7 = vpop.xlane.xlu0 %3461  ;;  %v3491_v53 = vmax.f32 %v3489_v14, %v3477_v63 }
0x2418   :  { %v3495_v3 = vmax.f32 %v3450_v16, %v3462_v7 }
0x241a   :  { %v3444_v61 = vpop.xlane.xlu1 %3443 }
0x241b   :  { %v3468_v9 = vpop.xlane.xlu0 %3467  ;;  %v3494_v8 = vmax.f32 %v3444_v61, %v3456_v52 }
0x241d   :  { %v3496_v49 = vmax.f32 %v3494_v8, %v3468_v9  ;;  %v7702_v8 = vld [vmem:[#allocation3 + $0x8] sm:$0xff] }
0x241e   :  { %v3483_v35 = vpop.xlane.xlu1 %3482 }
0x241f   :  { %v3474_v50 = vpop.xlane.xlu0 %3473  ;;  %v3492_v6 = vmax.f32 %v3490_v18, %v3483_v35 }
0x2420   :  { %v3497_v32 = vmax.f32 %v3495_v3, %v3474_v50 }
0x2421   :  { %v3493_v43 = vmax.f32 %v3491_v53, %v3492_v6 }
0x2423   :  { %v3501_v28 = vsub.f32 %v3441_v2, %v3493_v43  ;;  %v3503_v48 = vsub.f32 %v3447_v51, %v3493_v43  ;;  %v3505_v20 = vsub.f32 %v3453_v17, %v3493_v43  ;;  %v3480_v39 = vpop.xlane.xlu0 %3479  ;;  %v3507_v33 = vsub.f32 %v3459_v62, %v3493_v43 }
0x2424   :  { %v3509_v21 = vsub.f32 %v3465_v10, %v3493_v43  ;;  %v3511_v45 = vsub.f32 %v3471_v4, %v3493_v43  ;;  %v3498_v12 = vmax.f32 %v3496_v49, %v3480_v39  ;;  %v3513_v60 = vsub.f32 %v3477_v63, %v3493_v43 }
0x2425   :  { %v3517_v42 = vmul.f32 1.442695, %v3501_v28  ;;  %v3521_v0 = vmul.f32 1.442695, %v3503_v48  ;;  %v3525_v40 = vmul.f32 1.442695, %v3505_v20  ;;  %v3515_v15 = vsub.f32 %v3483_v35, %v3493_v43 }
0x2426   :  { %v3529_v11 = vmul.f32 1.442695, %v3507_v33  ;;  %v3533_v54 = vmul.f32 1.442695, %v3509_v21  ;;  %v3537_v44 = vmul.f32 1.442695, %v3511_v45 }
0x2427   :  { %6078 = vpow2.f32 %v3517_v42  ;;  %v3486_v22 = vpop.xlane.xlu0 %3485  ;;  %v3541_v26 = vmul.f32 1.442695, %v3513_v60  ;;  %v3545_v62 = vmul.f32 1.442695, %v3515_v15  ;;  %v7704_v48 = vld [vmem:[#allocation3 + $0x18] sm:$0xff]  ;;  %v7711_v21 = vld [vmem:[#allocation3 + $0x28] sm:$0xff] }
0x2428   :  { %6080 = vpow2.f32 %v3521_v0  ;;  %v3499_v13 = vmax.f32 %v3497_v32, %v3486_v22  ;;  %v7709_v32 = vld [vmem:[#allocation3 + $0x20] sm:$0xff]  ;;  %v7720_v60 = vld [vmem:[#allocation3 + $0x38] sm:$0xff] }
0x2429   :  { %6082 = vpow2.f32 %v3525_v40 }
0x242a   :  { %v3500_v58 = vmax.f32 %v3498_v12, %v3499_v13  ;;  %6084 = vpow2.f32 %v3529_v11 }
0x242b   :  { %6086 = vpow2.f32 %v3533_v54 }
0x242c   :  { %v3502_v5 = vsub.f32 %v3444_v61, %v3500_v58  ;;  %v3504_v57 = vsub.f32 %v3450_v16, %v3500_v58  ;;  %v3506_v25 = vsub.f32 %v3456_v52, %v3500_v58  ;;  %v3508_v23 = vsub.f32 %v3462_v7, %v3500_v58 }
0x242d   :  { %6088 = vpow2.f32 %v3537_v44  ;;  %v3510_v46 = vsub.f32 %v3468_v9, %v3500_v58  ;;  %v3512_v55 = vsub.f32 %v3474_v50, %v3500_v58  ;;  %v3514_v27 = vsub.f32 %v3480_v39, %v3500_v58  ;;  %v7698_v9 = vld [vmem:[#allocation3 + $0x10] sm:$0xff] }
0x242e   :  { %v3519_v38 = vmul.f32 1.442695, %v3502_v5  ;;  %v3523_v19 = vmul.f32 1.442695, %v3504_v57  ;;  %v3527_v47 = vmul.f32 1.442695, %v3506_v25  ;;  %v3516_v10 = vsub.f32 %v3486_v22, %v3500_v58 }
0x242f   :  { %v3531_v41 = vmul.f32 1.442695, %v3508_v23  ;;  %v3535_v17 = vmul.f32 1.442695, %v3510_v46  ;;  %v3539_v16 = vmul.f32 1.442695, %v3512_v55 }
0x2430   :  { %6090 = vpow2.f32 %v3519_v38  ;;  %v3543_v63 = vmul.f32 1.442695, %v3514_v27  ;;  %v3547_v31 = vmul.f32 1.442695, %v3516_v10  ;;  %v7718_v25 = vld [vmem:[#allocation3 + $0x30] sm:$0xff] }
0x2431   :  { %6092 = vpow2.f32 %v3523_v19 }
0x2432   :  { %6094 = vpow2.f32 %v3527_v47 }
0x2433   :  { %6096 = vpow2.f32 %v3531_v41 }
0x2434   :  { %v6079_v2 = vpop.eup %6078  ;;  %6098 = vpow2.f32 %v3541_v26 }
0x2435   :  { %v6081_v51 = vpop.eup %6080  ;;  %6100 = vpow2.f32 %v3535_v17  ;;  %v3549_v18 = vmul.f32 %v6079_v2, %v7696_v37 }
0x2436   :  { %v3595_v4 = vadd.f32 %v6081_v51, %v6079_v2  ;;  %v6083_v52 = vpop.eup %6082  ;;  %6102 = vpow2.f32 %v3545_v62  ;;  %v3551_v35 = vmul.f32 %v6081_v51, %v7698_v9  ;;  %v7726_v62 = vld [vmem:[#allocation3 + $0x40] sm:$0xff]  ;;  %v7728_v51 = vld [vmem:[#allocation3 + $0x48] sm:$0xff] }
0x2437   :  { %v6085_v61 = vpop.eup %6084  ;;  %6104 = vpow2.f32 %v3539_v16  ;;  %v3565_v39 = vsel %vm264_vm1, %v3549_v18, 0.0  ;;  %v3553_v49 = vmul.f32 %v6083_v52, %v7709_v32 }
0x2438   :  { %v3596_v7 = vadd.f32 %v6083_v52, %v3595_v4  ;;  %v6087_v53 = vpop.eup %6086  ;;  %6106 = vpow2.f32 %v3543_v63  ;;  %v3566_v3 = vsel %vm264_vm1, %v3551_v35, 0.0  ;;  %v3555_v38 = vmul.f32 %v6085_v61, %v7718_v25  ;;  %v7734_v35 = vld [vmem:[#allocation3 + $0x50] sm:$0xff] }
0x2439   :  { %6108 = vpow2.f32 %v3547_v31  ;;  %v3567_v13 = vadd.f32 %v3566_v3, %v3565_v39  ;;  %v3568_v19 = vsel %vm264_vm1, %v3553_v49, 0.0  ;;  %v3557_v16 = vmul.f32 %v6087_v53, %v7726_v62 }
0x243a   :  { %v3597_v14 = vadd.f32 %v6085_v61, %v3596_v7  ;;  %v6089_v50 = vpop.eup %6088  ;;  %v3570_v52 = vsel %vm264_vm1, %v3555_v38, 0.0 }
0x243b   :  { %v3569_v26 = vadd.f32 %v3568_v19, %v3567_v13 }
0x243c   :  { %v3598_v6 = vadd.f32 %v6087_v53, %v3597_v14 }
0x243d   :  { %v6091_v43 = vpop.eup %6090  ;;  %v3571_v61 = vadd.f32 %v3570_v52, %v3569_v26  ;;  %v3733_v52 = vld [vmem:[#allocation5 + $0x38] sm:$0xff] }
0x243e   :  { %v6093_v28 = vpop.eup %6092  ;;  %v3550_v20 = vmul.f32 %v6091_v43, %v7702_v8  ;;  %v3599_v42 = vadd.f32 %v6089_v50, %v3598_v6  ;;  %v7736_v6 = vld [vmem:[#allocation3 + $0x58] sm:$0xff] }
0x243f   :  { %v6095_v33 = vpop.eup %6094  ;;  %v3602_v0 = vadd.f32 %v6093_v28, %v6091_v43  ;;  %v3552_v40 = vmul.f32 %v6093_v28, %v7704_v48  ;;  %v3559_v43 = vmul.f32 %v6089_v50, %v7734_v35  ;;  %v3572_v28 = vsel %vm264_vm1, %v3557_v16, 0.0 }
0x2440   :  { %v3554_v45 = vmul.f32 %v6095_v33, %v7711_v21  ;;  %v3580_v22 = vsel %vm264_vm1, %v3550_v20, 0.0  ;;  %v6097_v11 = vpop.eup %6096  ;;  %v3573_v39 = vadd.f32 %v3572_v28, %v3571_v61 }
0x2441   :  { %v3603_v12 = vadd.f32 %v6095_v33, %v3602_v0  ;;  %v3581_v54 = vsel %vm264_vm1, %v3552_v40, 0.0  ;;  %v6099_v58 = vpop.eup %6098  ;;  %v3556_v46 = vmul.f32 %v6097_v11, %v7720_v60  ;;  %v7742_v33 = vld [vmem:[#allocation3 + $0x60] sm:$0xff]  ;;  %v3574_v49 = vsel %vm264_vm1, %v3559_v43, 0.0 }
0x2442   :  { %v3582_v44 = vadd.f32 %v3581_v54, %v3580_v22  ;;  %v3600_v5 = vadd.f32 %v6099_v58, %v3599_v42  ;;  %v6101_v23 = vpop.eup %6100  ;;  %v3583_v47 = vsel %vm264_vm1, %v3554_v45, 0.0  ;;  %v7744_v42 = vld [vmem:[#allocation3 + $0x68] sm:$0xff]  ;;  %v3561_v0 = vmul.f32 %v6099_v58, %v7742_v33 }
0x2443   :  { %v3604_v57 = vadd.f32 %v6097_v11, %v3603_v12  ;;  %v6103_v15 = vpop.eup %6102  ;;  %v3558_v4 = vmul.f32 %v6101_v23, %v7728_v51  ;;  %v3585_v63 = vsel %vm264_vm1, %v3556_v46, 0.0  ;;  %v3575_v45 = vadd.f32 %v3574_v49, %v3573_v39  ;;  %v7750_v11 = vld [vmem:[#allocation3 + $0x70] sm:$0xff]  ;;  %v7752_v12 = vld [vmem:[#allocation3 + $0x78] sm:$0xff]  ;;  %v3755_v39 = vpop.permute.xlu1 %3754 }
0x2444   :  { %v3584_v55 = vadd.f32 %v3583_v47, %v3582_v44  ;;  %v6105_v27 = vpop.eup %6104  ;;  %v3601_v17 = vadd.f32 %v6103_v15, %v3600_v5  ;;  %v3563_v13 = vmul.f32 %v6103_v15, %v7750_v11  ;;  %v3576_v44 = vsel %vm264_vm1, %v3561_v0, 0.0  ;;  %v3757_v0 = vpop.permute.xlu0 %3756 }
0x2445   :  { %v3605_v41 = vadd.f32 %v6101_v23, %v3604_v57  ;;  %v6107_v10 = vpop.eup %6106  ;;  %v3560_v53 = vmul.f32 %v6105_v27, %v7736_v6  ;;  %v3587_v20 = vsel %vm264_vm1, %v3558_v4, 0.0  ;;  %v3577_v5 = vadd.f32 %v3576_v44, %v3575_v45 }
0x2446   :  { %v3586_v31 = vadd.f32 %v3585_v63, %v3584_v55  ;;  %v6109_v14 = vpop.eup %6108  ;;  %6110 = vrcp.f32 %v3601_v17  ;;  %v3562_v40 = vmul.f32 %v6107_v10, %v7744_v42  ;;  %v3578_v38 = vsel %vm264_vm1, %v3563_v13, 0.0  ;;  %v3732_v17 = vld [vmem:[#allocation5 + $0x30] sm:$0xff] }
0x2447   :  { %v3606_v2 = vadd.f32 %v6105_v27, %v3605_v41  ;;  %v3589_v50 = vsel %vm264_vm1, %v3560_v53, 0.0  ;;  %v3564_v54 = vmul.f32 %v6109_v14, %v7752_v12  ;;  %v3579_v19 = vadd.f32 %v3578_v38, %v3577_v5 }
0x2448   :  { %v3588_v3 = vadd.f32 %v3587_v20, %v3586_v31  ;;  %v3591_v58 = vsel %vm264_vm1, %v3562_v40, 0.0 }
0x2449   :  { %v3607_v7 = vadd.f32 %v6107_v10, %v3606_v2  ;;  %v3593_v46 = vsel %vm264_vm1, %v3564_v54, 0.0  ;;  %v5659_v54 = vld [vmem:[#allocation15] sm:$0xff]  }
0x244a   :  { %v3590_v22 = vadd.f32 %v3589_v50, %v3588_v3 }
0x244b   :  { %v3608_v18 = vadd.f32 %v6109_v14, %v3607_v7 }
0x244c   :  { %v3592_v57 = vadd.f32 %v3591_v58, %v3590_v22  ;;  %v5658_v22 = vld [vmem:[#allocation15 + $0x8] sm:$0xff]  }
0x244d   :  { %6112 = vrcp.f32 %v3608_v18 }
0x244e   :  { %v3594_v47 = vadd.f32 %v3593_v46, %v3592_v57 }
0x2453   :  { %v6111_v23 = vpop.eup %6110 }
0x2454   :  { %v3610_v26 = vmul.f32 %v6111_v23, %v3579_v19 }
0x245a   :  { %v6113_v41 = vpop.eup %6112 }
0x245b   :  { %v3612_v55 = vmul.f32 %v6113_v41, %v3594_v47 }
0x245d   :  { %v3617_v27 = vpack.c.bf16 %v3612_v55, %v3610_v26 }
0x245f   :  { %5516 = vmatmul.mubr.msk.bf16.vlgmr.msra.gmra.mxu1 %vm264_vm1, %v3617_v27  ;;  %v5660_v27 = vld [vmem:[#allocation22 + $0x8] sm:$0xff]  }
0x2460   :  { %5531 = vmatprep.mubr.msk.bf16.mxu1 %vm6560_vm0, %v8196_v36  ;;  %5528 = vmatpush3.bf16.msra.mxu1 %v5658_v22 }
0x2461   :  { %5529 = vmatprep.subr.bf16.mxu1 %v8196_v36 }
0x2464   :  { %5530 = vmatpush3.bf16.msra.mxu1 %v5659_v54  ;;  %v7835_v54 = vld [vmem:[#allocation4 + $0x50] sm:$0xff] }
0x2465   :  { %5543 = vmatprep.subr.bf16.mxu1 %v8196_v36  ;;  %8241 = vst [vmem:[#allocation44_spill] sm:$0xff] %v7835_v54 }
0x251f   :  { %v3667_v15 = vpop.f32.mrf.mxu1 }
0x2520   :  { %v3734_v2 = vadd.f32 %v3732_v17, %v3667_v15  ;;  %v5661_v17 = vld [vmem:[#allocation22] sm:$0xff]  }
0x2521   :  { %v5517_v10 = vpop.f32.mrf.mxu1 }
0x2522   :  { %v3736_v16 = vadd.f32 %v3734_v2, %v7642_v56  ;;  %v7791_v10 = vld [vmem:[%s8125_s6] ss:$0 sm:$0xff] }
0x2523   :  { %v3670_v4 = vpop.f32.mrf.mxu1 }
0x2524   :  { %v5140_v63 = vmul.f32 -1.442695, %v3736_v16  ;;  %v3735_v7 = vadd.f32 %v3733_v52, %v3670_v4  ;;  %v7796_v52 = vld [vmem:[#allocation4 + $0x10] sm:$0xff] }
0x2525   :  { %v5518_v61 = vpop.f32.mrf.mxu1 }
0x2526   :  { %6114 = vpow2.f32 %v5140_v63  ;;  %v3737_v31 = vadd.f32 %v3735_v7, %v7646_v59  ;;  %v7798_v63 = vld [vmem:[#allocation4] sm:$0xff] }
0x2528   :  { %v5141_v14 = vmul.f32 -1.442695, %v3737_v31 }
0x252a   :  { %6116 = vpow2.f32 %v5141_v14 }
0x2533   :  { %v6115_v18 = vpop.eup %6114 }
0x2534   :  { %v3744_v43 = vadd.f32 1.0, %v6115_v18  ;;  %v7808_v18 = vld [vmem:[#allocation4 + $0x30] sm:$0xff] }
0x2536   :  { %6118 = vrcp.f32 %v3744_v43 }
0x2537   :  { %v6117_v53 = vpop.eup %6116 }
0x2538   :  { %v3745_v28 = vadd.f32 1.0, %v6117_v53 }
0x253a   :  { %6120 = vrcp.f32 %v3745_v28 }
0x2543   :  { %v6119_v20 = vpop.eup %6118 }
0x2544   :  { %v3760_v3 = vmul.f32 %v6119_v20, %v3755_v39  ;;  %v3774_v5 = vsub.f32 1.0, %v6119_v20  ;;  %v3786_v46 = vmul.f32 %v6119_v20, %v7619_v1  ;;  %v7815_v39 = vld [vmem:[#allocation4 + $0x18] sm:$0xff] }
0x2545   :  { %8237 = vst [vmem:[#allocation37_spill] sm:$0xff] %v7815_v39 }
0x2546   :  { %3764 = vrot.lane.b32.xlu1 %v3760_v3, %s6549_s22  ;;  %v7817_v3 = vld [vmem:[#allocation4 + $0x28] sm:$0xff] }
0x2547   :  { %v6121_v56 = vpop.eup %6120  ;;  %8238 = vst [vmem:[#allocation34_spill] sm:$0xff] %v7817_v3 }
0x2548   :  { %v3761_v40 = vmul.f32 %v6121_v56, %v3757_v0  ;;  %v3775_v23 = vsub.f32 1.0, %v6121_v56  ;;  %v3787_v19 = vmul.f32 %v6121_v56, %v7621_v34 }
0x254a   :  { %3766 = vrot.lane.b32.xlu1 %v3761_v40, %s6549_s22 }
0x25b8   :  { %v3765_v49 = vpop.permute.xlu1 %3764 }
0x25b9   :  { %v3770_v59 = vadd.f32 %v3765_v49, %v3734_v2  ;;  %v7825_v49 = vld [vmem:[#allocation4 + $0x40] sm:$0xff] }
0x25ba   :  { %8239 = vst [vmem:[#allocation39_spill] sm:$0xff] %v7825_v49 }
0x25bb   :  { %6122 = vtanh.f32 %v3770_v59 }
0x25bc   :  { %v3767_v50 = vpop.permute.xlu1 %3766 }
0x25bd   :  { %v3771_v45 = vadd.f32 %v3767_v50, %v3735_v7  ;;  %v7800_v7 = vld [vmem:[#allocation4 + $0x20] sm:$0xff]  ;;  %v7829_v50 = vld [vmem:[#allocation4 + $0x38] sm:$0xff] }
0x25be   :  { %8240 = vst [vmem:[#allocation36_spill] sm:$0xff] %v7829_v50 }
0x25bf   :  { %6124 = vtanh.f32 %v3771_v45 }
0x25c8   :  { %v6123_v13 = vpop.eup %6122 }
0x25c9   :  { %3778 = vrot.lane.b32.xlu0 %v6123_v13, %s6563_s14 }
0x25cc   :  { %v6125_v44 = vpop.eup %6124 }
0x25cd   :  { %3780 = vrot.lane.b32.xlu1 %v6125_v44, %s6563_s14 }
0x263b   :  { %v3779_v58 = vpop.permute.xlu0 %3778 }
0x263c   :  { %v3784_v57 = vmul.f32 %v3779_v58, %v3774_v5  ;;  %v7839_v58 = vld [vmem:[#allocation4 + $0x48] sm:$0xff] }
0x263d   :  { %8242 = vst [vmem:[#allocation38_spill] sm:$0xff] %v7839_v58 }
0x263e   :  { %v7773_v41 = vadd.f32 %v3786_v46, %v3784_v57  ;;  %v7847_v46 = vld [vmem:[#allocation4 + $0x58] sm:$0xff] }
0x263f   :  { %v3781_v38 = vpop.permute.xlu1 %3780  ;;  %8244 = vst [vmem:[#allocation43_spill] sm:$0xff] %v7847_v46 }
0x2640   :  { %v3785_v47 = vmul.f32 %v3781_v38, %v3775_v23  ;;  %v7843_v23 = vld [vmem:[#allocation4 + $0x60] sm:$0xff] }
0x2641   :  { %8243 = vst [vmem:[#allocation47_spill] sm:$0xff] %v7843_v23 }
0x2642   :  { %v7775_v26 = vadd.f32 %v3787_v19, %v3785_v47 }
0x2644   :  { %v3790_v55 = vpack.c.bf16 %v7775_v26, %v7773_v41 }
0x2646   :  { %3841 = vrot.lane.b32.xlu0 %v3790_v55, %s6563_s14 }
0x26b8   :  { %v3842_v15 = vpop.permute.xlu0 %3841 }
0x26b9   :  { %5532 = vmatmul.mubr.msk.bf16.vlgmr.msra.gmra.mxu1 %vm264_vm1, %v3842_v15 }
0x26ba   :  { %5544 = vmatpush3.bf16.msra.mxu1 %v5660_v27  ;;  %5547 = vmatprep.mubr.msk.bf16.mxu1 %vm6560_vm0, %v8196_v36  ;;  %v7851_v27 = vld [vmem:[#allocation19] ss:$0 sm:$0xff] }
0x26bb   :  { %5545 = vmatprep.subr.bf16.mxu1 %v8196_v36  ;;  %8245 = vst [vmem:[#allocation46_spill] sm:$0xff] %v7851_v27 }
0x26be   :  { %5546 = vmatpush3.bf16.msra.mxu1 %v5661_v17 }
0x26bf   :  { %5559 = vmatprep.subr.bf16.mxu1 %v8196_v36 }
0x26c1   :  { %5548 = vmatmul.mubr.msk.bf16.vlgmr.msra.gmra.mxu1 %vm264_vm1, %v3842_v15 }
0x26c2   :  { %5563 = vmatprep.mubr.msk.bf16.mxu1 %vm6560_vm0, %v8196_v36 }
0x2779   :  { %v3892_v2 = vpop.f32.mrf.mxu1 }
0x277a   :  { %v7794_v16 = vadd.f32 %v7791_v10, %v3892_v2 }
0x277b   :  { %v5533_v4 = vpop.f32.mrf.mxu1 }
0x277c   :  { %v3901_v61 = vadd.f32 %v7794_v16, %v7796_v52  ;;  %v3899_v31 = vadd.f32 %v7794_v16, %v7798_v63  ;;  %v3903_v14 = vadd.f32 %v7794_v16, %v7800_v7  ;;  %v3905_v53 = vadd.f32 %v7794_v16, %v7808_v18  ;;  %v7855_v4 = vld [vmem:[#allocation4 + $0x8] sm:$0xff] }
0x277d   :  { %v3895_v43 = vpop.f32.mrf.mxu1  ;;  %v3907_v59 = vadd.f32 %v7794_v16, %v7825_v49  ;;  %v3909_v44 = vadd.f32 %v7794_v16, %v7835_v54  ;;  %v3911_v38 = vadd.f32 %v7794_v16, %v7843_v23  ;;  %8246 = vst [vmem:[#allocation49_spill] sm:$0xff] %v7855_v4 }
0x277e   :  { %v7813_v28 = vadd.f32 %v7791_v10, %v3895_v43  ;;  %6126 = vtanh.f32 %v3901_v61  ;;  %v7859_v43 = vld [vmem:[#allocation4 + $0x68] sm:$0xff] }
0x277f   :  { %v5534_v20 = vpop.f32.mrf.mxu1  ;;  %6128 = vtanh.f32 %v3899_v31  ;;  %8247 = vst [vmem:[#allocation45_spill] sm:$0xff] %v7859_v43 }
0x2780   :  { %6130 = vtanh.f32 %v3903_v14  ;;  %v3902_v56 = vadd.f32 %v7813_v28, %v7815_v39  ;;  %v3904_v0 = vadd.f32 %v7813_v28, %v7817_v3  ;;  %v3906_v22 = vadd.f32 %v7813_v28, %v7829_v50 }
0x2781   :  { %v7823_v40 = vpop.f32.mrf.mxu1  ;;  %6132 = vtanh.f32 %v3905_v53  ;;  %v3908_v57 = vadd.f32 %v7813_v28, %v7839_v58  ;;  %v3910_v47 = vadd.f32 %v7813_v28, %v7847_v46  ;;  %v3900_v53 = vadd.f32 %v7813_v28, %v7855_v4 }
0x2782   :  { %6134 = vtanh.f32 %v3902_v56 }
0x2783   :  { %v5549_v45 = vpop.f32.mrf.mxu1  ;;  %6136 = vtanh.f32 %v3904_v0  ;;  %v3912_v0 = vadd.f32 %v7813_v28, %v7859_v43 }
0x2784   :  { %6138 = vtanh.f32 %v3907_v59 }
0x2785   :  { %v7833_v13 = vpop.f32.mrf.mxu1  ;;  %6140 = vtanh.f32 %v3906_v22  ;;  %v7867_v22 = vld [vmem:[#allocation4 + $0x70] sm:$0xff] }
0x2786   :  { %6142 = vtanh.f32 %v3909_v44  ;;  %8248 = vst [vmem:[#allocation48_spill] sm:$0xff] %v7867_v22  ;;  %v3913_v44 = vadd.f32 %v7794_v16, %v7867_v22 }
0x2787   :  { %v5550_v5 = vpop.f32.mrf.mxu1  ;;  %6144 = vtanh.f32 %v3908_v57 }
0x2788   :  { %6146 = vtanh.f32 %v3911_v38 }
0x2789   :  { %6148 = vtanh.f32 %v3910_v47 }
0x278a   :  { %6150 = vtanh.f32 %v3900_v53 }
0x278b   :  { %v6127_v19 = vpop.eup %6126  ;;  %6152 = vtanh.f32 %v3912_v0 }
0x278c   :  { %v6129_v55 = vpop.eup %6128  ;;  %v3933_v15 = vmul.f32 %v7851_v27, %v6127_v19  ;;  %v7874_v19 = vld [vmem:[#allocation4 + $0x78] sm:$0xff]  ;;  %6154 = vtanh.f32 %v3913_v44 }
0x278d   :  { %v6131_v17 = vpop.eup %6130  ;;  %v3931_v2 = vmul.f32 %v7851_v27, %v6129_v55  ;;  %8249 = vst [vmem:[#allocation50_spill] sm:$0xff] %v7874_v19 }
0x278e   :  { %v6133_v61 = vpop.eup %6132  ;;  %v3953_v31 = vsel %vm264_vm1, %v3933_v15, 0.0  ;;  %v3935_v14 = vmul.f32 %v7851_v27, %v6131_v17  ;;  %v3914_v15 = vadd.f32 %v7813_v28, %v7874_v19 }
0x278f   :  { %v6135_v20 = vpop.eup %6134  ;;  %3954 = vadd.xlane.f32.xlu0 %v3953_v31  ;;  %v3947_v56 = vsel %vm264_vm1, %v3931_v2, 0.0  ;;  %v3937_v38 = vmul.f32 %v7851_v27, %v6133_v61 }
0x2790   :  { %v6137_v59 = vpop.eup %6136  ;;  %3948 = vadd.xlane.f32.xlu1 %v3947_v56  ;;  %v3934_v45 = vmul.f32 %v7851_v27, %v6135_v20  ;;  %v3959_v5 = vsel %vm264_vm1, %v3935_v14, 0.0  ;;  %6156 = vtanh.f32 %v3914_v15 }
0x2791   :  { %v6139_v47 = vpop.eup %6138  ;;  %v3936_v55 = vmul.f32 %v7851_v27, %v6137_v59  ;;  %v3965_v16 = vsel %vm264_vm1, %v3937_v38, 0.0 }
0x2792   :  { %v3956_v57 = vsel %vm264_vm1, %v3934_v45, 0.0  ;;  %v6141_v17 = vpop.eup %6140  ;;  %v3939_v2 = vmul.f32 %v7851_v27, %v6139_v47 }
0x2793   :  { %3960 = vadd.xlane.f32.xlu0 %v3959_v5  ;;  %v6143_v31 = vpop.eup %6142  ;;  %v3962_v61 = vsel %vm264_vm1, %v3936_v55, 0.0  ;;  %v3938_v14 = vmul.f32 %v7851_v27, %v6141_v17 }
0x2794   :  { %3957 = vadd.xlane.f32.xlu1 %v3956_v57  ;;  %v6145_v53 = vpop.eup %6144  ;;  %v3971_v20 = vsel %vm264_vm1, %v3939_v2, 0.0  ;;  %v3941_v28 = vmul.f32 %v7851_v27, %v6143_v31 }
0x2795   :  { %v6147_v56 = vpop.eup %6146  ;;  %v3968_v0 = vsel %vm264_vm1, %v3938_v14, 0.0  ;;  %v3940_v59 = vmul.f32 %v7851_v27, %v6145_v53 }
0x2796   :  { %v6149_v45 = vpop.eup %6148  ;;  %v3977_v44 = vsel %vm264_vm1, %v3941_v28, 0.0  ;;  %v3943_v5 = vmul.f32 %v7851_v27, %v6147_v56 }
0x2797   :  { %3966 = vadd.xlane.f32.xlu0 %v3965_v16  ;;  %v6151_v57 = vpop.eup %6150  ;;  %v3974_v38 = vsel %vm264_vm1, %v3940_v59, 0.0  ;;  %v3942_v47 = vmul.f32 %v7851_v27, %v6149_v45  ;;  %v4259_v59 = vadd.f32 %v7833_v13, %v8236_v24  ;;  %v4258_v45 = vadd.f32 %v7823_v40, %v8236_v24 }
0x2798   :  { %3963 = vadd.xlane.f32.xlu1 %v3962_v61  ;;  %v6153_v55 = vpop.eup %6152  ;;  %v3983_v15 = vsel %vm264_vm1, %v3943_v5, 0.0  ;;  %v3932_v17 = vmul.f32 %v7851_v27, %v6151_v57  ;;  %v5663_v5 = vld [vmem:[#allocation21] sm:$0xff]  }
0x2799   :  { %v6155_v16 = vpop.eup %6154  ;;  %v3980_v2 = vsel %vm264_vm1, %v3942_v47, 0.0  ;;  %v3944_v31 = vmul.f32 %v7851_v27, %v6153_v55 }
0x279a   :  { %v3950_v14 = vsel %vm264_vm1, %v3932_v17, 0.0  ;;  %v3945_v53 = vmul.f32 %v7851_v27, %v6155_v16 }
0x279b   :  { %3972 = vadd.xlane.f32.xlu0 %v3971_v20  ;;  %v3986_v20 = vsel %vm264_vm1, %v3944_v31, 0.0 }
0x279c   :  { %3969 = vadd.xlane.f32.xlu1 %v3968_v0  ;;  %v3989_v56 = vsel %vm264_vm1, %v3945_v53, 0.0 }
0x279d   :  { %v6157_v61 = vpop.eup %6156 }
0x279e   :  { %v3946_v28 = vmul.f32 %v7851_v27, %v6157_v61 }
0x279f   :  { %3978 = vadd.xlane.f32.xlu0 %v3977_v44  ;;  %v5662_v44 = vld [vmem:[#allocation21 + $0x8] sm:$0xff]  }
0x27a0   :  { %3975 = vadd.xlane.f32.xlu1 %v3974_v38  ;;  %v3992_v0 = vsel %vm264_vm1, %v3946_v28, 0.0  ;;  %5536 = vmatpush3.bf16.msra.mxu0 %v5662_v44 }
0x27a1   :  { %5537 = vmatprep.subr.bf16.mxu0 %v8196_v36 }
0x27a3   :  { %3984 = vadd.xlane.f32.xlu0 %v3983_v15 }
0x27a4   :  { %3981 = vadd.xlane.f32.xlu1 %v3980_v2  ;;  %5538 = vmatpush3.bf16.msra.mxu0 %v5663_v5 }
0x27a5   :  { %5551 = vmatprep.subr.bf16.mxu0 %v8196_v36 }
0x27a7   :  { %3951 = vadd.xlane.f32.xlu0 %v3950_v14 }
0x27a8   :  { %3987 = vadd.xlane.f32.xlu1 %v3986_v20 }
0x27ab   :  { %3990 = vadd.xlane.f32.xlu0 %v3989_v56 }
0x27ac   :  { %3993 = vadd.xlane.f32.xlu1 %v3992_v0 }
0x27bd   :  { %4264 = vrot.lane.b32.xlu1 %v4259_v59, %s6549_s22 }
0x27c1   :  { %4262 = vrot.lane.b32.xlu0 %v4258_v45, %s6549_s22 }
0x2818   :  { %v3955_v57 = vpop.xlane.xlu0 %3954 }
0x2819   :  { %v3949_v38 = vpop.xlane.xlu1 %3948 }
0x281c   :  { %v3961_v47 = vpop.xlane.xlu0 %3960 }
0x281d   :  { %v3958_v55 = vpop.xlane.xlu1 %3957  ;;  %v3995_v44 = vmax.f32 %v3949_v38, %v3961_v47 }
0x2820   :  { %v3967_v15 = vpop.xlane.xlu0 %3966 }
0x2821   :  { %v3964_v17 = vpop.xlane.xlu1 %3963  ;;  %v3996_v0 = vmax.f32 %v3955_v57, %v3967_v15 }
0x2824   :  { %v3973_v16 = vpop.xlane.xlu0 %3972 }
0x2825   :  { %v3970_v2 = vpop.xlane.xlu1 %3969  ;;  %v3997_v24 = vmax.f32 %v3995_v44, %v3973_v16 }
0x2826   :  { %v4003_v59 = vmax.f32 %v3958_v55, %v3970_v2 }
0x2828   :  { %v7909_v31 = vpop.xlane.xlu0 %3978 }
0x2829   :  { %v3976_v61 = vpop.xlane.xlu1 %3975  ;;  %v3998_v5 = vmax.f32 %v3996_v0, %v7909_v31 }
0x282c   :  { %v7911_v14 = vpop.xlane.xlu0 %3984 }
0x282d   :  { %v3982_v53 = vpop.xlane.xlu1 %3981  ;;  %v3999_v46 = vmax.f32 %v3997_v24, %v7911_v14 }
0x282e   :  { %v4005_v34 = vmax.f32 %v4003_v59, %v3982_v53 }
0x2830   :  { %v3952_v20 = vpop.xlane.xlu0 %3951 }
0x2831   :  { %v3988_v28 = vpop.xlane.xlu1 %3987  ;;  %v4002_v56 = vmax.f32 %v3952_v20, %v3964_v17 }
0x2833   :  { %v4004_v45 = vmax.f32 %v4002_v56, %v3976_v61 }
0x2834   :  { %v3991_v30 = vpop.xlane.xlu0 %3990 }
0x2835   :  { %v3994_v1 = vpop.xlane.xlu1 %3993  ;;  %v4006_v29 = vmax.f32 %v4004_v45, %v3988_v28  ;;  %v4000_v43 = vmax.f32 %v3998_v5, %v3991_v30 }
0x2836   :  { %v4007_v19 = vmax.f32 %v4005_v34, %v3994_v1 }
0x2837   :  { %v4001_v50 = vmax.f32 %v3999_v46, %v4000_v43 }
0x2838   :  { %v4008_v22 = vmax.f32 %v4006_v29, %v4007_v19 }
0x2839   :  { %v4009_v59 = vsub.f32 %v3949_v38, %v4001_v50  ;;  %v4011_v44 = vsub.f32 %v3955_v57, %v4001_v50  ;;  %v4013_v5 = vsub.f32 %v3961_v47, %v4001_v50  ;;  %v4015_v24 = vsub.f32 %v3967_v15, %v4001_v50 }
0x283a   :  { %v4010_v27 = vsub.f32 %v3952_v20, %v4008_v22  ;;  %v4012_v58 = vsub.f32 %v3958_v55, %v4008_v22  ;;  %v4014_v4 = vsub.f32 %v3964_v17, %v4008_v22  ;;  %v4016_v23 = vsub.f32 %v3970_v2, %v4008_v22 }
0x283b   :  { %v4018_v3 = vsub.f32 %v3976_v61, %v4008_v22  ;;  %v4020_v39 = vsub.f32 %v3982_v53, %v4008_v22  ;;  %v4022_v49 = vsub.f32 %v3988_v28, %v4008_v22  ;;  %v4025_v19 = vmul.f32 1.442695, %v4009_v59 }
0x283c   :  { %v4027_v56 = vmul.f32 1.442695, %v4010_v27  ;;  %v4031_v54 = vmul.f32 1.442695, %v4012_v58  ;;  %v4035_v0 = vmul.f32 1.442695, %v4014_v4  ;;  %v4024_v43 = vsub.f32 %v3994_v1, %v4008_v22 }
0x283d   :  { %v4039_v45 = vmul.f32 1.442695, %v4016_v23  ;;  %v4043_v34 = vmul.f32 1.442695, %v4018_v3  ;;  %v4047_v29 = vmul.f32 1.442695, %v4020_v39  ;;  %v4017_v4 = vsub.f32 %v3973_v16, %v4001_v50 }
0x283e   :  { %6158 = vpow2.f32 %v4027_v56  ;;  %v4029_v46 = vmul.f32 1.442695, %v4011_v44  ;;  %v4033_v27 = vmul.f32 1.442695, %v4013_v5  ;;  %v4051_v58 = vmul.f32 1.442695, %v4022_v49 }
0x283f   :  { %6160 = vpow2.f32 %v4031_v54  ;;  %v4037_v38 = vmul.f32 1.442695, %v4015_v24  ;;  %v4019_v54 = vsub.f32 %v7909_v31, %v4001_v50  ;;  %v4055_v3 = vmul.f32 1.442695, %v4024_v43 }
0x2840   :  { %6162 = vpow2.f32 %v4035_v0  ;;  %v4021_v39 = vsub.f32 %v7911_v14, %v4001_v50  ;;  %v4041_v23 = vmul.f32 1.442695, %v4017_v4  ;;  %v4023_v47 = vsub.f32 %v3991_v30, %v4001_v50 }
0x2841   :  { %6164 = vpow2.f32 %v4039_v45  ;;  %v4045_v1 = vmul.f32 1.442695, %v4019_v54 }
0x2842   :  { %6166 = vpow2.f32 %v4043_v34  ;;  %v4049_v49 = vmul.f32 1.442695, %v4021_v39  ;;  %v4053_v31 = vmul.f32 1.442695, %v4023_v47 }
0x2843   :  { %6168 = vpow2.f32 %v4047_v29 }
0x2844   :  { %6170 = vpow2.f32 %v4025_v19 }
0x2845   :  { %6172 = vpow2.f32 %v4029_v46 }
0x2846   :  { %6174 = vpow2.f32 %v4033_v27 }
0x2847   :  { %6176 = vpow2.f32 %v4051_v58 }
0x2848   :  { %6178 = vpow2.f32 %v4037_v38 }
0x2849   :  { %6180 = vpow2.f32 %v4055_v3 }
0x284a   :  { %6182 = vpow2.f32 %v4041_v23 }
0x284b   :  { %v6159_v57 = vpop.eup %6158  ;;  %6184 = vpow2.f32 %v4045_v1 }
0x284c   :  { %v6161_v22 = vpop.eup %6160  ;;  %v4058_v17 = vmul.f32 %v6159_v57, %v7702_v8  ;;  %6186 = vpow2.f32 %v4049_v49 }
0x284d   :  { %v4110_v55 = vadd.f32 %v6161_v22, %v6159_v57  ;;  %v6163_v15 = vpop.eup %6162  ;;  %v4060_v16 = vmul.f32 %v6161_v22, %v7704_v48  ;;  %6188 = vpow2.f32 %v4053_v31 }
0x284e   :  { %v6165_v61 = vpop.eup %6164  ;;  %v4088_v30 = vsel %vm264_vm1, %v4058_v17, 0.0  ;;  %v4062_v48 = vmul.f32 %v6163_v15, %v7711_v21 }
0x284f   :  { %v4111_v2 = vadd.f32 %v6163_v15, %v4110_v55  ;;  %v6167_v14 = vpop.eup %6166  ;;  %v4089_v50 = vsel %vm264_vm1, %v4060_v16, 0.0 }
0x2850   :  { %v6169_v20 = vpop.eup %6168  ;;  %v4090_v5 = vadd.f32 %v4089_v50, %v4088_v30  ;;  %v4091_v21 = vsel %vm264_vm1, %v4062_v48, 0.0  ;;  %v4066_v22 = vmul.f32 %v6167_v14, %v7728_v51 }
0x2851   :  { %v4112_v53 = vadd.f32 %v6165_v61, %v4111_v2  ;;  %v6171_v28 = vpop.eup %6170 }
0x2852   :  { %v6173_v0 = vpop.eup %6172  ;;  %v4057_v8 = vmul.f32 %v6171_v28, %v7696_v37  ;;  %v4064_v37 = vmul.f32 %v6165_v61, %v7720_v60  ;;  %v4092_v3 = vadd.f32 %v4091_v21, %v4090_v5  ;;  %v4068_v61 = vmul.f32 %v6169_v20, %v7736_v6 }
0x2853   :  { %v4113_v56 = vadd.f32 %v6167_v14, %v4112_v53  ;;  %v6175_v59 = vpop.eup %6174  ;;  %v4103_v44 = vadd.f32 %v6173_v0, %v6171_v28  ;;  %v4059_v34 = vmul.f32 %v6173_v0, %v7698_v9  ;;  %v4095_v53 = vsel %vm264_vm1, %v4066_v22, 0.0 }
0x2854   :  { %v6177_v29 = vpop.eup %6176  ;;  %v4061_v24 = vmul.f32 %v6175_v59, %v7709_v32  ;;  %v4073_v19 = vsel %vm264_vm1, %v4057_v8, 0.0  ;;  %v4093_v55 = vsel %vm264_vm1, %v4064_v37, 0.0 }
0x2855   :  { %v4114_v45 = vadd.f32 %v6169_v20, %v4113_v56  ;;  %v6179_v46 = vpop.eup %6178  ;;  %v4104_v27 = vadd.f32 %v6175_v59, %v4103_v44  ;;  %v4074_v58 = vsel %vm264_vm1, %v4059_v34, 0.0  ;;  %v4094_v49 = vadd.f32 %v4093_v55, %v4092_v3  ;;  %v4263_v55 = vpop.permute.xlu0 %4262 }
0x2856   :  { %v4075_v4 = vadd.f32 %v4074_v58, %v4073_v19  ;;  %v6181_v38 = vpop.eup %6180  ;;  %v4063_v39 = vmul.f32 %v6179_v46, %v7718_v25  ;;  %v4076_v32 = vsel %vm264_vm1, %v4061_v24, 0.0  ;;  %v4097_v56 = vsel %vm264_vm1, %v4068_v61, 0.0  ;;  %v5665_v61 = vld [vmem:[#allocation15] sm:$0xff]  }
0x2857   :  { %v4115_v43 = vadd.f32 %v6177_v29, %v4114_v45  ;;  %v4105_v54 = vadd.f32 %v6179_v46, %v4104_v27  ;;  %v6183_v9 = vpop.eup %6182  ;;  %v4096_v50 = vadd.f32 %v4095_v53, %v4094_v49  ;;  %v4072_v20 = vmul.f32 %v6181_v38, %v7752_v12  ;;  %v4240_v12 = vld [vmem:[#allocation5 + $0x40] sm:$0xff]  ;;  %v4265_v49 = vpop.permute.xlu1 %4264 }
0x2858   :  { %v4077_v47 = vadd.f32 %v4076_v32, %v4075_v4  ;;  %v6185_v1 = vpop.eup %6184  ;;  %v4065_v17 = vmul.f32 %v6183_v9, %v7726_v62  ;;  %v4078_v16 = vsel %vm264_vm1, %v4063_v39, 0.0  ;;  %v4070_v62 = vmul.f32 %v6177_v29, %v7744_v42 }
0x2859   :  { %v4116_v23 = vadd.f32 %v6181_v38, %v4115_v43  ;;  %v4106_v57 = vadd.f32 %v6183_v9, %v4105_v54  ;;  %v6187_v15 = vpop.eup %6186  ;;  %v4067_v51 = vmul.f32 %v6185_v1, %v7734_v35  ;;  %v4098_v0 = vadd.f32 %v4097_v56, %v4096_v50  ;;  %v4241_v38 = vld [vmem:[#allocation5 + $0x48] sm:$0xff] }
0x285a   :  { %v4079_v25 = vadd.f32 %v4078_v16, %v4077_v47  ;;  %v6189_v31 = vpop.eup %6188  ;;  %v4080_v14 = vsel %vm264_vm1, %v4065_v17, 0.0  ;;  %v4069_v8 = vmul.f32 %v6187_v15, %v7742_v33  ;;  %v4099_v59 = vsel %vm264_vm1, %v4070_v62, 0.0 }
0x285b   :  { %v4107_v60 = vadd.f32 %v6185_v1, %v4106_v57  ;;  %6190 = vrcp.f32 %v4116_v23  ;;  %v4082_v48 = vsel %vm264_vm1, %v4067_v51, 0.0  ;;  %v4100_v45 = vadd.f32 %v4099_v59, %v4098_v0 }
0x285c   :  { %v4081_v28 = vadd.f32 %v4080_v14, %v4079_v25  ;;  %v4071_v35 = vmul.f32 %v6189_v31, %v7750_v11  ;;  %v4084_v44 = vsel %vm264_vm1, %v4069_v8, 0.0  ;;  %v4101_v42 = vsel %vm264_vm1, %v4072_v20, 0.0  ;;  %v5664_v25 = vld [vmem:[#allocation15 + $0x8] sm:$0xff]   ;;  %v5666_v20 = vld [vmem:[#allocation22 + $0x8] sm:$0xff]  }
0x285d   :  { %v4108_v2 = vadd.f32 %v6187_v15, %v4107_v60  ;;  %v4102_v29 = vadd.f32 %v4101_v42, %v4100_v45  ;;  %v5667_v45 = vld [vmem:[#allocation22] sm:$0xff]  }
0x285e   :  { %v4083_v6 = vadd.f32 %v4082_v48, %v4081_v28  ;;  %v4086_v24 = vsel %vm264_vm1, %v4071_v35, 0.0 }
0x285f   :  { %v4109_v30 = vadd.f32 %v6189_v31, %v4108_v2 }
0x2860   :  { %v4085_v34 = vadd.f32 %v4084_v44, %v4083_v6 }
0x2861   :  { %6192 = vrcp.f32 %v4109_v30 }
0x2862   :  { %v4087_v33 = vadd.f32 %v4086_v24, %v4085_v34 }
0x2868   :  { %v6191_v5 = vpop.eup %6190 }
0x2869   :  { %v4120_v19 = vmul.f32 %v6191_v5, %v4102_v29 }
0x286e   :  { %v6193_v46 = vpop.eup %6192 }
0x286f   :  { %v4118_v43 = vmul.f32 %v6193_v46, %v4087_v33  ;;  %v8250_v46 = vld [vmem:[#allocation39_spill] sm:$0xff] }
0x2871   :  { %v4125_v27 = vpack.c.bf16 %v4120_v19, %v4118_v43 }
0x2873   :  { %5540 = vmatmul.mubr.msk.bf16.vlgmr.msra.gmra.mxu0 %vm264_vm1, %v4125_v27 }
0x2874   :  { %5555 = vmatprep.mubr.msk.bf16.mxu0 %vm6560_vm0, %v8196_v36  ;;  %5552 = vmatpush3.bf16.msra.mxu0 %v5664_v25 }
0x2875   :  { %5553 = vmatprep.subr.bf16.mxu0 %v8196_v36 }
0x2878   :  { %5554 = vmatpush3.bf16.msra.mxu0 %v5665_v61 }
0x2879   :  { %5567 = vmatprep.subr.bf16.mxu0 %v8196_v36 }
0x2933   :  { %v4175_v11 = vpop.f32.mrf.mxu0 }
0x2934   :  { %v4242_v58 = vadd.f32 %v4240_v12, %v4175_v11  ;;  %v8251_v11 = vld [vmem:[#allocation37_spill] sm:$0xff] }
0x2935   :  { %v5541_v37 = vpop.f32.mrf.mxu0 }
0x2936   :  { %v4244_v4 = vadd.f32 %v4242_v58, %v7823_v40  ;;  %v8253_v37 = vld [vmem:[#allocation34_spill] sm:$0xff] }
0x2937   :  { %v4178_v21 = vpop.f32.mrf.mxu0 }
0x2938   :  { %v5153_v54 = vmul.f32 -1.442695, %v4244_v4  ;;  %v4243_v3 = vadd.f32 %v4241_v38, %v4178_v21 }
0x2939   :  { %v5542_v9 = vpop.f32.mrf.mxu0 }
0x293a   :  { %6194 = vpow2.f32 %v5153_v54  ;;  %v4245_v39 = vadd.f32 %v4243_v3, %v7833_v13  ;;  %v8255_v54 = vld [vmem:[#allocation36_spill] sm:$0xff]  ;;  %v8256_v9 = vld [vmem:[#allocation49_spill] sm:$0xff] }
0x293c   :  { %v5154_v32 = vmul.f32 -1.442695, %v4245_v39 }
0x293e   :  { %6196 = vpow2.f32 %v5154_v32 }
0x2947   :  { %v6195_v23 = vpop.eup %6194 }
0x2948   :  { %v4252_v57 = vadd.f32 1.0, %v6195_v23  ;;  %v8257_v23 = vld [vmem:[#allocation38_spill] sm:$0xff] }
0x294a   :  { %6198 = vrcp.f32 %v4252_v57 }
0x294b   :  { %v6197_v47 = vpop.eup %6196 }
0x294c   :  { %v4253_v1 = vadd.f32 1.0, %v6197_v47 }
0x294e   :  { %6200 = vrcp.f32 %v4253_v1  ;;  %v8258_v1 = vld [vmem:[#allocation46_spill] sm:$0xff] }
0x2957   :  { %v6199_v22 = vpop.eup %6198 }
0x2958   :  { %v4268_v60 = vmul.f32 %v6199_v22, %v4263_v55  ;;  %v4282_v50 = vsub.f32 1.0, %v6199_v22  ;;  %v4294_v62 = vmul.f32 %v6199_v22, %v7773_v41 }
0x295a   :  { %4272 = vrot.lane.b32.xlu1 %v4268_v60, %s6549_s22 }
0x295b   :  { %v6201_v40 = vpop.eup %6200 }
0x295c   :  { %v4269_v15 = vmul.f32 %v6201_v40, %v4265_v49  ;;  %v4283_v14 = vsub.f32 1.0, %v6201_v40  ;;  %v4295_v56 = vmul.f32 %v6201_v40, %v7775_v26 }
0x295e   :  { %4274 = vrot.lane.b32.xlu0 %v4269_v15, %s6549_s22 }
0x29cc   :  { %v4273_v17 = vpop.permute.xlu1 %4272 }
0x29cd   :  { %v4278_v13 = vadd.f32 %v4273_v17, %v4242_v58  ;;  %v8259_v17 = vld [vmem:[#allocation48_spill] sm:$0xff] }
0x29cf   :  { %6202 = vtanh.f32 %v4278_v13 }
0x29d0   :  { %v4275_v16 = vpop.permute.xlu0 %4274 }
0x29d1   :  { %v4279_v2 = vadd.f32 %v4275_v16, %v4243_v3 }
0x29d3   :  { %6204 = vtanh.f32 %v4279_v2 }
0x29dc   :  { %v6203_v31 = vpop.eup %6202 }
0x29dd   :  { %4286 = vrot.lane.b32.xlu1 %v6203_v31, %s6563_s14  ;;  %v8260_v31 = vld [vmem:[#allocation43_spill] sm:$0xff] }
0x29e0   :  { %v6205_v53 = vpop.eup %6204 }
0x29e1   :  { %4288 = vrot.lane.b32.xlu0 %v6205_v53, %s6563_s14 }
0x2a4f   :  { %v4287_v30 = vpop.permute.xlu1 %4286 }
0x2a50   :  { %v4292_v51 = vmul.f32 %v4287_v30, %v4282_v50 }
0x2a52   :  { %v7962_v8 = vadd.f32 %v4294_v62, %v4292_v51  ;;  %v8261_v62 = vld [vmem:[#allocation45_spill] sm:$0xff] }
0x2a53   :  { %v4289_v28 = vpop.permute.xlu0 %4288 }
0x2a54   :  { %v4293_v0 = vmul.f32 %v4289_v28, %v4283_v14 }
0x2a56   :  { %v7964_v48 = vadd.f32 %v4295_v56, %v4293_v0 }
0x2a58   :  { %v4298_v6 = vpack.c.bf16 %v7964_v48, %v7962_v8 }
0x2a5a   :  { %4349 = vrot.lane.b32.xlu1 %v4298_v6, %s6563_s14 }
0x2acc   :  { %v4350_v59 = vpop.permute.xlu1 %4349 }
0x2acd   :  { %5556 = vmatmul.mubr.msk.bf16.vlgmr.msra.gmra.mxu0 %vm264_vm1, %v4350_v59 }
0x2ace   :  { %5568 = vmatpush3.bf16.msra.mxu0 %v5666_v20  ;;  %5571 = vmatprep.mubr.msk.bf16.mxu0 %vm6560_vm0, %v8196_v36 }
0x2acf   :  { %5569 = vmatprep.subr.bf16.mxu0 %v8196_v36 }
0x2ad2   :  { %5570 = vmatpush3.bf16.msra.mxu0 %v5667_v45 }
0x2ad5   :  { %5572 = vmatmul.mubr.msk.bf16.vlgmr.msra.gmra.mxu0 %vm264_vm1, %v4350_v59 }
0x2b8d   :  { %v4400_v35 = vpop.f32.mrf.mxu0 }
0x2b8e   :  { %v4401_v44 = vadd.f32 %v7791_v10, %v4400_v35 }
0x2b8f   :  { %v5557_v34 = vpop.f32.mrf.mxu0 }
0x2b90   :  { %v4411_v5 = vadd.f32 %v4401_v44, %v7800_v7  ;;  %v4407_v42 = vadd.f32 %v4401_v44, %v7798_v63  ;;  %v4413_v29 = vadd.f32 %v4401_v44, %v7808_v18  ;;  %v4409_v33 = vadd.f32 %v4401_v44, %v7796_v52  ;;  %v8252_v63 = vld [vmem:[#allocation44_spill] sm:$0xff] }
0x2b91   :  { %v4403_v24 = vpop.f32.mrf.mxu0  ;;  %v4415_v43 = vadd.f32 %v4401_v44, %v8250_v46  ;;  %v4417_v7 = vadd.f32 %v4401_v44, %v8252_v63  ;;  %v4421_v13 = vadd.f32 %v4401_v44, %v8259_v17 }
0x2b92   :  { %v4404_v19 = vadd.f32 %v7791_v10, %v4403_v24  ;;  %6206 = vtanh.f32 %v4411_v5  ;;  %v8254_v10 = vld [vmem:[#allocation47_spill] sm:$0xff] }
0x2b93   :  { %v5558_v27 = vpop.f32.mrf.mxu0  ;;  %6208 = vtanh.f32 %v4407_v42  ;;  %v4419_v21 = vadd.f32 %v4401_v44, %v8254_v10  ;;  %v8262_v44 = vld [vmem:[#allocation50_spill] sm:$0xff] }
0x2b94   :  { %6210 = vtanh.f32 %v4413_v29  ;;  %v4410_v12 = vadd.f32 %v4404_v19, %v8251_v11  ;;  %v4412_v52 = vadd.f32 %v4404_v19, %v8253_v37  ;;  %v4414_v3 = vadd.f32 %v4404_v19, %v8255_v54 }
0x2b95   :  { %v7982_v58 = vpop.f32.mrf.mxu0  ;;  %6212 = vtanh.f32 %v4409_v33  ;;  %v4408_v39 = vadd.f32 %v4404_v19, %v8256_v9  ;;  %v4416_v57 = vadd.f32 %v4404_v19, %v8257_v23  ;;  %v4418_v61 = vadd.f32 %v4404_v19, %v8260_v31 }
0x2b96   :  { %6214 = vtanh.f32 %v4415_v43  ;;  %v4420_v56 = vadd.f32 %v4404_v19, %v8261_v62  ;;  %v4422_v34 = vadd.f32 %v4404_v19, %v8262_v44 }
0x2b97   :  { %v5573_v18 = vpop.f32.mrf.mxu0  ;;  %6216 = vtanh.f32 %v4410_v12 }
0x2b98   :  { %6218 = vtanh.f32 %v4417_v7 }
0x2b99   :  { %v7986_v4 = vpop.f32.mrf.mxu0  ;;  %6220 = vtanh.f32 %v4412_v52 }
0x2b9a   :  { %6222 = vtanh.f32 %v4419_v21 }
0x2b9b   :  { %v5574_v38 = vpop.f32.mrf.mxu0  ;;  %6224 = vtanh.f32 %v4414_v3 }
0x2b9c   :  { %6226 = vtanh.f32 %v4408_v39 }
0x2b9d   :  { %6228 = vtanh.f32 %v4416_v57  ;;  %v8263_v57 = vld [vmem:[#allocation40_spill] sm:$0xff] }
0x2b9e   :  { %6230 = vtanh.f32 %v4421_v13 }
0x2b9f   :  { %v6207_v32 = vpop.eup %6206  ;;  %6232 = vtanh.f32 %v4418_v61 }
0x2ba0   :  { %v6209_v47 = vpop.eup %6208  ;;  %v4443_v22 = vmul.f32 %v8258_v1, %v6207_v32  ;;  %6234 = vtanh.f32 %v4420_v56 }
0x2ba1   :  { %v6211_v55 = vpop.eup %6210  ;;  %v4439_v60 = vmul.f32 %v8258_v1, %v6209_v47  ;;  %6236 = vtanh.f32 %v4422_v34  ;;  %v4766_v47 = vadd.f32 %v7982_v58, %v8263_v57 }
0x2ba2   :  { %v6213_v40 = vpop.eup %6212  ;;  %v4467_v49 = vsel %vm264_vm1, %v4443_v22, 0.0  ;;  %v4445_v15 = vmul.f32 %v8258_v1, %v6211_v55  ;;  %v4767_v22 = vadd.f32 %v7986_v4, %v8263_v57  ;;  %v5668_v55 = vld [vmem:[#allocation21 + $0x8] sm:$0xff]  }
0x2ba3   :  { %v6215_v16 = vpop.eup %6214  ;;  %4468 = vadd.xlane.f32.xlu1 %v4467_v49  ;;  %v4455_v2 = vsel %vm264_vm1, %v4439_v60, 0.0  ;;  %v4441_v25 = vmul.f32 %v8258_v1, %v6213_v40  ;;  %5560 = vmatpush3.bf16.msra.mxu1 %v5668_v55  ;;  %v5669_v60 = vld [vmem:[#allocation21] sm:$0xff]  }
0x2ba4   :  { %v6217_v53 = vpop.eup %6216  ;;  %4456 = vadd.xlane.f32.xlu0 %v4455_v2  ;;  %v4473_v30 = vsel %vm264_vm1, %v4445_v15, 0.0  ;;  %v4447_v50 = vmul.f32 %v8258_v1, %v6215_v16  ;;  %5561 = vmatprep.subr.bf16.mxu1 %v8196_v36 }
0x2ba5   :  { %v6219_v51 = vpop.eup %6218  ;;  %v4461_v14 = vsel %vm264_vm1, %v4441_v25, 0.0  ;;  %v4442_v28 = vmul.f32 %v8258_v1, %v6217_v53 }
0x2ba6   :  { %v6221_v0 = vpop.eup %6220  ;;  %v4479_v6 = vsel %vm264_vm1, %v4447_v50, 0.0  ;;  %v4449_v20 = vmul.f32 %v8258_v1, %v6219_v51 }
0x2ba7   :  { %4474 = vadd.xlane.f32.xlu1 %v4473_v30  ;;  %v6223_v59 = vpop.eup %6222  ;;  %v4464_v45 = vsel %vm264_vm1, %v4442_v28, 0.0  ;;  %v4444_v35 = vmul.f32 %v8258_v1, %v6221_v0  ;;  %5562 = vmatpush3.bf16.msra.mxu1 %v5669_v60 }
0x2ba8   :  { %4462 = vadd.xlane.f32.xlu0 %v4461_v14  ;;  %v6225_v5 = vpop.eup %6224  ;;  %v4485_v42 = vsel %vm264_vm1, %v4449_v20, 0.0  ;;  %v4451_v29 = vmul.f32 %v8258_v1, %v6223_v59 }
0x2ba9   :  { %v6227_v24 = vpop.eup %6226  ;;  %v4470_v33 = vsel %vm264_vm1, %v4444_v35, 0.0  ;;  %v4446_v46 = vmul.f32 %v8258_v1, %v6225_v5 }
0x2baa   :  { %v6229_v43 = vpop.eup %6228  ;;  %v4491_v27 = vsel %vm264_vm1, %v4451_v29, 0.0  ;;  %v4440_v11 = vmul.f32 %v8258_v1, %v6227_v24 }
0x2bab   :  { %4480 = vadd.xlane.f32.xlu1 %v4479_v6  ;;  %v6231_v19 = vpop.eup %6230  ;;  %v4476_v12 = vsel %vm264_vm1, %v4446_v46, 0.0  ;;  %v4448_v63 = vmul.f32 %v8258_v1, %v6229_v43 }
0x2bac   :  { %4465 = vadd.xlane.f32.xlu0 %v4464_v45  ;;  %v6233_v7 = vpop.eup %6232  ;;  %v4458_v18 = vsel %vm264_vm1, %v4440_v11, 0.0  ;;  %v4453_v37 = vmul.f32 %v8258_v1, %v6231_v19 }
0x2bad   :  { %v4482_v52 = vsel %vm264_vm1, %v4448_v63, 0.0  ;;  %v4450_v10 = vmul.f32 %v8258_v1, %v6233_v7  ;;  %v6235_v21 = vpop.eup %6234 }
0x2bae   :  { %v4497_v38 = vsel %vm264_vm1, %v4453_v37, 0.0  ;;  %v4452_v3 = vmul.f32 %v8258_v1, %v6235_v21  ;;  %v6237_v9 = vpop.eup %6236 }
0x2baf   :  { %4486 = vadd.xlane.f32.xlu1 %v4485_v42  ;;  %v4488_v54 = vsel %vm264_vm1, %v4450_v10, 0.0  ;;  %v4454_v32 = vmul.f32 %v8258_v1, %v6237_v9 }
0x2bb0   :  { %4471 = vadd.xlane.f32.xlu0 %v4470_v33  ;;  %v4494_v39 = vsel %vm264_vm1, %v4452_v3, 0.0 }
0x2bb1   :  { %v4500_v23 = vsel %vm264_vm1, %v4454_v32, 0.0 }
0x2bb3   :  { %4492 = vadd.xlane.f32.xlu1 %v4491_v27 }
0x2bb4   :  { %4477 = vadd.xlane.f32.xlu0 %v4476_v12 }
0x2bb7   :  { %4459 = vadd.xlane.f32.xlu1 %v4458_v18 }
0x2bb8   :  { %4483 = vadd.xlane.f32.xlu0 %v4482_v52 }
0x2bbb   :  { %4498 = vadd.xlane.f32.xlu1 %v4497_v38 }
0x2bbc   :  { %4489 = vadd.xlane.f32.xlu0 %v4488_v54 }
0x2bc0   :  { %4495 = vadd.xlane.f32.xlu0 %v4494_v39 }
0x2bc4   :  { %4501 = vadd.xlane.f32.xlu0 %v4500_v23 }
0x2bcc   :  { %4770 = vrot.lane.b32.xlu1 %v4766_v47, %s6549_s22 }
0x2bda   :  { %4772 = vrot.lane.b32.xlu0 %v4767_v22, %s6549_s22 }
0x2c2c   :  { %v4469_v1 = vpop.xlane.xlu1 %4468 }
0x2c2d   :  { %v4457_v40 = vpop.xlane.xlu0 %4456 }
0x2c2e   :  { %v4503_v53 = vmax.f32 %v4457_v40, %v4469_v1 }
0x2c30   :  { %v4475_v49 = vpop.xlane.xlu1 %4474 }
0x2c31   :  { %v4463_v15 = vpop.xlane.xlu0 %4462 }
0x2c32   :  { %v4504_v30 = vmax.f32 %v4463_v15, %v4475_v49 }
0x2c34   :  { %v4481_v17 = vpop.xlane.xlu1 %4480 }
0x2c35   :  { %v4466_v13 = vpop.xlane.xlu0 %4465  ;;  %v4505_v51 = vmax.f32 %v4503_v53, %v4481_v17  ;;  %v4331_v53 = vld [vmem:[#allocation3 + $0x10] sm:$0xff] }
0x2c38   :  { %v4487_v16 = vpop.xlane.xlu1 %4486 }
0x2c39   :  { %v4472_v2 = vpop.xlane.xlu0 %4471  ;;  %v4506_v14 = vmax.f32 %v4504_v30, %v4487_v16 }
0x2c3c   :  { %v4493_v25 = vpop.xlane.xlu1 %4492 }
0x2c3d   :  { %v4478_v31 = vpop.xlane.xlu0 %4477  ;;  %v4507_v62 = vmax.f32 %v4505_v51, %v4493_v25 }
0x2c3e   :  { %v4511_v44 = vmax.f32 %v4466_v13, %v4478_v31 }
0x2c40   :  { %v4460_v61 = vpop.xlane.xlu1 %4459 }
0x2c41   :  { %v4484_v50 = vpop.xlane.xlu0 %4483  ;;  %v4510_v6 = vmax.f32 %v4460_v61, %v4472_v2 }
0x2c43   :  { %v4512_v46 = vmax.f32 %v4510_v6, %v4484_v50  ;;  %v4332_v6 = vld [vmem:[#allocation3 + $0x18] sm:$0xff] }
0x2c44   :  { %v4499_v28 = vpop.xlane.xlu1 %4498 }
0x2c45   :  { %v4490_v36 = vpop.xlane.xlu0 %4489  ;;  %v4508_v56 = vmax.f32 %v4506_v14, %v4499_v28 }
0x2c46   :  { %v4513_v29 = vmax.f32 %v4511_v44, %v4490_v36 }
0x2c47   :  { %v4509_v0 = vmax.f32 %v4507_v62, %v4508_v56  ;;  %v4330_v56 = vld [vmem:[#allocation3 + $0x8] sm:$0xff] }
0x2c49   :  { %v4517_v20 = vsub.f32 %v4457_v40, %v4509_v0  ;;  %v4519_v59 = vsub.f32 %v4463_v15, %v4509_v0  ;;  %v4521_v45 = vsub.f32 %v4469_v1, %v4509_v0  ;;  %v4496_v35 = vpop.xlane.xlu0 %4495  ;;  %v4523_v34 = vsub.f32 %v4475_v49, %v4509_v0 }
0x2c4a   :  { %v4525_v24 = vsub.f32 %v4481_v17, %v4509_v0  ;;  %v4527_v43 = vsub.f32 %v4487_v16, %v4509_v0  ;;  %v4514_v19 = vmax.f32 %v4512_v46, %v4496_v35  ;;  %v4529_v21 = vsub.f32 %v4493_v25, %v4509_v0 }
0x2c4b   :  { %v4533_v5 = vmul.f32 1.442695, %v4517_v20  ;;  %v4537_v42 = vmul.f32 1.442695, %v4519_v59  ;;  %v4541_v33 = vmul.f32 1.442695, %v4521_v45  ;;  %v4531_v32 = vsub.f32 %v4499_v28, %v4509_v0 }
0x2c4c   :  { %v4545_v11 = vmul.f32 1.442695, %v4523_v34  ;;  %v4549_v63 = vmul.f32 1.442695, %v4525_v24  ;;  %v4553_v18 = vmul.f32 1.442695, %v4527_v43 }
0x2c4d   :  { %6238 = vpow2.f32 %v4533_v5  ;;  %v4502_v27 = vpop.xlane.xlu0 %4501  ;;  %v4557_v57 = vmul.f32 1.442695, %v4529_v21  ;;  %v4561_v1 = vmul.f32 1.442695, %v4531_v32  ;;  %v4333_v5 = vld [vmem:[#allocation3 + $0x20] sm:$0xff] }
0x2c4e   :  { %6240 = vpow2.f32 %v4537_v42  ;;  %v4515_v12 = vmax.f32 %v4513_v29, %v4502_v27  ;;  %v4334_v42 = vld [vmem:[#allocation3 + $0x28] sm:$0xff] }
0x2c4f   :  { %6242 = vpow2.f32 %v4541_v33 }
0x2c50   :  { %v4516_v7 = vmax.f32 %v4514_v19, %v4515_v12  ;;  %6244 = vpow2.f32 %v4545_v11 }
0x2c51   :  { %6246 = vpow2.f32 %v4549_v63 }
0x2c52   :  { %v4518_v37 = vsub.f32 %v4460_v61, %v4516_v7  ;;  %v4520_v52 = vsub.f32 %v4466_v13, %v4516_v7  ;;  %v4522_v10 = vsub.f32 %v4472_v2, %v4516_v7  ;;  %v4524_v38 = vsub.f32 %v4478_v31, %v4516_v7  ;;  %v4329_v61 = vld [vmem:[#allocation3] sm:$0xff] }
0x2c53   :  { %6248 = vpow2.f32 %v4553_v18  ;;  %v4526_v3 = vsub.f32 %v4484_v50, %v4516_v7  ;;  %v4528_v47 = vsub.f32 %v4490_v36, %v4516_v7  ;;  %v4530_v22 = vsub.f32 %v4496_v35, %v4516_v7 }
0x2c54   :  { %v4535_v54 = vmul.f32 1.442695, %v4518_v37  ;;  %v4539_v9 = vmul.f32 1.442695, %v4520_v52  ;;  %v4543_v39 = vmul.f32 1.442695, %v4522_v10  ;;  %v4532_v49 = vsub.f32 %v4502_v27, %v4516_v7 }
0x2c55   :  { %v4547_v23 = vmul.f32 1.442695, %v4524_v38  ;;  %v4551_v55 = vmul.f32 1.442695, %v4526_v3  ;;  %v4555_v15 = vmul.f32 1.442695, %v4528_v47 }
0x2c56   :  { %6250 = vpow2.f32 %v4535_v54  ;;  %v4559_v16 = vmul.f32 1.442695, %v4530_v22  ;;  %v4563_v31 = vmul.f32 1.442695, %v4532_v49  ;;  %v4335_v37 = vld [vmem:[#allocation3 + $0x30] sm:$0xff]  ;;  %v4336_v52 = vld [vmem:[#allocation3 + $0x38] sm:$0xff] }
0x2c57   :  { %6252 = vpow2.f32 %v4539_v9 }
0x2c58   :  { %6254 = vpow2.f32 %v4543_v39 }
0x2c59   :  { %6256 = vpow2.f32 %v4547_v23 }
0x2c5a   :  { %v6239_v60 = vpop.eup %6238  ;;  %6258 = vpow2.f32 %v4557_v57 }
0x2c5b   :  { %v6241_v40 = vpop.eup %6240  ;;  %6260 = vpow2.f32 %v4551_v55  ;;  %v4565_v50 = vmul.f32 %v6239_v60, %v4329_v61  ;;  %v4337_v55 = vld [vmem:[#allocation3 + $0x40] sm:$0xff]  ;;  %v4339_v61 = vld [vmem:[#allocation3 + $0x50] sm:$0xff] }
0x2c5c   :  { %v4611_v17 = vadd.f32 %v6241_v40, %v6239_v60  ;;  %v6243_v13 = vpop.eup %6242  ;;  %6262 = vpow2.f32 %v4561_v1  ;;  %v4567_v51 = vmul.f32 %v6241_v40, %v4331_v53  ;;  %v4338_v60 = vld [vmem:[#allocation3 + $0x48] sm:$0xff]  ;;  %v4340_v53 = vld [vmem:[#allocation3 + $0x58] sm:$0xff] }
0x2c5d   :  { %v6245_v25 = vpop.eup %6244  ;;  %6264 = vpow2.f32 %v4555_v15  ;;  %v4581_v59 = vsel %vm264_vm1, %v4565_v50, 0.0  ;;  %v4569_v24 = vmul.f32 %v6243_v13, %v4333_v5 }
0x2c5e   :  { %v4612_v2 = vadd.f32 %v6243_v13, %v4611_v17  ;;  %v6247_v14 = vpop.eup %6246  ;;  %6266 = vpow2.f32 %v4559_v16  ;;  %v4582_v45 = vsel %vm264_vm1, %v4567_v51, 0.0  ;;  %v4571_v21 = vmul.f32 %v6245_v25, %v4335_v37 }
0x2c5f   :  { %6268 = vpow2.f32 %v4563_v31  ;;  %v4583_v11 = vadd.f32 %v4582_v45, %v4581_v59  ;;  %v4584_v54 = vsel %vm264_vm1, %v4569_v24, 0.0  ;;  %v4573_v40 = vmul.f32 %v6247_v14, %v4337_v55 }
0x2c60   :  { %v4613_v30 = vadd.f32 %v6245_v25, %v4612_v2  ;;  %v6249_v28 = vpop.eup %6248  ;;  %v4586_v15 = vsel %vm264_vm1, %v4571_v21, 0.0 }
0x2c61   :  { %v4585_v32 = vadd.f32 %v4584_v54, %v4583_v11  ;;  %v4588_v51 = vsel %vm264_vm1, %v4573_v40, 0.0 }
0x2c62   :  { %v4614_v62 = vadd.f32 %v6247_v14, %v4613_v30  ;;  %v4575_v30 = vmul.f32 %v6249_v28, %v4339_v61  ;;  %v5670_v61 = vld [vmem:[#allocation24 + $0x8] sm:$0xff]  }
0x2c63   :  { %v6251_v36 = vpop.eup %6250  ;;  %v4587_v16 = vadd.f32 %v4586_v15, %v4585_v32  ;;  %5575 = vmatprep.subr.bf16.mxu1 %v5670_v61 }
0x2c64   :  { %v6253_v0 = vpop.eup %6252  ;;  %v4566_v20 = vmul.f32 %v6251_v36, %v4330_v56  ;;  %v4615_v44 = vadd.f32 %v6249_v28, %v4614_v62  ;;  %v4341_v56 = vld [vmem:[#allocation3 + $0x60] sm:$0xff]  ;;  %v4590_v59 = vsel %vm264_vm1, %v4575_v30, 0.0  ;;  %v4344_v28 = vld [vmem:[#allocation3 + $0x78] sm:$0xff] }
0x2c65   :  { %v6255_v35 = vpop.eup %6254  ;;  %v4618_v34 = vadd.f32 %v6253_v0, %v6251_v36  ;;  %v4568_v29 = vmul.f32 %v6253_v0, %v4332_v6  ;;  %v4589_v14 = vadd.f32 %v4588_v51, %v4587_v16  ;;  %v4342_v0 = vld [vmem:[#allocation3 + $0x68] sm:$0xff]  ;;  %v5671_v51 = vld [vmem:[#allocation24] sm:$0xff]  }
0x2c66   :  { %v4570_v33 = vmul.f32 %v6255_v35, %v4334_v42  ;;  %v4596_v46 = vsel %vm264_vm1, %v4566_v20, 0.0  ;;  %v6257_v43 = vpop.eup %6256 }
0x2c67   :  { %v4619_v27 = vadd.f32 %v6255_v35, %v4618_v34  ;;  %v4597_v19 = vsel %vm264_vm1, %v4568_v29, 0.0  ;;  %v6259_v12 = vpop.eup %6258  ;;  %v4572_v38 = vmul.f32 %v6257_v43, %v4336_v52  ;;  %v4591_v35 = vadd.f32 %v4590_v59, %v4589_v14  ;;  %v4343_v34 = vld [vmem:[#allocation3 + $0x70] sm:$0xff] }
0x2c68   :  { %v4598_v63 = vadd.f32 %v4597_v19, %v4596_v46  ;;  %v4616_v7 = vadd.f32 %v6259_v12, %v4615_v44  ;;  %v6261_v10 = vpop.eup %6260  ;;  %v4599_v3 = vsel %vm264_vm1, %v4570_v33, 0.0  ;;  %v4577_v6 = vmul.f32 %v6259_v12, %v4341_v56 }
0x2c69   :  { %v4620_v18 = vadd.f32 %v6257_v43, %v4619_v27  ;;  %v6263_v9 = vpop.eup %6262  ;;  %v4574_v49 = vmul.f32 %v6261_v10, %v4338_v60  ;;  %v4601_v17 = vsel %vm264_vm1, %v4572_v38, 0.0 }
0x2c6a   :  { %v4600_v23 = vadd.f32 %v4599_v3, %v4598_v63  ;;  %v6265_v57 = vpop.eup %6264  ;;  %v4617_v47 = vadd.f32 %v6263_v9, %v4616_v7  ;;  %v4579_v5 = vmul.f32 %v6263_v9, %v4343_v34  ;;  %v4592_v29 = vsel %vm264_vm1, %v4577_v6, 0.0  ;;  %v4749_v9 = vld [vmem:[#allocation5 + $0x58] sm:$0xff] }
0x2c6b   :  { %v4621_v39 = vadd.f32 %v6261_v10, %v4620_v18  ;;  %v6267_v1 = vpop.eup %6266  ;;  %v4576_v50 = vmul.f32 %v6265_v57, %v4340_v53  ;;  %v4603_v62 = vsel %vm264_vm1, %v4574_v49, 0.0  ;;  %v4593_v33 = vadd.f32 %v4592_v29, %v4591_v35  ;;  %v4748_v10 = vld [vmem:[#allocation5 + $0x50] sm:$0xff]  ;;  %v4771_v49 = vpop.permute.xlu1 %4770  ;;  %v8264_v53 = vld [vmem:[#allocation41_spill] sm:$0xff] }
0x2c6c   :  { %v4602_v2 = vadd.f32 %v4601_v17, %v4600_v23  ;;  %v6269_v25 = vpop.eup %6268  ;;  %6270 = vrcp.f32 %v4617_v47  ;;  %v4578_v20 = vmul.f32 %v6267_v1, %v4342_v0  ;;  %v4594_v27 = vsel %vm264_vm1, %v4579_v5, 0.0  ;;  %v4773_v17 = vpop.permute.xlu0 %4772  ;;  %v8267_v0 = vld [vmem:[#allocation51_spill] sm:$0xff] }
0x2c6d   :  { %v4622_v22 = vadd.f32 %v6265_v57, %v4621_v39  ;;  %v4605_v45 = vsel %vm264_vm1, %v4576_v50, 0.0  ;;  %v4580_v42 = vmul.f32 %v6269_v25, %v4344_v28  ;;  %v4595_v19 = vadd.f32 %v4594_v27, %v4593_v33 }
0x2c6e   :  { %v4604_v36 = vadd.f32 %v4603_v62, %v4602_v2  ;;  %v4607_v24 = vsel %vm264_vm1, %v4578_v20, 0.0  ;;  %v5185_v30 = vpack.c.bf16 %v8264_v53, %v8264_v53  ;;  %v8265_v62 = vld [vmem:[#allocation33_spill] sm:$0xff]  ;;  %v5189_v6 = vpack.c.bf16 %v8267_v0, %v8267_v0  ;;  %v8268_v20 = vld [vmem:[#allocation35_spill] sm:$0xff] }
0x2c6f   :  { %v4623_v13 = vadd.f32 %v6267_v1, %v4622_v22  ;;  %v4609_v11 = vsel %vm264_vm1, %v4580_v42, 0.0  ;;  %v5187_v14 = vpack.c.bf16 %v8265_v62, %v8265_v62  ;;  %v5188_v59 = vpack.c.bf16 %v8268_v20, %v8268_v20 }
0x2c70   :  { %v4606_v44 = vadd.f32 %v4605_v45, %v4604_v36  ;;  %v8266_v36 = vld [vmem:[#allocation42_spill] sm:$0xff]  ;;  %v8269_v45 = vld [vmem:[#allocation52_spill] sm:$0xff]  ;;  %v5192_v34 = vpack.c.bf16 %v7775_v26, %v7775_v26  ;;  %v5193_v28 = vpack.c.bf16 %v7962_v8, %v7962_v8  ;;  %v5194_v5 = vpack.c.bf16 %v7964_v48, %v7964_v48 }
0x2c71   :  { %v4624_v31 = vadd.f32 %v6269_v25, %v4623_v13  ;;  %v5186_v56 = vpack.c.bf16 %v8266_v36, %v8266_v36  ;;  %v5190_v35 = vpack.c.bf16 %v8269_v45, %v8269_v45 }
0x2c72   :  { %v4608_v46 = vadd.f32 %v4607_v24, %v4606_v44  ;;  %v5191_v44 = vpack.c.bf16 %v7773_v41, %v7773_v41 }
0x2c73   :  { %6272 = vrcp.f32 %v4624_v31 }
0x2c74   :  { %v4610_v12 = vadd.f32 %v4609_v11, %v4608_v46 }
0x2c79   :  { %v6271_v43 = vpop.eup %6270 }
0x2c7a   :  { %v4626_v7 = vmul.f32 %v6271_v43, %v4595_v19 }
0x2c80   :  { %v6273_v63 = vpop.eup %6272 }
0x2c81   :  { %v4628_v18 = vmul.f32 %v6273_v63, %v4610_v12 }
0x2c83   :  { %v4633_v37 = vpack.c.bf16 %v4628_v18, %v4626_v7 }
0x2c85   :  { %5564 = vmatmul.mubr.msk.bf16.vlgmr.msra.gmra.mxu1 %vm264_vm1, %v4633_v37 }
0x2c86   :  { %5576 = vmatpush3.bf16.msra.mxu1 %v5670_v61 }
0x2c87   :  { %5577 = vmatprep.subr.bf16.mxu1 %v5671_v51 }
0x2c8a   :  { %5578 = vmatpush3.bf16.msra.mxu1 %v5671_v51 }
0x2d45   :  { %v4683_v52 = vpop.f32.mrf.mxu1 }
0x2d46   :  { %v4750_v21 = vadd.f32 %v4748_v10, %v4683_v52 }
0x2d47   :  { %v5565_v38 = vpop.f32.mrf.mxu1 }
0x2d48   :  { %v4752_v54 = vadd.f32 %v4750_v21, %v7982_v58 }
0x2d49   :  { %v4686_v3 = vpop.f32.mrf.mxu1 }
0x2d4a   :  { %v5166_v39 = vmul.f32 -1.442695, %v4752_v54  ;;  %v4751_v32 = vadd.f32 %v4749_v9, %v4686_v3 }
0x2d4b   :  { %v5566_v23 = vpop.f32.mrf.mxu1 }
0x2d4c   :  { %6274 = vpow2.f32 %v5166_v39  ;;  %v4753_v57 = vadd.f32 %v4751_v32, %v7986_v4 }
0x2d4e   :  { %v5167_v47 = vmul.f32 -1.442695, %v4753_v57 }
0x2d50   :  { %6276 = vpow2.f32 %v5167_v47 }
0x2d59   :  { %v6275_v22 = vpop.eup %6274 }
0x2d5a   :  { %v4760_v55 = vadd.f32 1.0, %v6275_v22  ;;  %v5170_v22 = vld [vmem:[%s8135_s16] ss:$0 sm:$0xff]  ;;  %s6564_s16 = smov [#allocation25]  }
0x2d5b   :  { %s5002_s3 = sshll.u32 %s6564_s16, 4  ;;  %s5003_s3 = int_to_ptr.vmem [resolvable:$true] %s5002_s3 }
0x2d5c   :  { %6278 = vrcp.f32 %v4760_v55  ;;  %s6510_s24 = scalar_lea.vmem %s5003_s3, 1536  ;;  %p6515_p0 = scmp.lt.s32.totalorder %s5003_s3, %s5003_s3 }
0x2d5d   :  { %v6277_v60 = vpop.eup %6276  ;;  %p6511_p13 = scmp.ne.s32.totalorder %s5003_s3, %s6510_s24  ;;  %p6516_p1 = scmp.lt.s32.totalorder %s6510_s24, %s6510_s24 }
0x2d5e   :  { %v4761_v1 = vadd.f32 1.0, %v6277_v60 }
0x2d5f   :  { %p6517_p2 = por %p6516_p1, %p6515_p0 }
0x2d60   :  { %6280 = vrcp.f32 %v4761_v1 }
0x2d61   :  { %p6518_p3 = pnand %p6517_p2, %p6511_p13 }
0x2d69   :  { %v6279_v40 = vpop.eup %6278 }
0x2d6a   :  { %v4776_v15 = vmul.f32 %v6279_v40, %v4771_v49  ;;  %v4790_v41 = vsub.f32 1.0, %v6279_v40  ;;  %v4802_v29 = vmul.f32 %v6279_v40, %v7962_v8 }
0x2d6c   :  { %4780 = vrot.lane.b32.xlu1 %v4776_v15, %s6549_s22 }
0x2d6d   :  { %v6281_v58 = vpop.eup %6280 }
0x2d6e   :  { %v4777_v13 = vmul.f32 %v6281_v58, %v4773_v17  ;;  %v4791_v26 = vsub.f32 1.0, %v6281_v58  ;;  %v4803_v11 = vmul.f32 %v6281_v58, %v7964_v48 }
0x2d70   :  { %4782 = vrot.lane.b32.xlu1 %v4777_v13, %s6549_s22 }
0x2dde   :  { %v4781_v16 = vpop.permute.xlu1 %4780 }
0x2ddf   :  { %v4786_v4 = vadd.f32 %v4781_v16, %v4750_v21 }
0x2de1   :  { %6282 = vtanh.f32 %v4786_v4 }
0x2de2   :  { %v4783_v2 = vpop.permute.xlu1 %4782 }
0x2de3   :  { %v4787_v25 = vadd.f32 %v4783_v2, %v4751_v32 }
0x2de5   :  { %6284 = vtanh.f32 %v4787_v25 }
0x2dee   :  { %v6283_v31 = vpop.eup %6282 }
0x2def   :  { %4794 = vrot.lane.b32.xlu0 %v6283_v31, %s6563_s14 }
0x2df2   :  { %v6285_v50 = vpop.eup %6284 }
0x2df3   :  { %2272 = vrot.lane.b32.xlu0 %v5185_v30, %s6563_s14  ;;  %4796 = vrot.lane.b32.xlu1 %v6285_v50, %s6563_s14 }
0x2df7   :  { %2780 = vrot.lane.b32.xlu0 %v5187_v14, %s6563_s14  ;;  %2274 = vrot.lane.b32.xlu1 %v5186_v56, %s6563_s14 }
0x2dfb   :  { %3288 = vrot.lane.b32.xlu0 %v5189_v6, %s6563_s14  ;;  %2782 = vrot.lane.b32.xlu1 %v5188_v59, %s6563_s14 }
0x2dff   :  { %3796 = vrot.lane.b32.xlu0 %v5191_v44, %s6563_s14  ;;  %3290 = vrot.lane.b32.xlu1 %v5190_v35, %s6563_s14 }
0x2e03   :  { %4304 = vrot.lane.b32.xlu0 %v5193_v28, %s6563_s14  ;;  %3798 = vrot.lane.b32.xlu1 %v5192_v34, %s6563_s14 }
0x2e07   :  { %4306 = vrot.lane.b32.xlu1 %v5194_v5, %s6563_s14 }
0x2e61   :  { %v4795_v42 = vpop.permute.xlu0 %4794 }
0x2e62   :  { %v4800_v24 = vmul.f32 %v4795_v42, %v4790_v41 }
0x2e64   :  { %v4804_v33 = vadd.f32 %v4802_v29, %v4800_v24 }
0x2e65   :  { %v2273_v46 = vpop.permute.xlu0 %2272  ;;  %v4797_v43 = vpop.permute.xlu1 %4796 }
0x2e66   :  { %v5195_v27 = vpack.c.bf16 %v4804_v33, %v4804_v33  ;;  %2279 = vst.msk [vmem:[#allocation6] sm:$0xf] %vm2278_vm3, %v2273_v46  ;;  %v4801_v19 = vmul.f32 %v4797_v43, %v4791_v26 }
0x2e68   :  { %v4805_v12 = vadd.f32 %v4803_v11, %v4801_v19  ;;  %4812 = vrot.lane.b32.xlu0 %v5195_v27, %s6563_s14 }
0x2e69   :  { %v2781_v63 = vpop.permute.xlu0 %2780  ;;  %v2275_v7 = vpop.permute.xlu1 %2274 }
0x2e6a   :  { %v5196_v18 = vpack.c.bf16 %v4805_v12, %v4805_v12  ;;  %2787 = vst.msk [vmem:[#allocation6 + $0x8] sm:$0xf] %vm2278_vm3, %v2781_v63  ;;  %2280 = vst.msk [vmem:[#allocation6 + $0x4] sm:$0xf] %vm2278_vm3, %v2275_v7 }
0x2e6c   :  { %4814 = vrot.lane.b32.xlu1 %v5196_v18, %s6563_s14 }
0x2e6d   :  { %v3289_v8 = vpop.permute.xlu0 %3288  ;;  %v2783_v37 = vpop.permute.xlu1 %2782 }
0x2e6e   :  { %3295 = vst.msk [vmem:[#allocation6 + $0x10] sm:$0xf] %vm2278_vm3, %v3289_v8  ;;  %2788 = vst.msk [vmem:[#allocation6 + $0xc] sm:$0xf] %vm2278_vm3, %v2783_v37 }
0x2e71   :  { %v3797_v48 = vpop.permute.xlu0 %3796  ;;  %v3291_v52 = vpop.permute.xlu1 %3290  ;;  %v5672_v10 = vld [vmem:[#allocation6] sm:$0xff]  }
0x2e72   :  { %3803 = vst.msk [vmem:[#allocation6 + $0x18] sm:$0xf] %vm2278_vm3, %v3797_v48  ;;  %3296 = vst.msk [vmem:[#allocation6 + $0x14] sm:$0xf] %vm2278_vm3, %v3291_v52  ;;  %5579 = vmatprep.mubr.msk.bf16.mxu1 %vm264_vm1, %v5672_v10 }
0x2e75   :  { %v4305_v21 = vpop.permute.xlu0 %4304  ;;  %v3799_v38 = vpop.permute.xlu1 %3798  ;;  %v5673_v54 = vld [vmem:[#allocation6 + $0x8] sm:$0xff]  }
0x2e76   :  { %4311 = vst.msk [vmem:[#allocation6 + $0x20] sm:$0xf] %vm2278_vm3, %v4305_v21  ;;  %3804 = vst.msk [vmem:[#allocation6 + $0x1c] sm:$0xf] %vm2278_vm3, %v3799_v38  ;;  %5580 = vmatmul.mubr.msk.bf16.vlgmr.msra.gmra.mxu1 %vm264_vm1, %v5673_v54 }
0x2e79   :  { %v4307_v3 = vpop.permute.xlu1 %4306  ;;  %v5674_v9 = vld [vmem:[#allocation6 + $0x10] sm:$0xff]  }
0x2e7a   :  { %4312 = vst.msk [vmem:[#allocation6 + $0x24] sm:$0xf] %vm2278_vm3, %v4307_v3  ;;  %5583 = vmatprep.mubr.msk.bf16.mxu1 %vm264_vm1, %v5674_v9 }
0x2e7d   :  { %v5675_v39 = vld [vmem:[#allocation6 + $0x18] sm:$0xff]  }
0x2e7e   :  { %5584 = vmatmul.mubr.msk.bf16.gmra.mxu1 %vm264_vm1, %v5675_v39 }
0x2e81   :  { %v5676_v32 = vld [vmem:[#allocation6 + $0x20] sm:$0xff]  }
0x2e82   :  { %5587 = vmatprep.mubr.msk.bf16.mxu1 %vm264_vm1, %v5676_v32 }
0x2eda   :  { %v4813_v23 = vpop.permute.xlu0 %4812 }
0x2edb   :  { %4819 = vst.msk [vmem:[#allocation6 + $0x28] sm:$0xf] %vm2278_vm3, %v4813_v23 }
0x2ede   :  { %v4815_v57 = vpop.permute.xlu1 %4814 }
0x2edf   :  { %4820 = vst.msk [vmem:[#allocation6 + $0x2c] sm:$0xf] %vm2278_vm3, %v4815_v57 }
0x2ee6   :  { %v5677_v47 = vld [vmem:[#allocation6 + $0x28] sm:$0xff]  }
0x2ee7   :  { %5588 = vmatmul.mubr.msk.bf16.gmra.mxu1 %vm264_vm1, %v5677_v47 }
0x2f36   :  { %v5581_v55 = vpop.f32.mrf.mxu1 }
0x2f37   :  { %v4947_v60 = vadd.f32 %v5581_v55, %v5170_v22 }
0x2f38   :  { %v4938_v1 = vpop.f32.mrf.mxu1 }
0x2f39   :  { %4987 = vst [vmem:[#allocation25 + $0x10] sm:$0xff] %v4947_v60  ;;  %v4939_v40 = vadd.f32 %v5170_v22, %v4938_v1 }
0x2f3a   :  { %v5582_v49 = vpop.f32.mrf.mxu1 }
0x2f3b   :  { %4985 = vst [vmem:[#allocation25] sm:$0xff] %v4939_v40  ;;  %v4950_v15 = vadd.f32 %v5582_v49, %v5170_v22 }
0x2f3c   :  { %v4941_v58 = vpop.f32.mrf.mxu1 }
0x2f3d   :  { %4988 = vst [vmem:[#allocation25 + $0x18] sm:$0xff] %v4950_v15  ;;  %v4942_v17 = vadd.f32 %v5170_v22, %v4941_v58 }
0x2f3e   :  { %v5585_v13 = vpop.f32.mrf.mxu1 }
0x2f3f   :  { %4986 = vst [vmem:[#allocation25 + $0x8] sm:$0xff] %v4942_v17  ;;  %v4963_v16 = vadd.f32 %v5585_v13, %v5170_v22 }
0x2f40   :  { %v4954_v4 = vpop.f32.mrf.mxu1 }
0x2f41   :  { %4991 = vst [vmem:[#allocation25 + $0x30] sm:$0xff] %v4963_v16  ;;  %v4955_v2 = vadd.f32 %v5170_v22, %v4954_v4 }
0x2f42   :  { %v5586_v25 = vpop.f32.mrf.mxu1 }
0x2f43   :  { %4989 = vst [vmem:[#allocation25 + $0x20] sm:$0xff] %v4955_v2  ;;  %v4966_v31 = vadd.f32 %v5586_v25, %v5170_v22 }
0x2f44   :  { %v4957_v61 = vpop.f32.mrf.mxu1 }
0x2f45   :  { %4992 = vst [vmem:[#allocation25 + $0x38] sm:$0xff] %v4966_v31  ;;  %v4958_v53 = vadd.f32 %v5170_v22, %v4957_v61 }
0x2f47   :  { %4990 = vst [vmem:[#allocation25 + $0x28] sm:$0xff] %v4958_v53 }
0x2fa7   :  { %v5589_v30 = vpop.f32.mrf.mxu1 }
0x2fa8   :  { %v4979_v50 = vadd.f32 %v5589_v30, %v5170_v22 }
0x2fa9   :  { %v4970_v51 = vpop.f32.mrf.mxu1 }
0x2faa   :  { %4995 = vst [vmem:[#allocation25 + $0x50] sm:$0xff] %v4979_v50  ;;  %v4971_v62 = vadd.f32 %v5170_v22, %v4970_v51 }
0x2fab   :  { %v5590_v14 = vpop.f32.mrf.mxu1 }
0x2fac   :  { %4993 = vst [vmem:[#allocation25 + $0x40] sm:$0xff] %v4971_v62  ;;  %v4982_v36 = vadd.f32 %v5590_v14, %v5170_v22 }
0x2fad   :  { %v4973_v56 = vpop.f32.mrf.mxu1 }
0x2fae   :  { %4996 = vst [vmem:[#allocation25 + $0x58] sm:$0xff] %v4982_v36  ;;  %v4974_v0 = vadd.f32 %v5170_v22, %v4973_v56 }
0x2fb0   :  { %4994 = vst [vmem:[#allocation25 + $0x48] sm:$0xff] %v4974_v0 }
0x2fb1   :  { %6521 = shalt.err (!%p6518_p3)
}
0x2fb2   :  { %5008 = dma.vmem_to_hbm [thread:$0]  %s5003_s3, 1536, %s8136_s17, [#allocation9], %s6545_s27, %s6545_s27, %s6546_s28  }
0x2fb3   :  { %6542 = dma.done.wait [#allocation9], 1536  }
0x2fb4   :  { %6543 = vsyncadd [#allocation9], 4294965760 }
0x2fb5   :  { %5012 = vsyncpa [#allocation8], 1 }
0x2fb6   :  { %5013 = vsyncpa [#allocation11], 1 }
0x2fb7   :  { %5014 = vsyncpa [#allocation14], 1 }
0x2fb8   :  { %5015 = vsyncpa [#allocation17], 1 }
0x2fb9   :  { %5016 = vsyncpa [#allocation20], 1 }
0x2fba   :  { %5017 = vsyncpa [#allocation23], 1 }
0x2fbb   :  { %5018 = vsyncpa [#allocation9], 1 }

</bundles_post_ra>
